<compile_context>
chip_gen: v6e
topology: v6e:2x2x1
jax: 0.10.0
libtpu: 0.0.40
codegen_flags: <defaults>
</compile_context>

<pallas_src>
import numpy as np

import jax
import jax.numpy as jnp
from jax import lax
from jax.experimental import pallas as pl
from jax.experimental.pallas import tpu as pltpu


# (kernel, stride, padding) of the four ConvTranspose2d blocks
_T_CFG = ((4, 1, 0), (4, 2, 1), (4, 2, 1), (4, 2, 1))


# ---------------------------------------------------------------------------
# Host-side, one-time weight packing into band / row-placement matrices
# ---------------------------------------------------------------------------

def _pack_conv_bands(w_oihw, hin, win, pad, dil):
    """Conv2d (stride 1) -> (B, R, hout, wout).

    B[ky] : (win*cin, wout*cout)  lane-space conv (W taps + channel mix).
    R     : (hout, kh*hin)        0/1 row placement (H taps + H padding).
    """
    w_np = np.asarray(w_oihw, np.float32)
    cout, cin, kh, kw = w_np.shape
    hout = hin + 2 * pad - dil * (kh - 1)
    wout = win + 2 * pad - dil * (kw - 1)
    B = np.zeros((kh, win * cin, wout * cout), np.float32)
    for ky in range(kh):
        for xo in range(wout):
            for kx in range(kw):
                xi = xo + kx * dil - pad
                if 0 <= xi < win:
                    B[ky, xi * cin:(xi + 1) * cin,
                      xo * cout:(xo + 1) * cout] += w_np[:, :, ky, kx].T
    R = np.zeros((hout, kh * hin), np.float32)
    for y in range(hout):
        for ky in range(kh):
            iy = y + ky * dil - pad
            if 0 <= iy < hin:
                R[y, ky * hin + iy] = 1.0
    return B, R, hout, wout


def _pack_convT_bands(w_iohw, hin, win, stride, pad):
    """ConvTranspose2d -> (B, R, hout, wout).

    The stride-2 up-sampling is folded into the (sparse) band matrices, so
    the kernel never materialises a zero-inserted input and never has to
    interleave sub-pixel phases -- the MXU does the scatter.
    """
    w_np = np.asarray(w_iohw, np.float32)
    cin, cout, kh, kw = w_np.shape
    hout = (hin - 1) * stride - 2 * pad + kh
    wout = (win - 1) * stride - 2 * pad + kw
    B = np.zeros((kh, win * cin, wout * cout), np.float32)
    for ky in range(kh):
        for xo in range(wout):
            for kx in range(kw):
                num = xo + pad - kx
                if num % stride == 0:
                    xi = num // stride
                    if 0 <= xi < win:
                        B[ky, xi * cin:(xi + 1) * cin,
                          xo * cout:(xo + 1) * cout] += w_np[:, :, ky, kx]
    R = np.zeros((hout, kh * hin), np.float32)
    for y in range(hout):
        for ky in range(kh):
            num = y + pad - ky
            if num % stride == 0:
                iy = num // stride
                if 0 <= iy < hin:
                    R[y, ky * hin + iy] = 1.0
    return B, R, hout, wout


def prepare_generator(params, latent_hw=(1, 1)):
    """One-time packing of the PyTorch-layout weights.  Call OUTSIDE jit."""
    h, w = latent_hw
    blocks = []
    # basic_blocks: ConvTranspose2d (bias=False) + BN + ReLU
    for idx, (k, s, p) in enumerate(_T_CFG):
        B, R, h, w = _pack_convT_bands(params[f"wt{idx}"], h, w, s, p)
        gb = np.stack([np.asarray(params[f"bn{idx}_g"], np.float32),
                       np.asarray(params[f"bn{idx}_b"], np.float32)], axis=0)
        blocks.append((jnp.asarray(B, dtype=jnp.bfloat16),
                       jnp.asarray(R, dtype=jnp.float32),
                       jnp.asarray(gb, dtype=jnp.float32)))
    # refine 1: 3x3, dilation 2, pad 0, bias=False + BN + ReLU
    B, R, h, w = _pack_conv_bands(params["wr1"], h, w, pad=0, dil=2)
    gb = np.stack([np.asarray(params["bnr_g"], np.float32),
                   np.asarray(params["bnr_b"], np.float32)], axis=0)
    blocks.append((jnp.asarray(B, dtype=jnp.bfloat16),
                   jnp.asarray(R, dtype=jnp.float32),
                   jnp.asarray(gb, dtype=jnp.float32)))
    # refine 2: 3x3, pad 1, bias + tanh
    B, R, h, w = _pack_conv_bands(params["wr2"], h, w, pad=1, dil=1)
    bias = np.asarray(params["br2"], np.float32).reshape(1, -1)
    final = (jnp.asarray(B, dtype=jnp.bfloat16),
             jnp.asarray(R, dtype=jnp.float32),
             jnp.asarray(bias, dtype=jnp.float32))
    return {"blocks": blocks, "final": final}


# ---------------------------------------------------------------------------
# In-kernel helpers for the (W*C) lane layout
# ---------------------------------------------------------------------------

def _lane_block_reduce(row, w, c):
    """(1, w*c) -> (1, c): sum over the w lane blocks (per-channel reduce)."""
    acc = row[:, 0:c]
    for i in range(1, w):
        acc = acc + row[:, i * c:(i + 1) * c]
    return acc


def _lane_tile(row_c, w):
    """(1, c) -> (1, w*c): repeat the channel vector across the w blocks."""
    if w == 1:
        return row_c
    return jnp.concatenate([row_c] * w, axis=1)


# ---------------------------------------------------------------------------
# Fused generator forward: ONE pallas_call for the whole network
# ---------------------------------------------------------------------------
# TODO(synk): the BatchNorm running-mean/var buffer update (a training-time
# side effect of the PyTorch module) is not reproduced; only the forward
# output (batch-statistics normalisation, as nn.BatchNorm2d does in train
# mode) is computed.

def generator_forward(packed, z_nchw):
    n, c, h, w = z_nchw.shape
    x0 = jnp.transpose(z_nchw, (0, 2, 3, 1)).reshape(n * h, w * c)
    x0 = x0.astype(jnp.float32)

    layers = list(packed["blocks"]) + [packed["final"]]
    num_layers = len(layers)
    assert layers[0][0].shape[1] == w * c, "latent size mismatch with packing"

    arrays = [x0]
    for t in layers:
        arrays.extend(t)

    b_f, r_f, bias_f = packed["final"]
    h_out, wc_out_f = r_f.shape[0], b_f.shape[2]
    cout_f = bias_f.shape[1]

    def kernel(*refs):
        out_ref = refs[-1]
        x = refs[0][...]                                  # (n*h0, w0*c0) f32
        pos = 1
        for li in range(num_layers):
            b_ref, r_ref, p_ref = refs[pos], refs[pos + 1], refs[pos + 2]
            pos += 3
            kh = b_ref.shape[0]
            wc_out = b_ref.shape[2]
            hout = r_ref.shape[0]
            hin = r_ref.shape[1] // kh
            cout = p_ref.shape[1]
            wout = wc_out // cout

            # ---- conv: kh band matmuls (bf16 in, f32 acc) + one 0/1 row-
            # placement matmul per batch element.  Accumulation happens in
            # the MXU; no VMEM scratch read-modify-write. -------------------
            xb = x.astype(jnp.bfloat16)
            parts = [jnp.dot(xb, b_ref[k], preferred_element_type=jnp.float32)
                     for k in range(kh)]                  # each (n*hin, wc_out)
            r_mat = r_ref[...]
            y_rows = []
            for bi in range(n):
                stacked = jnp.concatenate(
                    [p[bi * hin:(bi + 1) * hin, :] for p in parts], axis=0)
                y_rows.append(jnp.dot(r_mat, stacked,
                                      preferred_element_type=jnp.float32))
            y = jnp.concatenate(y_rows, axis=0)           # (n*hout, wout*cout)

            if li < num_layers - 1:
                # ---- fused BatchNorm (batch stats, two-pass) + ReLU, f32 --
                gb = p_ref[...]                           # (2, cout)
                cnt = float(n * hout * wout)
                mean_c = _lane_block_reduce(
                    jnp.sum(y, axis=0, keepdims=True), wout, cout) / cnt
                d = y - _lane_tile(mean_c, wout)
                var_c = _lane_block_reduce(
                    jnp.sum(d * d, axis=0, keepdims=True), wout, cout) / cnt
                scale_c = gb[0:1, :] * lax.rsqrt(var_c + 1e-5)
                x = jnp.maximum(
                    d * _lane_tile(scale_c, wout)
                    + _lane_tile(gb[1:2, :], wout), 0.0)
            else:
                # ---- final layer: bias + tanh -----------------------------
                x = jnp.tanh(y + _lane_tile(p_ref[...], wout))
        out_ref[...] = x

    vmem_spec = pl.BlockSpec(memory_space=pltpu.MemorySpace.VMEM)
    out2d = pl.pallas_call(
        kernel,
        out_shape=jax.ShapeDtypeStruct((n * h_out, wc_out_f), jnp.float32),
        in_specs=[vmem_spec] * len(arrays),
        out_specs=vmem_spec,
    )(*arrays)

    img = out2d.reshape(n, h_out, wc_out_f // cout_f, cout_f)
    return jnp.transpose(img, (0, 3, 1, 2))               # NHWC -> NCHW


# ---------------------------------------------------------------------------
# Parameter init (mirrors the PyTorch module's structure)
# ---------------------------------------------------------------------------

def init_params(key, in_channels, out_channels, base_channel):
    rate = [8, 4, 2]
    chans = [in_channels, base_channel * rate[0], base_channel * rate[1],
             base_channel * rate[2], base_channel]
    keys = iter(jax.random.split(key, 20))
    params = {}
    for idx in range(4):
        cin, cout = chans[idx], chans[idx + 1]
        params[f"wt{idx}"] = 0.05 * jax.random.normal(
            next(keys), (cin, cout, 4, 4), jnp.float32)
        params[f"bn{idx}_g"] = 1.0 + 0.1 * jax.random.normal(
            next(keys), (cout,), jnp.float32)
        params[f"bn{idx}_b"] = 0.1 * jax.random.normal(
            next(keys), (cout,), jnp.float32)
    bc = base_channel
    params["wr1"] = 0.05 * jax.random.normal(next(keys), (bc, bc, 3, 3), jnp.float32)
    params["bnr_g"] = 1.0 + 0.1 * jax.random.normal(next(keys), (bc,), jnp.float32)
    params["bnr_b"] = 0.1 * jax.random.normal(next(keys), (bc,), jnp.float32)
    params["wr2"] = 0.05 * jax.random.normal(
        next(keys), (out_channels, bc, 3, 3), jnp.float32)
    params["br2"] = 0.05 * jax.random.normal(next(keys), (out_channels,), jnp.float32)
    return params


# ---------------------------------------------------------------------------
# Pure-JAX f32 reference (PyTorch semantics) for the in-script check
# ---------------------------------------------------------------------------

def _ref_conv(x, w, bias=None, stride=1, padding=0, dilation=1):
    out = lax.conv_general_dilated(
        x, w, window_strides=(stride, stride),
        padding=[(padding, padding)] * 2, rhs_dilation=(dilation, dilation),
        dimension_numbers=("NCHW", "OIHW", "NCHW"),
        precision=lax.Precision.HIGHEST)
    if bias is not None:
        out = out + bias[None, :, None, None]
    return out


def _ref_conv_transpose(x, w_iohw, stride, padding):
    k = w_iohw.shape[-1]
    w = jnp.transpose(w_iohw[:, :, ::-1, ::-1], (1, 0, 2, 3))
    return lax.conv_general_dilated(
        x, w, window_strides=(1, 1),
        padding=[(k - 1 - padding, k - 1 - padding)] * 2,
        lhs_dilation=(stride, stride),
        dimension_numbers=("NCHW", "OIHW", "NCHW"),
        precision=lax.Precision.HIGHEST)


def _ref_bn_relu(x, gamma, beta, eps=1e-5):
    mean = jnp.mean(x, axis=(0, 2, 3), keepdims=True)
    var = jnp.mean(jnp.square(x - mean), axis=(0, 2, 3), keepdims=True)
    y = (x - mean) * (gamma[None, :, None, None] / jnp.sqrt(var + eps)) \
        + beta[None, :, None, None]
    return jnp.maximum(y, 0.0)


def _ref_forward(params, z):
    x = z
    for idx, (_, s, p) in enumerate(_T_CFG):
        x = _ref_conv_transpose(x, params[f"wt{idx}"], s, p)
        x = _ref_bn_relu(x, params[f"bn{idx}_g"], params[f"bn{idx}_b"])
    x = _ref_conv(x, params["wr1"], stride=1, padding=0, dilation=2)
    x = _ref_bn_relu(x, params["bnr_g"], params["bnr_b"])
    x = jnp.tanh(_ref_conv(x, params["wr2"], bias=params["br2"], padding=1))
    return x


# ---------------------------------------------------------------------------

if __name__ == "__main__":
    in_channels, out_channels, base_channel = 16, 3, 8
    key = jax.random.PRNGKey(0)
    pkey, zkey = jax.random.split(key)
    params = init_params(pkey, in_channels, out_channels, base_channel)
    z = jax.random.normal(zkey, (2, in_channels, 1, 1), jnp.float32)  # NCHW latent

    packed = prepare_generator(params, latent_hw=(1, 1))   # one-time packing
    fwd = jax.jit(generator_forward)
    out = jax.block_until_ready(fwd(packed, z))
    # z(1x1) -> 4 -> 8 -> 16 -> 32 -> (dilated 3x3, pad 0) 28 -> 28
    assert out.shape == (2, out_channels, 28, 28), out.shape

    ref = _ref_forward(params, z)
    err = float(jnp.max(jnp.abs(out - ref)))
    # bf16 band matmuls (f32 accumulation, f32 activations / BN / tanh)
    assert err < 6e-2, f"max abs err {err}"

    print("KERNEL_OK")
</pallas_src>

<mosaic_0001>
module attributes {stable_mosaic.version = 11 : i64} {
  func.func @kernel(%arg0: memref<2x16xf32, #tpu.memory_space<vmem>>, %arg1: memref<4x16x256xbf16, #tpu.memory_space<vmem>>, %arg2: memref<4x4xf32, #tpu.memory_space<vmem>>, %arg3: memref<2x64xf32, #tpu.memory_space<vmem>>, %arg4: memref<4x256x256xbf16, #tpu.memory_space<vmem>>, %arg5: memref<8x16xf32, #tpu.memory_space<vmem>>, %arg6: memref<2x32xf32, #tpu.memory_space<vmem>>, %arg7: memref<4x256x256xbf16, #tpu.memory_space<vmem>>, %arg8: memref<16x32xf32, #tpu.memory_space<vmem>>, %arg9: memref<2x16xf32, #tpu.memory_space<vmem>>, %arg10: memref<4x256x256xbf16, #tpu.memory_space<vmem>>, %arg11: memref<32x64xf32, #tpu.memory_space<vmem>>, %arg12: memref<2x8xf32, #tpu.memory_space<vmem>>, %arg13: memref<3x256x224xbf16, #tpu.memory_space<vmem>>, %arg14: memref<28x96xf32, #tpu.memory_space<vmem>>, %arg15: memref<2x8xf32, #tpu.memory_space<vmem>>, %arg16: memref<3x224x84xbf16, #tpu.memory_space<vmem>>, %arg17: memref<28x84xf32, #tpu.memory_space<vmem>>, %arg18: memref<1x3xf32, #tpu.memory_space<vmem>>, %arg19: memref<56x84xf32, #tpu.memory_space<vmem>>) attributes {dimension_semantics = [], scalar_prefetch = 0 : i64, scratch_operands = 0 : i64, tpu.core_type = #tpu.core_type<tc>} {
    %c0 = arith.constant 0 : index
    %c0_0 = arith.constant 0 : index
    %0 = vector.load %arg0[%c0, %c0_0] : memref<2x16xf32, #tpu.memory_space<vmem>>, vector<2x16xf32>
    %1 = arith.truncf %0 : vector<2x16xf32> to vector<2x16xbf16>
    %c0_1 = arith.constant 0 : index
    %c0_2 = arith.constant 0 : index
    %c0_3 = arith.constant 0 : index
    %2 = vector.load %arg1[%c0_1, %c0_2, %c0_3] : memref<4x16x256xbf16, #tpu.memory_space<vmem>>, vector<1x16x256xbf16>
    %3 = vector.shape_cast %2 : vector<1x16x256xbf16> to vector<16x256xbf16>
    %cst = arith.constant dense<0.000000e+00> : vector<2x256xf32>
    %4 = tpu.matmul %1, %3, %cst {dimension_numbers = #tpu.dot_dimension_numbers<[1], [0], [0], [1], [0, 0, 1, 1], [], []>} : vector<2x16xbf16>, vector<16x256xbf16>, vector<2x256xf32> -> vector<2x256xf32>
    %c1 = arith.constant 1 : index
    %c0_4 = arith.constant 0 : index
    %c0_5 = arith.constant 0 : index
    %5 = vector.load %arg1[%c1, %c0_4, %c0_5] : memref<4x16x256xbf16, #tpu.memory_space<vmem>>, vector<1x16x256xbf16>
    %6 = vector.shape_cast %5 : vector<1x16x256xbf16> to vector<16x256xbf16>
    %cst_6 = arith.constant dense<0.000000e+00> : vector<2x256xf32>
    %7 = tpu.matmul %1, %6, %cst_6 {dimension_numbers = #tpu.dot_dimension_numbers<[1], [0], [0], [1], [0, 0, 1, 1], [], []>} : vector<2x16xbf16>, vector<16x256xbf16>, vector<2x256xf32> -> vector<2x256xf32>
    %c2 = arith.constant 2 : index
    %c0_7 = arith.constant 0 : index
    %c0_8 = arith.constant 0 : index
    %8 = vector.load %arg1[%c2, %c0_7, %c0_8] : memref<4x16x256xbf16, #tpu.memory_space<vmem>>, vector<1x16x256xbf16>
    %9 = vector.shape_cast %8 : vector<1x16x256xbf16> to vector<16x256xbf16>
    %cst_9 = arith.constant dense<0.000000e+00> : vector<2x256xf32>
    %10 = tpu.matmul %1, %9, %cst_9 {dimension_numbers = #tpu.dot_dimension_numbers<[1], [0], [0], [1], [0, 0, 1, 1], [], []>} : vector<2x16xbf16>, vector<16x256xbf16>, vector<2x256xf32> -> vector<2x256xf32>
    %c3 = arith.constant 3 : index
    %c0_10 = arith.constant 0 : index
    %c0_11 = arith.constant 0 : index
    %11 = vector.load %arg1[%c3, %c0_10, %c0_11] : memref<4x16x256xbf16, #tpu.memory_space<vmem>>, vector<1x16x256xbf16>
    %12 = vector.shape_cast %11 : vector<1x16x256xbf16> to vector<16x256xbf16>
    %cst_12 = arith.constant dense<0.000000e+00> : vector<2x256xf32>
    %13 = tpu.matmul %1, %12, %cst_12 {dimension_numbers = #tpu.dot_dimension_numbers<[1], [0], [0], [1], [0, 0, 1, 1], [], []>} : vector<2x16xbf16>, vector<16x256xbf16>, vector<2x256xf32> -> vector<2x256xf32>
    %c0_13 = arith.constant 0 : index
    %c0_14 = arith.constant 0 : index
    %14 = vector.load %arg2[%c0_13, %c0_14] : memref<4x4xf32, #tpu.memory_space<vmem>>, vector<4x4xf32>
    %15 = vector.extract_strided_slice %4 {offsets = [0, 0], sizes = [1, 256], strides = [1, 1]} : vector<2x256xf32> to vector<1x256xf32>
    %16 = vector.extract_strided_slice %7 {offsets = [0, 0], sizes = [1, 256], strides = [1, 1]} : vector<2x256xf32> to vector<1x256xf32>
    %17 = vector.extract_strided_slice %10 {offsets = [0, 0], sizes = [1, 256], strides = [1, 1]} : vector<2x256xf32> to vector<1x256xf32>
    %18 = vector.extract_strided_slice %13 {offsets = [0, 0], sizes = [1, 256], strides = [1, 1]} : vector<2x256xf32> to vector<1x256xf32>
    %19 = tpu.concatenate %15, %16, %17, %18 in 0 : vector<1x256xf32>, vector<1x256xf32>, vector<1x256xf32>, vector<1x256xf32> -> vector<4x256xf32>
    %cst_15 = arith.constant dense<0.000000e+00> : vector<4x256xf32>
    %20 = tpu.matmul %14, %19, %cst_15 {dimension_numbers = #tpu.dot_dimension_numbers<[1], [0], [0], [1], [0, 0, 1, 1], [], []>} : vector<4x4xf32>, vector<4x256xf32>, vector<4x256xf32> -> vector<4x256xf32>
    %21 = vector.extract_strided_slice %4 {offsets = [1, 0], sizes = [1, 256], strides = [1, 1]} : vector<2x256xf32> to vector<1x256xf32>
    %22 = vector.extract_strided_slice %7 {offsets = [1, 0], sizes = [1, 256], strides = [1, 1]} : vector<2x256xf32> to vector<1x256xf32>
    %23 = vector.extract_strided_slice %10 {offsets = [1, 0], sizes = [1, 256], strides = [1, 1]} : vector<2x256xf32> to vector<1x256xf32>
    %24 = vector.extract_strided_slice %13 {offsets = [1, 0], sizes = [1, 256], strides = [1, 1]} : vector<2x256xf32> to vector<1x256xf32>
    %25 = tpu.concatenate %21, %22, %23, %24 in 0 : vector<1x256xf32>, vector<1x256xf32>, vector<1x256xf32>, vector<1x256xf32> -> vector<4x256xf32>
    %cst_16 = arith.constant dense<0.000000e+00> : vector<4x256xf32>
    %26 = tpu.matmul %14, %25, %cst_16 {dimension_numbers = #tpu.dot_dimension_numbers<[1], [0], [0], [1], [0, 0, 1, 1], [], []>} : vector<4x4xf32>, vector<4x256xf32>, vector<4x256xf32> -> vector<4x256xf32>
    %27 = tpu.concatenate %20, %26 in 0 : vector<4x256xf32>, vector<4x256xf32> -> vector<8x256xf32>
    %c0_17 = arith.constant 0 : index
    %c0_18 = arith.constant 0 : index
    %28 = vector.load %arg3[%c0_17, %c0_18] : memref<2x64xf32, #tpu.memory_space<vmem>>, vector<2x64xf32>
    %cst_19 = arith.constant dense<0.000000e+00> : vector<256xf32>
    %29 = vector.multi_reduction <add>, %27, %cst_19 [0] : vector<8x256xf32> to vector<256xf32>
    %30 = vector.shape_cast %29 : vector<256xf32> to vector<1x256xf32>
    %31 = vector.extract_strided_slice %30 {offsets = [0, 0], sizes = [1, 64], strides = [1, 1]} : vector<1x256xf32> to vector<1x64xf32>
    %32 = vector.extract_strided_slice %30 {offsets = [0, 64], sizes = [1, 64], strides = [1, 1]} : vector<1x256xf32> to vector<1x64xf32>
    %33 = arith.addf %31, %32 : vector<1x64xf32>
    %34 = vector.extract_strided_slice %30 {offsets = [0, 128], sizes = [1, 64], strides = [1, 1]} : vector<1x256xf32> to vector<1x64xf32>
    %35 = arith.addf %33, %34 : vector<1x64xf32>
    %36 = vector.extract_strided_slice %30 {offsets = [0, 192], sizes = [1, 64], strides = [1, 1]} : vector<1x256xf32> to vector<1x64xf32>
    %37 = arith.addf %35, %36 : vector<1x64xf32>
    %cst_20 = arith.constant 3.200000e+01 : f32
    %38 = vector.broadcast %cst_20 : f32 to vector<1x64xf32>
    %39 = arith.divf %37, %38 : vector<1x64xf32>
    %40 = tpu.concatenate %39, %39, %39, %39 in 1 : vector<1x64xf32>, vector<1x64xf32>, vector<1x64xf32>, vector<1x64xf32> -> vector<1x256xf32>
    %41 = vector.broadcast %40 : vector<1x256xf32> to vector<8x256xf32>
    %42 = arith.subf %27, %41 : vector<8x256xf32>
    %43 = arith.mulf %42, %42 : vector<8x256xf32>
    %cst_21 = arith.constant dense<0.000000e+00> : vector<256xf32>
    %44 = vector.multi_reduction <add>, %43, %cst_21 [0] : vector<8x256xf32> to vector<256xf32>
    %45 = vector.shape_cast %44 : vector<256xf32> to vector<1x256xf32>
    %46 = vector.extract_strided_slice %45 {offsets = [0, 0], sizes = [1, 64], strides = [1, 1]} : vector<1x256xf32> to vector<1x64xf32>
    %47 = vector.extract_strided_slice %45 {offsets = [0, 64], sizes = [1, 64], strides = [1, 1]} : vector<1x256xf32> to vector<1x64xf32>
    %48 = arith.addf %46, %47 : vector<1x64xf32>
    %49 = vector.extract_strided_slice %45 {offsets = [0, 128], sizes = [1, 64], strides = [1, 1]} : vector<1x256xf32> to vector<1x64xf32>
    %50 = arith.addf %48, %49 : vector<1x64xf32>
    %51 = vector.extract_strided_slice %45 {offsets = [0, 192], sizes = [1, 64], strides = [1, 1]} : vector<1x256xf32> to vector<1x64xf32>
    %52 = arith.addf %50, %51 : vector<1x64xf32>
    %cst_22 = arith.constant 3.200000e+01 : f32
    %53 = vector.broadcast %cst_22 : f32 to vector<1x64xf32>
    %54 = arith.divf %52, %53 : vector<1x64xf32>
    %55 = vector.extract_strided_slice %28 {offsets = [0, 0], sizes = [1, 64], strides = [1, 1]} : vector<2x64xf32> to vector<1x64xf32>
    %cst_23 = arith.constant 9.99999974E-6 : f32
    %56 = vector.broadcast %cst_23 : f32 to vector<1x64xf32>
    %57 = arith.addf %54, %56 : vector<1x64xf32>
    %58 = math.rsqrt %57 : vector<1x64xf32>
    %59 = arith.mulf %55, %58 : vector<1x64xf32>
    %60 = tpu.concatenate %59, %59, %59, %59 in 1 : vector<1x64xf32>, vector<1x64xf32>, vector<1x64xf32>, vector<1x64xf32> -> vector<1x256xf32>
    %61 = vector.broadcast %60 : vector<1x256xf32> to vector<8x256xf32>
    %62 = arith.mulf %42, %61 : vector<8x256xf32>
    %63 = vector.extract_strided_slice %28 {offsets = [1, 0], sizes = [1, 64], strides = [1, 1]} : vector<2x64xf32> to vector<1x64xf32>
    %64 = tpu.concatenate %63, %63, %63, %63 in 1 : vector<1x64xf32>, vector<1x64xf32>, vector<1x64xf32>, vector<1x64xf32> -> vector<1x256xf32>
    %65 = vector.broadcast %64 : vector<1x256xf32> to vector<8x256xf32>
    %66 = arith.addf %62, %65 : vector<8x256xf32>
    %cst_24 = arith.constant 0.000000e+00 : f32
    %67 = vector.broadcast %cst_24 : f32 to vector<8x256xf32>
    %68 = arith.maximumf %66, %67 : vector<8x256xf32>
    %69 = arith.truncf %68 : vector<8x256xf32> to vector<8x256xbf16>
    %c0_25 = arith.constant 0 : index
    %c0_26 = arith.constant 0 : index
    %c0_27 = arith.constant 0 : index
    %70 = vector.load %arg4[%c0_25, %c0_26, %c0_27] : memref<4x256x256xbf16, #tpu.memory_space<vmem>>, vector<1x256x256xbf16>
    %71 = vector.shape_cast %70 : vector<1x256x256xbf16> to vector<256x256xbf16>
    %cst_28 = arith.constant dense<0.000000e+00> : vector<8x256xf32>
    %72 = tpu.matmul %69, %71, %cst_28 {dimension_numbers = #tpu.dot_dimension_numbers<[1], [0], [0], [1], [0, 0, 1, 1], [], []>} : vector<8x256xbf16>, vector<256x256xbf16>, vector<8x256xf32> -> vector<8x256xf32>
    %c1_29 = arith.constant 1 : index
    %c0_30 = arith.constant 0 : index
    %c0_31 = arith.constant 0 : index
    %73 = vector.load %arg4[%c1_29, %c0_30, %c0_31] : memref<4x256x256xbf16, #tpu.memory_space<vmem>>, vector<1x256x256xbf16>
    %74 = vector.shape_cast %73 : vector<1x256x256xbf16> to vector<256x256xbf16>
    %cst_32 = arith.constant dense<0.000000e+00> : vector<8x256xf32>
    %75 = tpu.matmul %69, %74, %cst_32 {dimension_numbers = #tpu.dot_dimension_numbers<[1], [0], [0], [1], [0, 0, 1, 1], [], []>} : vector<8x256xbf16>, vector<256x256xbf16>, vector<8x256xf32> -> vector<8x256xf32>
    %c2_33 = arith.constant 2 : index
    %c0_34 = arith.constant 0 : index
    %c0_35 = arith.constant 0 : index
    %76 = vector.load %arg4[%c2_33, %c0_34, %c0_35] : memref<4x256x256xbf16, #tpu.memory_space<vmem>>, vector<1x256x256xbf16>
    %77 = vector.shape_cast %76 : vector<1x256x256xbf16> to vector<256x256xbf16>
    %cst_36 = arith.constant dense<0.000000e+00> : vector<8x256xf32>
    %78 = tpu.matmul %69, %77, %cst_36 {dimension_numbers = #tpu.dot_dimension_numbers<[1], [0], [0], [1], [0, 0, 1, 1], [], []>} : vector<8x256xbf16>, vector<256x256xbf16>, vector<8x256xf32> -> vector<8x256xf32>
    %c3_37 = arith.constant 3 : index
    %c0_38 = arith.constant 0 : index
    %c0_39 = arith.constant 0 : index
    %79 = vector.load %arg4[%c3_37, %c0_38, %c0_39] : memref<4x256x256xbf16, #tpu.memory_space<vmem>>, vector<1x256x256xbf16>
    %80 = vector.shape_cast %79 : vector<1x256x256xbf16> to vector<256x256xbf16>
    %cst_40 = arith.constant dense<0.000000e+00> : vector<8x256xf32>
    %81 = tpu.matmul %69, %80, %cst_40 {dimension_numbers = #tpu.dot_dimension_numbers<[1], [0], [0], [1], [0, 0, 1, 1], [], []>} : vector<8x256xbf16>, vector<256x256xbf16>, vector<8x256xf32> -> vector<8x256xf32>
    %c0_41 = arith.constant 0 : index
    %c0_42 = arith.constant 0 : index
    %82 = vector.load %arg5[%c0_41, %c0_42] : memref<8x16xf32, #tpu.memory_space<vmem>>, vector<8x16xf32>
    %83 = vector.extract_strided_slice %72 {offsets = [0, 0], sizes = [4, 256], strides = [1, 1]} : vector<8x256xf32> to vector<4x256xf32>
    %84 = vector.extract_strided_slice %75 {offsets = [0, 0], sizes = [4, 256], strides = [1, 1]} : vector<8x256xf32> to vector<4x256xf32>
    %85 = vector.extract_strided_slice %78 {offsets = [0, 0], sizes = [4, 256], strides = [1, 1]} : vector<8x256xf32> to vector<4x256xf32>
    %86 = vector.extract_strided_slice %81 {offsets = [0, 0], sizes = [4, 256], strides = [1, 1]} : vector<8x256xf32> to vector<4x256xf32>
    %87 = tpu.concatenate %83, %84, %85, %86 in 0 : vector<4x256xf32>, vector<4x256xf32>, vector<4x256xf32>, vector<4x256xf32> -> vector<16x256xf32>
    %cst_43 = arith.constant dense<0.000000e+00> : vector<8x256xf32>
    %88 = tpu.matmul %82, %87, %cst_43 {dimension_numbers = #tpu.dot_dimension_numbers<[1], [0], [0], [1], [0, 0, 1, 1], [], []>} : vector<8x16xf32>, vector<16x256xf32>, vector<8x256xf32> -> vector<8x256xf32>
    %89 = vector.extract_strided_slice %72 {offsets = [4, 0], sizes = [4, 256], strides = [1, 1]} : vector<8x256xf32> to vector<4x256xf32>
    %90 = vector.extract_strided_slice %75 {offsets = [4, 0], sizes = [4, 256], strides = [1, 1]} : vector<8x256xf32> to vector<4x256xf32>
    %91 = vector.extract_strided_slice %78 {offsets = [4, 0], sizes = [4, 256], strides = [1, 1]} : vector<8x256xf32> to vector<4x256xf32>
    %92 = vector.extract_strided_slice %81 {offsets = [4, 0], sizes = [4, 256], strides = [1, 1]} : vector<8x256xf32> to vector<4x256xf32>
    %93 = tpu.concatenate %89, %90, %91, %92 in 0 : vector<4x256xf32>, vector<4x256xf32>, vector<4x256xf32>, vector<4x256xf32> -> vector<16x256xf32>
    %cst_44 = arith.constant dense<0.000000e+00> : vector<8x256xf32>
    %94 = tpu.matmul %82, %93, %cst_44 {dimension_numbers = #tpu.dot_dimension_numbers<[1], [0], [0], [1], [0, 0, 1, 1], [], []>} : vector<8x16xf32>, vector<16x256xf32>, vector<8x256xf32> -> vector<8x256xf32>
    %95 = tpu.concatenate %88, %94 in 0 : vector<8x256xf32>, vector<8x256xf32> -> vector<16x256xf32>
    %c0_45 = arith.constant 0 : index
    %c0_46 = arith.constant 0 : index
    %96 = vector.load %arg6[%c0_45, %c0_46] : memref<2x32xf32, #tpu.memory_space<vmem>>, vector<2x32xf32>
    %cst_47 = arith.constant dense<0.000000e+00> : vector<256xf32>
    %97 = vector.multi_reduction <add>, %95, %cst_47 [0] : vector<16x256xf32> to vector<256xf32>
    %98 = vector.shape_cast %97 : vector<256xf32> to vector<1x256xf32>
    %99 = vector.extract_strided_slice %98 {offsets = [0, 0], sizes = [1, 32], strides = [1, 1]} : vector<1x256xf32> to vector<1x32xf32>
    %100 = vector.extract_strided_slice %98 {offsets = [0, 32], sizes = [1, 32], strides = [1, 1]} : vector<1x256xf32> to vector<1x32xf32>
    %101 = arith.addf %99, %100 : vector<1x32xf32>
    %102 = vector.extract_strided_slice %98 {offsets = [0, 64], sizes = [1, 32], strides = [1, 1]} : vector<1x256xf32> to vector<1x32xf32>
    %103 = arith.addf %101, %102 : vector<1x32xf32>
    %104 = vector.extract_strided_slice %98 {offsets = [0, 96], sizes = [1, 32], strides = [1, 1]} : vector<1x256xf32> to vector<1x32xf32>
    %105 = arith.addf %103, %104 : vector<1x32xf32>
    %106 = vector.extract_strided_slice %98 {offsets = [0, 128], sizes = [1, 32], strides = [1, 1]} : vector<1x256xf32> to vector<1x32xf32>
    %107 = arith.addf %105, %106 : vector<1x32xf32>
    %108 = vector.extract_strided_slice %98 {offsets = [0, 160], sizes = [1, 32], strides = [1, 1]} : vector<1x256xf32> to vector<1x32xf32>
    %109 = arith.addf %107, %108 : vector<1x32xf32>
    %110 = vector.extract_strided_slice %98 {offsets = [0, 192], sizes = [1, 32], strides = [1, 1]} : vector<1x256xf32> to vector<1x32xf32>
    %111 = arith.addf %109, %110 : vector<1x32xf32>
    %112 = vector.extract_strided_slice %98 {offsets = [0, 224], sizes = [1, 32], strides = [1, 1]} : vector<1x256xf32> to vector<1x32xf32>
    %113 = arith.addf %111, %112 : vector<1x32xf32>
    %cst_48 = arith.constant 1.280000e+02 : f32
    %114 = vector.broadcast %cst_48 : f32 to vector<1x32xf32>
    %115 = arith.divf %113, %114 : vector<1x32xf32>
    %116 = tpu.concatenate %115, %115, %115, %115, %115, %115, %115, %115 in 1 : vector<1x32xf32>, vector<1x32xf32>, vector<1x32xf32>, vector<1x32xf32>, vector<1x32xf32>, vector<1x32xf32>, vector<1x32xf32>, vector<1x32xf32> -> vector<1x256xf32>
    %117 = vector.broadcast %116 : vector<1x256xf32> to vector<16x256xf32>
    %118 = arith.subf %95, %117 : vector<16x256xf32>
    %119 = arith.mulf %118, %118 : vector<16x256xf32>
    %cst_49 = arith.constant dense<0.000000e+00> : vector<256xf32>
    %120 = vector.multi_reduction <add>, %119, %cst_49 [0] : vector<16x256xf32> to vector<256xf32>
    %121 = vector.shape_cast %120 : vector<256xf32> to vector<1x256xf32>
    %122 = vector.extract_strided_slice %121 {offsets = [0, 0], sizes = [1, 32], strides = [1, 1]} : vector<1x256xf32> to vector<1x32xf32>
    %123 = vector.extract_strided_slice %121 {offsets = [0, 32], sizes = [1, 32], strides = [1, 1]} : vector<1x256xf32> to vector<1x32xf32>
    %124 = arith.addf %122, %123 : vector<1x32xf32>
    %125 = vector.extract_strided_slice %121 {offsets = [0, 64], sizes = [1, 32], strides = [1, 1]} : vector<1x256xf32> to vector<1x32xf32>
    %126 = arith.addf %124, %125 : vector<1x32xf32>
    %127 = vector.extract_strided_slice %121 {offsets = [0, 96], sizes = [1, 32], strides = [1, 1]} : vector<1x256xf32> to vector<1x32xf32>
    %128 = arith.addf %126, %127 : vector<1x32xf32>
    %129 = vector.extract_strided_slice %121 {offsets = [0, 128], sizes = [1, 32], strides = [1, 1]} : vector<1x256xf32> to vector<1x32xf32>
    %130 = arith.addf %128, %129 : vector<1x32xf32>
    %131 = vector.extract_strided_slice %121 {offsets = [0, 160], sizes = [1, 32], strides = [1, 1]} : vector<1x256xf32> to vector<1x32xf32>
    %132 = arith.addf %130, %131 : vector<1x32xf32>
    %133 = vector.extract_strided_slice %121 {offsets = [0, 192], sizes = [1, 32], strides = [1, 1]} : vector<1x256xf32> to vector<1x32xf32>
    %134 = arith.addf %132, %133 : vector<1x32xf32>
    %135 = vector.extract_strided_slice %121 {offsets = [0, 224], sizes = [1, 32], strides = [1, 1]} : vector<1x256xf32> to vector<1x32xf32>
    %136 = arith.addf %134, %135 : vector<1x32xf32>
    %cst_50 = arith.constant 1.280000e+02 : f32
    %137 = vector.broadcast %cst_50 : f32 to vector<1x32xf32>
    %138 = arith.divf %136, %137 : vector<1x32xf32>
    %139 = vector.extract_strided_slice %96 {offsets = [0, 0], sizes = [1, 32], strides = [1, 1]} : vector<2x32xf32> to vector<1x32xf32>
    %cst_51 = arith.constant 9.99999974E-6 : f32
    %140 = vector.broadcast %cst_51 : f32 to vector<1x32xf32>
    %141 = arith.addf %138, %140 : vector<1x32xf32>
    %142 = math.rsqrt %141 : vector<1x32xf32>
    %143 = arith.mulf %139, %142 : vector<1x32xf32>
    %144 = tpu.concatenate %143, %143, %143, %143, %143, %143, %143, %143 in 1 : vector<1x32xf32>, vector<1x32xf32>, vector<1x32xf32>, vector<1x32xf32>, vector<1x32xf32>, vector<1x32xf32>, vector<1x32xf32>, vector<1x32xf32> -> vector<1x256xf32>
    %145 = vector.broadcast %144 : vector<1x256xf32> to vector<16x256xf32>
    %146 = arith.mulf %118, %145 : vector<16x256xf32>
    %147 = vector.extract_strided_slice %96 {offsets = [1, 0], sizes = [1, 32], strides = [1, 1]} : vector<2x32xf32> to vector<1x32xf32>
    %148 = tpu.concatenate %147, %147, %147, %147, %147, %147, %147, %147 in 1 : vector<1x32xf32>, vector<1x32xf32>, vector<1x32xf32>, vector<1x32xf32>, vector<1x32xf32>, vector<1x32xf32>, vector<1x32xf32>, vector<1x32xf32> -> vector<1x256xf32>
    %149 = vector.broadcast %148 : vector<1x256xf32> to vector<16x256xf32>
    %150 = arith.addf %146, %149 : vector<16x256xf32>
    %cst_52 = arith.constant 0.000000e+00 : f32
    %151 = vector.broadcast %cst_52 : f32 to vector<16x256xf32>
    %152 = arith.maximumf %150, %151 : vector<16x256xf32>
    %153 = arith.truncf %152 : vector<16x256xf32> to vector<16x256xbf16>
    %c0_53 = arith.constant 0 : index
    %c0_54 = arith.constant 0 : index
    %c0_55 = arith.constant 0 : index
    %154 = vector.load %arg7[%c0_53, %c0_54, %c0_55] : memref<4x256x256xbf16, #tpu.memory_space<vmem>>, vector<1x256x256xbf16>
    %155 = vector.shape_cast %154 : vector<1x256x256xbf16> to vector<256x256xbf16>
    %cst_56 = arith.constant dense<0.000000e+00> : vector<16x256xf32>
    %156 = tpu.matmul %153, %155, %cst_56 {dimension_numbers = #tpu.dot_dimension_numbers<[1], [0], [0], [1], [0, 0, 1, 1], [], []>} : vector<16x256xbf16>, vector<256x256xbf16>, vector<16x256xf32> -> vector<16x256xf32>
    %c1_57 = arith.constant 1 : index
    %c0_58 = arith.constant 0 : index
    %c0_59 = arith.constant 0 : index
    %157 = vector.load %arg7[%c1_57, %c0_58, %c0_59] : memref<4x256x256xbf16, #tpu.memory_space<vmem>>, vector<1x256x256xbf16>
    %158 = vector.shape_cast %157 : vector<1x256x256xbf16> to vector<256x256xbf16>
    %cst_60 = arith.constant dense<0.000000e+00> : vector<16x256xf32>
    %159 = tpu.matmul %153, %158, %cst_60 {dimension_numbers = #tpu.dot_dimension_numbers<[1], [0], [0], [1], [0, 0, 1, 1], [], []>} : vector<16x256xbf16>, vector<256x256xbf16>, vector<16x256xf32> -> vector<16x256xf32>
    %c2_61 = arith.constant 2 : index
    %c0_62 = arith.constant 0 : index
    %c0_63 = arith.constant 0 : index
    %160 = vector.load %arg7[%c2_61, %c0_62, %c0_63] : memref<4x256x256xbf16, #tpu.memory_space<vmem>>, vector<1x256x256xbf16>
    %161 = vector.shape_cast %160 : vector<1x256x256xbf16> to vector<256x256xbf16>
    %cst_64 = arith.constant dense<0.000000e+00> : vector<16x256xf32>
    %162 = tpu.matmul %153, %161, %cst_64 {dimension_numbers = #tpu.dot_dimension_numbers<[1], [0], [0], [1], [0, 0, 1, 1], [], []>} : vector<16x256xbf16>, vector<256x256xbf16>, vector<16x256xf32> -> vector<16x256xf32>
    %c3_65 = arith.constant 3 : index
    %c0_66 = arith.constant 0 : index
    %c0_67 = arith.constant 0 : index
    %163 = vector.load %arg7[%c3_65, %c0_66, %c0_67] : memref<4x256x256xbf16, #tpu.memory_space<vmem>>, vector<1x256x256xbf16>
    %164 = vector.shape_cast %163 : vector<1x256x256xbf16> to vector<256x256xbf16>
    %cst_68 = arith.constant dense<0.000000e+00> : vector<16x256xf32>
    %165 = tpu.matmul %153, %164, %cst_68 {dimension_numbers = #tpu.dot_dimension_numbers<[1], [0], [0], [1], [0, 0, 1, 1], [], []>} : vector<16x256xbf16>, vector<256x256xbf16>, vector<16x256xf32> -> vector<16x256xf32>
    %c0_69 = arith.constant 0 : index
    %c0_70 = arith.constant 0 : index
    %166 = vector.load %arg8[%c0_69, %c0_70] : memref<16x32xf32, #tpu.memory_space<vmem>>, vector<16x32xf32>
    %167 = vector.extract_strided_slice %156 {offsets = [0, 0], sizes = [8, 256], strides = [1, 1]} : vector<16x256xf32> to vector<8x256xf32>
    %168 = vector.extract_strided_slice %159 {offsets = [0, 0], sizes = [8, 256], strides = [1, 1]} : vector<16x256xf32> to vector<8x256xf32>
    %169 = vector.extract_strided_slice %162 {offsets = [0, 0], sizes = [8, 256], strides = [1, 1]} : vector<16x256xf32> to vector<8x256xf32>
    %170 = vector.extract_strided_slice %165 {offsets = [0, 0], sizes = [8, 256], strides = [1, 1]} : vector<16x256xf32> to vector<8x256xf32>
    %171 = tpu.concatenate %167, %168, %169, %170 in 0 : vector<8x256xf32>, vector<8x256xf32>, vector<8x256xf32>, vector<8x256xf32> -> vector<32x256xf32>
    %cst_71 = arith.constant dense<0.000000e+00> : vector<16x256xf32>
    %172 = tpu.matmul %166, %171, %cst_71 {dimension_numbers = #tpu.dot_dimension_numbers<[1], [0], [0], [1], [0, 0, 1, 1], [], []>} : vector<16x32xf32>, vector<32x256xf32>, vector<16x256xf32> -> vector<16x256xf32>
    %173 = vector.extract_strided_slice %156 {offsets = [8, 0], sizes = [8, 256], strides = [1, 1]} : vector<16x256xf32> to vector<8x256xf32>
    %174 = vector.extract_strided_slice %159 {offsets = [8, 0], sizes = [8, 256], strides = [1, 1]} : vector<16x256xf32> to vector<8x256xf32>
    %175 = vector.extract_strided_slice %162 {offsets = [8, 0], sizes = [8, 256], strides = [1, 1]} : vector<16x256xf32> to vector<8x256xf32>
    %176 = vector.extract_strided_slice %165 {offsets = [8, 0], sizes = [8, 256], strides = [1, 1]} : vector<16x256xf32> to vector<8x256xf32>
    %177 = tpu.concatenate %173, %174, %175, %176 in 0 : vector<8x256xf32>, vector<8x256xf32>, vector<8x256xf32>, vector<8x256xf32> -> vector<32x256xf32>
    %cst_72 = arith.constant dense<0.000000e+00> : vector<16x256xf32>
    %178 = tpu.matmul %166, %177, %cst_72 {dimension_numbers = #tpu.dot_dimension_numbers<[1], [0], [0], [1], [0, 0, 1, 1], [], []>} : vector<16x32xf32>, vector<32x256xf32>, vector<16x256xf32> -> vector<16x256xf32>
    %179 = tpu.concatenate %172, %178 in 0 : vector<16x256xf32>, vector<16x256xf32> -> vector<32x256xf32>
    %c0_73 = arith.constant 0 : index
    %c0_74 = arith.constant 0 : index
    %180 = vector.load %arg9[%c0_73, %c0_74] : memref<2x16xf32, #tpu.memory_space<vmem>>, vector<2x16xf32>
    %cst_75 = arith.constant dense<0.000000e+00> : vector<256xf32>
    %181 = vector.multi_reduction <add>, %179, %cst_75 [0] : vector<32x256xf32> to vector<256xf32>
    %182 = vector.shape_cast %181 : vector<256xf32> to vector<1x256xf32>
    %183 = vector.extract_strided_slice %182 {offsets = [0, 0], sizes = [1, 16], strides = [1, 1]} : vector<1x256xf32> to vector<1x16xf32>
    %184 = vector.extract_strided_slice %182 {offsets = [0, 16], sizes = [1, 16], strides = [1, 1]} : vector<1x256xf32> to vector<1x16xf32>
    %185 = arith.addf %183, %184 : vector<1x16xf32>
    %186 = vector.extract_strided_slice %182 {offsets = [0, 32], sizes = [1, 16], strides = [1, 1]} : vector<1x256xf32> to vector<1x16xf32>
    %187 = arith.addf %185, %186 : vector<1x16xf32>
    %188 = vector.extract_strided_slice %182 {offsets = [0, 48], sizes = [1, 16], strides = [1, 1]} : vector<1x256xf32> to vector<1x16xf32>
    %189 = arith.addf %187, %188 : vector<1x16xf32>
    %190 = vector.extract_strided_slice %182 {offsets = [0, 64], sizes = [1, 16], strides = [1, 1]} : vector<1x256xf32> to vector<1x16xf32>
    %191 = arith.addf %189, %190 : vector<1x16xf32>
    %192 = vector.extract_strided_slice %182 {offsets = [0, 80], sizes = [1, 16], strides = [1, 1]} : vector<1x256xf32> to vector<1x16xf32>
    %193 = arith.addf %191, %192 : vector<1x16xf32>
    %194 = vector.extract_strided_slice %182 {offsets = [0, 96], sizes = [1, 16], strides = [1, 1]} : vector<1x256xf32> to vector<1x16xf32>
    %195 = arith.addf %193, %194 : vector<1x16xf32>
    %196 = vector.extract_strided_slice %182 {offsets = [0, 112], sizes = [1, 16], strides = [1, 1]} : vector<1x256xf32> to vector<1x16xf32>
    %197 = arith.addf %195, %196 : vector<1x16xf32>
    %198 = vector.extract_strided_slice %182 {offsets = [0, 128], sizes = [1, 16], strides = [1, 1]} : vector<1x256xf32> to vector<1x16xf32>
    %199 = arith.addf %197, %198 : vector<1x16xf32>
    %200 = vector.extract_strided_slice %182 {offsets = [0, 144], sizes = [1, 16], strides = [1, 1]} : vector<1x256xf32> to vector<1x16xf32>
    %201 = arith.addf %199, %200 : vector<1x16xf32>
    %202 = vector.extract_strided_slice %182 {offsets = [0, 160], sizes = [1, 16], strides = [1, 1]} : vector<1x256xf32> to vector<1x16xf32>
    %203 = arith.addf %201, %202 : vector<1x16xf32>
    %204 = vector.extract_strided_slice %182 {offsets = [0, 176], sizes = [1, 16], strides = [1, 1]} : vector<1x256xf32> to vector<1x16xf32>
    %205 = arith.addf %203, %204 : vector<1x16xf32>
    %206 = vector.extract_strided_slice %182 {offsets = [0, 192], sizes = [1, 16], strides = [1, 1]} : vector<1x256xf32> to vector<1x16xf32>
    %207 = arith.addf %205, %206 : vector<1x16xf32>
    %208 = vector.extract_strided_slice %182 {offsets = [0, 208], sizes = [1, 16], strides = [1, 1]} : vector<1x256xf32> to vector<1x16xf32>
    %209 = arith.addf %207, %208 : vector<1x16xf32>
    %210 = vector.extract_strided_slice %182 {offsets = [0, 224], sizes = [1, 16], strides = [1, 1]} : vector<1x256xf32> to vector<1x16xf32>
    %211 = arith.addf %209, %210 : vector<1x16xf32>
    %212 = vector.extract_strided_slice %182 {offsets = [0, 240], sizes = [1, 16], strides = [1, 1]} : vector<1x256xf32> to vector<1x16xf32>
    %213 = arith.addf %211, %212 : vector<1x16xf32>
    %cst_76 = arith.constant 5.120000e+02 : f32
    %214 = vector.broadcast %cst_76 : f32 to vector<1x16xf32>
    %215 = arith.divf %213, %214 : vector<1x16xf32>
    %216 = tpu.concatenate %215, %215, %215, %215, %215, %215, %215, %215, %215, %215, %215, %215, %215, %215, %215, %215 in 1 : vector<1x16xf32>, vector<1x16xf32>, vector<1x16xf32>, vector<1x16xf32>, vector<1x16xf32>, vector<1x16xf32>, vector<1x16xf32>, vector<1x16xf32>, vector<1x16xf32>, vector<1x16xf32>, vector<1x16xf32>, vector<1x16xf32>, vector<1x16xf32>, vector<1x16xf32>, vector<1x16xf32>, vector<1x16xf32> -> vector<1x256xf32>
    %217 = vector.broadcast %216 : vector<1x256xf32> to vector<32x256xf32>
    %218 = arith.subf %179, %217 : vector<32x256xf32>
    %219 = arith.mulf %218, %218 : vector<32x256xf32>
    %cst_77 = arith.constant dense<0.000000e+00> : vector<256xf32>
    %220 = vector.multi_reduction <add>, %219, %cst_77 [0] : vector<32x256xf32> to vector<256xf32>
    %221 = vector.shape_cast %220 : vector<256xf32> to vector<1x256xf32>
    %222 = vector.extract_strided_slice %221 {offsets = [0, 0], sizes = [1, 16], strides = [1, 1]} : vector<1x256xf32> to vector<1x16xf32>
    %223 = vector.extract_strided_slice %221 {offsets = [0, 16], sizes = [1, 16], strides = [1, 1]} : vector<1x256xf32> to vector<1x16xf32>
    %224 = arith.addf %222, %223 : vector<1x16xf32>
    %225 = vector.extract_strided_slice %221 {offsets = [0, 32], sizes = [1, 16], strides = [1, 1]} : vector<1x256xf32> to vector<1x16xf32>
    %226 = arith.addf %224, %225 : vector<1x16xf32>
    %227 = vector.extract_strided_slice %221 {offsets = [0, 48], sizes = [1, 16], strides = [1, 1]} : vector<1x256xf32> to vector<1x16xf32>
    %228 = arith.addf %226, %227 : vector<1x16xf32>
    %229 = vector.extract_strided_slice %221 {offsets = [0, 64], sizes = [1, 16], strides = [1, 1]} : vector<1x256xf32> to vector<1x16xf32>
    %230 = arith.addf %228, %229 : vector<1x16xf32>
    %231 = vector.extract_strided_slice %221 {offsets = [0, 80], sizes = [1, 16], strides = [1, 1]} : vector<1x256xf32> to vector<1x16xf32>
    %232 = arith.addf %230, %231 : vector<1x16xf32>
    %233 = vector.extract_strided_slice %221 {offsets = [0, 96], sizes = [1, 16], strides = [1, 1]} : vector<1x256xf32> to vector<1x16xf32>
    %234 = arith.addf %232, %233 : vector<1x16xf32>
    %235 = vector.extract_strided_slice %221 {offsets = [0, 112], sizes = [1, 16], strides = [1, 1]} : vector<1x256xf32> to vector<1x16xf32>
    %236 = arith.addf %234, %235 : vector<1x16xf32>
    %237 = vector.extract_strided_slice %221 {offsets = [0, 128], sizes = [1, 16], strides = [1, 1]} : vector<1x256xf32> to vector<1x16xf32>
    %238 = arith.addf %236, %237 : vector<1x16xf32>
    %239 = vector.extract_strided_slice %221 {offsets = [0, 144], sizes = [1, 16], strides = [1, 1]} : vector<1x256xf32> to vector<1x16xf32>
    %240 = arith.addf %238, %239 : vector<1x16xf32>
    %241 = vector.extract_strided_slice %221 {offsets = [0, 160], sizes = [1, 16], strides = [1, 1]} : vector<1x256xf32> to vector<1x16xf32>
    %242 = arith.addf %240, %241 : vector<1x16xf32>
    %243 = vector.extract_strided_slice %221 {offsets = [0, 176], sizes = [1, 16], strides = [1, 1]} : vector<1x256xf32> to vector<1x16xf32>
    %244 = arith.addf %242, %243 : vector<1x16xf32>
    %245 = vector.extract_strided_slice %221 {offsets = [0, 192], sizes = [1, 16], strides = [1, 1]} : vector<1x256xf32> to vector<1x16xf32>
    %246 = arith.addf %244, %245 : vector<1x16xf32>
    %247 = vector.extract_strided_slice %221 {offsets = [0, 208], sizes = [1, 16], strides = [1, 1]} : vector<1x256xf32> to vector<1x16xf32>
    %248 = arith.addf %246, %247 : vector<1x16xf32>
    %249 = vector.extract_strided_slice %221 {offsets = [0, 224], sizes = [1, 16], strides = [1, 1]} : vector<1x256xf32> to vector<1x16xf32>
    %250 = arith.addf %248, %249 : vector<1x16xf32>
    %251 = vector.extract_strided_slice %221 {offsets = [0, 240], sizes = [1, 16], strides = [1, 1]} : vector<1x256xf32> to vector<1x16xf32>
    %252 = arith.addf %250, %251 : vector<1x16xf32>
    %cst_78 = arith.constant 5.120000e+02 : f32
    %253 = vector.broadcast %cst_78 : f32 to vector<1x16xf32>
    %254 = arith.divf %252, %253 : vector<1x16xf32>
    %255 = vector.extract_strided_slice %180 {offsets = [0, 0], sizes = [1, 16], strides = [1, 1]} : vector<2x16xf32> to vector<1x16xf32>
    %cst_79 = arith.constant 9.99999974E-6 : f32
    %256 = vector.broadcast %cst_79 : f32 to vector<1x16xf32>
    %257 = arith.addf %254, %256 : vector<1x16xf32>
    %258 = math.rsqrt %257 : vector<1x16xf32>
    %259 = arith.mulf %255, %258 : vector<1x16xf32>
    %260 = tpu.concatenate %259, %259, %259, %259, %259, %259, %259, %259, %259, %259, %259, %259, %259, %259, %259, %259 in 1 : vector<1x16xf32>, vector<1x16xf32>, vector<1x16xf32>, vector<1x16xf32>, vector<1x16xf32>, vector<1x16xf32>, vector<1x16xf32>, vector<1x16xf32>, vector<1x16xf32>, vector<1x16xf32>, vector<1x16xf32>, vector<1x16xf32>, vector<1x16xf32>, vector<1x16xf32>, vector<1x16xf32>, vector<1x16xf32> -> vector<1x256xf32>
    %261 = vector.broadcast %260 : vector<1x256xf32> to vector<32x256xf32>
    %262 = arith.mulf %218, %261 : vector<32x256xf32>
    %263 = vector.extract_strided_slice %180 {offsets = [1, 0], sizes = [1, 16], strides = [1, 1]} : vector<2x16xf32> to vector<1x16xf32>
    %264 = tpu.concatenate %263, %263, %263, %263, %263, %263, %263, %263, %263, %263, %263, %263, %263, %263, %263, %263 in 1 : vector<1x16xf32>, vector<1x16xf32>, vector<1x16xf32>, vector<1x16xf32>, vector<1x16xf32>, vector<1x16xf32>, vector<1x16xf32>, vector<1x16xf32>, vector<1x16xf32>, vector<1x16xf32>, vector<1x16xf32>, vector<1x16xf32>, vector<1x16xf32>, vector<1x16xf32>, vector<1x16xf32>, vector<1x16xf32> -> vector<1x256xf32>
    %265 = vector.broadcast %264 : vector<1x256xf32> to vector<32x256xf32>
    %266 = arith.addf %262, %265 : vector<32x256xf32>
    %cst_80 = arith.constant 0.000000e+00 : f32
    %267 = vector.broadcast %cst_80 : f32 to vector<32x256xf32>
    %268 = arith.maximumf %266, %267 : vector<32x256xf32>
    %269 = arith.truncf %268 : vector<32x256xf32> to vector<32x256xbf16>
    %c0_81 = arith.constant 0 : index
    %c0_82 = arith.constant 0 : index
    %c0_83 = arith.constant 0 : index
    %270 = vector.load %arg10[%c0_81, %c0_82, %c0_83] : memref<4x256x256xbf16, #tpu.memory_space<vmem>>, vector<1x256x256xbf16>
    %271 = vector.shape_cast %270 : vector<1x256x256xbf16> to vector<256x256xbf16>
    %cst_84 = arith.constant dense<0.000000e+00> : vector<32x256xf32>
    %272 = tpu.matmul %269, %271, %cst_84 {dimension_numbers = #tpu.dot_dimension_numbers<[1], [0], [0], [1], [0, 0, 1, 1], [], []>} : vector<32x256xbf16>, vector<256x256xbf16>, vector<32x256xf32> -> vector<32x256xf32>
    %c1_85 = arith.constant 1 : index
    %c0_86 = arith.constant 0 : index
    %c0_87 = arith.constant 0 : index
    %273 = vector.load %arg10[%c1_85, %c0_86, %c0_87] : memref<4x256x256xbf16, #tpu.memory_space<vmem>>, vector<1x256x256xbf16>
    %274 = vector.shape_cast %273 : vector<1x256x256xbf16> to vector<256x256xbf16>
    %cst_88 = arith.constant dense<0.000000e+00> : vector<32x256xf32>
    %275 = tpu.matmul %269, %274, %cst_88 {dimension_numbers = #tpu.dot_dimension_numbers<[1], [0], [0], [1], [0, 0, 1, 1], [], []>} : vector<32x256xbf16>, vector<256x256xbf16>, vector<32x256xf32> -> vector<32x256xf32>
    %c2_89 = arith.constant 2 : index
    %c0_90 = arith.constant 0 : index
    %c0_91 = arith.constant 0 : index
    %276 = vector.load %arg10[%c2_89, %c0_90, %c0_91] : memref<4x256x256xbf16, #tpu.memory_space<vmem>>, vector<1x256x256xbf16>
    %277 = vector.shape_cast %276 : vector<1x256x256xbf16> to vector<256x256xbf16>
    %cst_92 = arith.constant dense<0.000000e+00> : vector<32x256xf32>
    %278 = tpu.matmul %269, %277, %cst_92 {dimension_numbers = #tpu.dot_dimension_numbers<[1], [0], [0], [1], [0, 0, 1, 1], [], []>} : vector<32x256xbf16>, vector<256x256xbf16>, vector<32x256xf32> -> vector<32x256xf32>
    %c3_93 = arith.constant 3 : index
    %c0_94 = arith.constant 0 : index
    %c0_95 = arith.constant 0 : index
    %279 = vector.load %arg10[%c3_93, %c0_94, %c0_95] : memref<4x256x256xbf16, #tpu.memory_space<vmem>>, vector<1x256x256xbf16>
    %280 = vector.shape_cast %279 : vector<1x256x256xbf16> to vector<256x256xbf16>
    %cst_96 = arith.constant dense<0.000000e+00> : vector<32x256xf32>
    %281 = tpu.matmul %269, %280, %cst_96 {dimension_numbers = #tpu.dot_dimension_numbers<[1], [0], [0], [1], [0, 0, 1, 1], [], []>} : vector<32x256xbf16>, vector<256x256xbf16>, vector<32x256xf32> -> vector<32x256xf32>
    %c0_97 = arith.constant 0 : index
    %c0_98 = arith.constant 0 : index
    %282 = vector.load %arg11[%c0_97, %c0_98] : memref<32x64xf32, #tpu.memory_space<vmem>>, vector<32x64xf32>
    %283 = vector.extract_strided_slice %272 {offsets = [0, 0], sizes = [16, 256], strides = [1, 1]} : vector<32x256xf32> to vector<16x256xf32>
    %284 = vector.extract_strided_slice %275 {offsets = [0, 0], sizes = [16, 256], strides = [1, 1]} : vector<32x256xf32> to vector<16x256xf32>
    %285 = vector.extract_strided_slice %278 {offsets = [0, 0], sizes = [16, 256], strides = [1, 1]} : vector<32x256xf32> to vector<16x256xf32>
    %286 = vector.extract_strided_slice %281 {offsets = [0, 0], sizes = [16, 256], strides = [1, 1]} : vector<32x256xf32> to vector<16x256xf32>
    %287 = tpu.concatenate %283, %284, %285, %286 in 0 : vector<16x256xf32>, vector<16x256xf32>, vector<16x256xf32>, vector<16x256xf32> -> vector<64x256xf32>
    %cst_99 = arith.constant dense<0.000000e+00> : vector<32x256xf32>
    %288 = tpu.matmul %282, %287, %cst_99 {dimension_numbers = #tpu.dot_dimension_numbers<[1], [0], [0], [1], [0, 0, 1, 1], [], []>} : vector<32x64xf32>, vector<64x256xf32>, vector<32x256xf32> -> vector<32x256xf32>
    %289 = vector.extract_strided_slice %272 {offsets = [16, 0], sizes = [16, 256], strides = [1, 1]} : vector<32x256xf32> to vector<16x256xf32>
    %290 = vector.extract_strided_slice %275 {offsets = [16, 0], sizes = [16, 256], strides = [1, 1]} : vector<32x256xf32> to vector<16x256xf32>
    %291 = vector.extract_strided_slice %278 {offsets = [16, 0], sizes = [16, 256], strides = [1, 1]} : vector<32x256xf32> to vector<16x256xf32>
    %292 = vector.extract_strided_slice %281 {offsets = [16, 0], sizes = [16, 256], strides = [1, 1]} : vector<32x256xf32> to vector<16x256xf32>
    %293 = tpu.concatenate %289, %290, %291, %292 in 0 : vector<16x256xf32>, vector<16x256xf32>, vector<16x256xf32>, vector<16x256xf32> -> vector<64x256xf32>
    %cst_100 = arith.constant dense<0.000000e+00> : vector<32x256xf32>
    %294 = tpu.matmul %282, %293, %cst_100 {dimension_numbers = #tpu.dot_dimension_numbers<[1], [0], [0], [1], [0, 0, 1, 1], [], []>} : vector<32x64xf32>, vector<64x256xf32>, vector<32x256xf32> -> vector<32x256xf32>
    %295 = tpu.concatenate %288, %294 in 0 : vector<32x256xf32>, vector<32x256xf32> -> vector<64x256xf32>
    %c0_101 = arith.constant 0 : index
    %c0_102 = arith.constant 0 : index
    %296 = vector.load %arg12[%c0_101, %c0_102] : memref<2x8xf32, #tpu.memory_space<vmem>>, vector<2x8xf32>
    %cst_103 = arith.constant dense<0.000000e+00> : vector<256xf32>
    %297 = vector.multi_reduction <add>, %295, %cst_103 [0] : vector<64x256xf32> to vector<256xf32>
    %298 = vector.shape_cast %297 : vector<256xf32> to vector<1x256xf32>
    %299 = vector.extract_strided_slice %298 {offsets = [0, 0], sizes = [1, 8], strides = [1, 1]} : vector<1x256xf32> to vector<1x8xf32>
    %300 = vector.extract_strided_slice %298 {offsets = [0, 8], sizes = [1, 8], strides = [1, 1]} : vector<1x256xf32> to vector<1x8xf32>
    %301 = arith.addf %299, %300 : vector<1x8xf32>
    %302 = vector.extract_strided_slice %298 {offsets = [0, 16], sizes = [1, 8], strides = [1, 1]} : vector<1x256xf32> to vector<1x8xf32>
    %303 = arith.addf %301, %302 : vector<1x8xf32>
    %304 = vector.extract_strided_slice %298 {offsets = [0, 24], sizes = [1, 8], strides = [1, 1]} : vector<1x256xf32> to vector<1x8xf32>
    %305 = arith.addf %303, %304 : vector<1x8xf32>
    %306 = vector.extract_strided_slice %298 {offsets = [0, 32], sizes = [1, 8], strides = [1, 1]} : vector<1x256xf32> to vector<1x8xf32>
    %307 = arith.addf %305, %306 : vector<1x8xf32>
    %308 = vector.extract_strided_slice %298 {offsets = [0, 40], sizes = [1, 8], strides = [1, 1]} : vector<1x256xf32> to vector<1x8xf32>
    %309 = arith.addf %307, %308 : vector<1x8xf32>
    %310 = vector.extract_strided_slice %298 {offsets = [0, 48], sizes = [1, 8], strides = [1, 1]} : vector<1x256xf32> to vector<1x8xf32>
    %311 = arith.addf %309, %310 : vector<1x8xf32>
    %312 = vector.extract_strided_slice %298 {offsets = [0, 56], sizes = [1, 8], strides = [1, 1]} : vector<1x256xf32> to vector<1x8xf32>
    %313 = arith.addf %311, %312 : vector<1x8xf32>
    %314 = vector.extract_strided_slice %298 {offsets = [0, 64], sizes = [1, 8], strides = [1, 1]} : vector<1x256xf32> to vector<1x8xf32>
    %315 = arith.addf %313, %314 : vector<1x8xf32>
    %316 = vector.extract_strided_slice %298 {offsets = [0, 72], sizes = [1, 8], strides = [1, 1]} : vector<1x256xf32> to vector<1x8xf32>
    %317 = arith.addf %315, %316 : vector<1x8xf32>
    %318 = vector.extract_strided_slice %298 {offsets = [0, 80], sizes = [1, 8], strides = [1, 1]} : vector<1x256xf32> to vector<1x8xf32>
    %319 = arith.addf %317, %318 : vector<1x8xf32>
    %320 = vector.extract_strided_slice %298 {offsets = [0, 88], sizes = [1, 8], strides = [1, 1]} : vector<1x256xf32> to vector<1x8xf32>
    %321 = arith.addf %319, %320 : vector<1x8xf32>
    %322 = vector.extract_strided_slice %298 {offsets = [0, 96], sizes = [1, 8], strides = [1, 1]} : vector<1x256xf32> to vector<1x8xf32>
    %323 = arith.addf %321, %322 : vector<1x8xf32>
    %324 = vector.extract_strided_slice %298 {offsets = [0, 104], sizes = [1, 8], strides = [1, 1]} : vector<1x256xf32> to vector<1x8xf32>
    %325 = arith.addf %323, %324 : vector<1x8xf32>
    %326 = vector.extract_strided_slice %298 {offsets = [0, 112], sizes = [1, 8], strides = [1, 1]} : vector<1x256xf32> to vector<1x8xf32>
    %327 = arith.addf %325, %326 : vector<1x8xf32>
    %328 = vector.extract_strided_slice %298 {offsets = [0, 120], sizes = [1, 8], strides = [1, 1]} : vector<1x256xf32> to vector<1x8xf32>
    %329 = arith.addf %327, %328 : vector<1x8xf32>
    %330 = vector.extract_strided_slice %298 {offsets = [0, 128], sizes = [1, 8], strides = [1, 1]} : vector<1x256xf32> to vector<1x8xf32>
    %331 = arith.addf %329, %330 : vector<1x8xf32>
    %332 = vector.extract_strided_slice %298 {offsets = [0, 136], sizes = [1, 8], strides = [1, 1]} : vector<1x256xf32> to vector<1x8xf32>
    %333 = arith.addf %331, %332 : vector<1x8xf32>
    %334 = vector.extract_strided_slice %298 {offsets = [0, 144], sizes = [1, 8], strides = [1, 1]} : vector<1x256xf32> to vector<1x8xf32>
    %335 = arith.addf %333, %334 : vector<1x8xf32>
    %336 = vector.extract_strided_slice %298 {offsets = [0, 152], sizes = [1, 8], strides = [1, 1]} : vector<1x256xf32> to vector<1x8xf32>
    %337 = arith.addf %335, %336 : vector<1x8xf32>
    %338 = vector.extract_strided_slice %298 {offsets = [0, 160], sizes = [1, 8], strides = [1, 1]} : vector<1x256xf32> to vector<1x8xf32>
    %339 = arith.addf %337, %338 : vector<1x8xf32>
    %340 = vector.extract_strided_slice %298 {offsets = [0, 168], sizes = [1, 8], strides = [1, 1]} : vector<1x256xf32> to vector<1x8xf32>
    %341 = arith.addf %339, %340 : vector<1x8xf32>
    %342 = vector.extract_strided_slice %298 {offsets = [0, 176], sizes = [1, 8], strides = [1, 1]} : vector<1x256xf32> to vector<1x8xf32>
    %343 = arith.addf %341, %342 : vector<1x8xf32>
    %344 = vector.extract_strided_slice %298 {offsets = [0, 184], sizes = [1, 8], strides = [1, 1]} : vector<1x256xf32> to vector<1x8xf32>
    %345 = arith.addf %343, %344 : vector<1x8xf32>
    %346 = vector.extract_strided_slice %298 {offsets = [0, 192], sizes = [1, 8], strides = [1, 1]} : vector<1x256xf32> to vector<1x8xf32>
    %347 = arith.addf %345, %346 : vector<1x8xf32>
    %348 = vector.extract_strided_slice %298 {offsets = [0, 200], sizes = [1, 8], strides = [1, 1]} : vector<1x256xf32> to vector<1x8xf32>
    %349 = arith.addf %347, %348 : vector<1x8xf32>
    %350 = vector.extract_strided_slice %298 {offsets = [0, 208], sizes = [1, 8], strides = [1, 1]} : vector<1x256xf32> to vector<1x8xf32>
    %351 = arith.addf %349, %350 : vector<1x8xf32>
    %352 = vector.extract_strided_slice %298 {offsets = [0, 216], sizes = [1, 8], strides = [1, 1]} : vector<1x256xf32> to vector<1x8xf32>
    %353 = arith.addf %351, %352 : vector<1x8xf32>
    %354 = vector.extract_strided_slice %298 {offsets = [0, 224], sizes = [1, 8], strides = [1, 1]} : vector<1x256xf32> to vector<1x8xf32>
    %355 = arith.addf %353, %354 : vector<1x8xf32>
    %356 = vector.extract_strided_slice %298 {offsets = [0, 232], sizes = [1, 8], strides = [1, 1]} : vector<1x256xf32> to vector<1x8xf32>
    %357 = arith.addf %355, %356 : vector<1x8xf32>
    %358 = vector.extract_strided_slice %298 {offsets = [0, 240], sizes = [1, 8], strides = [1, 1]} : vector<1x256xf32> to vector<1x8xf32>
    %359 = arith.addf %357, %358 : vector<1x8xf32>
    %360 = vector.extract_strided_slice %298 {offsets = [0, 248], sizes = [1, 8], strides = [1, 1]} : vector<1x256xf32> to vector<1x8xf32>
    %361 = arith.addf %359, %360 : vector<1x8xf32>
    %cst_104 = arith.constant 2.048000e+03 : f32
    %362 = vector.broadcast %cst_104 : f32 to vector<1x8xf32>
    %363 = arith.divf %361, %362 : vector<1x8xf32>
    %364 = tpu.concatenate %363, %363, %363, %363, %363, %363, %363, %363, %363, %363, %363, %363, %363, %363, %363, %363 in 1 : vector<1x8xf32>, vector<1x8xf32>, vector<1x8xf32>, vector<1x8xf32>, vector<1x8xf32>, vector<1x8xf32>, vector<1x8xf32>, vector<1x8xf32>, vector<1x8xf32>, vector<1x8xf32>, vector<1x8xf32>, vector<1x8xf32>, vector<1x8xf32>, vector<1x8xf32>, vector<1x8xf32>, vector<1x8xf32> -> vector<1x128xf32>
    %365 = tpu.concatenate %363, %363, %363, %363, %363, %363, %363, %363, %363, %363, %363, %363, %363, %363, %363, %363 in 1 : vector<1x8xf32>, vector<1x8xf32>, vector<1x8xf32>, vector<1x8xf32>, vector<1x8xf32>, vector<1x8xf32>, vector<1x8xf32>, vector<1x8xf32>, vector<1x8xf32>, vector<1x8xf32>, vector<1x8xf32>, vector<1x8xf32>, vector<1x8xf32>, vector<1x8xf32>, vector<1x8xf32>, vector<1x8xf32> -> vector<1x128xf32>
    %366 = tpu.concatenate %364, %365 in 1 : vector<1x128xf32>, vector<1x128xf32> -> vector<1x256xf32>
    %367 = vector.broadcast %366 : vector<1x256xf32> to vector<64x256xf32>
    %368 = arith.subf %295, %367 : vector<64x256xf32>
    %369 = arith.mulf %368, %368 : vector<64x256xf32>
    %cst_105 = arith.constant dense<0.000000e+00> : vector<256xf32>
    %370 = vector.multi_reduction <add>, %369, %cst_105 [0] : vector<64x256xf32> to vector<256xf32>
    %371 = vector.shape_cast %370 : vector<256xf32> to vector<1x256xf32>
    %372 = vector.extract_strided_slice %371 {offsets = [0, 0], sizes = [1, 8], strides = [1, 1]} : vector<1x256xf32> to vector<1x8xf32>
    %373 = vector.extract_strided_slice %371 {offsets = [0, 8], sizes = [1, 8], strides = [1, 1]} : vector<1x256xf32> to vector<1x8xf32>
    %374 = arith.addf %372, %373 : vector<1x8xf32>
    %375 = vector.extract_strided_slice %371 {offsets = [0, 16], sizes = [1, 8], strides = [1, 1]} : vector<1x256xf32> to vector<1x8xf32>
    %376 = arith.addf %374, %375 : vector<1x8xf32>
    %377 = vector.extract_strided_slice %371 {offsets = [0, 24], sizes = [1, 8], strides = [1, 1]} : vector<1x256xf32> to vector<1x8xf32>
    %378 = arith.addf %376, %377 : vector<1x8xf32>
    %379 = vector.extract_strided_slice %371 {offsets = [0, 32], sizes = [1, 8], strides = [1, 1]} : vector<1x256xf32> to vector<1x8xf32>
    %380 = arith.addf %378, %379 : vector<1x8xf32>
    %381 = vector.extract_strided_slice %371 {offsets = [0, 40], sizes = [1, 8], strides = [1, 1]} : vector<1x256xf32> to vector<1x8xf32>
    %382 = arith.addf %380, %381 : vector<1x8xf32>
    %383 = vector.extract_strided_slice %371 {offsets = [0, 48], sizes = [1, 8], strides = [1, 1]} : vector<1x256xf32> to vector<1x8xf32>
    %384 = arith.addf %382, %383 : vector<1x8xf32>
    %385 = vector.extract_strided_slice %371 {offsets = [0, 56], sizes = [1, 8], strides = [1, 1]} : vector<1x256xf32> to vector<1x8xf32>
    %386 = arith.addf %384, %385 : vector<1x8xf32>
    %387 = vector.extract_strided_slice %371 {offsets = [0, 64], sizes = [1, 8], strides = [1, 1]} : vector<1x256xf32> to vector<1x8xf32>
    %388 = arith.addf %386, %387 : vector<1x8xf32>
    %389 = vector.extract_strided_slice %371 {offsets = [0, 72], sizes = [1, 8], strides = [1, 1]} : vector<1x256xf32> to vector<1x8xf32>
    %390 = arith.addf %388, %389 : vector<1x8xf32>
    %391 = vector.extract_strided_slice %371 {offsets = [0, 80], sizes = [1, 8], strides = [1, 1]} : vector<1x256xf32> to vector<1x8xf32>
    %392 = arith.addf %390, %391 : vector<1x8xf32>
    %393 = vector.extract_strided_slice %371 {offsets = [0, 88], sizes = [1, 8], strides = [1, 1]} : vector<1x256xf32> to vector<1x8xf32>
    %394 = arith.addf %392, %393 : vector<1x8xf32>
    %395 = vector.extract_strided_slice %371 {offsets = [0, 96], sizes = [1, 8], strides = [1, 1]} : vector<1x256xf32> to vector<1x8xf32>
    %396 = arith.addf %394, %395 : vector<1x8xf32>
    %397 = vector.extract_strided_slice %371 {offsets = [0, 104], sizes = [1, 8], strides = [1, 1]} : vector<1x256xf32> to vector<1x8xf32>
    %398 = arith.addf %396, %397 : vector<1x8xf32>
    %399 = vector.extract_strided_slice %371 {offsets = [0, 112], sizes = [1, 8], strides = [1, 1]} : vector<1x256xf32> to vector<1x8xf32>
    %400 = arith.addf %398, %399 : vector<1x8xf32>
    %401 = vector.extract_strided_slice %371 {offsets = [0, 120], sizes = [1, 8], strides = [1, 1]} : vector<1x256xf32> to vector<1x8xf32>
    %402 = arith.addf %400, %401 : vector<1x8xf32>
    %403 = vector.extract_strided_slice %371 {offsets = [0, 128], sizes = [1, 8], strides = [1, 1]} : vector<1x256xf32> to vector<1x8xf32>
    %404 = arith.addf %402, %403 : vector<1x8xf32>
    %405 = vector.extract_strided_slice %371 {offsets = [0, 136], sizes = [1, 8], strides = [1, 1]} : vector<1x256xf32> to vector<1x8xf32>
    %406 = arith.addf %404, %405 : vector<1x8xf32>
    %407 = vector.extract_strided_slice %371 {offsets = [0, 144], sizes = [1, 8], strides = [1, 1]} : vector<1x256xf32> to vector<1x8xf32>
    %408 = arith.addf %406, %407 : vector<1x8xf32>
    %409 = vector.extract_strided_slice %371 {offsets = [0, 152], sizes = [1, 8], strides = [1, 1]} : vector<1x256xf32> to vector<1x8xf32>
    %410 = arith.addf %408, %409 : vector<1x8xf32>
    %411 = vector.extract_strided_slice %371 {offsets = [0, 160], sizes = [1, 8], strides = [1, 1]} : vector<1x256xf32> to vector<1x8xf32>
    %412 = arith.addf %410, %411 : vector<1x8xf32>
    %413 = vector.extract_strided_slice %371 {offsets = [0, 168], sizes = [1, 8], strides = [1, 1]} : vector<1x256xf32> to vector<1x8xf32>
    %414 = arith.addf %412, %413 : vector<1x8xf32>
    %415 = vector.extract_strided_slice %371 {offsets = [0, 176], sizes = [1, 8], strides = [1, 1]} : vector<1x256xf32> to vector<1x8xf32>
    %416 = arith.addf %414, %415 : vector<1x8xf32>
    %417 = vector.extract_strided_slice %371 {offsets = [0, 184], sizes = [1, 8], strides = [1, 1]} : vector<1x256xf32> to vector<1x8xf32>
    %418 = arith.addf %416, %417 : vector<1x8xf32>
    %419 = vector.extract_strided_slice %371 {offsets = [0, 192], sizes = [1, 8], strides = [1, 1]} : vector<1x256xf32> to vector<1x8xf32>
    %420 = arith.addf %418, %419 : vector<1x8xf32>
    %421 = vector.extract_strided_slice %371 {offsets = [0, 200], sizes = [1, 8], strides = [1, 1]} : vector<1x256xf32> to vector<1x8xf32>
    %422 = arith.addf %420, %421 : vector<1x8xf32>
    %423 = vector.extract_strided_slice %371 {offsets = [0, 208], sizes = [1, 8], strides = [1, 1]} : vector<1x256xf32> to vector<1x8xf32>
    %424 = arith.addf %422, %423 : vector<1x8xf32>
    %425 = vector.extract_strided_slice %371 {offsets = [0, 216], sizes = [1, 8], strides = [1, 1]} : vector<1x256xf32> to vector<1x8xf32>
    %426 = arith.addf %424, %425 : vector<1x8xf32>
    %427 = vector.extract_strided_slice %371 {offsets = [0, 224], sizes = [1, 8], strides = [1, 1]} : vector<1x256xf32> to vector<1x8xf32>
    %428 = arith.addf %426, %427 : vector<1x8xf32>
    %429 = vector.extract_strided_slice %371 {offsets = [0, 232], sizes = [1, 8], strides = [1, 1]} : vector<1x256xf32> to vector<1x8xf32>
    %430 = arith.addf %428, %429 : vector<1x8xf32>
    %431 = vector.extract_strided_slice %371 {offsets = [0, 240], sizes = [1, 8], strides = [1, 1]} : vector<1x256xf32> to vector<1x8xf32>
    %432 = arith.addf %430, %431 : vector<1x8xf32>
    %433 = vector.extract_strided_slice %371 {offsets = [0, 248], sizes = [1, 8], strides = [1, 1]} : vector<1x256xf32> to vector<1x8xf32>
    %434 = arith.addf %432, %433 : vector<1x8xf32>
    %cst_106 = arith.constant 2.048000e+03 : f32
    %435 = vector.broadcast %cst_106 : f32 to vector<1x8xf32>
    %436 = arith.divf %434, %435 : vector<1x8xf32>
    %437 = vector.extract_strided_slice %296 {offsets = [0, 0], sizes = [1, 8], strides = [1, 1]} : vector<2x8xf32> to vector<1x8xf32>
    %cst_107 = arith.constant 9.99999974E-6 : f32
    %438 = vector.broadcast %cst_107 : f32 to vector<1x8xf32>
    %439 = arith.addf %436, %438 : vector<1x8xf32>
    %440 = math.rsqrt %439 : vector<1x8xf32>
    %441 = arith.mulf %437, %440 : vector<1x8xf32>
    %442 = tpu.concatenate %441, %441, %441, %441, %441, %441, %441, %441, %441, %441, %441, %441, %441, %441, %441, %441 in 1 : vector<1x8xf32>, vector<1x8xf32>, vector<1x8xf32>, vector<1x8xf32>, vector<1x8xf32>, vector<1x8xf32>, vector<1x8xf32>, vector<1x8xf32>, vector<1x8xf32>, vector<1x8xf32>, vector<1x8xf32>, vector<1x8xf32>, vector<1x8xf32>, vector<1x8xf32>, vector<1x8xf32>, vector<1x8xf32> -> vector<1x128xf32>
    %443 = tpu.concatenate %441, %441, %441, %441, %441, %441, %441, %441, %441, %441, %441, %441, %441, %441, %441, %441 in 1 : vector<1x8xf32>, vector<1x8xf32>, vector<1x8xf32>, vector<1x8xf32>, vector<1x8xf32>, vector<1x8xf32>, vector<1x8xf32>, vector<1x8xf32>, vector<1x8xf32>, vector<1x8xf32>, vector<1x8xf32>, vector<1x8xf32>, vector<1x8xf32>, vector<1x8xf32>, vector<1x8xf32>, vector<1x8xf32> -> vector<1x128xf32>
    %444 = tpu.concatenate %442, %443 in 1 : vector<1x128xf32>, vector<1x128xf32> -> vector<1x256xf32>
    %445 = vector.broadcast %444 : vector<1x256xf32> to vector<64x256xf32>
    %446 = arith.mulf %368, %445 : vector<64x256xf32>
    %447 = vector.extract_strided_slice %296 {offsets = [1, 0], sizes = [1, 8], strides = [1, 1]} : vector<2x8xf32> to vector<1x8xf32>
    %448 = tpu.concatenate %447, %447, %447, %447, %447, %447, %447, %447, %447, %447, %447, %447, %447, %447, %447, %447 in 1 : vector<1x8xf32>, vector<1x8xf32>, vector<1x8xf32>, vector<1x8xf32>, vector<1x8xf32>, vector<1x8xf32>, vector<1x8xf32>, vector<1x8xf32>, vector<1x8xf32>, vector<1x8xf32>, vector<1x8xf32>, vector<1x8xf32>, vector<1x8xf32>, vector<1x8xf32>, vector<1x8xf32>, vector<1x8xf32> -> vector<1x128xf32>
    %449 = tpu.concatenate %447, %447, %447, %447, %447, %447, %447, %447, %447, %447, %447, %447, %447, %447, %447, %447 in 1 : vector<1x8xf32>, vector<1x8xf32>, vector<1x8xf32>, vector<1x8xf32>, vector<1x8xf32>, vector<1x8xf32>, vector<1x8xf32>, vector<1x8xf32>, vector<1x8xf32>, vector<1x8xf32>, vector<1x8xf32>, vector<1x8xf32>, vector<1x8xf32>, vector<1x8xf32>, vector<1x8xf32>, vector<1x8xf32> -> vector<1x128xf32>
    %450 = tpu.concatenate %448, %449 in 1 : vector<1x128xf32>, vector<1x128xf32> -> vector<1x256xf32>
    %451 = vector.broadcast %450 : vector<1x256xf32> to vector<64x256xf32>
    %452 = arith.addf %446, %451 : vector<64x256xf32>
    %cst_108 = arith.constant 0.000000e+00 : f32
    %453 = vector.broadcast %cst_108 : f32 to vector<64x256xf32>
    %454 = arith.maximumf %452, %453 : vector<64x256xf32>
    %455 = arith.truncf %454 : vector<64x256xf32> to vector<64x256xbf16>
    %c0_109 = arith.constant 0 : index
    %c0_110 = arith.constant 0 : index
    %c0_111 = arith.constant 0 : index
    %456 = vector.load %arg13[%c0_109, %c0_110, %c0_111] : memref<3x256x224xbf16, #tpu.memory_space<vmem>>, vector<1x256x224xbf16>
    %457 = vector.shape_cast %456 : vector<1x256x224xbf16> to vector<256x224xbf16>
    %cst_112 = arith.constant dense<0.000000e+00> : vector<64x224xf32>
    %458 = tpu.matmul %455, %457, %cst_112 {dimension_numbers = #tpu.dot_dimension_numbers<[1], [0], [0], [1], [0, 0, 1, 1], [], []>} : vector<64x256xbf16>, vector<256x224xbf16>, vector<64x224xf32> -> vector<64x224xf32>
    %c1_113 = arith.constant 1 : index
    %c0_114 = arith.constant 0 : index
    %c0_115 = arith.constant 0 : index
    %459 = vector.load %arg13[%c1_113, %c0_114, %c0_115] : memref<3x256x224xbf16, #tpu.memory_space<vmem>>, vector<1x256x224xbf16>
    %460 = vector.shape_cast %459 : vector<1x256x224xbf16> to vector<256x224xbf16>
    %cst_116 = arith.constant dense<0.000000e+00> : vector<64x224xf32>
    %461 = tpu.matmul %455, %460, %cst_116 {dimension_numbers = #tpu.dot_dimension_numbers<[1], [0], [0], [1], [0, 0, 1, 1], [], []>} : vector<64x256xbf16>, vector<256x224xbf16>, vector<64x224xf32> -> vector<64x224xf32>
    %c2_117 = arith.constant 2 : index
    %c0_118 = arith.constant 0 : index
    %c0_119 = arith.constant 0 : index
    %462 = vector.load %arg13[%c2_117, %c0_118, %c0_119] : memref<3x256x224xbf16, #tpu.memory_space<vmem>>, vector<1x256x224xbf16>
    %463 = vector.shape_cast %462 : vector<1x256x224xbf16> to vector<256x224xbf16>
    %cst_120 = arith.constant dense<0.000000e+00> : vector<64x224xf32>
    %464 = tpu.matmul %455, %463, %cst_120 {dimension_numbers = #tpu.dot_dimension_numbers<[1], [0], [0], [1], [0, 0, 1, 1], [], []>} : vector<64x256xbf16>, vector<256x224xbf16>, vector<64x224xf32> -> vector<64x224xf32>
    %c0_121 = arith.constant 0 : index
    %c0_122 = arith.constant 0 : index
    %465 = vector.load %arg14[%c0_121, %c0_122] : memref<28x96xf32, #tpu.memory_space<vmem>>, vector<28x96xf32>
    %466 = vector.extract_strided_slice %458 {offsets = [0, 0], sizes = [32, 224], strides = [1, 1]} : vector<64x224xf32> to vector<32x224xf32>
    %467 = vector.extract_strided_slice %461 {offsets = [0, 0], sizes = [32, 224], strides = [1, 1]} : vector<64x224xf32> to vector<32x224xf32>
    %468 = vector.extract_strided_slice %464 {offsets = [0, 0], sizes = [32, 224], strides = [1, 1]} : vector<64x224xf32> to vector<32x224xf32>
    %469 = tpu.concatenate %466, %467, %468 in 0 : vector<32x224xf32>, vector<32x224xf32>, vector<32x224xf32> -> vector<96x224xf32>
    %cst_123 = arith.constant dense<0.000000e+00> : vector<28x224xf32>
    %470 = tpu.matmul %465, %469, %cst_123 {dimension_numbers = #tpu.dot_dimension_numbers<[1], [0], [0], [1], [0, 0, 1, 1], [], []>} : vector<28x96xf32>, vector<96x224xf32>, vector<28x224xf32> -> vector<28x224xf32>
    %471 = vector.extract_strided_slice %458 {offsets = [32, 0], sizes = [32, 224], strides = [1, 1]} : vector<64x224xf32> to vector<32x224xf32>
    %472 = vector.extract_strided_slice %461 {offsets = [32, 0], sizes = [32, 224], strides = [1, 1]} : vector<64x224xf32> to vector<32x224xf32>
    %473 = vector.extract_strided_slice %464 {offsets = [32, 0], sizes = [32, 224], strides = [1, 1]} : vector<64x224xf32> to vector<32x224xf32>
    %474 = tpu.concatenate %471, %472, %473 in 0 : vector<32x224xf32>, vector<32x224xf32>, vector<32x224xf32> -> vector<96x224xf32>
    %cst_124 = arith.constant dense<0.000000e+00> : vector<28x224xf32>
    %475 = tpu.matmul %465, %474, %cst_124 {dimension_numbers = #tpu.dot_dimension_numbers<[1], [0], [0], [1], [0, 0, 1, 1], [], []>} : vector<28x96xf32>, vector<96x224xf32>, vector<28x224xf32> -> vector<28x224xf32>
    %476 = tpu.concatenate %470, %475 in 0 : vector<28x224xf32>, vector<28x224xf32> -> vector<56x224xf32>
    %c0_125 = arith.constant 0 : index
    %c0_126 = arith.constant 0 : index
    %477 = vector.load %arg15[%c0_125, %c0_126] : memref<2x8xf32, #tpu.memory_space<vmem>>, vector<2x8xf32>
    %cst_127 = arith.constant dense<0.000000e+00> : vector<224xf32>
    %478 = vector.multi_reduction <add>, %476, %cst_127 [0] : vector<56x224xf32> to vector<224xf32>
    %479 = vector.shape_cast %478 : vector<224xf32> to vector<1x224xf32>
    %480 = vector.extract_strided_slice %479 {offsets = [0, 0], sizes = [1, 8], strides = [1, 1]} : vector<1x224xf32> to vector<1x8xf32>
    %481 = vector.extract_strided_slice %479 {offsets = [0, 8], sizes = [1, 8], strides = [1, 1]} : vector<1x224xf32> to vector<1x8xf32>
    %482 = arith.addf %480, %481 : vector<1x8xf32>
    %483 = vector.extract_strided_slice %479 {offsets = [0, 16], sizes = [1, 8], strides = [1, 1]} : vector<1x224xf32> to vector<1x8xf32>
    %484 = arith.addf %482, %483 : vector<1x8xf32>
    %485 = vector.extract_strided_slice %479 {offsets = [0, 24], sizes = [1, 8], strides = [1, 1]} : vector<1x224xf32> to vector<1x8xf32>
    %486 = arith.addf %484, %485 : vector<1x8xf32>
    %487 = vector.extract_strided_slice %479 {offsets = [0, 32], sizes = [1, 8], strides = [1, 1]} : vector<1x224xf32> to vector<1x8xf32>
    %488 = arith.addf %486, %487 : vector<1x8xf32>
    %489 = vector.extract_strided_slice %479 {offsets = [0, 40], sizes = [1, 8], strides = [1, 1]} : vector<1x224xf32> to vector<1x8xf32>
    %490 = arith.addf %488, %489 : vector<1x8xf32>
    %491 = vector.extract_strided_slice %479 {offsets = [0, 48], sizes = [1, 8], strides = [1, 1]} : vector<1x224xf32> to vector<1x8xf32>
    %492 = arith.addf %490, %491 : vector<1x8xf32>
    %493 = vector.extract_strided_slice %479 {offsets = [0, 56], sizes = [1, 8], strides = [1, 1]} : vector<1x224xf32> to vector<1x8xf32>
    %494 = arith.addf %492, %493 : vector<1x8xf32>
    %495 = vector.extract_strided_slice %479 {offsets = [0, 64], sizes = [1, 8], strides = [1, 1]} : vector<1x224xf32> to vector<1x8xf32>
    %496 = arith.addf %494, %495 : vector<1x8xf32>
    %497 = vector.extract_strided_slice %479 {offsets = [0, 72], sizes = [1, 8], strides = [1, 1]} : vector<1x224xf32> to vector<1x8xf32>
    %498 = arith.addf %496, %497 : vector<1x8xf32>
    %499 = vector.extract_strided_slice %479 {offsets = [0, 80], sizes = [1, 8], strides = [1, 1]} : vector<1x224xf32> to vector<1x8xf32>
    %500 = arith.addf %498, %499 : vector<1x8xf32>
    %501 = vector.extract_strided_slice %479 {offsets = [0, 88], sizes = [1, 8], strides = [1, 1]} : vector<1x224xf32> to vector<1x8xf32>
    %502 = arith.addf %500, %501 : vector<1x8xf32>
    %503 = vector.extract_strided_slice %479 {offsets = [0, 96], sizes = [1, 8], strides = [1, 1]} : vector<1x224xf32> to vector<1x8xf32>
    %504 = arith.addf %502, %503 : vector<1x8xf32>
    %505 = vector.extract_strided_slice %479 {offsets = [0, 104], sizes = [1, 8], strides = [1, 1]} : vector<1x224xf32> to vector<1x8xf32>
    %506 = arith.addf %504, %505 : vector<1x8xf32>
    %507 = vector.extract_strided_slice %479 {offsets = [0, 112], sizes = [1, 8], strides = [1, 1]} : vector<1x224xf32> to vector<1x8xf32>
    %508 = arith.addf %506, %507 : vector<1x8xf32>
    %509 = vector.extract_strided_slice %479 {offsets = [0, 120], sizes = [1, 8], strides = [1, 1]} : vector<1x224xf32> to vector<1x8xf32>
    %510 = arith.addf %508, %509 : vector<1x8xf32>
    %511 = vector.extract_strided_slice %479 {offsets = [0, 128], sizes = [1, 8], strides = [1, 1]} : vector<1x224xf32> to vector<1x8xf32>
    %512 = arith.addf %510, %511 : vector<1x8xf32>
    %513 = vector.extract_strided_slice %479 {offsets = [0, 136], sizes = [1, 8], strides = [1, 1]} : vector<1x224xf32> to vector<1x8xf32>
    %514 = arith.addf %512, %513 : vector<1x8xf32>
    %515 = vector.extract_strided_slice %479 {offsets = [0, 144], sizes = [1, 8], strides = [1, 1]} : vector<1x224xf32> to vector<1x8xf32>
    %516 = arith.addf %514, %515 : vector<1x8xf32>
    %517 = vector.extract_strided_slice %479 {offsets = [0, 152], sizes = [1, 8], strides = [1, 1]} : vector<1x224xf32> to vector<1x8xf32>
    %518 = arith.addf %516, %517 : vector<1x8xf32>
    %519 = vector.extract_strided_slice %479 {offsets = [0, 160], sizes = [1, 8], strides = [1, 1]} : vector<1x224xf32> to vector<1x8xf32>
    %520 = arith.addf %518, %519 : vector<1x8xf32>
    %521 = vector.extract_strided_slice %479 {offsets = [0, 168], sizes = [1, 8], strides = [1, 1]} : vector<1x224xf32> to vector<1x8xf32>
    %522 = arith.addf %520, %521 : vector<1x8xf32>
    %523 = vector.extract_strided_slice %479 {offsets = [0, 176], sizes = [1, 8], strides = [1, 1]} : vector<1x224xf32> to vector<1x8xf32>
    %524 = arith.addf %522, %523 : vector<1x8xf32>
    %525 = vector.extract_strided_slice %479 {offsets = [0, 184], sizes = [1, 8], strides = [1, 1]} : vector<1x224xf32> to vector<1x8xf32>
    %526 = arith.addf %524, %525 : vector<1x8xf32>
    %527 = vector.extract_strided_slice %479 {offsets = [0, 192], sizes = [1, 8], strides = [1, 1]} : vector<1x224xf32> to vector<1x8xf32>
    %528 = arith.addf %526, %527 : vector<1x8xf32>
    %529 = vector.extract_strided_slice %479 {offsets = [0, 200], sizes = [1, 8], strides = [1, 1]} : vector<1x224xf32> to vector<1x8xf32>
    %530 = arith.addf %528, %529 : vector<1x8xf32>
    %531 = vector.extract_strided_slice %479 {offsets = [0, 208], sizes = [1, 8], strides = [1, 1]} : vector<1x224xf32> to vector<1x8xf32>
    %532 = arith.addf %530, %531 : vector<1x8xf32>
    %533 = vector.extract_strided_slice %479 {offsets = [0, 216], sizes = [1, 8], strides = [1, 1]} : vector<1x224xf32> to vector<1x8xf32>
    %534 = arith.addf %532, %533 : vector<1x8xf32>
    %cst_128 = arith.constant 1.568000e+03 : f32
    %535 = vector.broadcast %cst_128 : f32 to vector<1x8xf32>
    %536 = arith.divf %534, %535 : vector<1x8xf32>
    %537 = tpu.concatenate %536, %536, %536, %536, %536, %536, %536, %536, %536, %536, %536, %536, %536, %536, %536, %536 in 1 : vector<1x8xf32>, vector<1x8xf32>, vector<1x8xf32>, vector<1x8xf32>, vector<1x8xf32>, vector<1x8xf32>, vector<1x8xf32>, vector<1x8xf32>, vector<1x8xf32>, vector<1x8xf32>, vector<1x8xf32>, vector<1x8xf32>, vector<1x8xf32>, vector<1x8xf32>, vector<1x8xf32>, vector<1x8xf32> -> vector<1x128xf32>
    %538 = tpu.concatenate %536, %536, %536, %536, %536, %536, %536, %536, %536, %536, %536, %536 in 1 : vector<1x8xf32>, vector<1x8xf32>, vector<1x8xf32>, vector<1x8xf32>, vector<1x8xf32>, vector<1x8xf32>, vector<1x8xf32>, vector<1x8xf32>, vector<1x8xf32>, vector<1x8xf32>, vector<1x8xf32>, vector<1x8xf32> -> vector<1x96xf32>
    %539 = tpu.concatenate %537, %538 in 1 : vector<1x128xf32>, vector<1x96xf32> -> vector<1x224xf32>
    %540 = vector.broadcast %539 : vector<1x224xf32> to vector<56x224xf32>
    %541 = arith.subf %476, %540 : vector<56x224xf32>
    %542 = arith.mulf %541, %541 : vector<56x224xf32>
    %cst_129 = arith.constant dense<0.000000e+00> : vector<224xf32>
    %543 = vector.multi_reduction <add>, %542, %cst_129 [0] : vector<56x224xf32> to vector<224xf32>
    %544 = vector.shape_cast %543 : vector<224xf32> to vector<1x224xf32>
    %545 = vector.extract_strided_slice %544 {offsets = [0, 0], sizes = [1, 8], strides = [1, 1]} : vector<1x224xf32> to vector<1x8xf32>
    %546 = vector.extract_strided_slice %544 {offsets = [0, 8], sizes = [1, 8], strides = [1, 1]} : vector<1x224xf32> to vector<1x8xf32>
    %547 = arith.addf %545, %546 : vector<1x8xf32>
    %548 = vector.extract_strided_slice %544 {offsets = [0, 16], sizes = [1, 8], strides = [1, 1]} : vector<1x224xf32> to vector<1x8xf32>
    %549 = arith.addf %547, %548 : vector<1x8xf32>
    %550 = vector.extract_strided_slice %544 {offsets = [0, 24], sizes = [1, 8], strides = [1, 1]} : vector<1x224xf32> to vector<1x8xf32>
    %551 = arith.addf %549, %550 : vector<1x8xf32>
    %552 = vector.extract_strided_slice %544 {offsets = [0, 32], sizes = [1, 8], strides = [1, 1]} : vector<1x224xf32> to vector<1x8xf32>
    %553 = arith.addf %551, %552 : vector<1x8xf32>
    %554 = vector.extract_strided_slice %544 {offsets = [0, 40], sizes = [1, 8], strides = [1, 1]} : vector<1x224xf32> to vector<1x8xf32>
    %555 = arith.addf %553, %554 : vector<1x8xf32>
    %556 = vector.extract_strided_slice %544 {offsets = [0, 48], sizes = [1, 8], strides = [1, 1]} : vector<1x224xf32> to vector<1x8xf32>
    %557 = arith.addf %555, %556 : vector<1x8xf32>
    %558 = vector.extract_strided_slice %544 {offsets = [0, 56], sizes = [1, 8], strides = [1, 1]} : vector<1x224xf32> to vector<1x8xf32>
    %559 = arith.addf %557, %558 : vector<1x8xf32>
    %560 = vector.extract_strided_slice %544 {offsets = [0, 64], sizes = [1, 8], strides = [1, 1]} : vector<1x224xf32> to vector<1x8xf32>
    %561 = arith.addf %559, %560 : vector<1x8xf32>
    %562 = vector.extract_strided_slice %544 {offsets = [0, 72], sizes = [1, 8], strides = [1, 1]} : vector<1x224xf32> to vector<1x8xf32>
    %563 = arith.addf %561, %562 : vector<1x8xf32>
    %564 = vector.extract_strided_slice %544 {offsets = [0, 80], sizes = [1, 8], strides = [1, 1]} : vector<1x224xf32> to vector<1x8xf32>
    %565 = arith.addf %563, %564 : vector<1x8xf32>
    %566 = vector.extract_strided_slice %544 {offsets = [0, 88], sizes = [1, 8], strides = [1, 1]} : vector<1x224xf32> to vector<1x8xf32>
    %567 = arith.addf %565, %566 : vector<1x8xf32>
    %568 = vector.extract_strided_slice %544 {offsets = [0, 96], sizes = [1, 8], strides = [1, 1]} : vector<1x224xf32> to vector<1x8xf32>
    %569 = arith.addf %567, %568 : vector<1x8xf32>
    %570 = vector.extract_strided_slice %544 {offsets = [0, 104], sizes = [1, 8], strides = [1, 1]} : vector<1x224xf32> to vector<1x8xf32>
    %571 = arith.addf %569, %570 : vector<1x8xf32>
    %572 = vector.extract_strided_slice %544 {offsets = [0, 112], sizes = [1, 8], strides = [1, 1]} : vector<1x224xf32> to vector<1x8xf32>
    %573 = arith.addf %571, %572 : vector<1x8xf32>
    %574 = vector.extract_strided_slice %544 {offsets = [0, 120], sizes = [1, 8], strides = [1, 1]} : vector<1x224xf32> to vector<1x8xf32>
    %575 = arith.addf %573, %574 : vector<1x8xf32>
    %576 = vector.extract_strided_slice %544 {offsets = [0, 128], sizes = [1, 8], strides = [1, 1]} : vector<1x224xf32> to vector<1x8xf32>
    %577 = arith.addf %575, %576 : vector<1x8xf32>
    %578 = vector.extract_strided_slice %544 {offsets = [0, 136], sizes = [1, 8], strides = [1, 1]} : vector<1x224xf32> to vector<1x8xf32>
    %579 = arith.addf %577, %578 : vector<1x8xf32>
    %580 = vector.extract_strided_slice %544 {offsets = [0, 144], sizes = [1, 8], strides = [1, 1]} : vector<1x224xf32> to vector<1x8xf32>
    %581 = arith.addf %579, %580 : vector<1x8xf32>
    %582 = vector.extract_strided_slice %544 {offsets = [0, 152], sizes = [1, 8], strides = [1, 1]} : vector<1x224xf32> to vector<1x8xf32>
    %583 = arith.addf %581, %582 : vector<1x8xf32>
    %584 = vector.extract_strided_slice %544 {offsets = [0, 160], sizes = [1, 8], strides = [1, 1]} : vector<1x224xf32> to vector<1x8xf32>
    %585 = arith.addf %583, %584 : vector<1x8xf32>
    %586 = vector.extract_strided_slice %544 {offsets = [0, 168], sizes = [1, 8], strides = [1, 1]} : vector<1x224xf32> to vector<1x8xf32>
    %587 = arith.addf %585, %586 : vector<1x8xf32>
    %588 = vector.extract_strided_slice %544 {offsets = [0, 176], sizes = [1, 8], strides = [1, 1]} : vector<1x224xf32> to vector<1x8xf32>
    %589 = arith.addf %587, %588 : vector<1x8xf32>
    %590 = vector.extract_strided_slice %544 {offsets = [0, 184], sizes = [1, 8], strides = [1, 1]} : vector<1x224xf32> to vector<1x8xf32>
    %591 = arith.addf %589, %590 : vector<1x8xf32>
    %592 = vector.extract_strided_slice %544 {offsets = [0, 192], sizes = [1, 8], strides = [1, 1]} : vector<1x224xf32> to vector<1x8xf32>
    %593 = arith.addf %591, %592 : vector<1x8xf32>
    %594 = vector.extract_strided_slice %544 {offsets = [0, 200], sizes = [1, 8], strides = [1, 1]} : vector<1x224xf32> to vector<1x8xf32>
    %595 = arith.addf %593, %594 : vector<1x8xf32>
    %596 = vector.extract_strided_slice %544 {offsets = [0, 208], sizes = [1, 8], strides = [1, 1]} : vector<1x224xf32> to vector<1x8xf32>
    %597 = arith.addf %595, %596 : vector<1x8xf32>
    %598 = vector.extract_strided_slice %544 {offsets = [0, 216], sizes = [1, 8], strides = [1, 1]} : vector<1x224xf32> to vector<1x8xf32>
    %599 = arith.addf %597, %598 : vector<1x8xf32>
    %cst_130 = arith.constant 1.568000e+03 : f32
    %600 = vector.broadcast %cst_130 : f32 to vector<1x8xf32>
    %601 = arith.divf %599, %600 : vector<1x8xf32>
    %602 = vector.extract_strided_slice %477 {offsets = [0, 0], sizes = [1, 8], strides = [1, 1]} : vector<2x8xf32> to vector<1x8xf32>
    %cst_131 = arith.constant 9.99999974E-6 : f32
    %603 = vector.broadcast %cst_131 : f32 to vector<1x8xf32>
    %604 = arith.addf %601, %603 : vector<1x8xf32>
    %605 = math.rsqrt %604 : vector<1x8xf32>
    %606 = arith.mulf %602, %605 : vector<1x8xf32>
    %607 = tpu.concatenate %606, %606, %606, %606, %606, %606, %606, %606, %606, %606, %606, %606, %606, %606, %606, %606 in 1 : vector<1x8xf32>, vector<1x8xf32>, vector<1x8xf32>, vector<1x8xf32>, vector<1x8xf32>, vector<1x8xf32>, vector<1x8xf32>, vector<1x8xf32>, vector<1x8xf32>, vector<1x8xf32>, vector<1x8xf32>, vector<1x8xf32>, vector<1x8xf32>, vector<1x8xf32>, vector<1x8xf32>, vector<1x8xf32> -> vector<1x128xf32>
    %608 = tpu.concatenate %606, %606, %606, %606, %606, %606, %606, %606, %606, %606, %606, %606 in 1 : vector<1x8xf32>, vector<1x8xf32>, vector<1x8xf32>, vector<1x8xf32>, vector<1x8xf32>, vector<1x8xf32>, vector<1x8xf32>, vector<1x8xf32>, vector<1x8xf32>, vector<1x8xf32>, vector<1x8xf32>, vector<1x8xf32> -> vector<1x96xf32>
    %609 = tpu.concatenate %607, %608 in 1 : vector<1x128xf32>, vector<1x96xf32> -> vector<1x224xf32>
    %610 = vector.broadcast %609 : vector<1x224xf32> to vector<56x224xf32>
    %611 = arith.mulf %541, %610 : vector<56x224xf32>
    %612 = vector.extract_strided_slice %477 {offsets = [1, 0], sizes = [1, 8], strides = [1, 1]} : vector<2x8xf32> to vector<1x8xf32>
    %613 = tpu.concatenate %612, %612, %612, %612, %612, %612, %612, %612, %612, %612, %612, %612, %612, %612, %612, %612 in 1 : vector<1x8xf32>, vector<1x8xf32>, vector<1x8xf32>, vector<1x8xf32>, vector<1x8xf32>, vector<1x8xf32>, vector<1x8xf32>, vector<1x8xf32>, vector<1x8xf32>, vector<1x8xf32>, vector<1x8xf32>, vector<1x8xf32>, vector<1x8xf32>, vector<1x8xf32>, vector<1x8xf32>, vector<1x8xf32> -> vector<1x128xf32>
    %614 = tpu.concatenate %612, %612, %612, %612, %612, %612, %612, %612, %612, %612, %612, %612 in 1 : vector<1x8xf32>, vector<1x8xf32>, vector<1x8xf32>, vector<1x8xf32>, vector<1x8xf32>, vector<1x8xf32>, vector<1x8xf32>, vector<1x8xf32>, vector<1x8xf32>, vector<1x8xf32>, vector<1x8xf32>, vector<1x8xf32> -> vector<1x96xf32>
    %615 = tpu.concatenate %613, %614 in 1 : vector<1x128xf32>, vector<1x96xf32> -> vector<1x224xf32>
    %616 = vector.broadcast %615 : vector<1x224xf32> to vector<56x224xf32>
    %617 = arith.addf %611, %616 : vector<56x224xf32>
    %cst_132 = arith.constant 0.000000e+00 : f32
    %618 = vector.broadcast %cst_132 : f32 to vector<56x224xf32>
    %619 = arith.maximumf %617, %618 : vector<56x224xf32>
    %620 = arith.truncf %619 : vector<56x224xf32> to vector<56x224xbf16>
    %c0_133 = arith.constant 0 : index
    %c0_134 = arith.constant 0 : index
    %c0_135 = arith.constant 0 : index
    %621 = vector.load %arg16[%c0_133, %c0_134, %c0_135] : memref<3x224x84xbf16, #tpu.memory_space<vmem>>, vector<1x224x84xbf16>
    %622 = vector.shape_cast %621 : vector<1x224x84xbf16> to vector<224x84xbf16>
    %cst_136 = arith.constant dense<0.000000e+00> : vector<56x84xf32>
    %623 = tpu.matmul %620, %622, %cst_136 {dimension_numbers = #tpu.dot_dimension_numbers<[1], [0], [0], [1], [0, 0, 1, 1], [], []>} : vector<56x224xbf16>, vector<224x84xbf16>, vector<56x84xf32> -> vector<56x84xf32>
    %c1_137 = arith.constant 1 : index
    %c0_138 = arith.constant 0 : index
    %c0_139 = arith.constant 0 : index
    %624 = vector.load %arg16[%c1_137, %c0_138, %c0_139] : memref<3x224x84xbf16, #tpu.memory_space<vmem>>, vector<1x224x84xbf16>
    %625 = vector.shape_cast %624 : vector<1x224x84xbf16> to vector<224x84xbf16>
    %cst_140 = arith.constant dense<0.000000e+00> : vector<56x84xf32>
    %626 = tpu.matmul %620, %625, %cst_140 {dimension_numbers = #tpu.dot_dimension_numbers<[1], [0], [0], [1], [0, 0, 1, 1], [], []>} : vector<56x224xbf16>, vector<224x84xbf16>, vector<56x84xf32> -> vector<56x84xf32>
    %c2_141 = arith.constant 2 : index
    %c0_142 = arith.constant 0 : index
    %c0_143 = arith.constant 0 : index
    %627 = vector.load %arg16[%c2_141, %c0_142, %c0_143] : memref<3x224x84xbf16, #tpu.memory_space<vmem>>, vector<1x224x84xbf16>
    %628 = vector.shape_cast %627 : vector<1x224x84xbf16> to vector<224x84xbf16>
    %cst_144 = arith.constant dense<0.000000e+00> : vector<56x84xf32>
    %629 = tpu.matmul %620, %628, %cst_144 {dimension_numbers = #tpu.dot_dimension_numbers<[1], [0], [0], [1], [0, 0, 1, 1], [], []>} : vector<56x224xbf16>, vector<224x84xbf16>, vector<56x84xf32> -> vector<56x84xf32>
    %c0_145 = arith.constant 0 : index
    %c0_146 = arith.constant 0 : index
    %630 = vector.load %arg17[%c0_145, %c0_146] : memref<28x84xf32, #tpu.memory_space<vmem>>, vector<28x84xf32>
    %631 = vector.extract_strided_slice %623 {offsets = [0, 0], sizes = [28, 84], strides = [1, 1]} : vector<56x84xf32> to vector<28x84xf32>
    %632 = vector.extract_strided_slice %626 {offsets = [0, 0], sizes = [28, 84], strides = [1, 1]} : vector<56x84xf32> to vector<28x84xf32>
    %633 = vector.extract_strided_slice %629 {offsets = [0, 0], sizes = [28, 84], strides = [1, 1]} : vector<56x84xf32> to vector<28x84xf32>
    %634 = tpu.concatenate %631, %632, %633 in 0 : vector<28x84xf32>, vector<28x84xf32>, vector<28x84xf32> -> vector<84x84xf32>
    %cst_147 = arith.constant dense<0.000000e+00> : vector<28x84xf32>
    %635 = tpu.matmul %630, %634, %cst_147 {dimension_numbers = #tpu.dot_dimension_numbers<[1], [0], [0], [1], [0, 0, 1, 1], [], []>} : vector<28x84xf32>, vector<84x84xf32>, vector<28x84xf32> -> vector<28x84xf32>
    %636 = vector.extract_strided_slice %623 {offsets = [28, 0], sizes = [28, 84], strides = [1, 1]} : vector<56x84xf32> to vector<28x84xf32>
    %637 = vector.extract_strided_slice %626 {offsets = [28, 0], sizes = [28, 84], strides = [1, 1]} : vector<56x84xf32> to vector<28x84xf32>
    %638 = vector.extract_strided_slice %629 {offsets = [28, 0], sizes = [28, 84], strides = [1, 1]} : vector<56x84xf32> to vector<28x84xf32>
    %639 = tpu.concatenate %636, %637, %638 in 0 : vector<28x84xf32>, vector<28x84xf32>, vector<28x84xf32> -> vector<84x84xf32>
    %cst_148 = arith.constant dense<0.000000e+00> : vector<28x84xf32>
    %640 = tpu.matmul %630, %639, %cst_148 {dimension_numbers = #tpu.dot_dimension_numbers<[1], [0], [0], [1], [0, 0, 1, 1], [], []>} : vector<28x84xf32>, vector<84x84xf32>, vector<28x84xf32> -> vector<28x84xf32>
    %641 = tpu.concatenate %635, %640 in 0 : vector<28x84xf32>, vector<28x84xf32> -> vector<56x84xf32>
    %c0_149 = arith.constant 0 : index
    %c0_150 = arith.constant 0 : index
    %642 = vector.load %arg18[%c0_149, %c0_150] : memref<1x3xf32, #tpu.memory_space<vmem>>, vector<1x3xf32>
    %643 = tpu.concatenate %642, %642, %642, %642, %642, %642, %642, %642, %642, %642, %642, %642, %642, %642, %642, %642 in 1 : vector<1x3xf32>, vector<1x3xf32>, vector<1x3xf32>, vector<1x3xf32>, vector<1x3xf32>, vector<1x3xf32>, vector<1x3xf32>, vector<1x3xf32>, vector<1x3xf32>, vector<1x3xf32>, vector<1x3xf32>, vector<1x3xf32>, vector<1x3xf32>, vector<1x3xf32>, vector<1x3xf32>, vector<1x3xf32> -> vector<1x48xf32>
    %644 = tpu.concatenate %642, %642, %642, %642, %642, %642, %642, %642, %642, %642, %642, %642 in 1 : vector<1x3xf32>, vector<1x3xf32>, vector<1x3xf32>, vector<1x3xf32>, vector<1x3xf32>, vector<1x3xf32>, vector<1x3xf32>, vector<1x3xf32>, vector<1x3xf32>, vector<1x3xf32>, vector<1x3xf32>, vector<1x3xf32> -> vector<1x36xf32>
    %645 = tpu.concatenate %643, %644 in 1 : vector<1x48xf32>, vector<1x36xf32> -> vector<1x84xf32>
    %646 = vector.broadcast %645 : vector<1x84xf32> to vector<56x84xf32>
    %647 = arith.addf %641, %646 : vector<56x84xf32>
    %648 = math.tanh %647 : vector<56x84xf32>
    %c0_151 = arith.constant 0 : index
    %c0_152 = arith.constant 0 : index
    %649 = vector.load %arg19[%c0_151, %c0_152] : memref<56x84xf32, #tpu.memory_space<vmem>>, vector<56x84xf32>
    tpu.vector_store %arg19[%c0_151, %c0_152], %648 {strides = array<i32>} : memref<56x84xf32, #tpu.memory_space<vmem>>, vector<56x84xf32>,
    return
  }
}

</mosaic_0001>

<bundles_post_ra>
// kernel: generator_forward.1
= control target key start
LH: loop header
LB: loop body
LE: loop exit
PB: predicated region body
PF: predicated region fallthrough
CT: control target
= control target key end

     0   :  { %s12538_s0 = inlined_call_operand.vmem [shape: f32[2,16], index: 0, kind: input, shape index: {}]   ;;  %s12539_s1 = inlined_call_operand.hbm [shape: bf16[4,16,256], index: 1, kind: input, shape index: {}]   ;;  %s12540_s2 = inlined_call_operand.hbm [shape: f32[4,4], index: 2, kind: input, shape index: {}]   ;;  %s12541_s3 = inlined_call_operand.hbm [shape: f32[2,64], index: 3, kind: input, shape index: {}]   ;;  %s12542_s4 = inlined_call_operand.vmem [shape: bf16[4,256,256], index: 4, kind: input, shape index: {}]   ;;  %s12543_s5 = inlined_call_operand.hbm [shape: f32[8,16], index: 5, kind: input, shape index: {}]   ;;  %s12544_s6 = inlined_call_operand.hbm [shape: f32[2,32], index: 6, kind: input, shape index: {}]   ;;  %s12545_s7 = inlined_call_operand.vmem [shape: bf16[4,256,256], index: 7, kind: input, shape index: {}]   ;;  %s12546_s8 = inlined_call_operand.hbm [shape: f32[16,32], index: 8, kind: input, shape index: {}]   ;;  %s12547_s9 = inlined_call_operand.hbm [shape: f32[2,16], index: 9, kind: input, shape index: {}]   ;;  %s12548_s10 = inlined_call_operand.hbm [shape: bf16[4,256,256], index: 10, kind: input, shape index: {}]   ;;  %s12549_s11 = inlined_call_operand.hbm [shape: f32[32,64], index: 11, kind: input, shape index: {}]   ;;  %s12550_s12 = inlined_call_operand.vmem [shape: f32[2,8], index: 12, kind: input, shape index: {}]   ;;  %s12551_s13 = inlined_call_operand.vmem [shape: bf16[3,256,224], index: 13, kind: input, shape index: {}]   ;;  %s12552_s14 = inlined_call_operand.hbm [shape: f32[28,96], index: 14, kind: input, shape index: {}]   ;;  %s12553_s15 = inlined_call_operand.vmem [shape: f32[2,8], index: 15, kind: input, shape index: {}]   ;;  %s12554_s16 = inlined_call_operand.vmem [shape: bf16[3,224,84], index: 16, kind: input, shape index: {}]   ;;  %s12555_s17 = inlined_call_operand.hbm [shape: f32[28,84], index: 17, kind: input, shape index: {}]   ;;  %s12556_s18 = inlined_call_operand.vmem [shape: f32[1,3], index: 18, kind: input, shape index: {}]   ;;  %s12557_s19 = inlined_call_operand.vmem [shape: f32[56,84], index: 19, kind: output, shape index: {}]  }
   0x1   :  { %12558 = sst [smem:[#allocation25_spill]] %s12538_s0 }
   0x2   :  { %12559 = sst [smem:[#allocation26_spill]] %s12539_s1 }
   0x3   :  { %12560 = sst [smem:[#allocation27_spill]] %s12540_s2 }
   0x4   :  { %12561 = sst [smem:[#allocation28_spill]] %s12541_s3 }
   0x5   :  { %24 = vsyncpa [#allocation3], 0 }
   0x6   :  { %25 = vsyncpa [#allocation5], 0 }
   0x7   :  { %26 = vsyncpa [#allocation8], 0 }
   0x8   :  { %27 = vsyncpa [#allocation11], 0 }
   0x9   :  { %28 = vsyncpa [#allocation14], 0 }
   0xa   :  { %29 = vsyncpa [#allocation17], 0  ;;  %s9754_s0 = smov [#allocation4]   ;;  %s9755_s20 = smov [#allocation7]  }
   0xb   :  { %s50_s30 = sshll.u32 %s9754_s0, 4  ;;  %s72_s21 = sshll.u32 %s9755_s20, 4  ;;  %s51_s30 = int_to_ptr.vmem [resolvable:$true] %s50_s30  ;;  %s73_s21 = int_to_ptr.vmem [resolvable:$true] %s72_s21 }
   0xc   :  { %s9530_s1 = scalar_lea.vmem %s51_s30, 64  ;;  %p9535_p1 = scmp.lt.s32.totalorder %s51_s30, %s51_s30 }
   0xd   :  { %p9531_p0 = scmp.ne.s32.totalorder %s51_s30, %s9530_s1  ;;  %p9536_p2 = scmp.lt.s32.totalorder %s9530_s1, %s9530_s1 }
   0xf   :  { %p9537_p3 = por %p9536_p2, %p9535_p1 }
  0x11   :  { %p9538_p4 = pnand %p9537_p3, %p9531_p0 }
  0x13   :  { %9541 = shalt.err (!%p9538_p4)
}
  0x14   :  { %s12562_s23 = sld [smem:[#allocation27_spill]]  ;;  %s9550_s24 = scalar_lea.vmem %s73_s21, 128 }
  0x15   :  { %p9551_p5 = scmp.ne.s32.totalorder %s73_s21, %s9550_s24  ;;  %p9555_p6 = scmp.lt.s32.totalorder %s73_s21, %s73_s21 }
  0x16   :  { %p9556_p7 = scmp.lt.s32.totalorder %s9550_s24, %s9550_s24 }
  0x18   :  { %p9557_p8 = por %p9556_p7, %p9555_p6 }
  0x1a   :  { %53 = dma.hbm_to_vmem [thread:$0]  %s12562_s23, 64, %s51_s30, [#allocation5]  }
  0x1b   :  { %p9558_p9 = pnand %p9557_p8, %p9551_p5 }
  0x1d   :  { %9561 = shalt.err (!%p9558_p9)
}
  0x1e   :  { %75 = dma.hbm_to_vmem [thread:$0]  %s12543_s5, 128, %s73_s21, [#allocation8]  }
  0x1f   :  { %s9756_s26 = smov [#allocation10]   ;;  %s9757_s28 = smov [#allocation13]  }
  0x20   :  { %s93_s27 = sshll.u32 %s9756_s26, 4  ;;  %s115_s29 = sshll.u32 %s9757_s28, 4  ;;  %s94_s27 = int_to_ptr.vmem [resolvable:$true] %s93_s27  ;;  %s116_s29 = int_to_ptr.vmem [resolvable:$true] %s115_s29 }
  0x21   :  { %s9570_s0 = scalar_lea.vmem %s94_s27, 256  ;;  %p9575_p11 = scmp.lt.s32.totalorder %s94_s27, %s94_s27 }
  0x22   :  { %p9571_p10 = scmp.ne.s32.totalorder %s94_s27, %s9570_s0  ;;  %p9576_p12 = scmp.lt.s32.totalorder %s9570_s0, %s9570_s0 }
  0x24   :  { %p9577_p13 = por %p9576_p12, %p9575_p11 }
  0x26   :  { %p9578_p0 = pnand %p9577_p13, %p9571_p10 }
  0x28   :  { %9581 = shalt.err (!%p9578_p0)
}
  0x29   :  { %s9758_s30 = smov 128   ;;  %s9759_s20 = smov 8  }
  0x2a   :  { %99 = dma.hbm_to_vmem [thread:$0]  %s12546_s8, 256, %s94_s27, [#allocation11], %s9758_s30, %s9758_s30, %s9759_s20  }
  0x2b   :  { %s9590_s21 = scalar_lea.vmem %s116_s29, 16384  ;;  %p9595_p2 = scmp.lt.s32.totalorder %s116_s29, %s116_s29 }
  0x2c   :  { %p9591_p1 = scmp.ne.s32.totalorder %s116_s29, %s9590_s21  ;;  %p9596_p3 = scmp.lt.s32.totalorder %s9590_s21, %s9590_s21 }
  0x2e   :  { %p9597_p4 = por %p9596_p3, %p9595_p2 }
  0x30   :  { %p9598_p5 = pnand %p9597_p4, %p9591_p1 }
  0x32   :  { %9601 = shalt.err (!%p9598_p5)
}
  0x33   :  { %121 = dma.hbm_to_vmem [thread:$0]  %s12548_s10, 16384, %s116_s29, [#allocation14], %s9758_s30, %s9758_s30, %s9759_s20  }
  0x34   :  { %s9760_s23 = smov [#allocation16]   ;;  %s9761_s25 = smov [#allocation2]  }
  0x35   :  { %s143_s24 = sshll.u32 %s9760_s23, 4  ;;  %s37_s3 = sshll.u32 %s9761_s25, 4  ;;  %s144_s24 = int_to_ptr.vmem [resolvable:$true] %s143_s24  ;;  %s38_s3 = int_to_ptr.vmem [resolvable:$true] %s37_s3 }
  0x36   :  { %s9610_s8 = scalar_lea.vmem %s144_s24, 512  ;;  %p9615_p7 = scmp.lt.s32.totalorder %s144_s24, %s144_s24 }
  0x37   :  { %p9611_p6 = scmp.ne.s32.totalorder %s144_s24, %s9610_s8  ;;  %p9616_p8 = scmp.lt.s32.totalorder %s9610_s8, %s9610_s8 }
  0x39   :  { %p9617_p9 = por %p9616_p8, %p9615_p7 }
  0x3b   :  { %p9618_p10 = pnand %p9617_p9, %p9611_p6 }
  0x3d   :  { %9621 = shalt.err (!%p9618_p10)
}
  0x3e   :  { %149 = dma.hbm_to_vmem [thread:$0]  %s12552_s14, 512, %s144_s24, [#allocation17], %s9758_s30, %s9758_s30, %s9759_s20  }
  0x3f   :  { %s9630_s10 = scalar_lea.vmem %s38_s3, 1024  ;;  %p9635_p12 = scmp.lt.s32.totalorder %s38_s3, %s38_s3 }
  0x40   :  { %p9631_p11 = scmp.ne.s32.totalorder %s38_s3, %s9630_s10  ;;  %p9636_p13 = scmp.lt.s32.totalorder %s9630_s10, %s9630_s10 }
  0x42   :  { %p9637_p0 = por %p9636_p13, %p9635_p12 }
  0x44   :  { %p9638_p1 = pnand %p9637_p0, %p9631_p11 }
  0x46   :  { %9641 = shalt.err (!%p9638_p1)
}
  0x47   :  { %s12563_s0 = sld [smem:[#allocation26_spill]]  ;;  %s9762_s1 = smov [#allocation6]  }
  0x48   :  { %s60_s5 = sshll.u32 %s9762_s1, 4  ;;  %s9763_s21 = smov [#allocation9]   ;;  %s61_s5 = int_to_ptr.vmem [resolvable:$true] %s60_s5 }
  0x49   :  { %s82_s22 = sshll.u32 %s9763_s21, 4  ;;  %s9650_s14 = scalar_lea.vmem %s61_s5, 32  ;;  %s83_s22 = int_to_ptr.vmem [resolvable:$true] %s82_s22 }
  0x4a   :  { %p9651_p2 = scmp.ne.s32.totalorder %s61_s5, %s9650_s14  ;;  %p9655_p3 = scmp.lt.s32.totalorder %s61_s5, %s61_s5 }
  0x4b   :  { %p9656_p4 = scmp.lt.s32.totalorder %s9650_s14, %s9650_s14 }
  0x4d   :  { %43 = dma.hbm_to_vmem [thread:$0]  %s12563_s0, 1024, %s38_s3, [#allocation3], %s9758_s30, %s9758_s30, %s9759_s20  }
  0x4e   :  { %p9657_p5 = por %p9656_p4, %p9655_p3 }
  0x50   :  { %p9658_p6 = pnand %p9657_p5, %p9651_p2 }
  0x52   :  { %9661 = shalt.err (!%p9658_p6)
}
  0x53   :  { %s12564_s24 = sld [smem:[#allocation28_spill]]  ;;  %s9670_s25 = scalar_lea.vmem %s83_s22, 32 }
  0x54   :  { %p9671_p7 = scmp.ne.s32.totalorder %s83_s22, %s9670_s25  ;;  %p9675_p8 = scmp.lt.s32.totalorder %s83_s22, %s83_s22 }
  0x55   :  { %p9676_p9 = scmp.lt.s32.totalorder %s9670_s25, %s9670_s25 }
  0x57   :  { %p9677_p10 = por %p9676_p9, %p9675_p8 }
  0x59   :  { %63 = dma.hbm_to_vmem [thread:$0]  %s12564_s24, 32, %s61_s5, [#allocation5]  }
  0x5a   :  { %p9678_p11 = pnand %p9677_p10, %p9671_p7 }
  0x5c   :  { %9681 = shalt.err (!%p9678_p11)
}
  0x5d   :  { %85 = dma.hbm_to_vmem [thread:$0]  %s12544_s6, 32, %s83_s22, [#allocation8]  }
  0x5e   :  { %s9764_s26 = smov [#allocation12]   ;;  %s9765_s10 = smov [#allocation15]  }
  0x5f   :  { %s106_s27 = sshll.u32 %s9764_s26, 4  ;;  %s127_s28 = sshll.u32 %s9765_s10, 4  ;;  %s107_s27 = int_to_ptr.vmem [resolvable:$true] %s106_s27  ;;  %s128_s28 = int_to_ptr.vmem [resolvable:$true] %s127_s28 }
  0x60   :  { %s9690_s29 = scalar_lea.vmem %s107_s27, 32  ;;  %p9695_p13 = scmp.lt.s32.totalorder %s107_s27, %s107_s27 }
  0x61   :  { %p9691_p12 = scmp.ne.s32.totalorder %s107_s27, %s9690_s29  ;;  %p9696_p0 = scmp.lt.s32.totalorder %s9690_s29, %s9690_s29 }
  0x63   :  { %p9697_p1 = por %p9696_p0, %p9695_p13 }
  0x65   :  { %p9698_p2 = pnand %p9697_p1, %p9691_p12 }
  0x67   :  { %9701 = shalt.err (!%p9698_p2)
}
  0x68   :  { %109 = dma.hbm_to_vmem [thread:$0]  %s12547_s9, 32, %s107_s27, [#allocation11]  }
  0x69   :  { %s9710_s5 = scalar_lea.vmem %s128_s28, 512  ;;  %p9715_p4 = scmp.lt.s32.totalorder %s128_s28, %s128_s28 }
  0x6a   :  { %p9711_p3 = scmp.ne.s32.totalorder %s128_s28, %s9710_s5  ;;  %p9716_p5 = scmp.lt.s32.totalorder %s9710_s5, %s9710_s5 }
  0x6c   :  { %p9717_p6 = por %p9716_p5, %p9715_p4 }
  0x6e   :  { %p9718_p7 = pnand %p9717_p6, %p9711_p3 }
  0x70   :  { %9721 = shalt.err (!%p9718_p7)
}
  0x71   :  { %133 = dma.hbm_to_vmem [thread:$0]  %s12549_s11, 512, %s128_s28, [#allocation14], %s9758_s30, %s9758_s30, %s9759_s20  }
  0x72   :  { %s9766_s22 = smov [#allocation18]  }
  0x73   :  { %s159_s14 = sshll.u32 %s9766_s22, 4  ;;  %s160_s14 = int_to_ptr.vmem [resolvable:$true] %s159_s14 }
  0x74   :  { %s9730_s2 = scalar_lea.vmem %s160_s14, 512  ;;  %p9735_p9 = scmp.lt.s32.totalorder %s160_s14, %s160_s14 }
  0x75   :  { %p9731_p8 = scmp.ne.s32.totalorder %s160_s14, %s9730_s2  ;;  %p9736_p10 = scmp.lt.s32.totalorder %s9730_s2, %s9730_s2 }
  0x77   :  { %p9737_p11 = por %p9736_p10, %p9735_p9 }
  0x79   :  { %p9738_p12 = pnand %p9737_p11, %p9731_p8 }
  0x7b   :  { %9741 = shalt.err (!%p9738_p12)
}
  0x7c   :  { %165 = dma.hbm_to_vmem [thread:$0]  %s12555_s17, 512, %s160_s14, [#allocation17], %s9758_s30, %s9758_s30, %s9759_s20  }
  0x7d   :  { %9742 = dma.done.wait [#allocation3], 1024  }
  0x7e   :  { %9743 = vsyncadd [#allocation3], 4294966272 }
  0x7f   :  { %9744 = dma.done.wait [#allocation5], 96  }
  0x80   :  { %9745 = vsyncadd [#allocation5], 4294967200 }
  0x81   :  { %9746 = dma.done.wait [#allocation8], 160  }
  0x82   :  { %9747 = vsyncadd [#allocation8], 4294967136 }
  0x83   :  { %9748 = dma.done.wait [#allocation11], 288  }
  0x84   :  { %9749 = vsyncadd [#allocation11], 4294967008 }
  0x85   :  { %9750 = dma.done.wait [#allocation14], 16896  }
  0x86   :  { %9751 = vsyncadd [#allocation14], 4294950400 }
  0x87   :  { %9752 = dma.done.wait [#allocation17], 1024  }
  0x88   :  { %9753 = vsyncadd [#allocation17], 4294966272  ;;  %v9767_v0 = vmov 0   ;;  %v8724_v1 = vld [vmem:[#allocation2 + $0x4] ss:$8 sps:$4 sm:$0xff]   ;;  %s12565_s30 = sld [smem:[#allocation25_spill]] }
  0x89   :  { %252 = vmatprep.mubr.bf16.mxu0 %v9767_v0  ;;  %414 = vmatprep.mubr.bf16.mxu1 %v9767_v0  ;;  %v8726_v2 = vld [vmem:[#allocation2] ss:$8 sps:$4 sm:$0xff]   ;;  %v8727_v5 = vld [vmem:[#allocation2 + $0x10] ss:$8 sps:$4 sm:$0xff]   ;;  %v8729_v6 = vld [vmem:[#allocation2 + $0x14] ss:$8 sps:$4 sm:$0xff]  }
  0x8a   :  { %234 = vmatprep.subr.bf16.mxu0 %v8724_v1  ;;  %vm216_vm0 = vcmask 130048   ;;  %v8730_v7 = vld [vmem:[#allocation2 + $0x34] ss:$8 sps:$4 sm:$0xff]   ;;  %v8732_v8 = vld [vmem:[#allocation2 + $0x30] ss:$8 sps:$4 sm:$0xff]   ;;  %v9768_v11 = vmov 0.0  }
  0x8b   :  { %235 = vmatpush1.bf16.msra.mxu0 %v8726_v2  ;;  %396 = vmatprep.subr.bf16.mxu1 %v8730_v7  ;;  %v8735_v9 = vld [vmem:[#allocation2 + $0x24] ss:$8 sps:$4 sm:$0xff]   ;;  %v8733_v10 = vld [vmem:[#allocation2 + $0x20] ss:$8 sps:$4 sm:$0xff]   ;;  %vm442_vm1 = vcmask 1040384   ;;  %vm445_vm2 = vcmask 1041408  }
  0x8c   :  { %288 = vmatprep.subr.bf16.mxu0 %v8729_v6  ;;  %397 = vmatpush1.bf16.msra.mxu1 %v8732_v8  ;;  %vm448_vm3 = vcmask 1042432   ;;  %vm455_vm4 = vcmask 1043456   ;;  %v423_v50 = vld [vmem:[#allocation4] sm:$0xf]  ;;  %vm451_vm5 = vcmask 31744   ;;  %s9769_s24 = smov 64  }
  0x8d   :  { %vm668_vm6 = vcmask 523264   ;;  %s9771_s27 = smov 32   ;;  %vm1898_vm7 = vcmask 261120   ;;  %vm1901_vm8 = vcmask 785408   ;;  %s9773_s25 = smov 80   ;;  %vm3217_vm9 = vcmask 392192  }
  0x8e   :  { %v202_v3 = vld [vmem:[%s12565_s30] sm:$0x3]  ;;  %s9774_s3 = smov 48   ;;  %s9775_s8 = smov 16   ;;  %vm3220_vm10 = vcmask 654336   ;;  %vm3223_vm11 = vcmask 916480  }
  0x8f   :  { %v203_v4 = vpack.c.bf16 %v202_v3, %v202_v3  ;;  %s9776_s26 = smov 120   ;;  %s9777_s10 = smov 104   ;;  %vm4795_vm12 = vcmask 64512   ;;  %vm4798_vm13 = vcmask 195584   ;;  %vm4801_vm14 = vcmask 326656  }
  0x90   :  { %s9778_s28 = smov 88   ;;  %s9779_s29 = smov 72   ;;  %vm4804_vm15 = vcmask 457728  }
  0x91   :  { %7701 = vmatmul.mubr.msk.bf16.vlgmr.msra.gmra.mxu0 %vm216_vm0, %v203_v4  ;;  %7710 = vmatmul.mubr.msk.bf16.vlgmr.msra.gmra.mxu1 %vm216_vm0, %v203_v4  ;;  %s9780_s0 = smov 56   ;;  %s9781_s1 = smov 40  }
  0x92   :  { %289 = vmatpush1.bf16.msra.mxu0 %v8727_v5  ;;  %306 = vmatprep.mubr.bf16.mxu0 %v9767_v0  ;;  %s9782_s5 = smov 24   ;;  %s9786_s11 = smov 12  }
  0x93   :  { %342 = vmatprep.subr.bf16.mxu0 %v8735_v9  ;;  %623 = vmatprep.mubr.f32.mxu1 %v9768_v11  ;;  %s9788_s17 = smov 18   ;;  %s9789_s30 = smov 21  }
  0x94   :  { %s9790_s6 = smov 27   ;;  %s9795_s21 = smov 42  }
  0x99   :  { %7704 = vmatmul.mubr.msk.bf16.vlgmr.msra.gmra.mxu0 %vm216_vm0, %v203_v4 }
  0x9a   :  { %343 = vmatpush1.bf16.msra.mxu0 %v8733_v10  ;;  %360 = vmatprep.mubr.bf16.mxu0 %v9767_v0 }
  0xa1   :  { %7707 = vmatmul.mubr.msk.bf16.vlgmr.msra.gmra.mxu0 %vm216_vm0, %v203_v4 }
  0xa2   :  { %526 = vmatprep.mubr.f32.mxu0 %v9768_v11 }
 0x151   :  { %v254_v12 = vpop.f32.mrf.mxu0  ;;  %v416_v14 = vpop.f32.mrf.mxu1 }
 0x152   :  { %v535_v27 = vrot.slane %v254_v12, 1  ;;  %v438_v31 = vrot.slane %v416_v14, 5  ;;  %v543_v32 = vrot.slane %v416_v14, 6 }
 0x153   :  { %v256_v13 = vpop.f32.mrf.mxu0  ;;  %v418_v16 = vpop.f32.mrf.mxu1 }
 0x154   :  { %v536_v28 = vrot.slane %v256_v13, 1  ;;  %v439_v33 = vrot.slane %v418_v16, 5  ;;  %v544_v34 = vrot.slane %v418_v16, 6 }
 0x155   :  { %v258_v15 = vpop.f32.mrf.mxu0  ;;  %v420_v18 = vpop.f32.mrf.mxu1 }
 0x157   :  { %v259_v17 = vpop.f32.mrf.mxu0  ;;  %v421_v20 = vpop.f32.mrf.mxu1 }
 0x158   :  { %v670_v17 = vlaneseq }
 0x159   :  { %v308_v19 = vpop.f32.mrf.mxu0 }
 0x15a   :  { %v426_v24 = vrot.slane %v308_v19, 7  ;;  %v547_v37 = vsel %vm442_vm1, %v535_v27, %v308_v19  ;;  %v9982_v18 = vshrl.u32 %v670_v17, 7  ;;  %v8793_v17 = vld [vmem:[%s12542_s4 + $0x1e0] ss:$8 sps:$4 sm:$0xff]  }
 0x15b   :  { %v310_v21 = vpop.f32.mrf.mxu0 }
 0x15c   :  { %v427_v25 = vrot.slane %v310_v21, 7  ;;  %v443_v36 = vsel %vm442_vm1, %v254_v12, %v426_v24  ;;  %v548_v41 = vsel %vm442_vm1, %v536_v28, %v310_v21  ;;  %v9985_v19 = vsub.s32 0, %v9982_v18 }
 0x15d   :  { %v312_v22 = vpop.f32.mrf.mxu0 }
 0x15e   :  { %v444_v40 = vsel %vm442_vm1, %v256_v13, %v427_v25  ;;  %vm4807_vm1 = vcmask 588800  }
 0x15f   :  { %v313_v23 = vpop.f32.mrf.mxu0 }
 0x161   :  { %v362_v26 = vpop.f32.mrf.mxu0 }
 0x162   :  { %v432_v29 = vrot.slane %v362_v26, 6  ;;  %v539_v30 = vrot.slane %v362_v26, 7 }
 0x163   :  { %v364_v35 = vpop.f32.mrf.mxu0 }
 0x164   :  { %v433_v38 = vrot.slane %v364_v35, 6  ;;  %v540_v39 = vrot.slane %v364_v35, 7  ;;  %v446_v42 = vsel %vm445_vm2, %v443_v36, %v432_v29  ;;  %v549_v43 = vsel %vm445_vm2, %v547_v37, %v539_v30 }
 0x165   :  { %v366_v44 = vpop.f32.mrf.mxu0  ;;  %v449_v51 = vsel %vm448_vm3, %v446_v42, %v438_v31  ;;  %v551_v52 = vsel %vm448_vm3, %v549_v43, %v543_v32  ;;  %v8739_v42 = vld [vmem:[%s12542_s4 + $0x170] ss:$8 sps:$4 sm:$0xff]   ;;  %v8741_v43 = vld [vmem:[%s12542_s4 + $0x174] ss:$8 sps:$4 sm:$0xff]  }
 0x166   :  { %v447_v45 = vsel %vm445_vm2, %v444_v40, %v433_v38  ;;  %v550_v46 = vsel %vm445_vm2, %v548_v41, %v540_v39  ;;  %v10005_v39 = vld [vmem:[#allocation6] sm:$0x3]  ;;  %v8736_v40 = vld [vmem:[%s12542_s4 + $0x70] ss:$8 sps:$4 sm:$0xff]   ;;  %v8738_v41 = vld [vmem:[%s12542_s4 + $0x74] ss:$8 sps:$4 sm:$0xff]  }
 0x167   :  { %v367_v47 = vpop.f32.mrf.mxu0  ;;  %v450_v48 = vsel %vm448_vm3, %v447_v45, %v439_v33  ;;  %v552_v49 = vsel %vm448_vm3, %v550_v46, %v544_v34  ;;  %v8744_v44 = vld [vmem:[%s12542_s4 + $0x64] ss:$8 sps:$4 sm:$0xff]   ;;  %v8742_v46 = vld [vmem:[%s12542_s4 + $0x60] ss:$8 sps:$4 sm:$0xff]   ;;  %vm4810_vm2 = vcmask 719872   ;;  %vm4813_vm3 = vcmask 850944  }
 0x168   :  { %7711 = vmatprep.subr.msk.mxu0 %vm455_vm4, %v450_v48  ;;  %7714 = vmatprep.subr.msk.mxu1 %vm455_vm4, %v552_v49  ;;  %v8747_v45 = vld [vmem:[%s12542_s4 + $0x164] ss:$8 sps:$4 sm:$0xff]   ;;  %v8745_v47 = vld [vmem:[%s12542_s4 + $0x160] ss:$8 sps:$4 sm:$0xff]   ;;  %v8750_v48 = vld [vmem:[%s12542_s4 + $0x54] ss:$8 sps:$4 sm:$0xff]  }
 0x169   :  { %7712 = vmatpush1.msk.msra.mxu0 %vm455_vm4, %v449_v51  ;;  %7715 = vmatpush1.msk.msra.mxu1 %vm455_vm4, %v551_v52  ;;  %v8753_v49 = vld [vmem:[%s12542_s4 + $0x154] ss:$8 sps:$4 sm:$0xff]   ;;  %v8751_v51 = vld [vmem:[%s12542_s4 + $0x150] ss:$8 sps:$4 sm:$0xff]   ;;  %v8756_v52 = vld [vmem:[%s12542_s4 + $0x44] ss:$8 sps:$4 sm:$0xff]  }
 0x16a   :  { %7713 = vmatmul.mubr.msk.f32.vlgmr.msra.gmra.mxu0 %vm451_vm5, %v423_v50  ;;  %7716 = vmatmul.mubr.msk.f32.vlgmr.msra.gmra.mxu1 %vm451_vm5, %v423_v50  ;;  %v8748_v50 = vld [vmem:[%s12542_s4 + $0x50] ss:$8 sps:$4 sm:$0xff]   ;;  %vm4816_vm5 = vcmask 982016  }
 0x16b   :  { %923 = vmatprep.subr.bf16.mxu0 %v8738_v41  ;;  %1157 = vmatprep.subr.bf16.mxu1 %v8741_v43 }
 0x16c   :  { %924 = vmatpush1.bf16.msra.mxu0 %v8736_v40  ;;  %1158 = vmatpush1.bf16.msra.mxu1 %v8739_v42  ;;  %v8817_v40 = vld [vmem:[%s12542_s4 + $0x1a0] ss:$8 sps:$4 sm:$0xff]  }
 0x16d   :  { %925 = vmatprep.subr.bf16.mxu0 %v8744_v44  ;;  %1159 = vmatprep.subr.bf16.mxu1 %v8747_v45 }
 0x170   :  { %926 = vmatpush1.bf16.msra.mxu0 %v8742_v46  ;;  %1160 = vmatpush1.bf16.msra.mxu1 %v8745_v47 }
 0x171   :  { %927 = vmatprep.subr.bf16.mxu0 %v8750_v48  ;;  %1161 = vmatprep.subr.bf16.mxu1 %v8753_v49  ;;  %v8822_v48 = vld [vmem:[%s12542_s4 + $0x94] ss:$8 sps:$4 sm:$0xff]  }
 0x172   :  { %v8825_v49 = vld [vmem:[%s12542_s4 + $0x194] ss:$8 sps:$4 sm:$0xff]  }
 0x174   :  { %928 = vmatpush1.bf16.msra.mxu0 %v8748_v50  ;;  %1162 = vmatpush1.bf16.msra.mxu1 %v8751_v51  ;;  %v8820_v50 = vld [vmem:[%s12542_s4 + $0x90] ss:$8 sps:$4 sm:$0xff]   ;;  %v8831_v51 = vld [vmem:[%s12542_s4 + $0x184] ss:$8 sps:$4 sm:$0xff]  }
 0x175   :  { %929 = vmatprep.subr.bf16.mxu0 %v8756_v52  ;;  %v8826_v52 = vld [vmem:[%s12542_s4 + $0x80] ss:$8 sps:$4 sm:$0xff]  }
 0x22a   :  { %v528_v53 = vpop.f32.mrf.mxu0  ;;  %v625_v54 = vpop.f32.mrf.mxu1 }
 0x22b   :  { %v632_v55 = vrot.slane %v625_v54, 4  ;;  %v8754_v54 = vld [vmem:[%s12542_s4 + $0x40] ss:$8 sps:$4 sm:$0xff]  }
 0x22c   :  { %v627_v56 = vpop.f32.mrf.mxu1  ;;  %v530_v60 = vpop.f32.mrf.mxu0  ;;  %930 = vmatpush1.bf16.msra.mxu0 %v8754_v54  ;;  %v8834_v54 = vld [vmem:[%s12542_s4 + $0x274] ss:$8 sps:$4 sm:$0xff]  }
 0x22d   :  { %v636_v57 = vsel %vm455_vm4, %v528_v53, %v632_v55  ;;  %v633_v58 = vrot.slane %v627_v56, 4  ;;  %v8759_v53 = vld [vmem:[%s12542_s4 + $0x144] ss:$8 sps:$4 sm:$0xff]   ;;  %v8757_v55 = vld [vmem:[%s12542_s4 + $0x140] ss:$8 sps:$4 sm:$0xff]  }
 0x22e   :  { %v639_v59 = vrot.slane %v636_v57, 4  ;;  %v8762_v56 = vld [vmem:[%s12542_s4 + $0x34] ss:$8 sps:$4 sm:$0xff]   ;;  %1163 = vmatprep.subr.bf16.mxu1 %v8759_v53  ;;  %v8829_v53 = vld [vmem:[%s12542_s4 + $0x180] ss:$8 sps:$4 sm:$0xff]  }
 0x22f   :  { %v637_v61 = vsel %vm455_vm4, %v530_v60, %v633_v58  ;;  %v8760_v58 = vld [vmem:[%s12542_s4 + $0x30] ss:$8 sps:$4 sm:$0xff]   ;;  %1164 = vmatpush1.bf16.msra.mxu1 %v8757_v55  ;;  %931 = vmatprep.subr.bf16.mxu0 %v8762_v56  ;;  %v8768_v60 = vld [vmem:[%s12542_s4 + $0x24] ss:$8 sps:$4 sm:$0xff]   ;;  %v8837_v55 = vld [vmem:[%s12542_s4 + $0x374] ss:$8 sps:$4 sm:$0xff]  }
 0x230   :  { %v645_v62 = vrot.slane %v637_v61, 4  ;;  %v640_v63 = vadd.f32 %v639_v59, %v636_v57  ;;  %v8763_v59 = vld [vmem:[%s12542_s4 + $0x130] ss:$8 sps:$4 sm:$0xff]   ;;  %932 = vmatpush1.bf16.msra.mxu0 %v8760_v58 }
 0x231   :  { %933 = vmatprep.subr.bf16.mxu0 %v8768_v60 }
 0x232   :  { %v646_v1 = vadd.f32 %v645_v62, %v637_v61  ;;  %v641_v2 = vrot.slane %v640_v63, 2  ;;  %v8766_v62 = vld [vmem:[%s12542_s4 + $0x20] ss:$8 sps:$4 sm:$0xff]  }
 0x234   :  { %v642_v3 = vadd.f32 %v641_v2, %v640_v63  ;;  %v647_v4 = vrot.slane %v646_v1, 2  ;;  %v8769_v63 = vld [vmem:[%s12542_s4 + $0x120] ss:$8 sps:$4 sm:$0xff]   ;;  %v8777_v2 = vld [vmem:[%s12542_s4 + $0x114] ss:$8 sps:$4 sm:$0xff]   ;;  %934 = vmatpush1.bf16.msra.mxu0 %v8766_v62 }
 0x236   :  { %v643_v5 = vrot.slane %v642_v3, 1  ;;  %v648_v6 = vadd.f32 %v647_v4, %v646_v1  ;;  %v8774_v1 = vld [vmem:[%s12542_s4 + $0x14] ss:$8 sps:$4 sm:$0xff]   ;;  %v8775_v4 = vld [vmem:[%s12542_s4 + $0x110] ss:$8 sps:$4 sm:$0xff]  }
 0x237   :  { %935 = vmatprep.subr.bf16.mxu0 %v8774_v1 }
 0x238   :  { %v644_v7 = vadd.f32 %v643_v5, %v642_v3  ;;  %v649_v8 = vrot.slane %v648_v6, 1  ;;  %v8772_v3 = vld [vmem:[%s12542_s4 + $0x10] ss:$8 sps:$4 sm:$0xff]   ;;  %v8780_v5 = vld [vmem:[%s12542_s4 + $0x4] ss:$8 sps:$4 sm:$0xff]  }
 0x239   :  { %936 = vmatpush1.bf16.msra.mxu0 %v8772_v3 }
 0x23a   :  { %652 = vrot.lane.b32.xlu0 %v644_v7, %s9769_s24  ;;  %v650_v9 = vadd.f32 %v649_v8, %v648_v6  ;;  %v8783_v6 = vld [vmem:[%s12542_s4 + $0x104] ss:$8 sps:$4 sm:$0xff]   ;;  %937 = vmatprep.subr.bf16.mxu0 %v8780_v5  ;;  %v8781_v8 = vld [vmem:[%s12542_s4 + $0x100] ss:$8 sps:$4 sm:$0xff]  }
 0x23e   :  { %658 = vrot.lane.b32.xlu0 %v650_v9, %s9769_s24 }
 0x2ac   :  { %v653_v10 = vpop.permute.xlu0 %652 }
 0x2ad   :  { %v655_v12 = vadd.f32 %v653_v10, %v644_v7  ;;  %v8778_v7 = vld [vmem:[%s12542_s4] ss:$8 sps:$4 sm:$0xff]   ;;  %v8789_v10 = vld [vmem:[%s12542_s4 + $0x1f4] ss:$8 sps:$4 sm:$0xff]  }
 0x2ae   :  { %938 = vmatpush1.bf16.msra.mxu0 %v8778_v7 }
 0x2af   :  { %v656_v13 = vadd.f32 %v655_v12, %v650_v9  ;;  %v8786_v9 = vld [vmem:[%s12542_s4 + $0xf4] ss:$8 sps:$4 sm:$0xff]   ;;  %v8784_v12 = vld [vmem:[%s12542_s4 + $0xf0] ss:$8 sps:$4 sm:$0xff]  }
 0x2b0   :  { %v659_v14 = vpop.permute.xlu0 %658  ;;  %939 = vmatprep.subr.bf16.mxu0 %v8786_v9  ;;  %v8835_v9 = vld [vmem:[%s12542_s4 + $0x370] ss:$8 sps:$4 sm:$0xff]  }
 0x2b1   :  { %v661_v15 = vadd.f32 %v659_v14, %v656_v13  ;;  %v8787_v13 = vld [vmem:[%s12542_s4 + $0x1f0] ss:$8 sps:$4 sm:$0xff]   ;;  %v8792_v14 = vld [vmem:[%s12542_s4 + $0xe4] ss:$8 sps:$4 sm:$0xff]  }
 0x2b2   :  { %940 = vmatpush2.bf16.msra.mxu0 %v8784_v12  ;;  %v8841_v12 = vld [vmem:[%s12542_s4 + $0x360] ss:$8 sps:$4 sm:$0xff]  }
 0x2b3   :  { %v663_v16 = vmul.f32 0.03125, %v661_v15  ;;  %v8795_v15 = vld [vmem:[%s12542_s4 + $0x1e4] ss:$8 sps:$4 sm:$0xff]   ;;  %941 = vmatprep.subr.bf16.mxu0 %v8792_v14  ;;  %v8849_v14 = vld [vmem:[%s12542_s4 + $0x354] ss:$8 sps:$4 sm:$0xff]  }
 0x2b5   :  { %665 = vrot.lane.b32.xlu1 %v663_v16, %s9769_s24 }
 0x327   :  { %v666_v20 = vpop.permute.xlu1 %665 }
 0x328   :  { %v669_v21 = vsel %vm668_vm6, %v663_v16, %v666_v20  ;;  %v8790_v16 = vld [vmem:[%s12542_s4 + $0xe0] ss:$8 sps:$4 sm:$0xff]   ;;  %v8798_v20 = vld [vmem:[%s12542_s4 + $0xd4] ss:$8 sps:$4 sm:$0xff]  }
 0x329   :  { %v673_v22 = vrot.slane %v669_v21, %v9985_v19  ;;  %v8801_v21 = vld [vmem:[%s12542_s4 + $0x1d4] ss:$8 sps:$4 sm:$0xff]   ;;  %942 = vmatpush2.bf16.msra.mxu0 %v8790_v16  ;;  %v8847_v16 = vld [vmem:[%s12542_s4 + $0x350] ss:$8 sps:$4 sm:$0xff]  }
 0x32a   :  { %943 = vmatprep.subr.bf16.mxu0 %v8798_v20  ;;  %v8855_v20 = vld [vmem:[%s12542_s4 + $0x344] ss:$8 sps:$4 sm:$0xff]  }
 0x32b   :  { %v9989_v23 = vsub.f32 %v636_v57, %v673_v22  ;;  %v9991_v24 = vsub.f32 %v637_v61, %v673_v22  ;;  %v8765_v57 = vld [vmem:[%s12542_s4 + $0x134] ss:$8 sps:$4 sm:$0xff]   ;;  %v8771_v61 = vld [vmem:[%s12542_s4 + $0x124] ss:$8 sps:$4 sm:$0xff]   ;;  %v8796_v22 = vld [vmem:[%s12542_s4 + $0xd0] ss:$8 sps:$4 sm:$0xff]  }
 0x32c   :  { %1165 = vmatprep.subr.bf16.mxu1 %v8765_v57 }
 0x32d   :  { %v676_v25 = vmul.f32 %v9989_v23, %v9989_v23  ;;  %v677_v26 = vmul.f32 %v9991_v24, %v9991_v24  ;;  %1166 = vmatpush1.bf16.msra.mxu1 %v8763_v59  ;;  %944 = vmatpush2.bf16.msra.mxu0 %v8796_v22  ;;  %v10212_v59 = vsub.s32 1, %v9982_v18  ;;  %v8853_v22 = vld [vmem:[%s12542_s4 + $0x340] ss:$8 sps:$4 sm:$0xff]  }
 0x32e   :  { %1167 = vmatprep.subr.bf16.mxu1 %v8771_v61 }
 0x32f   :  { %v678_v27 = vrot.slane %v676_v25, 4  ;;  %v684_v28 = vrot.slane %v677_v26, 4 }
 0x331   :  { %v685_v29 = vadd.f32 %v684_v28, %v677_v26  ;;  %v679_v30 = vadd.f32 %v678_v27, %v676_v25  ;;  %1168 = vmatpush1.bf16.msra.mxu1 %v8769_v63  ;;  %v8799_v25 = vld [vmem:[%s12542_s4 + $0x1d0] ss:$8 sps:$4 sm:$0xff]   ;;  %v8804_v26 = vld [vmem:[%s12542_s4 + $0xc4] ss:$8 sps:$4 sm:$0xff]   ;;  %v8802_v28 = vld [vmem:[%s12542_s4 + $0xc0] ss:$8 sps:$4 sm:$0xff]  }
 0x332   :  { %1169 = vmatprep.subr.bf16.mxu1 %v8777_v2  ;;  %v8807_v27 = vld [vmem:[%s12542_s4 + $0x1c4] ss:$8 sps:$4 sm:$0xff]   ;;  %945 = vmatprep.subr.bf16.mxu0 %v8804_v26  ;;  %v8861_v26 = vld [vmem:[%s12542_s4 + $0x334] ss:$8 sps:$4 sm:$0xff]  }
 0x333   :  { %v686_v31 = vrot.slane %v685_v29, 2  ;;  %v680_v32 = vrot.slane %v679_v30, 2  ;;  %946 = vmatpush2.bf16.msra.mxu0 %v8802_v28  ;;  %v8859_v28 = vld [vmem:[%s12542_s4 + $0x330] ss:$8 sps:$4 sm:$0xff]  }
 0x335   :  { %v687_v33 = vadd.f32 %v686_v31, %v685_v29  ;;  %v681_v34 = vadd.f32 %v680_v32, %v679_v30  ;;  %1170 = vmatpush1.bf16.msra.mxu1 %v8775_v4  ;;  %v8805_v29 = vld [vmem:[%s12542_s4 + $0x1c0] ss:$8 sps:$4 sm:$0xff]   ;;  %v8810_v30 = vld [vmem:[%s12542_s4 + $0xb4] ss:$8 sps:$4 sm:$0xff]   ;;  %v8808_v32 = vld [vmem:[%s12542_s4 + $0xb0] ss:$8 sps:$4 sm:$0xff]  }
 0x336   :  { %1171 = vmatprep.subr.bf16.mxu1 %v8783_v6  ;;  %v8813_v31 = vld [vmem:[%s12542_s4 + $0x1b4] ss:$8 sps:$4 sm:$0xff]   ;;  %947 = vmatprep.subr.bf16.mxu0 %v8810_v30  ;;  %v8867_v30 = vld [vmem:[%s12542_s4 + $0x324] ss:$8 sps:$4 sm:$0xff]  }
 0x337   :  { %v688_v35 = vrot.slane %v687_v33, 1  ;;  %v682_v36 = vrot.slane %v681_v34, 1  ;;  %948 = vmatpush2.bf16.msra.mxu0 %v8808_v32  ;;  %v8865_v32 = vld [vmem:[%s12542_s4 + $0x320] ss:$8 sps:$4 sm:$0xff]  }
 0x339   :  { %v9997_v37 = vadd.f32 %v688_v35, %v687_v33  ;;  %v9999_v38 = vadd.f32 %v682_v36, %v681_v34  ;;  %1172 = vmatpush1.bf16.msra.mxu1 %v8781_v8  ;;  %v8811_v33 = vld [vmem:[%s12542_s4 + $0x1b0] ss:$8 sps:$4 sm:$0xff]   ;;  %v8816_v34 = vld [vmem:[%s12542_s4 + $0xa4] ss:$8 sps:$4 sm:$0xff]   ;;  %v8814_v36 = vld [vmem:[%s12542_s4 + $0xa0] ss:$8 sps:$4 sm:$0xff]  }
 0x33a   :  { %1173 = vmatprep.subr.bf16.mxu1 %v8789_v10  ;;  %v8819_v35 = vld [vmem:[%s12542_s4 + $0x1a4] ss:$8 sps:$4 sm:$0xff]   ;;  %949 = vmatprep.subr.bf16.mxu0 %v8816_v34  ;;  %v8838_v10 = vld [vmem:[%s12542_s4 + $0x260] ss:$8 sps:$4 sm:$0xff]   ;;  %v8873_v34 = vld [vmem:[%s12542_s4 + $0x314] ss:$8 sps:$4 sm:$0xff]  }
 0x33b   :  { %697 = vrot.lane.b32.xlu0 %v9997_v37, %s9769_s24  ;;  %691 = vrot.lane.b32.xlu1 %v9999_v38, %s9769_s24 }
 0x33c   :  { %950 = vmatpush2.bf16.msra.mxu0 %v8814_v36  ;;  %v8871_v36 = vld [vmem:[%s12542_s4 + $0x310] ss:$8 sps:$4 sm:$0xff]  }
 0x33d   :  { %1174 = vmatpush2.bf16.msra.mxu1 %v8787_v13  ;;  %951 = vmatprep.subr.bf16.mxu0 %v8822_v48  ;;  %v8846_v13 = vld [vmem:[%s12542_s4 + $0x254] ss:$8 sps:$4 sm:$0xff]   ;;  %v8888_v48 = vld [vmem:[%s12542_s4 + $0x2e4] ss:$8 sps:$4 sm:$0xff]  }
 0x33e   :  { %1175 = vmatprep.subr.bf16.mxu1 %v8795_v15  ;;  %v8844_v15 = vld [vmem:[%s12542_s4 + $0x250] ss:$8 sps:$4 sm:$0xff]  }
 0x33f   :  { %717 = vrot.lane.b32.xlu0 %v10005_v39, %s9769_s24 }
 0x340   :  { %952 = vmatpush2.bf16.msra.mxu0 %v8820_v50  ;;  %v8886_v50 = vld [vmem:[%s12542_s4 + $0x2e0] ss:$8 sps:$4 sm:$0xff]  }
 0x341   :  { %1176 = vmatpush2.bf16.msra.mxu1 %v8793_v17  ;;  %v8852_v17 = vld [vmem:[%s12542_s4 + $0x244] ss:$8 sps:$4 sm:$0xff]  }
 0x342   :  { %1177 = vmatprep.subr.bf16.mxu1 %v8801_v21  ;;  %v8850_v21 = vld [vmem:[%s12542_s4 + $0x240] ss:$8 sps:$4 sm:$0xff]  }
 0x345   :  { %1178 = vmatpush2.bf16.msra.mxu1 %v8799_v25  ;;  %v8858_v25 = vld [vmem:[%s12542_s4 + $0x234] ss:$8 sps:$4 sm:$0xff]  }
 0x346   :  { %1179 = vmatprep.subr.bf16.mxu1 %v8807_v27  ;;  %v8856_v27 = vld [vmem:[%s12542_s4 + $0x230] ss:$8 sps:$4 sm:$0xff]  }
 0x349   :  { %1180 = vmatpush2.bf16.msra.mxu1 %v8805_v29  ;;  %v8864_v29 = vld [vmem:[%s12542_s4 + $0x224] ss:$8 sps:$4 sm:$0xff]  }
 0x34a   :  { %1181 = vmatprep.subr.bf16.mxu1 %v8813_v31  ;;  %v8862_v31 = vld [vmem:[%s12542_s4 + $0x220] ss:$8 sps:$4 sm:$0xff]  }
 0x34d   :  { %1182 = vmatpush2.bf16.msra.mxu1 %v8811_v33  ;;  %v8870_v33 = vld [vmem:[%s12542_s4 + $0x214] ss:$8 sps:$4 sm:$0xff]  }
 0x34e   :  { %1183 = vmatprep.subr.bf16.mxu1 %v8819_v35  ;;  %v8868_v35 = vld [vmem:[%s12542_s4 + $0x210] ss:$8 sps:$4 sm:$0xff]  }
 0x351   :  { %1184 = vmatpush2.bf16.msra.mxu1 %v8817_v40  ;;  %v8876_v40 = vld [vmem:[%s12542_s4 + $0x204] ss:$8 sps:$4 sm:$0xff]  }
 0x352   :  { %1185 = vmatprep.subr.bf16.mxu1 %v8825_v49  ;;  %v8891_v49 = vld [vmem:[%s12542_s4 + $0x3e4] ss:$8 sps:$4 sm:$0xff]  }
 0x3ad   :  { %v692_v41 = vpop.permute.xlu1 %691  ;;  %v698_v44 = vpop.permute.xlu0 %697 }
 0x3ae   :  { %v694_v42 = vadd.f32 %v692_v41, %v9999_v38  ;;  %v8828_v38 = vld [vmem:[%s12542_s4 + $0x84] ss:$8 sps:$4 sm:$0xff]  }
 0x3af   :  { %953 = vmatprep.subr.bf16.mxu0 %v8828_v38  ;;  %v8879_v41 = vld [vmem:[%s12542_s4 + $0x304] ss:$8 sps:$4 sm:$0xff]   ;;  %v8894_v38 = vld [vmem:[%s12542_s4 + $0x2d4] ss:$8 sps:$4 sm:$0xff]  }
 0x3b0   :  { %v695_v43 = vadd.f32 %v694_v42, %v9997_v37  ;;  %v8823_v37 = vld [vmem:[%s12542_s4 + $0x190] ss:$8 sps:$4 sm:$0xff]   ;;  %954 = vmatpush2.bf16.msra.mxu0 %v8826_v52  ;;  %v8874_v42 = vld [vmem:[%s12542_s4 + $0x200] ss:$8 sps:$4 sm:$0xff]  }
 0x3b1   :  { %1186 = vmatpush2.bf16.msra.mxu1 %v8823_v37  ;;  %1391 = vmatprep.subr.bf16.mxu0 %v8834_v54  ;;  %v718_v58 = vpop.permute.xlu0 %717  ;;  %v8889_v37 = vld [vmem:[%s12542_s4 + $0x3e0] ss:$8 sps:$4 sm:$0xff]   ;;  %v8892_v52 = vld [vmem:[%s12542_s4 + $0x2d0] ss:$8 sps:$4 sm:$0xff]   ;;  %v8900_v54 = vld [vmem:[%s12542_s4 + $0x2c4] ss:$8 sps:$4 sm:$0xff]  }
 0x3b2   :  { %v700_v45 = vadd.f32 %v698_v44, %v695_v43  ;;  %1187 = vmatprep.subr.bf16.mxu1 %v8831_v51  ;;  %v720_v60 = vsel %vm668_vm6, %v10005_v39, %v718_v58  ;;  %v8877_v43 = vld [vmem:[%s12542_s4 + $0x300] ss:$8 sps:$4 sm:$0xff]   ;;  %v8882_v44 = vld [vmem:[%s12542_s4 + $0x2f4] ss:$8 sps:$4 sm:$0xff]  }
 0x3b3   :  { %v724_v1 = vrot.slane %v720_v60, %v10212_v59  ;;  %v8897_v51 = vld [vmem:[%s12542_s4 + $0x3d4] ss:$8 sps:$4 sm:$0xff]  }
 0x3b4   :  { %v701_v46 = vmul.f32 0.03125, %v700_v45  ;;  %v8885_v45 = vld [vmem:[%s12542_s4 + $0x3f4] ss:$8 sps:$4 sm:$0xff]  }
 0x3b5   :  { %1188 = vmatpush2.bf16.msra.mxu1 %v8829_v53  ;;  %v8895_v53 = vld [vmem:[%s12542_s4 + $0x3d0] ss:$8 sps:$4 sm:$0xff]   ;;  %v8906_v58 = vld [vmem:[%s12542_s4 + $0x2b4] ss:$8 sps:$4 sm:$0xff]  }
 0x3b6   :  { %v702_v47 = vadd.f32 1e-05, %v701_v46  ;;  %1625 = vmatprep.subr.bf16.mxu1 %v8837_v55  ;;  %v8880_v46 = vld [vmem:[%s12542_s4 + $0x2f0] ss:$8 sps:$4 sm:$0xff]   ;;  %v8903_v55 = vld [vmem:[%s12542_s4 + $0x3c4] ss:$8 sps:$4 sm:$0xff]  }
 0x3b7   :  { %v8909_v60 = vld [vmem:[%s12542_s4 + $0x3b4] ss:$8 sps:$4 sm:$0xff]  }
 0x3b8   :  { %9498 = vrsqrt.f32 %v702_v47  ;;  %v8883_v47 = vld [vmem:[%s12542_s4 + $0x3f0] ss:$8 sps:$4 sm:$0xff]  }
 0x3c5   :  { %v9499_v56 = vpop.eup %9498 }
 0x3c6   :  { %v704_v57 = vmul.f32 %v9499_v56, %v10005_v39  ;;  %v8832_v39 = vld [vmem:[%s12542_s4 + $0x270] ss:$8 sps:$4 sm:$0xff]   ;;  %v8898_v56 = vld [vmem:[%s12542_s4 + $0x2c0] ss:$8 sps:$4 sm:$0xff]  }
 0x3c8   :  { %706 = vrot.lane.b32.xlu1 %v704_v57, %s9769_s24 }
 0x43a   :  { %v707_v61 = vpop.permute.xlu1 %706 }
 0x43b   :  { %v709_v62 = vsel %vm668_vm6, %v704_v57, %v707_v61  ;;  %v8901_v57 = vld [vmem:[%s12542_s4 + $0x3c0] ss:$8 sps:$4 sm:$0xff]   ;;  %v8904_v61 = vld [vmem:[%s12542_s4 + $0x2b0] ss:$8 sps:$4 sm:$0xff]  }
 0x43c   :  { %v713_v63 = vrot.slane %v709_v62, %v9985_v19  ;;  %v8907_v62 = vld [vmem:[%s12542_s4 + $0x3b0] ss:$8 sps:$4 sm:$0xff]  }
 0x43e   :  { %v714_v2 = vmul.f32 %v713_v63, %v9989_v23  ;;  %v715_v3 = vmul.f32 %v713_v63, %v9991_v24  ;;  %v8840_v23 = vld [vmem:[%s12542_s4 + $0x264] ss:$8 sps:$4 sm:$0xff]  }
 0x43f   :  { %v8843_v24 = vld [vmem:[%s12542_s4 + $0x364] ss:$8 sps:$4 sm:$0xff]  }
 0x440   :  { %v725_v4 = vadd.f32 %v724_v1, %v714_v2  ;;  %v726_v5 = vadd.f32 %v724_v1, %v715_v3  ;;  %v8912_v63 = vld [vmem:[%s12542_s4 + $0x2a4] ss:$8 sps:$4 sm:$0xff]   ;;  %v8910_v2 = vld [vmem:[%s12542_s4 + $0x2a0] ss:$8 sps:$4 sm:$0xff]  }
 0x441   :  { %v8915_v1 = vld [vmem:[%s12542_s4 + $0x3a4] ss:$8 sps:$4 sm:$0xff]   ;;  %v8913_v3 = vld [vmem:[%s12542_s4 + $0x3a0] ss:$8 sps:$4 sm:$0xff]  }
 0x442   :  { %v727_v6 = vmax.f32 %v725_v4, 0.0  ;;  %v728_v7 = vmax.f32 %v726_v5, 0.0  ;;  %v8918_v4 = vld [vmem:[%s12542_s4 + $0x294] ss:$8 sps:$4 sm:$0xff]  }
 0x443   :  { %v8921_v5 = vld [vmem:[%s12542_s4 + $0x394] ss:$8 sps:$4 sm:$0xff]  }
 0x444   :  { %v10221_v18 = vpack.c.bf16 %v727_v6, %v727_v6  ;;  %v730_v8 = vpack.c.bf16 %v728_v7, %v728_v7  ;;  %v8916_v6 = vld [vmem:[%s12542_s4 + $0x290] ss:$8 sps:$4 sm:$0xff]  }
 0x445   :  { %v8919_v7 = vld [vmem:[%s12542_s4 + $0x390] ss:$8 sps:$4 sm:$0xff]  }
 0x446   :  { %955 = vmatprep.mubr.bf16.mxu0 %v730_v8  ;;  %1189 = vmatprep.mubr.bf16.mxu1 %v730_v8 }
 0x447   :  { %956 = vmatmul.mubr.bf16.vlgmr.msra.gmra.mxu0 %v10221_v18  ;;  %1190 = vmatmul.mubr.bf16.vlgmr.msra.gmra.mxu1 %v10221_v18 }
 0x448   :  { %1392 = vmatpush1.bf16.msra.mxu0 %v8832_v39  ;;  %1626 = vmatpush1.bf16.msra.mxu1 %v8835_v9  ;;  %v8927_v39 = vld [vmem:[%s12542_s4 + $0x384] ss:$8 sps:$4 sm:$0xff]   ;;  %v8922_v9 = vld [vmem:[%s12542_s4 + $0x280] ss:$8 sps:$4 sm:$0xff]  }
 0x449   :  { %1423 = vmatprep.mubr.bf16.mxu0 %v730_v8  ;;  %1657 = vmatprep.mubr.bf16.mxu1 %v730_v8  ;;  %v8924_v8 = vld [vmem:[%s12542_s4 + $0x284] ss:$8 sps:$4 sm:$0xff]  }
 0x44a   :  { %1393 = vmatprep.subr.bf16.mxu0 %v8840_v23  ;;  %1627 = vmatprep.subr.bf16.mxu1 %v8843_v24  ;;  %v8925_v23 = vld [vmem:[%s12542_s4 + $0x380] ss:$8 sps:$4 sm:$0xff]   ;;  %s9770_s4 = smov 96  }
 0x44c   :  { %1394 = vmatpush1.bf16.msra.mxu0 %v8838_v10  ;;  %1628 = vmatpush1.bf16.msra.mxu1 %v8841_v12 }
 0x44d   :  { %1395 = vmatprep.subr.bf16.mxu0 %v8846_v13  ;;  %1629 = vmatprep.subr.bf16.mxu1 %v8849_v14 }
 0x450   :  { %1396 = vmatpush1.bf16.msra.mxu0 %v8844_v15  ;;  %1630 = vmatpush1.bf16.msra.mxu1 %v8847_v16 }
 0x451   :  { %1397 = vmatprep.subr.bf16.mxu0 %v8852_v17  ;;  %1631 = vmatprep.subr.bf16.mxu1 %v8855_v20 }
 0x454   :  { %1398 = vmatpush1.bf16.msra.mxu0 %v8850_v21  ;;  %1632 = vmatpush1.bf16.msra.mxu1 %v8853_v22 }
 0x455   :  { %1399 = vmatprep.subr.bf16.mxu0 %v8858_v25  ;;  %1633 = vmatprep.subr.bf16.mxu1 %v8861_v26 }
 0x458   :  { %1400 = vmatpush1.bf16.msra.mxu0 %v8856_v27  ;;  %1634 = vmatpush1.bf16.msra.mxu1 %v8859_v28 }
 0x459   :  { %1401 = vmatprep.subr.bf16.mxu0 %v8864_v29  ;;  %1635 = vmatprep.subr.bf16.mxu1 %v8867_v30 }
 0x45c   :  { %1402 = vmatpush1.bf16.msra.mxu0 %v8862_v31  ;;  %1636 = vmatpush1.bf16.msra.mxu1 %v8865_v32 }
 0x45d   :  { %1403 = vmatprep.subr.bf16.mxu0 %v8870_v33  ;;  %1637 = vmatprep.subr.bf16.mxu1 %v8873_v34 }
 0x460   :  { %1404 = vmatpush1.bf16.msra.mxu0 %v8868_v35  ;;  %1638 = vmatpush1.bf16.msra.mxu1 %v8871_v36 }
 0x461   :  { %1405 = vmatprep.subr.bf16.mxu0 %v8876_v40  ;;  %1639 = vmatprep.subr.bf16.mxu1 %v8879_v41 }
 0x464   :  { %1406 = vmatpush1.bf16.msra.mxu0 %v8874_v42  ;;  %1640 = vmatpush1.bf16.msra.mxu1 %v8877_v43 }
 0x465   :  { %1407 = vmatprep.subr.bf16.mxu0 %v8882_v44  ;;  %1641 = vmatprep.subr.bf16.mxu1 %v8885_v45 }
 0x468   :  { %1408 = vmatpush2.bf16.msra.mxu0 %v8880_v46  ;;  %1642 = vmatpush2.bf16.msra.mxu1 %v8883_v47 }
 0x469   :  { %1409 = vmatprep.subr.bf16.mxu0 %v8888_v48  ;;  %1643 = vmatprep.subr.bf16.mxu1 %v8891_v49  ;;  %v1666_v48 = vld [vmem:[#allocation7] sm:$0xff] }
 0x46c   :  { %1410 = vmatpush2.bf16.msra.mxu0 %v8886_v50  ;;  %1644 = vmatpush2.bf16.msra.mxu1 %v8889_v37 }
 0x46d   :  { %1411 = vmatprep.subr.bf16.mxu0 %v8894_v38  ;;  %1645 = vmatprep.subr.bf16.mxu1 %v8897_v51 }
 0x470   :  { %1412 = vmatpush2.bf16.msra.mxu0 %v8892_v52  ;;  %1646 = vmatpush2.bf16.msra.mxu1 %v8895_v53 }
 0x471   :  { %1413 = vmatprep.subr.bf16.mxu0 %v8900_v54  ;;  %1647 = vmatprep.subr.bf16.mxu1 %v8903_v55 }
 0x474   :  { %1414 = vmatpush2.bf16.msra.mxu0 %v8898_v56  ;;  %1648 = vmatpush2.bf16.msra.mxu1 %v8901_v57 }
 0x475   :  { %1415 = vmatprep.subr.bf16.mxu0 %v8906_v58  ;;  %1649 = vmatprep.subr.bf16.mxu1 %v8909_v60 }
 0x478   :  { %1416 = vmatpush2.bf16.msra.mxu0 %v8904_v61  ;;  %1650 = vmatpush2.bf16.msra.mxu1 %v8907_v62 }
 0x479   :  { %1417 = vmatprep.subr.bf16.mxu0 %v8912_v63  ;;  %1651 = vmatprep.subr.bf16.mxu1 %v8915_v1 }
 0x47c   :  { %1418 = vmatpush2.bf16.msra.mxu0 %v8910_v2  ;;  %1652 = vmatpush2.bf16.msra.mxu1 %v8913_v3 }
 0x47d   :  { %1419 = vmatprep.subr.bf16.mxu0 %v8918_v4  ;;  %1653 = vmatprep.subr.bf16.mxu1 %v8921_v5 }
 0x480   :  { %1420 = vmatpush2.bf16.msra.mxu0 %v8916_v6  ;;  %1654 = vmatpush2.bf16.msra.mxu1 %v8919_v7 }
 0x481   :  { %1421 = vmatprep.subr.bf16.mxu0 %v8924_v8  ;;  %1655 = vmatprep.subr.bf16.mxu1 %v8927_v39 }
 0x484   :  { %1422 = vmatpush2.bf16.msra.mxu0 %v8922_v9  ;;  %1656 = vmatpush2.bf16.msra.mxu1 %v8925_v23 }
 0x487   :  { %1424 = vmatmul.mubr.bf16.vlgmr.msra.gmra.mxu0 %v10221_v18  ;;  %1658 = vmatmul.mubr.bf16.vlgmr.msra.gmra.mxu1 %v10221_v18 }
 0x488   :  { %1750 = vmatprep.mubr.f32.mxu0 %v9768_v11  ;;  %1837 = vmatprep.mubr.f32.mxu1 %v9768_v11 }
 0x507   :  { %v957_v24 = vpop.f32.mrf.mxu0  ;;  %v1191_v10 = vpop.f32.mrf.mxu1 }
 0x508   :  { %v1759_v12 = vrot.slane %v957_v24, 4  ;;  %v1669_v13 = vrot.slane %v1191_v10, 4 }
 0x509   :  { %v959_v14 = vpop.f32.mrf.mxu0  ;;  %v1193_v15 = vpop.f32.mrf.mxu1 }
 0x50a   :  { %v1769_v16 = vsel %vm455_vm4, %v1759_v12, %v1191_v10  ;;  %v1760_v17 = vrot.slane %v959_v14, 4  ;;  %v1670_v20 = vrot.slane %v1193_v15, 4  ;;  %v1679_v21 = vsel %vm455_vm4, %v957_v24, %v1669_v13 }
 0x50b   :  { %v961_v22 = vpop.f32.mrf.mxu0  ;;  %v1195_v25 = vpop.f32.mrf.mxu1 }
 0x50c   :  { %v1680_v18 = vsel %vm455_vm4, %v959_v14, %v1670_v20  ;;  %v1770_v26 = vsel %vm455_vm4, %v1760_v17, %v1193_v15 }
 0x50d   :  { %v962_v27 = vpop.f32.mrf.mxu0  ;;  %v1196_v28 = vpop.f32.mrf.mxu1 }
 0x547   :  { %v1425_v29 = vpop.f32.mrf.mxu0  ;;  %v1659_v30 = vpop.f32.mrf.mxu1 }
 0x548   :  { %v1765_v31 = vrot.slane %v1425_v29, 4  ;;  %v1675_v32 = vrot.slane %v1659_v30, 4 }
 0x549   :  { %v1427_v33 = vpop.f32.mrf.mxu0  ;;  %v1661_v34 = vpop.f32.mrf.mxu1 }
 0x54a   :  { %v1766_v35 = vrot.slane %v1427_v33, 4  ;;  %v1676_v36 = vrot.slane %v1661_v34, 4  ;;  %v1771_v44 = vsel %vm455_vm4, %v1765_v31, %v1659_v30  ;;  %v1681_v47 = vsel %vm455_vm4, %v1425_v29, %v1675_v32 }
 0x54b   :  { %v1429_v40 = vpop.f32.mrf.mxu0  ;;  %v1663_v41 = vpop.f32.mrf.mxu1 }
 0x54c   :  { %v1682_v42 = vsel %vm455_vm4, %v1427_v33, %v1676_v36  ;;  %v1772_v43 = vsel %vm455_vm4, %v1766_v35, %v1661_v34 }
 0x54d   :  { %v1430_v45 = vpop.f32.mrf.mxu0  ;;  %v1664_v46 = vpop.f32.mrf.mxu1  ;;  %1714 = vmatprep.subr.mxu0 %v1682_v42  ;;  %1801 = vmatprep.subr.mxu1 %v1772_v43 }
 0x54e   :  { %1715 = vmatpush1.msra.mxu0 %v1681_v47  ;;  %1802 = vmatpush1.msra.mxu1 %v1771_v44 }
 0x54f   :  { %1716 = vmatprep.subr.mxu0 %v1680_v18  ;;  %1803 = vmatprep.subr.mxu1 %v1770_v26 }
 0x550   :  { %1717 = vmatpush1.msra.mxu0 %v1679_v21  ;;  %1804 = vmatpush1.msra.mxu1 %v1769_v16 }
 0x551   :  { %7941 = vmatmul.mubr.msk.f32.vlgmr.msra.gmra.mxu0 %vm216_vm0, %v1666_v48  ;;  %7942 = vmatmul.mubr.msk.f32.vlgmr.msra.gmra.mxu1 %vm216_vm0, %v1666_v48 }
 0x611   :  { %v1752_v49 = vpop.f32.mrf.mxu0  ;;  %v1839_v50 = vpop.f32.mrf.mxu1 }
 0x612   :  { %v1845_v37 = vadd.f32 %v1839_v50, %v1752_v49 }
 0x613   :  { %v1754_v38 = vpop.f32.mrf.mxu0  ;;  %v1841_v51 = vpop.f32.mrf.mxu1 }
 0x614   :  { %v1846_v52 = vrot.slane %v1845_v37, 4  ;;  %v1852_v53 = vadd.f32 %v1841_v51, %v1754_v38 }
 0x616   :  { %v1847_v54 = vadd.f32 %v1846_v52, %v1845_v37  ;;  %v1853_v55 = vrot.slane %v1852_v53, 4  ;;  %v8928_v37 = vld [vmem:[%s12545_s7 + $0x70] ss:$8 sps:$4 sm:$0xff]   ;;  %v8933_v52 = vld [vmem:[%s12545_s7 + $0x174] ss:$8 sps:$4 sm:$0xff]  }
 0x617   :  { %2436 = vmatprep.subr.bf16.mxu1 %v8933_v52 }
 0x618   :  { %v1848_v56 = vrot.slane %v1847_v54, 2  ;;  %v1854_v57 = vadd.f32 %v1853_v55, %v1852_v53  ;;  %v8936_v53 = vld [vmem:[%s12545_s7 + $0x64] ss:$8 sps:$4 sm:$0xff]   ;;  %v8934_v55 = vld [vmem:[%s12545_s7 + $0x60] ss:$8 sps:$4 sm:$0xff]  }
 0x61a   :  { %v1849_v58 = vadd.f32 %v1848_v56, %v1847_v54  ;;  %v1855_v60 = vrot.slane %v1854_v57, 2  ;;  %v8939_v54 = vld [vmem:[%s12545_s7 + $0x164] ss:$8 sps:$4 sm:$0xff]   ;;  %v8937_v56 = vld [vmem:[%s12545_s7 + $0x160] ss:$8 sps:$4 sm:$0xff]  }
 0x61c   :  { %v1850_v61 = vrot.slane %v1849_v58, 1  ;;  %v1856_v62 = vadd.f32 %v1855_v60, %v1854_v57  ;;  %v8942_v57 = vld [vmem:[%s12545_s7 + $0x54] ss:$8 sps:$4 sm:$0xff]   ;;  %v8940_v60 = vld [vmem:[%s12545_s7 + $0x50] ss:$8 sps:$4 sm:$0xff]  }
 0x61e   :  { %v1857_v63 = vrot.slane %v1856_v62, 1  ;;  %v1851_v1 = vadd.f32 %v1850_v61, %v1849_v58  ;;  %v8945_v58 = vld [vmem:[%s12545_s7 + $0x154] ss:$8 sps:$4 sm:$0xff]   ;;  %v8943_v61 = vld [vmem:[%s12545_s7 + $0x150] ss:$8 sps:$4 sm:$0xff]  }
 0x620   :  { %1864 = vrot.lane.b32.xlu0 %v1851_v1, %s9769_s24  ;;  %1860 = vrot.lane.b32.xlu1 %v1851_v1, %s9770_s4  ;;  %v1858_v2 = vadd.f32 %v1857_v63, %v1856_v62  ;;  %v8948_v62 = vld [vmem:[%s12545_s7 + $0x44] ss:$8 sps:$4 sm:$0xff]  }
 0x621   :  { %v8951_v63 = vld [vmem:[%s12545_s7 + $0x144] ss:$8 sps:$4 sm:$0xff]  }
 0x624   :  { %1868 = vrot.lane.b32.xlu1 %v1851_v1, %s9771_s27  ;;  %1874 = vrot.lane.b32.xlu0 %v1858_v2, %s9770_s4 }
 0x628   :  { %1878 = vrot.lane.b32.xlu1 %v1858_v2, %s9769_s24  ;;  %1882 = vrot.lane.b32.xlu0 %v1858_v2, %s9771_s27 }
 0x692   :  { %v1865_v3 = vpop.permute.xlu0 %1864  ;;  %v1861_v4 = vpop.permute.xlu1 %1860 }
 0x693   :  { %v1863_v5 = vadd.f32 %v1861_v4, %v1851_v1  ;;  %v8946_v1 = vld [vmem:[%s12545_s7 + $0x40] ss:$8 sps:$4 sm:$0xff]   ;;  %v8957_v4 = vld [vmem:[%s12545_s7 + $0x134] ss:$8 sps:$4 sm:$0xff]  }
 0x695   :  { %v1867_v6 = vadd.f32 %v1865_v3, %v1863_v5  ;;  %v8954_v3 = vld [vmem:[%s12545_s7 + $0x34] ss:$8 sps:$4 sm:$0xff]   ;;  %v8952_v5 = vld [vmem:[%s12545_s7 + $0x30] ss:$8 sps:$4 sm:$0xff]  }
 0x696   :  { %v1869_v7 = vpop.permute.xlu1 %1868  ;;  %v1875_v39 = vpop.permute.xlu0 %1874 }
 0x697   :  { %v1871_v8 = vadd.f32 %v1869_v7, %v1867_v6  ;;  %v8955_v6 = vld [vmem:[%s12545_s7 + $0x130] ss:$8 sps:$4 sm:$0xff]   ;;  %v8960_v7 = vld [vmem:[%s12545_s7 + $0x24] ss:$8 sps:$4 sm:$0xff]  }
 0x699   :  { %v1872_v9 = vadd.f32 %v1871_v8, %v1858_v2  ;;  %v8949_v2 = vld [vmem:[%s12545_s7 + $0x140] ss:$8 sps:$4 sm:$0xff]   ;;  %v8963_v8 = vld [vmem:[%s12545_s7 + $0x124] ss:$8 sps:$4 sm:$0xff]  }
 0x69a   :  { %v1879_v24 = vpop.permute.xlu1 %1878  ;;  %v1883_v12 = vpop.permute.xlu0 %1882 }
 0x69b   :  { %v1877_v23 = vadd.f32 %v1875_v39, %v1872_v9  ;;  %v8958_v39 = vld [vmem:[%s12545_s7 + $0x20] ss:$8 sps:$4 sm:$0xff]  }
 0x69c   :  { %v8961_v9 = vld [vmem:[%s12545_s7 + $0x120] ss:$8 sps:$4 sm:$0xff]  }
 0x69d   :  { %v1881_v10 = vadd.f32 %v1879_v24, %v1877_v23  ;;  %v8966_v23 = vld [vmem:[%s12545_s7 + $0x14] ss:$8 sps:$4 sm:$0xff]  }
 0x69e   :  { %v8969_v24 = vld [vmem:[%s12545_s7 + $0x114] ss:$8 sps:$4 sm:$0xff]  }
 0x69f   :  { %v1885_v13 = vadd.f32 %v1883_v12, %v1881_v10  ;;  %v8964_v10 = vld [vmem:[%s12545_s7 + $0x10] ss:$8 sps:$4 sm:$0xff]  }
 0x6a0   :  { %v8967_v12 = vld [vmem:[%s12545_s7 + $0x110] ss:$8 sps:$4 sm:$0xff]  }
 0x6a1   :  { %v1887_v14 = vmul.f32 0.0078125, %v1885_v13  ;;  %v8972_v13 = vld [vmem:[%s12545_s7 + $0x4] ss:$8 sps:$4 sm:$0xff]  }
 0x6a3   :  { %1892 = vrot.lane.b32.xlu0 %v1887_v14, %s9769_s24  ;;  %1889 = vrot.lane.b32.xlu1 %v1887_v14, %s9771_s27 }
 0x6a7   :  { %1895 = vrot.lane.b32.xlu1 %v1887_v14, %s9770_s4 }
 0x715   :  { %v1890_v15 = vpop.permute.xlu1 %1889  ;;  %v1893_v16 = vpop.permute.xlu0 %1892 }
 0x716   :  { %v1899_v17 = vsel %vm1898_vm7, %v1887_v14, %v1890_v15  ;;  %v8975_v14 = vld [vmem:[%s12545_s7 + $0x104] ss:$8 sps:$4 sm:$0xff]   ;;  %v8970_v15 = vld [vmem:[%s12545_s7] ss:$8 sps:$4 sm:$0xff]  }
 0x717   :  { %v1900_v20 = vsel %vm668_vm6, %v1899_v17, %v1893_v16  ;;  %v8973_v16 = vld [vmem:[%s12545_s7 + $0x100] ss:$8 sps:$4 sm:$0xff]   ;;  %v8978_v17 = vld [vmem:[%s12545_s7 + $0xf4] ss:$8 sps:$4 sm:$0xff]  }
 0x719   :  { %v1896_v21 = vpop.permute.xlu1 %1895 }
 0x71a   :  { %v1902_v22 = vsel %vm1901_vm8, %v1900_v20, %v1896_v21  ;;  %v8981_v20 = vld [vmem:[%s12545_s7 + $0x1f4] ss:$8 sps:$4 sm:$0xff]   ;;  %v8976_v21 = vld [vmem:[%s12545_s7 + $0xf0] ss:$8 sps:$4 sm:$0xff]  }
 0x71b   :  { %v1906_v25 = vrot.slane %v1902_v22, %v9985_v19  ;;  %v8979_v22 = vld [vmem:[%s12545_s7 + $0x1f0] ss:$8 sps:$4 sm:$0xff]  }
 0x71d   :  { %v10438_v18 = vsub.f32 %v1752_v49, %v1906_v25  ;;  %v10440_v26 = vsub.f32 %v1754_v38, %v1906_v25  ;;  %v10442_v27 = vsub.f32 %v1839_v50, %v1906_v25  ;;  %v10444_v28 = vsub.f32 %v1841_v51, %v1906_v25  ;;  %v10470_v50 = vld [vmem:[#allocation9] sm:$0x3]  ;;  %v8930_v38 = vld [vmem:[%s12545_s7 + $0x74] ss:$8 sps:$4 sm:$0xff]   ;;  %v8931_v51 = vld [vmem:[%s12545_s7 + $0x170] ss:$8 sps:$4 sm:$0xff]  }
 0x71e   :  { %2200 = vmatprep.subr.bf16.mxu0 %v8930_v38  ;;  %2437 = vmatpush1.bf16.msra.mxu1 %v8931_v51  ;;  %v8984_v25 = vld [vmem:[%s12545_s7 + $0xe4] ss:$8 sps:$4 sm:$0xff]  }
 0x71f   :  { %v1911_v29 = vmul.f32 %v10438_v18, %v10438_v18  ;;  %v1912_v30 = vmul.f32 %v10440_v26, %v10440_v26  ;;  %v1913_v31 = vmul.f32 %v10442_v27, %v10442_v27  ;;  %v1914_v32 = vmul.f32 %v10444_v28, %v10444_v28  ;;  %2201 = vmatpush1.bf16.msra.mxu0 %v8928_v37 }
 0x720   :  { %2202 = vmatprep.subr.bf16.mxu0 %v8936_v53  ;;  %2438 = vmatprep.subr.bf16.mxu1 %v8939_v54 }
 0x721   :  { %v1915_v33 = vadd.f32 %v1913_v31, %v1911_v29  ;;  %v1922_v34 = vadd.f32 %v1914_v32, %v1912_v30  ;;  %v8987_v29 = vld [vmem:[%s12545_s7 + $0x1e4] ss:$8 sps:$4 sm:$0xff]   ;;  %v8982_v30 = vld [vmem:[%s12545_s7 + $0xe0] ss:$8 sps:$4 sm:$0xff]   ;;  %v8990_v32 = vld [vmem:[%s12545_s7 + $0xd4] ss:$8 sps:$4 sm:$0xff]  }
 0x722   :  { %2439 = vmatpush1.bf16.msra.mxu1 %v8937_v56  ;;  %v8985_v31 = vld [vmem:[%s12545_s7 + $0x1e0] ss:$8 sps:$4 sm:$0xff]  }
 0x723   :  { %v1916_v35 = vrot.slane %v1915_v33, 4  ;;  %v1923_v36 = vrot.slane %v1922_v34, 4  ;;  %2203 = vmatpush1.bf16.msra.mxu0 %v8934_v55  ;;  %2440 = vmatprep.subr.bf16.mxu1 %v8945_v58 }
 0x724   :  { %2204 = vmatprep.subr.bf16.mxu0 %v8942_v57 }
 0x725   :  { %v1917_v40 = vadd.f32 %v1916_v35, %v1915_v33  ;;  %v1924_v41 = vadd.f32 %v1923_v36, %v1922_v34  ;;  %v8993_v33 = vld [vmem:[%s12545_s7 + $0x1d4] ss:$8 sps:$4 sm:$0xff]   ;;  %v8988_v34 = vld [vmem:[%s12545_s7 + $0xd0] ss:$8 sps:$4 sm:$0xff]   ;;  %v8996_v36 = vld [vmem:[%s12545_s7 + $0xc4] ss:$8 sps:$4 sm:$0xff]  }
 0x726   :  { %2441 = vmatpush1.bf16.msra.mxu1 %v8943_v61  ;;  %v8991_v35 = vld [vmem:[%s12545_s7 + $0x1d0] ss:$8 sps:$4 sm:$0xff]   ;;  %v9005_v61 = vld [vmem:[%s12545_s7 + $0x1b4] ss:$8 sps:$4 sm:$0xff]  }
 0x727   :  { %v1918_v42 = vrot.slane %v1917_v40, 2  ;;  %v1925_v43 = vrot.slane %v1924_v41, 2  ;;  %2205 = vmatpush1.bf16.msra.mxu0 %v8940_v60  ;;  %2442 = vmatprep.subr.bf16.mxu1 %v8951_v63  ;;  %v9000_v60 = vld [vmem:[%s12545_s7 + $0xb0] ss:$8 sps:$4 sm:$0xff]   ;;  %v9011_v63 = vld [vmem:[%s12545_s7 + $0x1a4] ss:$8 sps:$4 sm:$0xff]  }
 0x728   :  { %2206 = vmatprep.subr.bf16.mxu0 %v8948_v62  ;;  %v9008_v62 = vld [vmem:[%s12545_s7 + $0xa4] ss:$8 sps:$4 sm:$0xff]  }
 0x729   :  { %v1919_v44 = vadd.f32 %v1918_v42, %v1917_v40  ;;  %v1926_v45 = vadd.f32 %v1925_v43, %v1924_v41  ;;  %v8999_v40 = vld [vmem:[%s12545_s7 + $0x1c4] ss:$8 sps:$4 sm:$0xff]   ;;  %v8994_v41 = vld [vmem:[%s12545_s7 + $0xc0] ss:$8 sps:$4 sm:$0xff]  }
 0x72a   :  { %2443 = vmatpush1.bf16.msra.mxu1 %v8949_v2  ;;  %v8997_v42 = vld [vmem:[%s12545_s7 + $0x1c0] ss:$8 sps:$4 sm:$0xff]  }
 0x72b   :  { %v1920_v46 = vrot.slane %v1919_v44, 1  ;;  %v1927_v48 = vrot.slane %v1926_v45, 1  ;;  %2207 = vmatpush1.bf16.msra.mxu0 %v8946_v1  ;;  %2444 = vmatprep.subr.bf16.mxu1 %v8957_v4  ;;  %v9006_v1 = vld [vmem:[%s12545_s7 + $0xa0] ss:$8 sps:$4 sm:$0xff]   ;;  %v9017_v4 = vld [vmem:[%s12545_s7 + $0x194] ss:$8 sps:$4 sm:$0xff]  }
 0x72c   :  { %2208 = vmatprep.subr.bf16.mxu0 %v8954_v3  ;;  %v9009_v2 = vld [vmem:[%s12545_s7 + $0x1a0] ss:$8 sps:$4 sm:$0xff]   ;;  %v9014_v3 = vld [vmem:[%s12545_s7 + $0x94] ss:$8 sps:$4 sm:$0xff]  }
 0x72d   :  { %v10454_v47 = vadd.f32 %v1920_v46, %v1919_v44  ;;  %v10460_v49 = vadd.f32 %v1927_v48, %v1926_v45 }
 0x72e   :  { %2445 = vmatpush1.bf16.msra.mxu1 %v8955_v6  ;;  %v9015_v6 = vld [vmem:[%s12545_s7 + $0x190] ss:$8 sps:$4 sm:$0xff]  }
 0x72f   :  { %1934 = vrot.lane.b32.xlu1 %v10454_v47, %s9769_s24  ;;  %1930 = vrot.lane.b32.xlu0 %v10454_v47, %s9770_s4 }
 0x730   :  { %2209 = vmatpush1.bf16.msra.mxu0 %v8952_v5  ;;  %2446 = vmatprep.subr.bf16.mxu1 %v8963_v8  ;;  %v9012_v5 = vld [vmem:[%s12545_s7 + $0x90] ss:$8 sps:$4 sm:$0xff]   ;;  %v9020_v8 = vld [vmem:[%s12545_s7 + $0x84] ss:$8 sps:$4 sm:$0xff]  }
 0x731   :  { %2210 = vmatprep.subr.bf16.mxu0 %v8960_v7 }
 0x732   :  { %2447 = vmatpush1.bf16.msra.mxu1 %v8961_v9  ;;  %v9018_v9 = vld [vmem:[%s12545_s7 + $0x80] ss:$8 sps:$4 sm:$0xff]  }
 0x733   :  { %1944 = vrot.lane.b32.xlu1 %v10460_v49, %s9770_s4  ;;  %1938 = vrot.lane.b32.xlu0 %v10454_v47, %s9771_s27 }
 0x734   :  { %2211 = vmatpush1.bf16.msra.mxu0 %v8958_v39  ;;  %2448 = vmatprep.subr.bf16.mxu1 %v8969_v24  ;;  %v9021_v24 = vld [vmem:[%s12545_s7 + $0x180] ss:$8 sps:$4 sm:$0xff]  }
 0x735   :  { %2212 = vmatprep.subr.bf16.mxu0 %v8966_v23  ;;  %v9023_v23 = vld [vmem:[%s12545_s7 + $0x184] ss:$8 sps:$4 sm:$0xff]  }
 0x736   :  { %2449 = vmatpush1.bf16.msra.mxu1 %v8967_v12  ;;  %v9029_v12 = vld [vmem:[%s12545_s7 + $0x374] ss:$8 sps:$4 sm:$0xff]  }
 0x737   :  { %1952 = vrot.lane.b32.xlu1 %v10460_v49, %s9771_s27  ;;  %1948 = vrot.lane.b32.xlu0 %v10460_v49, %s9769_s24 }
 0x738   :  { %2213 = vmatpush1.bf16.msra.mxu0 %v8964_v10  ;;  %2450 = vmatprep.subr.bf16.mxu1 %v8975_v14  ;;  %v9026_v10 = vld [vmem:[%s12545_s7 + $0x274] ss:$8 sps:$4 sm:$0xff]  }
 0x739   :  { %2214 = vmatprep.subr.bf16.mxu0 %v8972_v13 }
 0x73a   :  { %2451 = vmatpush1.bf16.msra.mxu1 %v8973_v16 }
 0x73b   :  { %1982 = vrot.lane.b32.xlu1 %v10470_v50, %s9771_s27  ;;  %2452 = vmatprep.subr.bf16.mxu1 %v8981_v20 }
 0x73c   :  { %2215 = vmatpush1.bf16.msra.mxu0 %v8970_v15 }
 0x73d   :  { %2216 = vmatprep.subr.bf16.mxu0 %v8978_v17 }
 0x73e   :  { %2453 = vmatpush2.bf16.msra.mxu1 %v8979_v22 }
 0x73f   :  { %2454 = vmatprep.subr.bf16.mxu1 %v8987_v29 }
 0x740   :  { %2217 = vmatpush2.bf16.msra.mxu0 %v8976_v21 }
 0x741   :  { %2218 = vmatprep.subr.bf16.mxu0 %v8984_v25 }
 0x742   :  { %2455 = vmatpush2.bf16.msra.mxu1 %v8985_v31 }
 0x743   :  { %2456 = vmatprep.subr.bf16.mxu1 %v8993_v33 }
 0x744   :  { %2219 = vmatpush2.bf16.msra.mxu0 %v8982_v30 }
 0x745   :  { %2220 = vmatprep.subr.bf16.mxu0 %v8990_v32 }
 0x746   :  { %2457 = vmatpush2.bf16.msra.mxu1 %v8991_v35 }
 0x747   :  { %2458 = vmatprep.subr.bf16.mxu1 %v8999_v40 }
 0x748   :  { %2221 = vmatpush2.bf16.msra.mxu0 %v8988_v34 }
 0x749   :  { %2222 = vmatprep.subr.bf16.mxu0 %v8996_v36 }
 0x74a   :  { %2459 = vmatpush2.bf16.msra.mxu1 %v8997_v42 }
 0x74b   :  { %2460 = vmatprep.subr.bf16.mxu1 %v9005_v61  ;;  %v9053_v61 = vld [vmem:[%s12545_s7 + $0x334] ss:$8 sps:$4 sm:$0xff]  }
 0x74c   :  { %2223 = vmatpush2.bf16.msra.mxu0 %v8994_v41 }
 0x7a1   :  { %v1935_v43 = vpop.permute.xlu1 %1934  ;;  %v1931_v44 = vpop.permute.xlu0 %1930 }
 0x7a2   :  { %v1933_v45 = vadd.f32 %v1931_v44, %v10454_v47  ;;  %v9002_v47 = vld [vmem:[%s12545_s7 + $0xb4] ss:$8 sps:$4 sm:$0xff]  }
 0x7a3   :  { %2224 = vmatprep.subr.bf16.mxu0 %v9002_v47  ;;  %v9045_v47 = vld [vmem:[%s12545_s7 + $0x340] ss:$8 sps:$4 sm:$0xff]  }
 0x7a4   :  { %v1937_v46 = vadd.f32 %v1935_v43, %v1933_v45  ;;  %2225 = vmatpush2.bf16.msra.mxu0 %v9000_v60  ;;  %v9042_v60 = vld [vmem:[%s12545_s7 + $0x240] ss:$8 sps:$4 sm:$0xff]  }
 0x7a5   :  { %v1939_v48 = vpop.permute.xlu0 %1938  ;;  %v1945_v38 = vpop.permute.xlu1 %1944  ;;  %2226 = vmatprep.subr.bf16.mxu0 %v9008_v62  ;;  %v9048_v62 = vld [vmem:[%s12545_s7 + $0x230] ss:$8 sps:$4 sm:$0xff]  }
 0x7a6   :  { %v1941_v37 = vadd.f32 %v1939_v48, %v1937_v46 }
 0x7a8   :  { %v1942_v51 = vadd.f32 %v1941_v37, %v10460_v49  ;;  %v9003_v49 = vld [vmem:[%s12545_s7 + $0x1b0] ss:$8 sps:$4 sm:$0xff]   ;;  %2227 = vmatpush2.bf16.msra.mxu0 %v9006_v1  ;;  %v9056_v1 = vld [vmem:[%s12545_s7 + $0x224] ss:$8 sps:$4 sm:$0xff]  }
 0x7a9   :  { %v1949_v53 = vpop.permute.xlu0 %1948  ;;  %v1953_v55 = vpop.permute.xlu1 %1952  ;;  %2461 = vmatpush2.bf16.msra.mxu1 %v9003_v49  ;;  %2228 = vmatprep.subr.bf16.mxu0 %v9014_v3  ;;  %v9050_v49 = vld [vmem:[%s12545_s7 + $0x234] ss:$8 sps:$4 sm:$0xff]   ;;  %v9054_v3 = vld [vmem:[%s12545_s7 + $0x220] ss:$8 sps:$4 sm:$0xff]  }
 0x7aa   :  { %v1947_v52 = vadd.f32 %v1945_v38, %v1942_v51  ;;  %2462 = vmatprep.subr.bf16.mxu1 %v9011_v63  ;;  %v9035_v38 = vld [vmem:[%s12545_s7 + $0x364] ss:$8 sps:$4 sm:$0xff]   ;;  %v9030_v51 = vld [vmem:[%s12545_s7 + $0x260] ss:$8 sps:$4 sm:$0xff]   ;;  %v9051_v63 = vld [vmem:[%s12545_s7 + $0x330] ss:$8 sps:$4 sm:$0xff]  }
 0x7ac   :  { %v1951_v54 = vadd.f32 %v1949_v53, %v1947_v52  ;;  %2229 = vmatpush2.bf16.msra.mxu0 %v9012_v5  ;;  %v9033_v52 = vld [vmem:[%s12545_s7 + $0x360] ss:$8 sps:$4 sm:$0xff]   ;;  %v9038_v53 = vld [vmem:[%s12545_s7 + $0x254] ss:$8 sps:$4 sm:$0xff]  }
 0x7ad   :  { %2463 = vmatpush2.bf16.msra.mxu1 %v9009_v2  ;;  %2230 = vmatprep.subr.bf16.mxu0 %v9020_v8  ;;  %v1983_v13 = vpop.permute.xlu1 %1982  ;;  %v9059_v2 = vld [vmem:[%s12545_s7 + $0x324] ss:$8 sps:$4 sm:$0xff]   ;;  %v9062_v5 = vld [vmem:[%s12545_s7 + $0x214] ss:$8 sps:$4 sm:$0xff]   ;;  %v9063_v8 = vld [vmem:[%s12545_s7 + $0x310] ss:$8 sps:$4 sm:$0xff]  }
 0x7ae   :  { %v1955_v56 = vadd.f32 %v1953_v55, %v1951_v54  ;;  %2464 = vmatprep.subr.bf16.mxu1 %v9017_v4  ;;  %v1991_v29 = vsel %vm1898_vm7, %v10470_v50, %v1983_v13  ;;  %v9041_v54 = vld [vmem:[%s12545_s7 + $0x354] ss:$8 sps:$4 sm:$0xff]   ;;  %v9036_v55 = vld [vmem:[%s12545_s7 + $0x250] ss:$8 sps:$4 sm:$0xff]   ;;  %v9057_v4 = vld [vmem:[%s12545_s7 + $0x320] ss:$8 sps:$4 sm:$0xff]  }
 0x7af   :  { %v9072_v13 = vld [vmem:[%s12545_s7 + $0x2f0] ss:$8 sps:$4 sm:$0xff]  }
 0x7b0   :  { %v1956_v57 = vmul.f32 0.0078125, %v1955_v56  ;;  %2231 = vmatpush2.bf16.msra.mxu0 %v9018_v9  ;;  %v9039_v56 = vld [vmem:[%s12545_s7 + $0x350] ss:$8 sps:$4 sm:$0xff]   ;;  %v9071_v9 = vld [vmem:[%s12545_s7 + $0x304] ss:$8 sps:$4 sm:$0xff]  }
 0x7b1   :  { %2465 = vmatpush2.bf16.msra.mxu1 %v9015_v6  ;;  %2672 = vmatprep.subr.bf16.mxu0 %v9026_v10  ;;  %v9065_v6 = vld [vmem:[%s12545_s7 + $0x314] ss:$8 sps:$4 sm:$0xff]  }
 0x7b2   :  { %v1957_v58 = vadd.f32 1e-05, %v1956_v57  ;;  %2466 = vmatprep.subr.bf16.mxu1 %v9023_v23  ;;  %v9044_v57 = vld [vmem:[%s12545_s7 + $0x244] ss:$8 sps:$4 sm:$0xff]   ;;  %v9066_v23 = vld [vmem:[%s12545_s7 + $0x200] ss:$8 sps:$4 sm:$0xff]  }
 0x7b3   :  { %v9074_v10 = vld [vmem:[%s12545_s7 + $0x2f4] ss:$8 sps:$4 sm:$0xff]  }
 0x7b4   :  { %9500 = vrsqrt.f32 %v1957_v58  ;;  %v9047_v58 = vld [vmem:[%s12545_s7 + $0x344] ss:$8 sps:$4 sm:$0xff]  }
 0x7b5   :  { %2467 = vmatpush2.bf16.msra.mxu1 %v9021_v24  ;;  %v9069_v24 = vld [vmem:[%s12545_s7 + $0x300] ss:$8 sps:$4 sm:$0xff]  }
 0x7b6   :  { %2908 = vmatprep.subr.bf16.mxu1 %v9029_v12  ;;  %v9077_v12 = vld [vmem:[%s12545_s7 + $0x3f4] ss:$8 sps:$4 sm:$0xff]  }
 0x7c1   :  { %v9501_v7 = vpop.eup %9500 }
 0x7c2   :  { %v1959_v39 = vmul.f32 %v9501_v7, %v10470_v50  ;;  %v9060_v7 = vld [vmem:[%s12545_s7 + $0x210] ss:$8 sps:$4 sm:$0xff]  }
 0x7c4   :  { %1964 = vrot.lane.b32.xlu1 %v1959_v39, %s9769_s24  ;;  %1961 = vrot.lane.b32.xlu0 %v1959_v39, %s9771_s27 }
 0x7c8   :  { %1967 = vrot.lane.b32.xlu0 %v1959_v39, %s9770_s4  ;;  %1988 = vrot.lane.b32.xlu1 %v10470_v50, %s9770_s4 }
 0x7cc   :  { %1985 = vrot.lane.b32.xlu0 %v10470_v50, %s9769_s24 }
 0x836   :  { %v1962_v14 = vpop.permute.xlu0 %1961  ;;  %v1965_v15 = vpop.permute.xlu1 %1964 }
 0x837   :  { %v1970_v16 = vsel %vm1898_vm7, %v1959_v39, %v1962_v14  ;;  %v9068_v39 = vld [vmem:[%s12545_s7 + $0x204] ss:$8 sps:$4 sm:$0xff]   ;;  %v9075_v14 = vld [vmem:[%s12545_s7 + $0x3f0] ss:$8 sps:$4 sm:$0xff]  }
 0x838   :  { %v1971_v17 = vsel %vm668_vm6, %v1970_v16, %v1965_v15  ;;  %v9080_v15 = vld [vmem:[%s12545_s7 + $0x2e4] ss:$8 sps:$4 sm:$0xff]  }
 0x839   :  { %v9083_v16 = vld [vmem:[%s12545_s7 + $0x3e4] ss:$8 sps:$4 sm:$0xff]  }
 0x83a   :  { %v1968_v20 = vpop.permute.xlu0 %1967  ;;  %v1989_v25 = vpop.permute.xlu1 %1988 }
 0x83b   :  { %v1972_v21 = vsel %vm1901_vm8, %v1971_v17, %v1968_v20  ;;  %v9078_v17 = vld [vmem:[%s12545_s7 + $0x2e0] ss:$8 sps:$4 sm:$0xff]  }
 0x83c   :  { %v1976_v22 = vrot.slane %v1972_v21, %v9985_v19  ;;  %v9081_v20 = vld [vmem:[%s12545_s7 + $0x3e0] ss:$8 sps:$4 sm:$0xff]   ;;  %v9086_v21 = vld [vmem:[%s12545_s7 + $0x2d4] ss:$8 sps:$4 sm:$0xff]  }
 0x83e   :  { %v1986_v30 = vpop.permute.xlu0 %1985  ;;  %v1977_v32 = vmul.f32 %v1976_v22, %v10438_v18  ;;  %v1978_v34 = vmul.f32 %v1976_v22, %v10440_v26  ;;  %v1979_v35 = vmul.f32 %v1976_v22, %v10442_v27  ;;  %v1980_v36 = vmul.f32 %v1976_v22, %v10444_v28  ;;  %v9024_v18 = vld [vmem:[%s12545_s7 + $0x270] ss:$8 sps:$4 sm:$0xff]   ;;  %v9032_v28 = vld [vmem:[%s12545_s7 + $0x264] ss:$8 sps:$4 sm:$0xff]   ;;  %v9089_v22 = vld [vmem:[%s12545_s7 + $0x3d4] ss:$8 sps:$4 sm:$0xff]  }
 0x83f   :  { %v1992_v31 = vsel %vm668_vm6, %v1991_v29, %v1986_v30  ;;  %v9027_v26 = vld [vmem:[%s12545_s7 + $0x370] ss:$8 sps:$4 sm:$0xff]   ;;  %v9092_v30 = vld [vmem:[%s12545_s7 + $0x2c4] ss:$8 sps:$4 sm:$0xff]  }
 0x840   :  { %v1993_v33 = vsel %vm1901_vm8, %v1992_v31, %v1989_v25  ;;  %v9084_v25 = vld [vmem:[%s12545_s7 + $0x2d0] ss:$8 sps:$4 sm:$0xff]   ;;  %v9095_v31 = vld [vmem:[%s12545_s7 + $0x3c4] ss:$8 sps:$4 sm:$0xff]  }
 0x841   :  { %v1997_v40 = vrot.slane %v1993_v33, %v10212_v59  ;;  %v9087_v29 = vld [vmem:[%s12545_s7 + $0x3d0] ss:$8 sps:$4 sm:$0xff]   ;;  %v9093_v33 = vld [vmem:[%s12545_s7 + $0x3c0] ss:$8 sps:$4 sm:$0xff]  }
 0x843   :  { %v1999_v41 = vadd.f32 %v1997_v40, %v1978_v34  ;;  %v2001_v42 = vadd.f32 %v1997_v40, %v1980_v36  ;;  %v1998_v43 = vadd.f32 %v1997_v40, %v1977_v32  ;;  %v2000_v44 = vadd.f32 %v1997_v40, %v1979_v35  ;;  %v9090_v32 = vld [vmem:[%s12545_s7 + $0x2c0] ss:$8 sps:$4 sm:$0xff]   ;;  %v9098_v34 = vld [vmem:[%s12545_s7 + $0x2b4] ss:$8 sps:$4 sm:$0xff]   ;;  %v9096_v36 = vld [vmem:[%s12545_s7 + $0x2b0] ss:$8 sps:$4 sm:$0xff]  }
 0x844   :  { %v9101_v35 = vld [vmem:[%s12545_s7 + $0x3b4] ss:$8 sps:$4 sm:$0xff]   ;;  %v9099_v40 = vld [vmem:[%s12545_s7 + $0x3b0] ss:$8 sps:$4 sm:$0xff]  }
 0x845   :  { %v2003_v50 = vmax.f32 %v1999_v41, 0.0  ;;  %v2005_v45 = vmax.f32 %v2001_v42, 0.0  ;;  %v2002_v46 = vmax.f32 %v1998_v43, 0.0  ;;  %v2004_v48 = vmax.f32 %v2000_v44, 0.0  ;;  %v9104_v41 = vld [vmem:[%s12545_s7 + $0x2a4] ss:$8 sps:$4 sm:$0xff]  }
 0x846   :  { %v9107_v42 = vld [vmem:[%s12545_s7 + $0x3a4] ss:$8 sps:$4 sm:$0xff]   ;;  %v9102_v43 = vld [vmem:[%s12545_s7 + $0x2a0] ss:$8 sps:$4 sm:$0xff]  }
 0x847   :  { %v2007_v37 = vpack.c.bf16 %v2005_v45, %v2003_v50  ;;  %v10701_v27 = vpack.c.bf16 %v2004_v48, %v2002_v46  ;;  %v9105_v44 = vld [vmem:[%s12545_s7 + $0x3a0] ss:$8 sps:$4 sm:$0xff]   ;;  %v9110_v50 = vld [vmem:[%s12545_s7 + $0x294] ss:$8 sps:$4 sm:$0xff]   ;;  %v9108_v46 = vld [vmem:[%s12545_s7 + $0x290] ss:$8 sps:$4 sm:$0xff]  }
 0x848   :  { %v9113_v45 = vld [vmem:[%s12545_s7 + $0x394] ss:$8 sps:$4 sm:$0xff]   ;;  %v9111_v48 = vld [vmem:[%s12545_s7 + $0x390] ss:$8 sps:$4 sm:$0xff]  }
 0x849   :  { %2232 = vmatprep.mubr.bf16.mxu0 %v2007_v37  ;;  %2468 = vmatprep.mubr.bf16.mxu1 %v2007_v37 }
 0x84a   :  { %2233 = vmatmul.mubr.bf16.vlgmr.msra.gmra.mxu0 %v10701_v27  ;;  %2469 = vmatmul.mubr.bf16.vlgmr.msra.gmra.mxu1 %v10701_v27 }
 0x84b   :  { %2673 = vmatpush1.bf16.msra.mxu0 %v9024_v18  ;;  %2909 = vmatpush1.bf16.msra.mxu1 %v9027_v26  ;;  %v9119_v18 = vld [vmem:[%s12545_s7 + $0x384] ss:$8 sps:$4 sm:$0xff]   ;;  %v9114_v26 = vld [vmem:[%s12545_s7 + $0x280] ss:$8 sps:$4 sm:$0xff]  }
 0x84c   :  { %2704 = vmatprep.mubr.bf16.mxu0 %v2007_v37  ;;  %2940 = vmatprep.mubr.bf16.mxu1 %v2007_v37  ;;  %v9116_v37 = vld [vmem:[%s12545_s7 + $0x284] ss:$8 sps:$4 sm:$0xff]  }
 0x84d   :  { %2674 = vmatprep.subr.bf16.mxu0 %v9032_v28  ;;  %2910 = vmatprep.subr.bf16.mxu1 %v9035_v38  ;;  %v9117_v28 = vld [vmem:[%s12545_s7 + $0x380] ss:$8 sps:$4 sm:$0xff]   ;;  %s9772_s7 = smov 112  }
 0x84f   :  { %2675 = vmatpush1.bf16.msra.mxu0 %v9030_v51  ;;  %2911 = vmatpush1.bf16.msra.mxu1 %v9033_v52 }
 0x850   :  { %2676 = vmatprep.subr.bf16.mxu0 %v9038_v53  ;;  %2912 = vmatprep.subr.bf16.mxu1 %v9041_v54 }
 0x853   :  { %2677 = vmatpush1.bf16.msra.mxu0 %v9036_v55  ;;  %2913 = vmatpush1.bf16.msra.mxu1 %v9039_v56 }
 0x854   :  { %2678 = vmatprep.subr.bf16.mxu0 %v9044_v57  ;;  %2914 = vmatprep.subr.bf16.mxu1 %v9047_v58 }
 0x857   :  { %2679 = vmatpush1.bf16.msra.mxu0 %v9042_v60  ;;  %2915 = vmatpush1.bf16.msra.mxu1 %v9045_v47 }
 0x858   :  { %2680 = vmatprep.subr.bf16.mxu0 %v9050_v49  ;;  %2916 = vmatprep.subr.bf16.mxu1 %v9053_v61 }
 0x85b   :  { %2681 = vmatpush1.bf16.msra.mxu0 %v9048_v62  ;;  %2917 = vmatpush1.bf16.msra.mxu1 %v9051_v63 }
 0x85c   :  { %2682 = vmatprep.subr.bf16.mxu0 %v9056_v1  ;;  %2918 = vmatprep.subr.bf16.mxu1 %v9059_v2  ;;  %v2951_v1 = vld [vmem:[#allocation10] sm:$0xff]  ;;  %v2952_v2 = vld [vmem:[#allocation10 + $0x8] sm:$0xff] }
 0x85f   :  { %2683 = vmatpush1.bf16.msra.mxu0 %v9054_v3  ;;  %2919 = vmatpush1.bf16.msra.mxu1 %v9057_v4 }
 0x860   :  { %2684 = vmatprep.subr.bf16.mxu0 %v9062_v5  ;;  %2920 = vmatprep.subr.bf16.mxu1 %v9065_v6 }
 0x863   :  { %2685 = vmatpush1.bf16.msra.mxu0 %v9060_v7  ;;  %2921 = vmatpush1.bf16.msra.mxu1 %v9063_v8 }
 0x864   :  { %2686 = vmatprep.subr.bf16.mxu0 %v9068_v39  ;;  %2922 = vmatprep.subr.bf16.mxu1 %v9071_v9 }
 0x867   :  { %2687 = vmatpush1.bf16.msra.mxu0 %v9066_v23  ;;  %2923 = vmatpush1.bf16.msra.mxu1 %v9069_v24 }
 0x868   :  { %2688 = vmatprep.subr.bf16.mxu0 %v9074_v10  ;;  %2924 = vmatprep.subr.bf16.mxu1 %v9077_v12 }
 0x86b   :  { %2689 = vmatpush2.bf16.msra.mxu0 %v9072_v13  ;;  %2925 = vmatpush2.bf16.msra.mxu1 %v9075_v14 }
 0x86c   :  { %2690 = vmatprep.subr.bf16.mxu0 %v9080_v15  ;;  %2926 = vmatprep.subr.bf16.mxu1 %v9083_v16 }
 0x86f   :  { %2691 = vmatpush2.bf16.msra.mxu0 %v9078_v17  ;;  %2927 = vmatpush2.bf16.msra.mxu1 %v9081_v20 }
 0x870   :  { %2692 = vmatprep.subr.bf16.mxu0 %v9086_v21  ;;  %2928 = vmatprep.subr.bf16.mxu1 %v9089_v22 }
 0x873   :  { %2693 = vmatpush2.bf16.msra.mxu0 %v9084_v25  ;;  %2929 = vmatpush2.bf16.msra.mxu1 %v9087_v29 }
 0x874   :  { %2694 = vmatprep.subr.bf16.mxu0 %v9092_v30  ;;  %2930 = vmatprep.subr.bf16.mxu1 %v9095_v31 }
 0x877   :  { %2695 = vmatpush2.bf16.msra.mxu0 %v9090_v32  ;;  %2931 = vmatpush2.bf16.msra.mxu1 %v9093_v33 }
 0x878   :  { %2696 = vmatprep.subr.bf16.mxu0 %v9098_v34  ;;  %2932 = vmatprep.subr.bf16.mxu1 %v9101_v35 }
 0x87b   :  { %2697 = vmatpush2.bf16.msra.mxu0 %v9096_v36  ;;  %2933 = vmatpush2.bf16.msra.mxu1 %v9099_v40 }
 0x87c   :  { %2698 = vmatprep.subr.bf16.mxu0 %v9104_v41  ;;  %2934 = vmatprep.subr.bf16.mxu1 %v9107_v42 }
 0x87f   :  { %2699 = vmatpush2.bf16.msra.mxu0 %v9102_v43  ;;  %2935 = vmatpush2.bf16.msra.mxu1 %v9105_v44 }
 0x880   :  { %2700 = vmatprep.subr.bf16.mxu0 %v9110_v50  ;;  %2936 = vmatprep.subr.bf16.mxu1 %v9113_v45 }
 0x883   :  { %2701 = vmatpush2.bf16.msra.mxu0 %v9108_v46  ;;  %2937 = vmatpush2.bf16.msra.mxu1 %v9111_v48 }
 0x884   :  { %2702 = vmatprep.subr.bf16.mxu0 %v9116_v37  ;;  %2938 = vmatprep.subr.bf16.mxu1 %v9119_v18 }
 0x887   :  { %2703 = vmatpush2.bf16.msra.mxu0 %v9114_v26  ;;  %2939 = vmatpush2.bf16.msra.mxu1 %v9117_v28 }
 0x88a   :  { %2705 = vmatmul.mubr.bf16.vlgmr.msra.gmra.mxu0 %v10701_v27  ;;  %2941 = vmatmul.mubr.bf16.vlgmr.msra.gmra.mxu1 %v10701_v27 }
 0x88b   :  { %3023 = vmatprep.mubr.f32.mxu0 %v9768_v11  ;;  %3100 = vmatprep.mubr.f32.mxu1 %v9768_v11 }
 0x90a   :  { %v2234_v38 = vpop.f32.mrf.mxu0  ;;  %v2470_v51 = vpop.f32.mrf.mxu1 }
 0x90c   :  { %v2236_v52 = vpop.f32.mrf.mxu0  ;;  %v2472_v53 = vpop.f32.mrf.mxu1 }
 0x90e   :  { %v2238_v54 = vpop.f32.mrf.mxu0  ;;  %v2474_v55 = vpop.f32.mrf.mxu1 }
 0x910   :  { %v2240_v56 = vpop.f32.mrf.mxu0  ;;  %v2476_v57 = vpop.f32.mrf.mxu1 }
 0x94a   :  { %v2706_v58 = vpop.f32.mrf.mxu0  ;;  %v2942_v60 = vpop.f32.mrf.mxu1 }
 0x94c   :  { %v2708_v47 = vpop.f32.mrf.mxu0  ;;  %v2944_v49 = vpop.f32.mrf.mxu1 }
 0x94d   :  { %2983 = vmatprep.subr.mxu0 %v2944_v49 }
 0x94e   :  { %v2710_v61 = vpop.f32.mrf.mxu0  ;;  %v2946_v62 = vpop.f32.mrf.mxu1  ;;  %2984 = vmatpush1.msra.mxu0 %v2942_v60 }
 0x94f   :  { %2985 = vmatprep.subr.mxu0 %v2708_v47 }
 0x950   :  { %v2948_v27 = vpop.f32.mrf.mxu1  ;;  %2986 = vmatpush1.msra.mxu0 %v2706_v58  ;;  %v2712_v63 = vpop.f32.mrf.mxu0 }
 0x951   :  { %2987 = vmatprep.subr.mxu0 %v2472_v53  ;;  %3060 = vmatprep.subr.mxu1 %v2948_v27 }
 0x952   :  { %2988 = vmatpush1.msra.mxu0 %v2470_v51  ;;  %3061 = vmatpush1.msra.mxu1 %v2946_v62 }
 0x953   :  { %2989 = vmatprep.subr.mxu0 %v2236_v52  ;;  %3062 = vmatprep.subr.mxu1 %v2712_v63 }
 0x954   :  { %2990 = vmatpush1.msra.mxu0 %v2234_v38  ;;  %3063 = vmatpush1.msra.mxu1 %v2710_v61 }
 0x955   :  { %8167 = vmatmul.mubr.msk.f32.vlgmr.msra.gmra.mxu0 %vm1898_vm7, %v2951_v1  ;;  %3064 = vmatprep.subr.mxu1 %v2476_v57 }
 0x956   :  { %3065 = vmatpush1.msra.mxu1 %v2474_v55  ;;  %3029 = vmatprep.mubr.f32.mxu0 %v9768_v11 }
 0x957   :  { %3066 = vmatprep.subr.mxu1 %v2240_v56 }
 0x958   :  { %3067 = vmatpush1.msra.mxu1 %v2238_v54 }
 0x959   :  { %8168 = vmatmul.mubr.msk.f32.gmra.mxu0 %vm1898_vm7, %v2952_v2  ;;  %8169 = vmatmul.mubr.msk.f32.vlgmr.msra.gmra.mxu1 %vm1898_vm7, %v2951_v1 }
 0x95a   :  { %3106 = vmatprep.mubr.f32.mxu1 %v9768_v11 }
 0x95d   :  { %8170 = vmatmul.mubr.msk.f32.gmra.mxu1 %vm1898_vm7, %v2952_v2 }
 0xa15   :  { %v10895_v3 = vpop.f32.mrf.mxu0 }
 0xa17   :  { %v10897_v4 = vpop.f32.mrf.mxu0 }
 0xa19   :  { %v10899_v5 = vpop.f32.mrf.mxu0  ;;  %v10901_v6 = vpop.f32.mrf.mxu1 }
 0xa1a   :  { %v3114_v7 = vadd.f32 %v10899_v5, %v10895_v3 }
 0xa1b   :  { %v10905_v8 = vpop.f32.mrf.mxu0  ;;  %v10907_v39 = vpop.f32.mrf.mxu1 }
 0xa1c   :  { %v3115_v9 = vadd.f32 %v3114_v7, %v10901_v6  ;;  %v3123_v23 = vadd.f32 %v10905_v8, %v10897_v4 }
 0xa1d   :  { %v10912_v24 = vpop.f32.mrf.mxu1 }
 0xa1e   :  { %v3124_v10 = vadd.f32 %v3123_v23, %v10907_v39  ;;  %v3116_v12 = vadd.f32 %v3115_v9, %v10912_v24 }
 0xa1f   :  { %v10916_v13 = vpop.f32.mrf.mxu1 }
 0xa20   :  { %v3117_v14 = vrot.slane %v3116_v12, 4  ;;  %v3125_v15 = vadd.f32 %v3124_v10, %v10916_v13 }
 0xa22   :  { %v3118_v16 = vadd.f32 %v3117_v14, %v3116_v12  ;;  %v3126_v17 = vrot.slane %v3125_v15, 4 }
 0xa24   :  { %v3119_v20 = vrot.slane %v3118_v16, 2  ;;  %v3127_v22 = vadd.f32 %v3126_v17, %v3125_v15 }
 0xa26   :  { %v3120_v21 = vadd.f32 %v3119_v20, %v3118_v16  ;;  %v3128_v30 = vrot.slane %v3127_v22, 2 }
 0xa28   :  { %v3121_v25 = vrot.slane %v3120_v21, 1  ;;  %v3129_v31 = vadd.f32 %v3128_v30, %v3127_v22 }
 0xa2a   :  { %v3122_v29 = vadd.f32 %v3121_v25, %v3120_v21  ;;  %v3130_v32 = vrot.slane %v3129_v31, 1 }
 0xa2c   :  { %3137 = vrot.lane.b32.xlu1 %v3122_v29, %s9770_s4  ;;  %3133 = vrot.lane.b32.xlu0 %v3122_v29, %s9772_s7  ;;  %v3131_v33 = vadd.f32 %v3130_v32, %v3129_v31 }
 0xa30   :  { %3145 = vrot.lane.b32.xlu1 %v3122_v29, %s9769_s24  ;;  %3141 = vrot.lane.b32.xlu0 %v3122_v29, %s9773_s25 }
 0xa34   :  { %3153 = vrot.lane.b32.xlu1 %v3122_v29, %s9771_s27  ;;  %3149 = vrot.lane.b32.xlu0 %v3122_v29, %s9774_s3 }
 0xa38   :  { %3157 = vrot.lane.b32.xlu0 %v3122_v29, %s9775_s8  ;;  %3163 = vrot.lane.b32.xlu1 %v3131_v33, %s9772_s7 }
 0xa3c   :  { %3167 = vrot.lane.b32.xlu0 %v3131_v33, %s9770_s4  ;;  %3171 = vrot.lane.b32.xlu1 %v3131_v33, %s9773_s25 }
 0xa40   :  { %3175 = vrot.lane.b32.xlu0 %v3131_v33, %s9769_s24  ;;  %3179 = vrot.lane.b32.xlu1 %v3131_v33, %s9774_s3 }
 0xa44   :  { %3183 = vrot.lane.b32.xlu0 %v3131_v33, %s9771_s27  ;;  %3187 = vrot.lane.b32.xlu1 %v3131_v33, %s9775_s8 }
 0xa9e   :  { %v3138_v34 = vpop.permute.xlu1 %3137  ;;  %v3134_v35 = vpop.permute.xlu0 %3133 }
 0xa9f   :  { %v3136_v36 = vadd.f32 %v3134_v35, %v3122_v29 }
 0xaa1   :  { %v3140_v40 = vadd.f32 %v3138_v34, %v3136_v36 }
 0xaa2   :  { %v3146_v41 = vpop.permute.xlu1 %3145  ;;  %v3142_v42 = vpop.permute.xlu0 %3141 }
 0xaa3   :  { %v3144_v43 = vadd.f32 %v3142_v42, %v3140_v40 }
 0xaa5   :  { %v3148_v44 = vadd.f32 %v3146_v41, %v3144_v43 }
 0xaa6   :  { %v3154_v50 = vpop.permute.xlu1 %3153  ;;  %v3150_v45 = vpop.permute.xlu0 %3149 }
 0xaa7   :  { %v3152_v46 = vadd.f32 %v3150_v45, %v3148_v44 }
 0xaa9   :  { %v3156_v48 = vadd.f32 %v3154_v50, %v3152_v46 }
 0xaaa   :  { %v3158_v37 = vpop.permute.xlu0 %3157  ;;  %v3164_v18 = vpop.permute.xlu1 %3163 }
 0xaab   :  { %v3160_v26 = vadd.f32 %v3158_v37, %v3156_v48 }
 0xaad   :  { %v3161_v28 = vadd.f32 %v3160_v26, %v3131_v33 }
 0xaae   :  { %v3168_v38 = vpop.permute.xlu0 %3167  ;;  %v3172_v51 = vpop.permute.xlu1 %3171 }
 0xaaf   :  { %v3166_v52 = vadd.f32 %v3164_v18, %v3161_v28 }
 0xab1   :  { %v3170_v53 = vadd.f32 %v3168_v38, %v3166_v52 }
 0xab2   :  { %v3176_v54 = vpop.permute.xlu0 %3175  ;;  %v3180_v56 = vpop.permute.xlu1 %3179 }
 0xab3   :  { %v3174_v55 = vadd.f32 %v3172_v51, %v3170_v53  ;;  %v11020_v53 = vld [vmem:[#allocation12] sm:$0x3] }
 0xab5   :  { %v3178_v57 = vadd.f32 %v3176_v54, %v3174_v55  ;;  %v9120_v54 = vld [vmem:[#allocation13 + $0x70] ss:$8 sps:$4 sm:$0xff]   ;;  %v9122_v55 = vld [vmem:[#allocation13 + $0x74] ss:$8 sps:$4 sm:$0xff]  }
 0xab6   :  { %v3184_v60 = vpop.permute.xlu0 %3183  ;;  %v3188_v49 = vpop.permute.xlu1 %3187  ;;  %3612 = vmatprep.subr.bf16.mxu0 %v9122_v55 }
 0xab7   :  { %v3182_v58 = vadd.f32 %v3180_v56, %v3178_v57  ;;  %v9123_v56 = vld [vmem:[#allocation13 + $0x170] ss:$8 sps:$4 sm:$0xff]   ;;  %v9125_v57 = vld [vmem:[#allocation13 + $0x174] ss:$8 sps:$4 sm:$0xff]   ;;  %3613 = vmatpush1.bf16.msra.mxu0 %v9120_v54 }
 0xab8   :  { %3858 = vmatprep.subr.bf16.mxu1 %v9125_v57 }
 0xab9   :  { %v3186_v47 = vadd.f32 %v3184_v60, %v3182_v58  ;;  %v9128_v58 = vld [vmem:[#allocation13 + $0x64] ss:$8 sps:$4 sm:$0xff]   ;;  %3859 = vmatpush1.bf16.msra.mxu1 %v9123_v56 }
 0xaba   :  { %v9131_v60 = vld [vmem:[#allocation13 + $0x164] ss:$8 sps:$4 sm:$0xff]   ;;  %3614 = vmatprep.subr.bf16.mxu0 %v9128_v58 }
 0xabb   :  { %v3190_v61 = vadd.f32 %v3188_v49, %v3186_v47  ;;  %v9126_v47 = vld [vmem:[#allocation13 + $0x60] ss:$8 sps:$4 sm:$0xff]   ;;  %3860 = vmatprep.subr.bf16.mxu1 %v9131_v60 }
 0xabc   :  { %v9129_v49 = vld [vmem:[#allocation13 + $0x160] ss:$8 sps:$4 sm:$0xff]   ;;  %3615 = vmatpush1.bf16.msra.mxu0 %v9126_v47 }
 0xabd   :  { %v3192_v62 = vmul.f32 0.001953125, %v3190_v61  ;;  %v9134_v61 = vld [vmem:[#allocation13 + $0x54] ss:$8 sps:$4 sm:$0xff]   ;;  %3861 = vmatpush1.bf16.msra.mxu1 %v9129_v49 }
 0xabe   :  { %3616 = vmatprep.subr.bf16.mxu0 %v9134_v61 }
 0xabf   :  { %3197 = vrot.lane.b32.xlu1 %v3192_v62, %s9771_s27  ;;  %3194 = vrot.lane.b32.xlu0 %v3192_v62, %s9775_s8 }
 0xac3   :  { %3203 = vrot.lane.b32.xlu1 %v3192_v62, %s9769_s24  ;;  %3200 = vrot.lane.b32.xlu0 %v3192_v62, %s9774_s3 }
 0xac7   :  { %3209 = vrot.lane.b32.xlu1 %v3192_v62, %s9770_s4  ;;  %3206 = vrot.lane.b32.xlu0 %v3192_v62, %s9773_s25 }
 0xacb   :  { %3212 = vrot.lane.b32.xlu0 %v3192_v62, %s9772_s7 }
 0xb31   :  { %v3198_v27 = vpop.permute.xlu1 %3197  ;;  %v3195_v63 = vpop.permute.xlu0 %3194 }
 0xb32   :  { %v3215_v1 = vsel %vm216_vm0, %v3192_v62, %v3195_v63  ;;  %v9137_v62 = vld [vmem:[#allocation13 + $0x154] ss:$8 sps:$4 sm:$0xff]   ;;  %v9135_v63 = vld [vmem:[#allocation13 + $0x150] ss:$8 sps:$4 sm:$0xff]  }
 0xb33   :  { %v3216_v7 = vsel %vm1898_vm7, %v3215_v1, %v3198_v27  ;;  %v9132_v27 = vld [vmem:[#allocation13 + $0x50] ss:$8 sps:$4 sm:$0xff]   ;;  %v9140_v1 = vld [vmem:[#allocation13 + $0x44] ss:$8 sps:$4 sm:$0xff]   ;;  %3862 = vmatprep.subr.bf16.mxu1 %v9137_v62 }
 0xb34   :  { %3617 = vmatpush1.bf16.msra.mxu0 %v9132_v27  ;;  %3863 = vmatpush1.bf16.msra.mxu1 %v9135_v63 }
 0xb35   :  { %v3204_v2 = vpop.permute.xlu1 %3203  ;;  %v3201_v9 = vpop.permute.xlu0 %3200  ;;  %3618 = vmatprep.subr.bf16.mxu0 %v9140_v1 }
 0xb36   :  { %v3218_v23 = vsel %vm3217_vm9, %v3216_v7, %v3201_v9  ;;  %v9138_v7 = vld [vmem:[#allocation13 + $0x40] ss:$8 sps:$4 sm:$0xff]  }
 0xb37   :  { %v3219_v10 = vsel %vm668_vm6, %v3218_v23, %v3204_v2  ;;  %v9143_v2 = vld [vmem:[#allocation13 + $0x144] ss:$8 sps:$4 sm:$0xff]   ;;  %v9141_v9 = vld [vmem:[#allocation13 + $0x140] ss:$8 sps:$4 sm:$0xff]   ;;  %v9146_v23 = vld [vmem:[#allocation13 + $0x34] ss:$8 sps:$4 sm:$0xff]  }
 0xb38   :  { %3864 = vmatprep.subr.bf16.mxu1 %v9143_v2  ;;  %3619 = vmatpush1.bf16.msra.mxu0 %v9138_v7  ;;  %v9168_v2 = vld [vmem:[#allocation13 + $0xf0] ss:$8 sps:$4 sm:$0xff]   ;;  %v9170_v7 = vld [vmem:[#allocation13 + $0xf4] ss:$8 sps:$4 sm:$0xff]  }
 0xb39   :  { %v3207_v12 = vpop.permute.xlu0 %3206  ;;  %v3210_v14 = vpop.permute.xlu1 %3209  ;;  %3865 = vmatpush1.bf16.msra.mxu1 %v9141_v9  ;;  %3620 = vmatprep.subr.bf16.mxu0 %v9146_v23  ;;  %v9171_v9 = vld [vmem:[#allocation13 + $0x1f0] ss:$8 sps:$4 sm:$0xff]   ;;  %v9174_v23 = vld [vmem:[#allocation13 + $0xe0] ss:$8 sps:$4 sm:$0xff]  }
 0xb3a   :  { %v3221_v15 = vsel %vm3220_vm10, %v3219_v10, %v3207_v12  ;;  %v9149_v10 = vld [vmem:[#allocation13 + $0x134] ss:$8 sps:$4 sm:$0xff]   ;;  %v9144_v12 = vld [vmem:[#allocation13 + $0x30] ss:$8 sps:$4 sm:$0xff]  }
 0xb3b   :  { %v3222_v16 = vsel %vm1901_vm8, %v3221_v15, %v3210_v14  ;;  %v9147_v14 = vld [vmem:[#allocation13 + $0x130] ss:$8 sps:$4 sm:$0xff]   ;;  %v9152_v15 = vld [vmem:[#allocation13 + $0x24] ss:$8 sps:$4 sm:$0xff]   ;;  %3866 = vmatprep.subr.bf16.mxu1 %v9149_v10 }
 0xb3c   :  { %3621 = vmatpush1.bf16.msra.mxu0 %v9144_v12  ;;  %v9176_v10 = vld [vmem:[#allocation13 + $0xe4] ss:$8 sps:$4 sm:$0xff]   ;;  %v9177_v12 = vld [vmem:[#allocation13 + $0x1e0] ss:$8 sps:$4 sm:$0xff]  }
 0xb3d   :  { %v3213_v17 = vpop.permute.xlu0 %3212  ;;  %3867 = vmatpush1.bf16.msra.mxu1 %v9147_v14  ;;  %3622 = vmatprep.subr.bf16.mxu0 %v9152_v15  ;;  %v9179_v14 = vld [vmem:[#allocation13 + $0x1e4] ss:$8 sps:$4 sm:$0xff]   ;;  %v9180_v15 = vld [vmem:[#allocation13 + $0xd0] ss:$8 sps:$4 sm:$0xff]  }
 0xb3e   :  { %v3224_v20 = vsel %vm3223_vm11, %v3222_v16, %v3213_v17  ;;  %v9155_v16 = vld [vmem:[#allocation13 + $0x124] ss:$8 sps:$4 sm:$0xff]   ;;  %v9150_v17 = vld [vmem:[#allocation13 + $0x20] ss:$8 sps:$4 sm:$0xff]  }
 0xb3f   :  { %v3228_v21 = vrot.slane %v3224_v20, %v9985_v19  ;;  %v9153_v20 = vld [vmem:[#allocation13 + $0x120] ss:$8 sps:$4 sm:$0xff]   ;;  %3868 = vmatprep.subr.bf16.mxu1 %v9155_v16  ;;  %v9182_v16 = vld [vmem:[#allocation13 + $0xd4] ss:$8 sps:$4 sm:$0xff]  }
 0xb40   :  { %3623 = vmatpush1.bf16.msra.mxu0 %v9150_v17  ;;  %v9183_v17 = vld [vmem:[#allocation13 + $0x1d0] ss:$8 sps:$4 sm:$0xff]  }
 0xb41   :  { %v10949_v22 = vsub.f32 %v10895_v3, %v3228_v21  ;;  %v10952_v25 = vsub.f32 %v10897_v4, %v3228_v21  ;;  %v10955_v29 = vsub.f32 %v10899_v5, %v3228_v21  ;;  %v10958_v30 = vsub.f32 %v10905_v8, %v3228_v21  ;;  %3869 = vmatpush1.bf16.msra.mxu1 %v9153_v20  ;;  %v9185_v20 = vld [vmem:[#allocation13 + $0x1d4] ss:$8 sps:$4 sm:$0xff]  }
 0xb42   :  { %v10961_v31 = vsub.f32 %v10901_v6, %v3228_v21  ;;  %v10964_v32 = vsub.f32 %v10907_v39, %v3228_v21  ;;  %v10967_v33 = vsub.f32 %v10912_v24, %v3228_v21  ;;  %v10970_v3 = vsub.f32 %v10916_v13, %v3228_v21  ;;  %v9158_v21 = vld [vmem:[#allocation13 + $0x14] ss:$8 sps:$4 sm:$0xff]  }
 0xb43   :  { %v3237_v4 = vmul.f32 %v10949_v22, %v10949_v22  ;;  %v3238_v5 = vmul.f32 %v10952_v25, %v10952_v25  ;;  %v3239_v8 = vmul.f32 %v10955_v29, %v10955_v29  ;;  %v3240_v6 = vmul.f32 %v10958_v30, %v10958_v30  ;;  %3624 = vmatprep.subr.bf16.mxu0 %v9158_v21 }
 0xb44   :  { %v3241_v39 = vmul.f32 %v10961_v31, %v10961_v31  ;;  %v3242_v24 = vmul.f32 %v10964_v32, %v10964_v32  ;;  %v3243_v35 = vmul.f32 %v10967_v33, %v10967_v33  ;;  %v3244_v36 = vmul.f32 %v10970_v3, %v10970_v3 }
 0xb45   :  { %v3245_v13 = vadd.f32 %v3239_v8, %v3237_v4  ;;  %v3254_v34 = vadd.f32 %v3240_v6, %v3238_v5  ;;  %v9161_v4 = vld [vmem:[#allocation13 + $0x114] ss:$8 sps:$4 sm:$0xff]   ;;  %v9156_v5 = vld [vmem:[#allocation13 + $0x10] ss:$8 sps:$4 sm:$0xff]   ;;  %v9164_v6 = vld [vmem:[#allocation13 + $0x4] ss:$8 sps:$4 sm:$0xff]  }
 0xb46   :  { %v9159_v8 = vld [vmem:[#allocation13 + $0x110] ss:$8 sps:$4 sm:$0xff]   ;;  %3870 = vmatprep.subr.bf16.mxu1 %v9161_v4  ;;  %3625 = vmatpush1.bf16.msra.mxu0 %v9156_v5  ;;  %v9186_v5 = vld [vmem:[#allocation13 + $0xc0] ss:$8 sps:$4 sm:$0xff]  }
 0xb47   :  { %v3246_v40 = vadd.f32 %v3245_v13, %v3241_v39  ;;  %v3255_v41 = vadd.f32 %v3254_v34, %v3242_v24  ;;  %v9167_v39 = vld [vmem:[#allocation13 + $0x104] ss:$8 sps:$4 sm:$0xff]   ;;  %v9162_v24 = vld [vmem:[#allocation13] ss:$8 sps:$4 sm:$0xff]   ;;  %3871 = vmatpush1.bf16.msra.mxu1 %v9159_v8  ;;  %3626 = vmatprep.subr.bf16.mxu0 %v9164_v6 }
 0xb48   :  { %v9165_v13 = vld [vmem:[#allocation13 + $0x100] ss:$8 sps:$4 sm:$0xff]   ;;  %3872 = vmatprep.subr.bf16.mxu1 %v9167_v39  ;;  %v9188_v8 = vld [vmem:[#allocation13 + $0xc4] ss:$8 sps:$4 sm:$0xff]  }
 0xb49   :  { %v3247_v42 = vadd.f32 %v3246_v40, %v3243_v35  ;;  %v3256_v43 = vadd.f32 %v3255_v41, %v3244_v36  ;;  %v9189_v6 = vld [vmem:[#allocation13 + $0x1c0] ss:$8 sps:$4 sm:$0xff]   ;;  %v9191_v39 = vld [vmem:[#allocation13 + $0x1c4] ss:$8 sps:$4 sm:$0xff]  }
 0xb4a   :  { %3627 = vmatpush1.bf16.msra.mxu0 %v9162_v24  ;;  %v9192_v24 = vld [vmem:[#allocation13 + $0xb0] ss:$8 sps:$4 sm:$0xff]  }
 0xb4b   :  { %v3248_v44 = vrot.slane %v3247_v42, 4  ;;  %v3257_v45 = vrot.slane %v3256_v43, 4  ;;  %3873 = vmatpush1.bf16.msra.mxu1 %v9165_v13  ;;  %3628 = vmatprep.subr.bf16.mxu0 %v9170_v7  ;;  %v9194_v13 = vld [vmem:[#allocation13 + $0xb4] ss:$8 sps:$4 sm:$0xff]  }
 0xb4d   :  { %v3249_v50 = vadd.f32 %v3248_v44, %v3247_v42  ;;  %v3258_v37 = vadd.f32 %v3257_v45, %v3256_v43 }
 0xb4e   :  { %3629 = vmatpush2.bf16.msra.mxu0 %v9168_v2 }
 0xb4f   :  { %v3250_v46 = vrot.slane %v3249_v50, 2  ;;  %v3259_v28 = vrot.slane %v3258_v37, 2  ;;  %3630 = vmatprep.subr.bf16.mxu0 %v9176_v10 }
 0xb51   :  { %v3251_v48 = vadd.f32 %v3250_v46, %v3249_v50  ;;  %v3260_v38 = vadd.f32 %v3259_v28, %v3258_v37 }
 0xb52   :  { %3631 = vmatpush2.bf16.msra.mxu0 %v9174_v23 }
 0xb53   :  { %v3252_v18 = vrot.slane %v3251_v48, 1  ;;  %v3261_v51 = vrot.slane %v3260_v38, 1  ;;  %3632 = vmatprep.subr.bf16.mxu0 %v9182_v16 }
 0xb55   :  { %v10988_v26 = vadd.f32 %v3252_v18, %v3251_v48  ;;  %v11002_v52 = vadd.f32 %v3261_v51, %v3260_v38 }
 0xb56   :  { %3633 = vmatpush2.bf16.msra.mxu0 %v9180_v15 }
 0xb57   :  { %3268 = vrot.lane.b32.xlu0 %v10988_v26, %s9770_s4  ;;  %3264 = vrot.lane.b32.xlu1 %v10988_v26, %s9772_s7 }
 0xb58   :  { %3634 = vmatprep.subr.bf16.mxu0 %v9188_v8 }
 0xb5a   :  { %3635 = vmatpush2.bf16.msra.mxu0 %v9186_v5 }
 0xb5b   :  { %3276 = vrot.lane.b32.xlu0 %v10988_v26, %s9769_s24  ;;  %3272 = vrot.lane.b32.xlu1 %v10988_v26, %s9773_s25 }
 0xb5c   :  { %3636 = vmatprep.subr.bf16.mxu0 %v9194_v13 }
 0xb5e   :  { %3637 = vmatpush2.bf16.msra.mxu0 %v9192_v24 }
 0xb5f   :  { %3284 = vrot.lane.b32.xlu0 %v10988_v26, %s9771_s27  ;;  %3280 = vrot.lane.b32.xlu1 %v10988_v26, %s9774_s3 }
 0xb63   :  { %3294 = vrot.lane.b32.xlu0 %v11002_v52, %s9772_s7  ;;  %3288 = vrot.lane.b32.xlu1 %v10988_v26, %s9775_s8 }
 0xb67   :  { %3302 = vrot.lane.b32.xlu0 %v11002_v52, %s9773_s25  ;;  %3298 = vrot.lane.b32.xlu1 %v11002_v52, %s9770_s4 }
 0xb6b   :  { %3310 = vrot.lane.b32.xlu0 %v11002_v52, %s9774_s3  ;;  %3306 = vrot.lane.b32.xlu1 %v11002_v52, %s9769_s24 }
 0xb6f   :  { %3318 = vrot.lane.b32.xlu0 %v11002_v52, %s9775_s8  ;;  %3314 = vrot.lane.b32.xlu1 %v11002_v52, %s9771_s27 }
 0xb73   :  { %3368 = vrot.lane.b32.xlu0 %v11020_v53, %s9775_s8 }
 0xb77   :  { %3371 = vrot.lane.b32.xlu0 %v11020_v53, %s9771_s27 }
 0xb7b   :  { %3374 = vrot.lane.b32.xlu0 %v11020_v53, %s9774_s3 }
 0xb7f   :  { %3377 = vrot.lane.b32.xlu0 %v11020_v53, %s9769_s24 }
 0xbc9   :  { %v3269_v34 = vpop.permute.xlu0 %3268  ;;  %v3265_v35 = vpop.permute.xlu1 %3264 }
 0xbca   :  { %v3267_v36 = vadd.f32 %v3265_v35, %v10988_v26  ;;  %v9197_v35 = vld [vmem:[#allocation13 + $0x1b4] ss:$8 sps:$4 sm:$0xff]  }
 0xbcc   :  { %v3271_v40 = vadd.f32 %v3269_v34, %v3267_v36  ;;  %v9195_v34 = vld [vmem:[#allocation13 + $0x1b0] ss:$8 sps:$4 sm:$0xff]   ;;  %v9198_v36 = vld [vmem:[#allocation13 + $0xa0] ss:$8 sps:$4 sm:$0xff]  }
 0xbcd   :  { %v3277_v41 = vpop.permute.xlu0 %3276  ;;  %v3273_v42 = vpop.permute.xlu1 %3272 }
 0xbce   :  { %v3275_v43 = vadd.f32 %v3273_v42, %v3271_v40  ;;  %v9200_v40 = vld [vmem:[#allocation13 + $0xa4] ss:$8 sps:$4 sm:$0xff]  }
 0xbcf   :  { %v9203_v42 = vld [vmem:[#allocation13 + $0x1a4] ss:$8 sps:$4 sm:$0xff]   ;;  %3638 = vmatprep.subr.bf16.mxu0 %v9200_v40 }
 0xbd0   :  { %v3279_v44 = vadd.f32 %v3277_v41, %v3275_v43  ;;  %v9201_v41 = vld [vmem:[#allocation13 + $0x1a0] ss:$8 sps:$4 sm:$0xff]   ;;  %3639 = vmatpush2.bf16.msra.mxu0 %v9198_v36  ;;  %v9206_v43 = vld [vmem:[#allocation13 + $0x94] ss:$8 sps:$4 sm:$0xff]  }
 0xbd1   :  { %v3285_v50 = vpop.permute.xlu0 %3284  ;;  %v3281_v45 = vpop.permute.xlu1 %3280  ;;  %3640 = vmatprep.subr.bf16.mxu0 %v9206_v43 }
 0xbd2   :  { %v3283_v46 = vadd.f32 %v3281_v45, %v3279_v44  ;;  %v9209_v44 = vld [vmem:[#allocation13 + $0x194] ss:$8 sps:$4 sm:$0xff]   ;;  %v9207_v45 = vld [vmem:[#allocation13 + $0x190] ss:$8 sps:$4 sm:$0xff]  }
 0xbd4   :  { %v3287_v48 = vadd.f32 %v3285_v50, %v3283_v46  ;;  %v9204_v50 = vld [vmem:[#allocation13 + $0x90] ss:$8 sps:$4 sm:$0xff]   ;;  %v9212_v46 = vld [vmem:[#allocation13 + $0x84] ss:$8 sps:$4 sm:$0xff]  }
 0xbd5   :  { %v3295_v37 = vpop.permute.xlu0 %3294  ;;  %v3289_v18 = vpop.permute.xlu1 %3288  ;;  %3641 = vmatpush2.bf16.msra.mxu0 %v9204_v50 }
 0xbd6   :  { %v3291_v28 = vadd.f32 %v3289_v18, %v3287_v48  ;;  %v9215_v48 = vld [vmem:[#allocation13 + $0x184] ss:$8 sps:$4 sm:$0xff]   ;;  %v9213_v18 = vld [vmem:[#allocation13 + $0x180] ss:$8 sps:$4 sm:$0xff]   ;;  %3642 = vmatprep.subr.bf16.mxu0 %v9212_v46 }
 0xbd8   :  { %v3292_v38 = vadd.f32 %v3291_v28, %v11002_v52  ;;  %v9173_v52 = vld [vmem:[#allocation13 + $0x1f4] ss:$8 sps:$4 sm:$0xff]  }
 0xbd9   :  { %v3303_v51 = vpop.permute.xlu0 %3302  ;;  %v3299_v54 = vpop.permute.xlu1 %3298  ;;  %3874 = vmatprep.subr.bf16.mxu1 %v9173_v52  ;;  %v9218_v28 = vld [vmem:[#allocation13 + $0x274] ss:$8 sps:$4 sm:$0xff]  }
 0xbda   :  { %v3297_v55 = vadd.f32 %v3295_v37, %v3292_v38  ;;  %3875 = vmatpush2.bf16.msra.mxu1 %v9171_v9  ;;  %v9210_v37 = vld [vmem:[#allocation13 + $0x80] ss:$8 sps:$4 sm:$0xff]   ;;  %v9221_v38 = vld [vmem:[#allocation13 + $0x374] ss:$8 sps:$4 sm:$0xff]  }
 0xbdb   :  { %3876 = vmatprep.subr.bf16.mxu1 %v9179_v14  ;;  %3643 = vmatpush2.bf16.msra.mxu0 %v9210_v37 }
 0xbdc   :  { %v3301_v56 = vadd.f32 %v3299_v54, %v3297_v55  ;;  %4104 = vmatprep.subr.bf16.mxu0 %v9218_v28  ;;  %v9224_v28 = vld [vmem:[#allocation13 + $0x264] ss:$8 sps:$4 sm:$0xff]  }
 0xbdd   :  { %v3307_v57 = vpop.permute.xlu1 %3306  ;;  %v3311_v58 = vpop.permute.xlu0 %3310 }
 0xbde   :  { %v3305_v26 = vadd.f32 %v3303_v51, %v3301_v56  ;;  %3877 = vmatpush2.bf16.msra.mxu1 %v9177_v12 }
 0xbdf   :  { %3878 = vmatprep.subr.bf16.mxu1 %v9185_v20 }
 0xbe0   :  { %v3309_v60 = vadd.f32 %v3307_v57, %v3305_v26 }
 0xbe1   :  { %v3315_v49 = vpop.permute.xlu1 %3314  ;;  %v3319_v62 = vpop.permute.xlu0 %3318 }
 0xbe2   :  { %v3313_v47 = vadd.f32 %v3311_v58, %v3309_v60  ;;  %3879 = vmatpush2.bf16.msra.mxu1 %v9183_v17 }
 0xbe3   :  { %3880 = vmatprep.subr.bf16.mxu1 %v9191_v39 }
 0xbe4   :  { %v3317_v61 = vadd.f32 %v3315_v49, %v3313_v47 }
 0xbe5   :  { %v3369_v51 = vpop.permute.xlu0 %3368 }
 0xbe6   :  { %v3321_v27 = vadd.f32 %v3319_v62, %v3317_v61  ;;  %3881 = vmatpush2.bf16.msra.mxu1 %v9189_v6  ;;  %v3389_v60 = vsel %vm216_vm0, %v11020_v53, %v3369_v51 }
 0xbe7   :  { %3882 = vmatprep.subr.bf16.mxu1 %v9197_v35 }
 0xbe8   :  { %v3322_v63 = vmul.f32 0.001953125, %v3321_v27 }
 0xbe9   :  { %v3372_v54 = vpop.permute.xlu0 %3371 }
 0xbea   :  { %v3323_v1 = vadd.f32 1e-05, %v3322_v63  ;;  %3883 = vmatpush2.bf16.msra.mxu1 %v9195_v34  ;;  %v3390_v62 = vsel %vm1898_vm7, %v3389_v60, %v3372_v54  ;;  %v9230_v54 = vld [vmem:[#allocation13 + $0x254] ss:$8 sps:$4 sm:$0xff]  }
 0xbeb   :  { %3884 = vmatprep.subr.bf16.mxu1 %v9203_v42 }
 0xbec   :  { %9502 = vrsqrt.f32 %v3323_v1 }
 0xbed   :  { %v3375_v56 = vpop.permute.xlu0 %3374 }
 0xbee   :  { %3885 = vmatpush2.bf16.msra.mxu1 %v9201_v41  ;;  %v3391_v2 = vsel %vm3217_vm9, %v3390_v62, %v3375_v56  ;;  %v9237_v62 = vld [vmem:[#allocation13 + $0x340] ss:$8 sps:$4 sm:$0xff]  }
 0xbef   :  { %3886 = vmatprep.subr.bf16.mxu1 %v9209_v44 }
 0xbf1   :  { %v3378_v26 = vpop.permute.xlu0 %3377 }
 0xbf2   :  { %3887 = vmatpush2.bf16.msra.mxu1 %v9207_v45  ;;  %v3392_v10 = vsel %vm668_vm6, %v3391_v2, %v3378_v26  ;;  %v9228_v26 = vld [vmem:[#allocation13 + $0x250] ss:$8 sps:$4 sm:$0xff]  }
 0xbf3   :  { %3888 = vmatprep.subr.bf16.mxu1 %v9215_v48  ;;  %v9219_v48 = vld [vmem:[#allocation13 + $0x370] ss:$8 sps:$4 sm:$0xff]  }
 0xbf4   :  { %v9243_v2 = vld [vmem:[#allocation13 + $0x330] ss:$8 sps:$4 sm:$0xff]  }
 0xbf6   :  { %3889 = vmatpush2.bf16.msra.mxu1 %v9213_v18 }
 0xbf7   :  { %4350 = vmatprep.subr.bf16.mxu1 %v9221_v38  ;;  %v9227_v38 = vld [vmem:[#allocation13 + $0x364] ss:$8 sps:$4 sm:$0xff]  }
 0xbf9   :  { %v9503_v21 = vpop.eup %9502 }
 0xbfa   :  { %v11033_v4 = vmul.f32 %v9503_v21, %v11020_v53 }
 0xbfc   :  { %3330 = vrot.lane.b32.xlu0 %v11033_v4, %s9771_s27  ;;  %3327 = vrot.lane.b32.xlu1 %v11033_v4, %s9775_s8 }
 0xc00   :  { %3333 = vrot.lane.b32.xlu1 %v11033_v4, %s9774_s3  ;;  %3380 = vrot.lane.b32.xlu0 %v11020_v53, %s9773_s25 }
 0xc04   :  { %3336 = vrot.lane.b32.xlu1 %v11033_v4, %s9769_s24  ;;  %3386 = vrot.lane.b32.xlu0 %v11020_v53, %s9772_s7 }
 0xc08   :  { %3339 = vrot.lane.b32.xlu1 %v11033_v4, %s9773_s25 }
 0xc0c   :  { %3342 = vrot.lane.b32.xlu1 %v11033_v4, %s9770_s4 }
 0xc10   :  { %3345 = vrot.lane.b32.xlu1 %v11033_v4, %s9772_s7 }
 0xc14   :  { %3383 = vrot.lane.b32.xlu1 %v11020_v53, %s9770_s4 }
 0xc6e   :  { %v3328_v55 = vpop.permute.xlu1 %3327  ;;  %v3331_v49 = vpop.permute.xlu0 %3330 }
 0xc6f   :  { %v3348_v61 = vsel %vm216_vm0, %v11033_v4, %v3328_v55  ;;  %v9233_v55 = vld [vmem:[#allocation13 + $0x354] ss:$8 sps:$4 sm:$0xff]  }
 0xc70   :  { %v3349_v27 = vsel %vm1898_vm7, %v3348_v61, %v3331_v49  ;;  %v9239_v49 = vld [vmem:[#allocation13 + $0x344] ss:$8 sps:$4 sm:$0xff]   ;;  %v9234_v61 = vld [vmem:[#allocation13 + $0x240] ss:$8 sps:$4 sm:$0xff]  }
 0xc72   :  { %v3334_v57 = vpop.permute.xlu1 %3333  ;;  %v3381_v9 = vpop.permute.xlu0 %3380 }
 0xc73   :  { %v3350_v1 = vsel %vm3217_vm9, %v3349_v27, %v3334_v57  ;;  %v3393_v16 = vsel %vm3220_vm10, %v3392_v10, %v3381_v9  ;;  %v9242_v27 = vld [vmem:[#allocation13 + $0x234] ss:$8 sps:$4 sm:$0xff]   ;;  %v9251_v9 = vld [vmem:[#allocation13 + $0x324] ss:$8 sps:$4 sm:$0xff]  }
 0xc74   :  { %v9257_v10 = vld [vmem:[#allocation13 + $0x314] ss:$8 sps:$4 sm:$0xff]  }
 0xc76   :  { %v3337_v58 = vpop.permute.xlu1 %3336  ;;  %v3387_v15 = vpop.permute.xlu0 %3386 }
 0xc77   :  { %v3351_v7 = vsel %vm668_vm6, %v3350_v1, %v3337_v58  ;;  %v9231_v58 = vld [vmem:[#allocation13 + $0x350] ss:$8 sps:$4 sm:$0xff]  }
 0xc78   :  { %v9240_v1 = vld [vmem:[#allocation13 + $0x230] ss:$8 sps:$4 sm:$0xff]  }
 0xc7a   :  { %v3340_v47 = vpop.permute.xlu1 %3339 }
 0xc7b   :  { %v3352_v52 = vsel %vm3220_vm10, %v3351_v7, %v3340_v47  ;;  %v9236_v47 = vld [vmem:[#allocation13 + $0x244] ss:$8 sps:$4 sm:$0xff]  }
 0xc7c   :  { %v9248_v7 = vld [vmem:[#allocation13 + $0x224] ss:$8 sps:$4 sm:$0xff]  }
 0xc7e   :  { %v3343_v63 = vpop.permute.xlu1 %3342 }
 0xc7f   :  { %v3353_v53 = vsel %vm1901_vm8, %v3352_v52, %v3343_v63  ;;  %v9245_v63 = vld [vmem:[#allocation13 + $0x334] ss:$8 sps:$4 sm:$0xff]   ;;  %v9246_v52 = vld [vmem:[#allocation13 + $0x220] ss:$8 sps:$4 sm:$0xff]  }
 0xc82   :  { %v3346_v23 = vpop.permute.xlu1 %3345 }
 0xc83   :  { %v3354_v12 = vsel %vm3223_vm11, %v3353_v53, %v3346_v23  ;;  %v9249_v53 = vld [vmem:[#allocation13 + $0x320] ss:$8 sps:$4 sm:$0xff]   ;;  %v9254_v23 = vld [vmem:[#allocation13 + $0x214] ss:$8 sps:$4 sm:$0xff]  }
 0xc84   :  { %v3358_v14 = vrot.slane %v3354_v12, %v9985_v19  ;;  %v9252_v12 = vld [vmem:[#allocation13 + $0x210] ss:$8 sps:$4 sm:$0xff]  }
 0xc86   :  { %v3384_v17 = vpop.permute.xlu1 %3383  ;;  %v3360_v4 = vmul.f32 %v3358_v14, %v10952_v25  ;;  %v3362_v8 = vmul.f32 %v3358_v14, %v10958_v30  ;;  %v3359_v6 = vmul.f32 %v3358_v14, %v10949_v22  ;;  %v3361_v39 = vmul.f32 %v3358_v14, %v10955_v29 }
 0xc87   :  { %v3394_v20 = vsel %vm1901_vm8, %v3393_v16, %v3384_v17  ;;  %v3364_v24 = vmul.f32 %v3358_v14, %v10964_v32  ;;  %v3366_v13 = vmul.f32 %v3358_v14, %v10970_v3  ;;  %v3363_v22 = vmul.f32 %v3358_v14, %v10961_v31  ;;  %v9216_v32 = vld [vmem:[#allocation13 + $0x270] ss:$8 sps:$4 sm:$0xff]   ;;  %v9222_v31 = vld [vmem:[#allocation13 + $0x260] ss:$8 sps:$4 sm:$0xff]   ;;  %v9263_v16 = vld [vmem:[#allocation13 + $0x304] ss:$8 sps:$4 sm:$0xff]  }
 0xc88   :  { %v3395_v21 = vsel %vm3223_vm11, %v3394_v20, %v3387_v15  ;;  %v3365_v29 = vmul.f32 %v3358_v14, %v10967_v33  ;;  %v9225_v33 = vld [vmem:[#allocation13 + $0x360] ss:$8 sps:$4 sm:$0xff]   ;;  %v9255_v14 = vld [vmem:[#allocation13 + $0x310] ss:$8 sps:$4 sm:$0xff]   ;;  %v9260_v15 = vld [vmem:[#allocation13 + $0x204] ss:$8 sps:$4 sm:$0xff]  }
 0xc89   :  { %v3399_v5 = vrot.slane %v3395_v21, %v10212_v59  ;;  %v9258_v17 = vld [vmem:[#allocation13 + $0x200] ss:$8 sps:$4 sm:$0xff]   ;;  %v9266_v21 = vld [vmem:[#allocation13 + $0x2f4] ss:$8 sps:$4 sm:$0xff]  }
 0xc8a   :  { %v9261_v20 = vld [vmem:[#allocation13 + $0x300] ss:$8 sps:$4 sm:$0xff]  }
 0xc8b   :  { %v3401_v34 = vadd.f32 %v3399_v5, %v3360_v4  ;;  %v3403_v35 = vadd.f32 %v3399_v5, %v3362_v8  ;;  %v3400_v36 = vadd.f32 %v3399_v5, %v3359_v6  ;;  %v3402_v40 = vadd.f32 %v3399_v5, %v3361_v39  ;;  %v9269_v4 = vld [vmem:[#allocation13 + $0x3f4] ss:$8 sps:$4 sm:$0xff]   ;;  %v9267_v8 = vld [vmem:[#allocation13 + $0x3f0] ss:$8 sps:$4 sm:$0xff]   ;;  %v9272_v6 = vld [vmem:[#allocation13 + $0x2e4] ss:$8 sps:$4 sm:$0xff]  }
 0xc8c   :  { %v3405_v41 = vadd.f32 %v3399_v5, %v3364_v24  ;;  %v3407_v42 = vadd.f32 %v3399_v5, %v3366_v13  ;;  %v3404_v37 = vadd.f32 %v3399_v5, %v3363_v22  ;;  %v3406_v18 = vadd.f32 %v3399_v5, %v3365_v29  ;;  %v9264_v5 = vld [vmem:[#allocation13 + $0x2f0] ss:$8 sps:$4 sm:$0xff]   ;;  %v9275_v39 = vld [vmem:[#allocation13 + $0x3e4] ss:$8 sps:$4 sm:$0xff]   ;;  %v9270_v24 = vld [vmem:[#allocation13 + $0x2e0] ss:$8 sps:$4 sm:$0xff]  }
 0xc8d   :  { %v3409_v43 = vmax.f32 %v3401_v34, 0.0  ;;  %v3411_v25 = vmax.f32 %v3403_v35, 0.0  ;;  %v3408_v44 = vmax.f32 %v3400_v36, 0.0  ;;  %v3410_v50 = vmax.f32 %v3402_v40, 0.0  ;;  %v9273_v13 = vld [vmem:[#allocation13 + $0x3e0] ss:$8 sps:$4 sm:$0xff]  }
 0xc8e   :  { %v3413_v45 = vmax.f32 %v3405_v41, 0.0  ;;  %v3415_v30 = vmax.f32 %v3407_v42, 0.0  ;;  %v3412_v56 = vmax.f32 %v3404_v37, 0.0  ;;  %v3414_v57 = vmax.f32 %v3406_v18, 0.0  ;;  %v9278_v34 = vld [vmem:[#allocation13 + $0x2d4] ss:$8 sps:$4 sm:$0xff]  }
 0xc8f   :  { %v3417_v46 = vpack.c.bf16 %v3411_v25, %v3409_v43  ;;  %v11081_v3 = vpack.c.bf16 %v3410_v50, %v3408_v44  ;;  %v9281_v35 = vld [vmem:[#allocation13 + $0x3d4] ss:$8 sps:$4 sm:$0xff]   ;;  %v9276_v36 = vld [vmem:[#allocation13 + $0x2d0] ss:$8 sps:$4 sm:$0xff]   ;;  %v9284_v41 = vld [vmem:[#allocation13 + $0x2c4] ss:$8 sps:$4 sm:$0xff]  }
 0xc90   :  { %v11085_v51 = vpack.c.bf16 %v3415_v30, %v3413_v45  ;;  %v11089_v60 = vpack.c.bf16 %v3414_v57, %v3412_v56  ;;  %v9279_v40 = vld [vmem:[#allocation13 + $0x3d0] ss:$8 sps:$4 sm:$0xff]   ;;  %v9287_v42 = vld [vmem:[#allocation13 + $0x3c4] ss:$8 sps:$4 sm:$0xff]   ;;  %v9282_v43 = vld [vmem:[#allocation13 + $0x2c0] ss:$8 sps:$4 sm:$0xff]  }
 0xc91   :  { %3644 = vmatprep.mubr.bf16.mxu0 %v3417_v46  ;;  %3890 = vmatprep.mubr.bf16.mxu1 %v3417_v46  ;;  %v9285_v25 = vld [vmem:[#allocation13 + $0x3c0] ss:$8 sps:$4 sm:$0xff]   ;;  %v9290_v44 = vld [vmem:[#allocation13 + $0x2b4] ss:$8 sps:$4 sm:$0xff]   ;;  %v9288_v45 = vld [vmem:[#allocation13 + $0x2b0] ss:$8 sps:$4 sm:$0xff]  }
 0xc92   :  { %3645 = vmatmul.mubr.bf16.vlgmr.msra.gmra.mxu0 %v11081_v3  ;;  %3891 = vmatmul.mubr.bf16.vlgmr.msra.gmra.mxu1 %v11081_v3  ;;  %v9293_v50 = vld [vmem:[#allocation13 + $0x3b4] ss:$8 sps:$4 sm:$0xff]   ;;  %v9291_v30 = vld [vmem:[#allocation13 + $0x3b0] ss:$8 sps:$4 sm:$0xff]   ;;  %v9296_v22 = vld [vmem:[#allocation13 + $0x2a4] ss:$8 sps:$4 sm:$0xff]  }
 0xc93   :  { %4105 = vmatpush1.bf16.msra.mxu0 %v9216_v32  ;;  %4351 = vmatpush1.bf16.msra.mxu1 %v9219_v48  ;;  %v9299_v29 = vld [vmem:[#allocation13 + $0x3a4] ss:$8 sps:$4 sm:$0xff]   ;;  %v9297_v32 = vld [vmem:[#allocation13 + $0x3a0] ss:$8 sps:$4 sm:$0xff]   ;;  %v9302_v48 = vld [vmem:[#allocation13 + $0x294] ss:$8 sps:$4 sm:$0xff]  }
 0xc94   :  { %3654 = vmatprep.mubr.bf16.mxu0 %v11085_v51  ;;  %3900 = vmatprep.mubr.bf16.mxu1 %v11085_v51  ;;  %v9305_v37 = vld [vmem:[#allocation13 + $0x394] ss:$8 sps:$4 sm:$0xff]   ;;  %v9300_v18 = vld [vmem:[#allocation13 + $0x290] ss:$8 sps:$4 sm:$0xff]  }
 0xc95   :  { %4106 = vmatprep.subr.bf16.mxu0 %v9224_v28  ;;  %4352 = vmatprep.subr.bf16.mxu1 %v9227_v38  ;;  %v9303_v28 = vld [vmem:[#allocation13 + $0x390] ss:$8 sps:$4 sm:$0xff]   ;;  %v9308_v38 = vld [vmem:[#allocation13 + $0x284] ss:$8 sps:$4 sm:$0xff]  }
 0xc97   :  { %4107 = vmatpush1.bf16.msra.mxu0 %v9222_v31  ;;  %4353 = vmatpush1.bf16.msra.mxu1 %v9225_v33  ;;  %v9311_v31 = vld [vmem:[#allocation13 + $0x384] ss:$8 sps:$4 sm:$0xff]   ;;  %v9306_v33 = vld [vmem:[#allocation13 + $0x280] ss:$8 sps:$4 sm:$0xff]  }
 0xc98   :  { %4108 = vmatprep.subr.bf16.mxu0 %v9230_v54  ;;  %4354 = vmatprep.subr.bf16.mxu1 %v9233_v55  ;;  %v9309_v54 = vld [vmem:[#allocation13 + $0x380] ss:$8 sps:$4 sm:$0xff]  }
 0xc9a   :  { %3655 = vmatmul.mubr.bf16.gmra.mxu0 %v11089_v60  ;;  %3901 = vmatmul.mubr.bf16.gmra.mxu1 %v11089_v60 }
 0xc9b   :  { %4109 = vmatpush1.bf16.msra.mxu0 %v9228_v26  ;;  %4355 = vmatpush1.bf16.msra.mxu1 %v9231_v58 }
 0xc9c   :  { %4136 = vmatprep.mubr.bf16.mxu0 %v3417_v46  ;;  %4382 = vmatprep.mubr.bf16.mxu1 %v3417_v46  ;;  %v9294_v46 = vld [vmem:[#allocation13 + $0x2a0] ss:$8 sps:$4 sm:$0xff]  }
 0xc9d   :  { %4110 = vmatprep.subr.bf16.mxu0 %v9236_v47  ;;  %4356 = vmatprep.subr.bf16.mxu1 %v9239_v49 }
 0xc9f   :  { %4111 = vmatpush1.bf16.msra.mxu0 %v9234_v61  ;;  %4357 = vmatpush1.bf16.msra.mxu1 %v9237_v62 }
 0xca0   :  { %4112 = vmatprep.subr.bf16.mxu0 %v9242_v27  ;;  %4358 = vmatprep.subr.bf16.mxu1 %v9245_v63 }
 0xca3   :  { %4113 = vmatpush1.bf16.msra.mxu0 %v9240_v1  ;;  %4359 = vmatpush1.bf16.msra.mxu1 %v9243_v2 }
 0xca4   :  { %4114 = vmatprep.subr.bf16.mxu0 %v9248_v7  ;;  %4360 = vmatprep.subr.bf16.mxu1 %v9251_v9 }
 0xca7   :  { %4115 = vmatpush1.bf16.msra.mxu0 %v9246_v52  ;;  %4361 = vmatpush1.bf16.msra.mxu1 %v9249_v53 }
 0xca8   :  { %4116 = vmatprep.subr.bf16.mxu0 %v9254_v23  ;;  %4362 = vmatprep.subr.bf16.mxu1 %v9257_v10 }
 0xcab   :  { %4117 = vmatpush1.bf16.msra.mxu0 %v9252_v12  ;;  %4363 = vmatpush1.bf16.msra.mxu1 %v9255_v14 }
 0xcac   :  { %4118 = vmatprep.subr.bf16.mxu0 %v9260_v15  ;;  %4364 = vmatprep.subr.bf16.mxu1 %v9263_v16 }
 0xcaf   :  { %4119 = vmatpush1.bf16.msra.mxu0 %v9258_v17  ;;  %4365 = vmatpush1.bf16.msra.mxu1 %v9261_v20 }
 0xcb0   :  { %4120 = vmatprep.subr.bf16.mxu0 %v9266_v21  ;;  %4366 = vmatprep.subr.bf16.mxu1 %v9269_v4 }
 0xcb3   :  { %4121 = vmatpush2.bf16.msra.mxu0 %v9264_v5  ;;  %4367 = vmatpush2.bf16.msra.mxu1 %v9267_v8 }
 0xcb4   :  { %4122 = vmatprep.subr.bf16.mxu0 %v9272_v6  ;;  %4368 = vmatprep.subr.bf16.mxu1 %v9275_v39  ;;  %v4403_v6 = vld [vmem:[#allocation15] sm:$0xff]  ;;  %v4404_v39 = vld [vmem:[#allocation15 + $0x8] sm:$0xff] }
 0xcb7   :  { %4123 = vmatpush2.bf16.msra.mxu0 %v9270_v24  ;;  %4369 = vmatpush2.bf16.msra.mxu1 %v9273_v13  ;;  %v4405_v24 = vld [vmem:[#allocation15 + $0x10] sm:$0xff]  ;;  %v4406_v13 = vld [vmem:[#allocation15 + $0x18] sm:$0xff] }
 0xcb8   :  { %4124 = vmatprep.subr.bf16.mxu0 %v9278_v34  ;;  %4370 = vmatprep.subr.bf16.mxu1 %v9281_v35 }
 0xcbb   :  { %4125 = vmatpush2.bf16.msra.mxu0 %v9276_v36  ;;  %4371 = vmatpush2.bf16.msra.mxu1 %v9279_v40 }
 0xcbc   :  { %4126 = vmatprep.subr.bf16.mxu0 %v9284_v41  ;;  %4372 = vmatprep.subr.bf16.mxu1 %v9287_v42 }
 0xcbf   :  { %4127 = vmatpush2.bf16.msra.mxu0 %v9282_v43  ;;  %4373 = vmatpush2.bf16.msra.mxu1 %v9285_v25 }
 0xcc0   :  { %4128 = vmatprep.subr.bf16.mxu0 %v9290_v44  ;;  %4374 = vmatprep.subr.bf16.mxu1 %v9293_v50 }
 0xcc3   :  { %4129 = vmatpush2.bf16.msra.mxu0 %v9288_v45  ;;  %4375 = vmatpush2.bf16.msra.mxu1 %v9291_v30 }
 0xcc4   :  { %4130 = vmatprep.subr.bf16.mxu0 %v9296_v22  ;;  %4376 = vmatprep.subr.bf16.mxu1 %v9299_v29 }
 0xcc7   :  { %4131 = vmatpush2.bf16.msra.mxu0 %v9294_v46  ;;  %4377 = vmatpush2.bf16.msra.mxu1 %v9297_v32 }
 0xcc8   :  { %4132 = vmatprep.subr.bf16.mxu0 %v9302_v48  ;;  %4378 = vmatprep.subr.bf16.mxu1 %v9305_v37 }
 0xccb   :  { %4133 = vmatpush2.bf16.msra.mxu0 %v9300_v18  ;;  %4379 = vmatpush2.bf16.msra.mxu1 %v9303_v28 }
 0xccc   :  { %4134 = vmatprep.subr.bf16.mxu0 %v9308_v38  ;;  %4380 = vmatprep.subr.bf16.mxu1 %v9311_v31 }
 0xccf   :  { %4135 = vmatpush2.bf16.msra.mxu0 %v9306_v33  ;;  %4381 = vmatpush2.bf16.msra.mxu1 %v9309_v54 }
 0xcd2   :  { %4137 = vmatmul.mubr.bf16.vlgmr.msra.gmra.mxu0 %v11081_v3  ;;  %4383 = vmatmul.mubr.bf16.vlgmr.msra.gmra.mxu1 %v11081_v3 }
 0xcd3   :  { %4146 = vmatprep.mubr.bf16.mxu0 %v11085_v51  ;;  %4392 = vmatprep.mubr.bf16.mxu1 %v11085_v51 }
 0xcda   :  { %4147 = vmatmul.mubr.bf16.gmra.mxu0 %v11089_v60  ;;  %4393 = vmatmul.mubr.bf16.gmra.mxu1 %v11089_v60 }
 0xcdb   :  { %4483 = vmatprep.mubr.f32.mxu0 %v9768_v11  ;;  %4572 = vmatprep.mubr.f32.mxu1 %v9768_v11 }
 0xd52   :  { %v3646_v55 = vpop.f32.mrf.mxu0  ;;  %v3892_v56 = vpop.f32.mrf.mxu1 }
 0xd54   :  { %v3648_v57 = vpop.f32.mrf.mxu0  ;;  %v3894_v26 = vpop.f32.mrf.mxu1 }
 0xd56   :  { %v3650_v58 = vpop.f32.mrf.mxu0  ;;  %v3896_v47 = vpop.f32.mrf.mxu1 }
 0xd58   :  { %v3652_v49 = vpop.f32.mrf.mxu0  ;;  %v3898_v3 = vpop.f32.mrf.mxu1 }
 0xd5a   :  { %v3656_v61 = vpop.f32.mrf.mxu0  ;;  %v3902_v62 = vpop.f32.mrf.mxu1 }
 0xd5c   :  { %v3658_v27 = vpop.f32.mrf.mxu0  ;;  %v3904_v51 = vpop.f32.mrf.mxu1 }
 0xd5e   :  { %v3660_v63 = vpop.f32.mrf.mxu0  ;;  %v3906_v1 = vpop.f32.mrf.mxu1 }
 0xd60   :  { %v3662_v2 = vpop.f32.mrf.mxu0  ;;  %v3908_v60 = vpop.f32.mrf.mxu1 }
 0xd92   :  { %v4138_v7 = vpop.f32.mrf.mxu0  ;;  %v4384_v9 = vpop.f32.mrf.mxu1 }
 0xd94   :  { %v4140_v52 = vpop.f32.mrf.mxu0  ;;  %v4386_v53 = vpop.f32.mrf.mxu1 }
 0xd96   :  { %v4142_v23 = vpop.f32.mrf.mxu0  ;;  %v4388_v10 = vpop.f32.mrf.mxu1 }
 0xd98   :  { %v4144_v12 = vpop.f32.mrf.mxu0  ;;  %v4390_v14 = vpop.f32.mrf.mxu1 }
 0xd99   :  { %4435 = vmatprep.subr.mxu0 %v4390_v14 }
 0xd9a   :  { %v4148_v15 = vpop.f32.mrf.mxu0  ;;  %v4394_v16 = vpop.f32.mrf.mxu1  ;;  %4436 = vmatpush1.msra.mxu0 %v4388_v10 }
 0xd9b   :  { %4437 = vmatprep.subr.mxu0 %v4386_v53 }
 0xd9c   :  { %v4150_v17 = vpop.f32.mrf.mxu0  ;;  %v4396_v20 = vpop.f32.mrf.mxu1  ;;  %4438 = vmatpush1.msra.mxu0 %v4384_v9 }
 0xd9d   :  { %4439 = vmatprep.subr.mxu0 %v4144_v12 }
 0xd9e   :  { %v4398_v21 = vpop.f32.mrf.mxu1  ;;  %4440 = vmatpush1.msra.mxu0 %v4142_v23  ;;  %v4152_v4 = vpop.f32.mrf.mxu0 }
 0xd9f   :  { %4441 = vmatprep.subr.mxu0 %v4140_v52 }
 0xda0   :  { %v4400_v5 = vpop.f32.mrf.mxu1  ;;  %4442 = vmatpush1.msra.mxu0 %v4138_v7  ;;  %v4154_v8 = vpop.f32.mrf.mxu0 }
 0xda1   :  { %4443 = vmatprep.subr.mxu0 %v3898_v3  ;;  %4524 = vmatprep.subr.mxu1 %v4400_v5 }
 0xda2   :  { %4444 = vmatpush1.msra.mxu0 %v3896_v47  ;;  %4525 = vmatpush1.msra.mxu1 %v4398_v21 }
 0xda3   :  { %4445 = vmatprep.subr.mxu0 %v3894_v26  ;;  %4526 = vmatprep.subr.mxu1 %v4396_v20 }
 0xda4   :  { %4446 = vmatpush1.msra.mxu0 %v3892_v56  ;;  %4527 = vmatpush1.msra.mxu1 %v4394_v16 }
 0xda5   :  { %4447 = vmatprep.subr.mxu0 %v3652_v49  ;;  %4528 = vmatprep.subr.mxu1 %v4154_v8 }
 0xda6   :  { %4448 = vmatpush1.msra.mxu0 %v3650_v58  ;;  %4529 = vmatpush1.msra.mxu1 %v4152_v4 }
 0xda7   :  { %4449 = vmatprep.subr.mxu0 %v3648_v57  ;;  %4530 = vmatprep.subr.mxu1 %v4150_v17 }
 0xda8   :  { %4450 = vmatpush1.msra.mxu0 %v3646_v55  ;;  %4531 = vmatpush1.msra.mxu1 %v4148_v15 }
 0xda9   :  { %8299 = vmatmul.mubr.msk.f32.vlgmr.msra.gmra.mxu0 %vm668_vm6, %v4403_v6  ;;  %4532 = vmatprep.subr.mxu1 %v3908_v60 }
 0xdaa   :  { %4533 = vmatpush1.msra.mxu1 %v3906_v1  ;;  %4489 = vmatprep.mubr.f32.mxu0 %v9768_v11 }
 0xdab   :  { %4534 = vmatprep.subr.mxu1 %v3904_v51 }
 0xdac   :  { %4535 = vmatpush1.msra.mxu1 %v3902_v62 }
 0xdad   :  { %8300 = vmatmul.mubr.msk.f32.gmra.mxu0 %vm668_vm6, %v4404_v39  ;;  %4536 = vmatprep.subr.mxu1 %v3662_v2 }
 0xdae   :  { %4537 = vmatpush1.msra.mxu1 %v3660_v63  ;;  %4495 = vmatprep.mubr.f32.mxu0 %v9768_v11 }
 0xdaf   :  { %4538 = vmatprep.subr.mxu1 %v3658_v27 }
 0xdb0   :  { %4539 = vmatpush1.msra.mxu1 %v3656_v61 }
 0xdb1   :  { %8301 = vmatmul.mubr.msk.f32.gmra.mxu0 %vm668_vm6, %v4405_v24  ;;  %8303 = vmatmul.mubr.msk.f32.vlgmr.msra.gmra.mxu1 %vm668_vm6, %v4403_v6 }
 0xdb2   :  { %4501 = vmatprep.mubr.f32.mxu0 %v9768_v11  ;;  %4578 = vmatprep.mubr.f32.mxu1 %v9768_v11 }
 0xdb5   :  { %8302 = vmatmul.mubr.msk.f32.gmra.mxu0 %vm668_vm6, %v4406_v13  ;;  %8304 = vmatmul.mubr.msk.f32.gmra.mxu1 %vm668_vm6, %v4404_v39 }
 0xdb6   :  { %4584 = vmatprep.mubr.f32.mxu1 %v9768_v11 }
 0xdb9   :  { %8305 = vmatmul.mubr.msk.f32.gmra.mxu1 %vm668_vm6, %v4405_v24 }
 0xdba   :  { %4590 = vmatprep.mubr.f32.mxu1 %v9768_v11 }
 0xdbd   :  { %8306 = vmatmul.mubr.msk.f32.gmra.mxu1 %vm668_vm6, %v4406_v13 }
 0xe69   :  { %v11115_v34 = vpop.f32.mrf.mxu0 }
 0xe6b   :  { %v11117_v35 = vpop.f32.mrf.mxu0 }
 0xe6d   :  { %v11119_v36 = vpop.f32.mrf.mxu0 }
 0xe6e   :  { %v4598_v43 = vadd.f32 %v11119_v36, %v11115_v34 }
 0xe6f   :  { %v11121_v40 = vpop.f32.mrf.mxu0 }
 0xe70   :  { %v4611_v48 = vadd.f32 %v11121_v40, %v11117_v35 }
 0xe71   :  { %v11123_v41 = vpop.f32.mrf.mxu0  ;;  %v11125_v42 = vpop.f32.mrf.mxu1 }
 0xe72   :  { %v4599_v50 = vadd.f32 %v4598_v43, %v11123_v41 }
 0xe73   :  { %v11129_v25 = vpop.f32.mrf.mxu0  ;;  %v11131_v44 = vpop.f32.mrf.mxu1 }
 0xe74   :  { %v4612_v38 = vadd.f32 %v4611_v48, %v11129_v25 }
 0xe75   :  { %v11134_v45 = vpop.f32.mrf.mxu0  ;;  %v11136_v30 = vpop.f32.mrf.mxu1 }
 0xe76   :  { %v4600_v22 = vadd.f32 %v4599_v50, %v11134_v45 }
 0xe77   :  { %v11139_v29 = vpop.f32.mrf.mxu1  ;;  %v11147_v18 = vpop.f32.mrf.mxu0 }
 0xe78   :  { %v4601_v46 = vadd.f32 %v4600_v22, %v11125_v42  ;;  %v4613_v54 = vadd.f32 %v4612_v38, %v11147_v18 }
 0xe79   :  { %v11142_v32 = vpop.f32.mrf.mxu1 }
 0xe7a   :  { %v4602_v37 = vadd.f32 %v4601_v46, %v11136_v30  ;;  %v4614_v57 = vadd.f32 %v4613_v54, %v11131_v44 }
 0xe7b   :  { %v11149_v28 = vpop.f32.mrf.mxu1 }
 0xe7c   :  { %v4603_v31 = vadd.f32 %v4602_v37, %v11142_v32  ;;  %v4615_v47 = vadd.f32 %v4614_v57, %v11139_v29 }
 0xe7d   :  { %v11153_v33 = vpop.f32.mrf.mxu1 }
 0xe7e   :  { %v4604_v55 = vadd.f32 %v4603_v31, %v11153_v33  ;;  %v4616_v61 = vadd.f32 %v4615_v47, %v11149_v28 }
 0xe7f   :  { %v11160_v27 = vpop.f32.mrf.mxu1 }
 0xe80   :  { %v4605_v56 = vrot.slane %v4604_v55, 4  ;;  %v4617_v51 = vadd.f32 %v4616_v61, %v11160_v27 }
 0xe82   :  { %v4606_v26 = vadd.f32 %v4605_v56, %v4604_v55  ;;  %v4618_v63 = vrot.slane %v4617_v51, 4 }
 0xe84   :  { %v4607_v58 = vrot.slane %v4606_v26, 2  ;;  %v4619_v1 = vadd.f32 %v4618_v63, %v4617_v51 }
 0xe86   :  { %v4608_v49 = vadd.f32 %v4607_v58, %v4606_v26  ;;  %v4620_v2 = vrot.slane %v4619_v1, 2 }
 0xe88   :  { %v4609_v3 = vrot.slane %v4608_v49, 1  ;;  %v4621_v60 = vadd.f32 %v4620_v2, %v4619_v1 }
 0xe8a   :  { %v4610_v62 = vadd.f32 %v4609_v3, %v4608_v49  ;;  %v4622_v7 = vrot.slane %v4621_v60, 1 }
 0xe8c   :  { %4629 = vrot.lane.b32.xlu0 %v4610_v62, %s9772_s7  ;;  %4625 = vrot.lane.b32.xlu1 %v4610_v62, %s9776_s26  ;;  %v4623_v9 = vadd.f32 %v4622_v7, %v4621_v60 }
 0xe90   :  { %4637 = vrot.lane.b32.xlu0 %v4610_v62, %s9770_s4  ;;  %4633 = vrot.lane.b32.xlu1 %v4610_v62, %s9777_s10 }
 0xe94   :  { %4645 = vrot.lane.b32.xlu0 %v4610_v62, %s9773_s25  ;;  %4641 = vrot.lane.b32.xlu1 %v4610_v62, %s9778_s28 }
 0xe98   :  { %4653 = vrot.lane.b32.xlu0 %v4610_v62, %s9769_s24  ;;  %4649 = vrot.lane.b32.xlu1 %v4610_v62, %s9779_s29 }
 0xe9c   :  { %4661 = vrot.lane.b32.xlu0 %v4610_v62, %s9774_s3  ;;  %4657 = vrot.lane.b32.xlu1 %v4610_v62, %s9780_s0 }
 0xea0   :  { %4669 = vrot.lane.b32.xlu0 %v4610_v62, %s9771_s27  ;;  %4665 = vrot.lane.b32.xlu1 %v4610_v62, %s9781_s1 }
 0xea4   :  { %4677 = vrot.lane.b32.xlu0 %v4610_v62, %s9775_s8  ;;  %4673 = vrot.lane.b32.xlu1 %v4610_v62, %s9782_s5 }
 0xea8   :  { %4681 = vrot.lane.b32.xlu1 %v4610_v62, %s9759_s20  ;;  %4687 = vrot.lane.b32.xlu0 %v4623_v9, %s9776_s26 }
 0xeac   :  { %4691 = vrot.lane.b32.xlu1 %v4623_v9, %s9772_s7  ;;  %4695 = vrot.lane.b32.xlu0 %v4623_v9, %s9777_s10 }
 0xeb0   :  { %4699 = vrot.lane.b32.xlu1 %v4623_v9, %s9770_s4  ;;  %4703 = vrot.lane.b32.xlu0 %v4623_v9, %s9778_s28 }
 0xeb4   :  { %4707 = vrot.lane.b32.xlu1 %v4623_v9, %s9773_s25  ;;  %4711 = vrot.lane.b32.xlu0 %v4623_v9, %s9779_s29 }
 0xeb8   :  { %4715 = vrot.lane.b32.xlu1 %v4623_v9, %s9769_s24  ;;  %4719 = vrot.lane.b32.xlu0 %v4623_v9, %s9780_s0 }
 0xebc   :  { %4723 = vrot.lane.b32.xlu1 %v4623_v9, %s9774_s3  ;;  %4727 = vrot.lane.b32.xlu0 %v4623_v9, %s9781_s1 }
 0xec0   :  { %4731 = vrot.lane.b32.xlu1 %v4623_v9, %s9771_s27  ;;  %4735 = vrot.lane.b32.xlu0 %v4623_v9, %s9782_s5 }
 0xec4   :  { %4739 = vrot.lane.b32.xlu1 %v4623_v9, %s9775_s8  ;;  %4743 = vrot.lane.b32.xlu0 %v4623_v9, %s9759_s20 }
 0xefe   :  { %v4630_v52 = vpop.permute.xlu0 %4629  ;;  %v4626_v53 = vpop.permute.xlu1 %4625 }
 0xeff   :  { %v4628_v23 = vadd.f32 %v4626_v53, %v4610_v62 }
 0xf01   :  { %v4632_v10 = vadd.f32 %v4630_v52, %v4628_v23 }
 0xf02   :  { %v4638_v12 = vpop.permute.xlu0 %4637  ;;  %v4634_v14 = vpop.permute.xlu1 %4633 }
 0xf03   :  { %v4636_v15 = vadd.f32 %v4634_v14, %v4632_v10 }
 0xf05   :  { %v4640_v16 = vadd.f32 %v4638_v12, %v4636_v15 }
 0xf06   :  { %v4646_v17 = vpop.permute.xlu0 %4645  ;;  %v4642_v20 = vpop.permute.xlu1 %4641 }
 0xf07   :  { %v4644_v21 = vadd.f32 %v4642_v20, %v4640_v16 }
 0xf09   :  { %v4648_v4 = vadd.f32 %v4646_v17, %v4644_v21 }
 0xf0a   :  { %v4654_v5 = vpop.permute.xlu0 %4653  ;;  %v4650_v8 = vpop.permute.xlu1 %4649 }
 0xf0b   :  { %v4652_v6 = vadd.f32 %v4650_v8, %v4648_v4 }
 0xf0d   :  { %v4656_v39 = vadd.f32 %v4654_v5, %v4652_v6 }
 0xf0e   :  { %v4662_v24 = vpop.permute.xlu0 %4661  ;;  %v4658_v13 = vpop.permute.xlu1 %4657 }
 0xf0f   :  { %v4660_v43 = vadd.f32 %v4658_v13, %v4656_v39 }
 0xf11   :  { %v4664_v50 = vadd.f32 %v4662_v24, %v4660_v43 }
 0xf12   :  { %v4670_v22 = vpop.permute.xlu0 %4669  ;;  %v4666_v46 = vpop.permute.xlu1 %4665 }
 0xf13   :  { %v4668_v48 = vadd.f32 %v4666_v46, %v4664_v50 }
 0xf15   :  { %v4672_v37 = vadd.f32 %v4670_v22, %v4668_v48 }
 0xf16   :  { %v4678_v38 = vpop.permute.xlu0 %4677  ;;  %v4674_v31 = vpop.permute.xlu1 %4673 }
 0xf17   :  { %v4676_v54 = vadd.f32 %v4674_v31, %v4672_v37 }
 0xf19   :  { %v4680_v55 = vadd.f32 %v4678_v38, %v4676_v54 }
 0xf1a   :  { %v4682_v56 = vpop.permute.xlu1 %4681  ;;  %v4688_v57 = vpop.permute.xlu0 %4687 }
 0xf1b   :  { %v4684_v26 = vadd.f32 %v4682_v56, %v4680_v55 }
 0xf1d   :  { %v4685_v58 = vadd.f32 %v4684_v26, %v4623_v9 }
 0xf1e   :  { %v4692_v47 = vpop.permute.xlu1 %4691  ;;  %v4696_v49 = vpop.permute.xlu0 %4695 }
 0xf1f   :  { %v4690_v3 = vadd.f32 %v4688_v57, %v4685_v58 }
 0xf21   :  { %v4694_v61 = vadd.f32 %v4692_v47, %v4690_v3 }
 0xf22   :  { %v4700_v62 = vpop.permute.xlu1 %4699  ;;  %v4704_v51 = vpop.permute.xlu0 %4703 }
 0xf23   :  { %v4698_v63 = vadd.f32 %v4696_v49, %v4694_v61 }
 0xf25   :  { %v4702_v1 = vadd.f32 %v4700_v62, %v4698_v63 }
 0xf26   :  { %v4708_v2 = vpop.permute.xlu1 %4707  ;;  %v4712_v60 = vpop.permute.xlu0 %4711 }
 0xf27   :  { %v4706_v7 = vadd.f32 %v4704_v51, %v4702_v1 }
 0xf29   :  { %v4710_v52 = vadd.f32 %v4708_v2, %v4706_v7 }
 0xf2a   :  { %v4716_v53 = vpop.permute.xlu1 %4715  ;;  %v4720_v23 = vpop.permute.xlu0 %4719 }
 0xf2b   :  { %v4714_v10 = vadd.f32 %v4712_v60, %v4710_v52 }
 0xf2d   :  { %v4718_v12 = vadd.f32 %v4716_v53, %v4714_v10 }
 0xf2e   :  { %v4724_v14 = vpop.permute.xlu1 %4723  ;;  %v4728_v15 = vpop.permute.xlu0 %4727 }
 0xf2f   :  { %v4722_v16 = vadd.f32 %v4720_v23, %v4718_v12 }
 0xf31   :  { %v4726_v9 = vadd.f32 %v4724_v14, %v4722_v16 }
 0xf32   :  { %v4732_v17 = vpop.permute.xlu1 %4731  ;;  %v4736_v21 = vpop.permute.xlu0 %4735 }
 0xf33   :  { %v4730_v20 = vadd.f32 %v4728_v15, %v4726_v9 }
 0xf35   :  { %v4734_v4 = vadd.f32 %v4732_v17, %v4730_v20 }
 0xf36   :  { %v4740_v8 = vpop.permute.xlu1 %4739  ;;  %v4744_v39 = vpop.permute.xlu0 %4743 }
 0xf37   :  { %v4738_v5 = vadd.f32 %v4736_v21, %v4734_v4 }
 0xf39   :  { %v4742_v6 = vadd.f32 %v4740_v8, %v4738_v5 }
 0xf3b   :  { %v4746_v24 = vadd.f32 %v4744_v39, %v4742_v6 }
 0xf3d   :  { %v4748_v13 = vmul.f32 0.00048828125, %v4746_v24 }
 0xf3f   :  { %4753 = vrot.lane.b32.xlu0 %v4748_v13, %s9775_s8  ;;  %4750 = vrot.lane.b32.xlu1 %v4748_v13, %s9759_s20 }
 0xf43   :  { %4759 = vrot.lane.b32.xlu0 %v4748_v13, %s9771_s27  ;;  %4756 = vrot.lane.b32.xlu1 %v4748_v13, %s9782_s5 }
 0xf47   :  { %4765 = vrot.lane.b32.xlu0 %v4748_v13, %s9774_s3  ;;  %4762 = vrot.lane.b32.xlu1 %v4748_v13, %s9781_s1 }
 0xf4b   :  { %4771 = vrot.lane.b32.xlu0 %v4748_v13, %s9769_s24  ;;  %4768 = vrot.lane.b32.xlu1 %v4748_v13, %s9780_s0 }
 0xf4f   :  { %4777 = vrot.lane.b32.xlu0 %v4748_v13, %s9773_s25  ;;  %4774 = vrot.lane.b32.xlu1 %v4748_v13, %s9779_s29 }
 0xf53   :  { %4783 = vrot.lane.b32.xlu0 %v4748_v13, %s9770_s4  ;;  %4780 = vrot.lane.b32.xlu1 %v4748_v13, %s9778_s28 }
 0xf57   :  { %4789 = vrot.lane.b32.xlu0 %v4748_v13, %s9772_s7  ;;  %4786 = vrot.lane.b32.xlu1 %v4748_v13, %s9777_s10 }
 0xf5b   :  { %4792 = vrot.lane.b32.xlu1 %v4748_v13, %s9776_s26 }
 0xfb1   :  { %v4754_v43 = vpop.permute.xlu0 %4753  ;;  %v4751_v50 = vpop.permute.xlu1 %4750 }
 0xfb2   :  { %v4796_v22 = vsel %vm4795_vm12, %v4748_v13, %v4751_v50 }
 0xfb3   :  { %v4797_v48 = vsel %vm216_vm0, %v4796_v22, %v4754_v43 }
 0xfb5   :  { %v4760_v46 = vpop.permute.xlu0 %4759  ;;  %v4757_v37 = vpop.permute.xlu1 %4756 }
 0xfb6   :  { %v4799_v38 = vsel %vm4798_vm13, %v4797_v48, %v4757_v37 }
 0xfb7   :  { %v4800_v54 = vsel %vm1898_vm7, %v4799_v38, %v4760_v46 }
 0xfb9   :  { %v4766_v31 = vpop.permute.xlu0 %4765  ;;  %v4763_v55 = vpop.permute.xlu1 %4762 }
 0xfba   :  { %v4802_v56 = vsel %vm4801_vm14, %v4800_v54, %v4763_v55 }
 0xfbb   :  { %v4803_v26 = vsel %vm3217_vm9, %v4802_v56, %v4766_v31 }
 0xfbd   :  { %v4772_v57 = vpop.permute.xlu0 %4771  ;;  %v4769_v58 = vpop.permute.xlu1 %4768 }
 0xfbe   :  { %v4805_v47 = vsel %vm4804_vm15, %v4803_v26, %v4769_v58 }
 0xfbf   :  { %v4806_v3 = vsel %vm668_vm6, %v4805_v47, %v4772_v57 }
 0xfc1   :  { %v4778_v49 = vpop.permute.xlu0 %4777  ;;  %v4775_v61 = vpop.permute.xlu1 %4774 }
 0xfc2   :  { %v4808_v62 = vsel %vm4807_vm1, %v4806_v3, %v4775_v61 }
 0xfc3   :  { %v4809_v63 = vsel %vm3220_vm10, %v4808_v62, %v4778_v49 }
 0xfc5   :  { %v4784_v51 = vpop.permute.xlu0 %4783  ;;  %v4781_v1 = vpop.permute.xlu1 %4780 }
 0xfc6   :  { %v4811_v2 = vsel %vm4810_vm2, %v4809_v63, %v4781_v1 }
 0xfc7   :  { %v4812_v60 = vsel %vm1901_vm8, %v4811_v2, %v4784_v51 }
 0xfc9   :  { %v4787_v7 = vpop.permute.xlu1 %4786  ;;  %v4790_v52 = vpop.permute.xlu0 %4789 }
 0xfca   :  { %v4814_v53 = vsel %vm4813_vm3, %v4812_v60, %v4787_v7 }
 0xfcb   :  { %v4815_v23 = vsel %vm3223_vm11, %v4814_v53, %v4790_v52 }
 0xfcd   :  { %v4793_v10 = vpop.permute.xlu1 %4792 }
 0xfce   :  { %v4817_v12 = vsel %vm4816_vm5, %v4815_v23, %v4793_v10 }
 0xfcf   :  { %v4821_v14 = vrot.slane %v4817_v12, %v9985_v19  ;;  %v11337_v12 = vld [vmem:[%s12550_s12] sm:$0x3]  ;;  %s9796_s12 = smov 45  }
 0xfd1   :  { %v11225_v15 = vsub.f32 %v11115_v34, %v4821_v14  ;;  %v11228_v16 = vsub.f32 %v11119_v36, %v4821_v14  ;;  %v11231_v9 = vsub.f32 %v11117_v35, %v4821_v14  ;;  %v11234_v17 = vsub.f32 %v11121_v40, %v4821_v14 }
 0xfd2   :  { %v11237_v20 = vsub.f32 %v11123_v41, %v4821_v14  ;;  %v11244_v34 = vsub.f32 %v11134_v45, %v4821_v14  ;;  %v11247_v36 = vsub.f32 %v11125_v42, %v4821_v14  ;;  %v11256_v8 = vsub.f32 %v11129_v25, %v4821_v14 }
 0xfd3   :  { %v4838_v21 = vmul.f32 %v11225_v15, %v11225_v15  ;;  %v4840_v4 = vmul.f32 %v11228_v16, %v11228_v16  ;;  %v4839_v35 = vmul.f32 %v11231_v9, %v11231_v9  ;;  %v4841_v40 = vmul.f32 %v11234_v17, %v11234_v17 }
 0xfd4   :  { %v4842_v41 = vmul.f32 %v11237_v20, %v11237_v20  ;;  %v11259_v6 = vsub.f32 %v11136_v30, %v4821_v14  ;;  %v4844_v42 = vmul.f32 %v11244_v34, %v11244_v34  ;;  %v11264_v39 = vsub.f32 %v11142_v32, %v4821_v14 }
 0xfd5   :  { %v4854_v5 = vadd.f32 %v4840_v4, %v4838_v21  ;;  %v4846_v24 = vmul.f32 %v11247_v36, %v11247_v36  ;;  %v4867_v43 = vadd.f32 %v4841_v40, %v4839_v35  ;;  %v11269_v50 = vsub.f32 %v11147_v18, %v4821_v14 }
 0xfd6   :  { %v11272_v25 = vsub.f32 %v11153_v33, %v4821_v14  ;;  %v4843_v30 = vmul.f32 %v11256_v8, %v11256_v8  ;;  %v4848_v22 = vmul.f32 %v11259_v6, %v11259_v6  ;;  %v4850_v32 = vmul.f32 %v11264_v39, %v11264_v39 }
 0xfd7   :  { %v4855_v45 = vadd.f32 %v4854_v5, %v4842_v41  ;;  %v11281_v38 = vsub.f32 %v11131_v44, %v4821_v14  ;;  %v4845_v18 = vmul.f32 %v11269_v50, %v11269_v50  ;;  %v11288_v56 = vsub.f32 %v11139_v29, %v4821_v14 }
 0xfd8   :  { %v4868_v37 = vadd.f32 %v4867_v43, %v4843_v30  ;;  %v4852_v33 = vmul.f32 %v11272_v25, %v11272_v25  ;;  %v11293_v44 = vsub.f32 %v11149_v28, %v4821_v14  ;;  %v11298_v51 = vsub.f32 %v11160_v27, %v4821_v14 }
 0xfd9   :  { %v4856_v13 = vadd.f32 %v4855_v45, %v4844_v42  ;;  %v4847_v57 = vmul.f32 %v11281_v38, %v11281_v38  ;;  %v4849_v49 = vmul.f32 %v11288_v56, %v11288_v56 }
 0xfda   :  { %v4869_v54 = vadd.f32 %v4868_v37, %v4845_v18  ;;  %v4851_v29 = vmul.f32 %v11293_v44, %v11293_v44  ;;  %v4853_v60 = vmul.f32 %v11298_v51, %v11298_v51 }
 0xfdb   :  { %v4857_v46 = vadd.f32 %v4856_v13, %v4846_v24 }
 0xfdc   :  { %v4870_v58 = vadd.f32 %v4869_v54, %v4847_v57 }
 0xfdd   :  { %v4858_v48 = vadd.f32 %v4857_v46, %v4848_v22 }
 0xfde   :  { %v4871_v61 = vadd.f32 %v4870_v58, %v4849_v49 }
 0xfdf   :  { %v4859_v31 = vadd.f32 %v4858_v48, %v4850_v32 }
 0xfe0   :  { %v4872_v1 = vadd.f32 %v4871_v61, %v4851_v29 }
 0xfe1   :  { %v4860_v55 = vadd.f32 %v4859_v31, %v4852_v33 }
 0xfe2   :  { %v4873_v28 = vadd.f32 %v4872_v1, %v4853_v60 }
 0xfe3   :  { %v4861_v26 = vrot.slane %v4860_v55, 4 }
 0xfe4   :  { %v4874_v27 = vrot.slane %v4873_v28, 4 }
 0xfe5   :  { %v4862_v47 = vadd.f32 %v4861_v26, %v4860_v55 }
 0xfe6   :  { %v4875_v7 = vadd.f32 %v4874_v27, %v4873_v28 }
 0xfe7   :  { %v4863_v3 = vrot.slane %v4862_v47, 2 }
 0xfe8   :  { %v4876_v52 = vrot.slane %v4875_v7, 2 }
 0xfe9   :  { %v4864_v62 = vadd.f32 %v4863_v3, %v4862_v47 }
 0xfea   :  { %v4877_v53 = vadd.f32 %v4876_v52, %v4875_v7 }
 0xfeb   :  { %v4865_v63 = vrot.slane %v4864_v62, 1 }
 0xfec   :  { %v4878_v23 = vrot.slane %v4877_v53, 1 }
 0xfed   :  { %v4866_v2 = vadd.f32 %v4865_v63, %v4864_v62 }
 0xfee   :  { %v4879_v10 = vadd.f32 %v4878_v23, %v4877_v53 }
 0xfef   :  { %4885 = vrot.lane.b32.xlu1 %v4866_v2, %s9772_s7  ;;  %4881 = vrot.lane.b32.xlu0 %v4866_v2, %s9776_s26 }
 0xff3   :  { %4893 = vrot.lane.b32.xlu1 %v4866_v2, %s9770_s4  ;;  %4889 = vrot.lane.b32.xlu0 %v4866_v2, %s9777_s10 }
 0xff7   :  { %4901 = vrot.lane.b32.xlu1 %v4866_v2, %s9773_s25  ;;  %4897 = vrot.lane.b32.xlu0 %v4866_v2, %s9778_s28 }
 0xffb   :  { %4909 = vrot.lane.b32.xlu1 %v4866_v2, %s9769_s24  ;;  %4905 = vrot.lane.b32.xlu0 %v4866_v2, %s9779_s29 }
 0xfff   :  { %4917 = vrot.lane.b32.xlu1 %v4866_v2, %s9774_s3  ;;  %4913 = vrot.lane.b32.xlu0 %v4866_v2, %s9780_s0 }
0x1003   :  { %4925 = vrot.lane.b32.xlu1 %v4866_v2, %s9771_s27  ;;  %4921 = vrot.lane.b32.xlu0 %v4866_v2, %s9781_s1 }
0x1007   :  { %4933 = vrot.lane.b32.xlu1 %v4866_v2, %s9775_s8  ;;  %4929 = vrot.lane.b32.xlu0 %v4866_v2, %s9782_s5 }
0x100b   :  { %4943 = vrot.lane.b32.xlu1 %v4879_v10, %s9776_s26  ;;  %4937 = vrot.lane.b32.xlu0 %v4866_v2, %s9759_s20 }
0x100f   :  { %4951 = vrot.lane.b32.xlu1 %v4879_v10, %s9777_s10  ;;  %4947 = vrot.lane.b32.xlu0 %v4879_v10, %s9772_s7 }
0x1013   :  { %4959 = vrot.lane.b32.xlu1 %v4879_v10, %s9778_s28  ;;  %4955 = vrot.lane.b32.xlu0 %v4879_v10, %s9770_s4 }
0x1017   :  { %4967 = vrot.lane.b32.xlu1 %v4879_v10, %s9779_s29  ;;  %4963 = vrot.lane.b32.xlu0 %v4879_v10, %s9773_s25 }
0x101b   :  { %4975 = vrot.lane.b32.xlu1 %v4879_v10, %s9780_s0  ;;  %4971 = vrot.lane.b32.xlu0 %v4879_v10, %s9769_s24 }
0x101f   :  { %4983 = vrot.lane.b32.xlu1 %v4879_v10, %s9781_s1  ;;  %4979 = vrot.lane.b32.xlu0 %v4879_v10, %s9774_s3 }
0x1023   :  { %4991 = vrot.lane.b32.xlu1 %v4879_v10, %s9782_s5  ;;  %4987 = vrot.lane.b32.xlu0 %v4879_v10, %s9771_s27 }
0x1027   :  { %4999 = vrot.lane.b32.xlu1 %v4879_v10, %s9759_s20  ;;  %4995 = vrot.lane.b32.xlu0 %v4879_v10, %s9775_s8 }
0x102b   :  { %5089 = vrot.lane.b32.xlu1 %v11337_v12, %s9759_s20 }
0x102f   :  { %5092 = vrot.lane.b32.xlu1 %v11337_v12, %s9775_s8 }
0x1033   :  { %5095 = vrot.lane.b32.xlu1 %v11337_v12, %s9782_s5 }
0x1037   :  { %5098 = vrot.lane.b32.xlu1 %v11337_v12, %s9771_s27 }
0x103b   :  { %5101 = vrot.lane.b32.xlu1 %v11337_v12, %s9781_s1 }
0x103f   :  { %5104 = vrot.lane.b32.xlu1 %v11337_v12, %s9774_s3 }
0x1043   :  { %5107 = vrot.lane.b32.xlu1 %v11337_v12, %s9780_s0 }
0x1047   :  { %5110 = vrot.lane.b32.xlu1 %v11337_v12, %s9769_s24 }
0x104b   :  { %5113 = vrot.lane.b32.xlu1 %v11337_v12, %s9779_s29 }
0x104f   :  { %5116 = vrot.lane.b32.xlu1 %v11337_v12, %s9773_s25 }
0x1061   :  { %v4886_v14 = vpop.permute.xlu1 %4885  ;;  %v4882_v21 = vpop.permute.xlu0 %4881 }
0x1062   :  { %v4884_v4 = vadd.f32 %v4882_v21, %v4866_v2 }
0x1064   :  { %v4888_v35 = vadd.f32 %v4886_v14, %v4884_v4 }
0x1065   :  { %v4894_v40 = vpop.permute.xlu1 %4893  ;;  %v4890_v41 = vpop.permute.xlu0 %4889 }
0x1066   :  { %v4892_v5 = vadd.f32 %v4890_v41, %v4888_v35 }
0x1068   :  { %v4896_v42 = vadd.f32 %v4894_v40, %v4892_v5 }
0x1069   :  { %v4902_v45 = vpop.permute.xlu1 %4901  ;;  %v4898_v24 = vpop.permute.xlu0 %4897 }
0x106a   :  { %v4900_v13 = vadd.f32 %v4898_v24, %v4896_v42 }
0x106c   :  { %v4904_v43 = vadd.f32 %v4902_v45, %v4900_v13 }
0x106d   :  { %v4910_v30 = vpop.permute.xlu1 %4909  ;;  %v4906_v22 = vpop.permute.xlu0 %4905 }
0x106e   :  { %v4908_v46 = vadd.f32 %v4906_v22, %v4904_v43 }
0x1070   :  { %v4912_v32 = vadd.f32 %v4910_v30, %v4908_v46 }
0x1071   :  { %v4918_v48 = vpop.permute.xlu1 %4917  ;;  %v4914_v37 = vpop.permute.xlu0 %4913 }
0x1072   :  { %v4916_v18 = vadd.f32 %v4914_v37, %v4912_v32 }
0x1074   :  { %v4920_v33 = vadd.f32 %v4918_v48, %v4916_v18 }
0x1075   :  { %v4926_v31 = vpop.permute.xlu1 %4925  ;;  %v4922_v54 = vpop.permute.xlu0 %4921 }
0x1076   :  { %v4924_v55 = vadd.f32 %v4922_v54, %v4920_v33  ;;  %v9314_v54 = vld [vmem:[%s12551_s13 + $0x74] ss:$8 sps:$4 sm:$0xff]  }
0x1077   :  { %5385 = vmatprep.subr.bf16.mxu0 %v9314_v54  ;;  %v9375_v54 = vld [vmem:[%s12551_s13 + $0x1d0] ss:$8 sps:$4 sm:$0xff]  }
0x1078   :  { %v4928_v57 = vadd.f32 %v4926_v31, %v4924_v55  ;;  %v9312_v31 = vld [vmem:[%s12551_s13 + $0x70] ss:$8 sps:$4 sm:$0xff]  }
0x1079   :  { %v4934_v26 = vpop.permute.xlu1 %4933  ;;  %v4930_v58 = vpop.permute.xlu0 %4929  ;;  %v9315_v55 = vld [vmem:[%s12551_s13 + $0x170] ss:$8 sps:$4 sm:$0xff]   ;;  %5386 = vmatpush1.bf16.msra.mxu0 %v9312_v31  ;;  %v9374_v31 = vld [vmem:[%s12551_s13 + $0xd4] ss:$8 sps:$4 sm:$0xff]  }
0x107a   :  { %v4932_v47 = vadd.f32 %v4930_v58, %v4928_v57  ;;  %v9317_v57 = vld [vmem:[%s12551_s13 + $0x174] ss:$8 sps:$4 sm:$0xff]   ;;  %v9320_v58 = vld [vmem:[%s12551_s13 + $0x64] ss:$8 sps:$4 sm:$0xff]  }
0x107b   :  { %5651 = vmatprep.subr.bf16.mxu1 %v9317_v57  ;;  %5387 = vmatprep.subr.bf16.mxu0 %v9320_v58  ;;  %v9378_v57 = vld [vmem:[%s12551_s13 + $0xc0] ss:$8 sps:$4 sm:$0xff]  }
0x107c   :  { %v4936_v49 = vadd.f32 %v4934_v26, %v4932_v47  ;;  %5652 = vmatpush1.bf16.msra.mxu1 %v9315_v55  ;;  %v9318_v26 = vld [vmem:[%s12551_s13 + $0x60] ss:$8 sps:$4 sm:$0xff]   ;;  %v9377_v55 = vld [vmem:[%s12551_s13 + $0x1d4] ss:$8 sps:$4 sm:$0xff]  }
0x107d   :  { %v4944_v3 = vpop.permute.xlu1 %4943  ;;  %v4938_v61 = vpop.permute.xlu0 %4937  ;;  %v9321_v47 = vld [vmem:[%s12551_s13 + $0x160] ss:$8 sps:$4 sm:$0xff]   ;;  %5388 = vmatpush1.bf16.msra.mxu0 %v9318_v26  ;;  %v9380_v26 = vld [vmem:[%s12551_s13 + $0xc4] ss:$8 sps:$4 sm:$0xff]  }
0x107e   :  { %v4940_v62 = vadd.f32 %v4938_v61, %v4936_v49  ;;  %v9323_v49 = vld [vmem:[%s12551_s13 + $0x164] ss:$8 sps:$4 sm:$0xff]   ;;  %v9326_v61 = vld [vmem:[%s12551_s13 + $0x54] ss:$8 sps:$4 sm:$0xff]   ;;  %v9381_v58 = vld [vmem:[%s12551_s13 + $0x1c0] ss:$8 sps:$4 sm:$0xff]  }
0x107f   :  { %5653 = vmatprep.subr.bf16.mxu1 %v9323_v49  ;;  %5389 = vmatprep.subr.bf16.mxu0 %v9326_v61  ;;  %v9384_v49 = vld [vmem:[%s12551_s13 + $0xb0] ss:$8 sps:$4 sm:$0xff]  }
0x1080   :  { %v4941_v29 = vadd.f32 %v4940_v62, %v4879_v10  ;;  %5654 = vmatpush1.bf16.msra.mxu1 %v9321_v47  ;;  %v9327_v62 = vld [vmem:[%s12551_s13 + $0x150] ss:$8 sps:$4 sm:$0xff]   ;;  %v9383_v47 = vld [vmem:[%s12551_s13 + $0x1c4] ss:$8 sps:$4 sm:$0xff]  }
0x1081   :  { %v4952_v63 = vpop.permute.xlu1 %4951  ;;  %v4948_v1 = vpop.permute.xlu0 %4947  ;;  %v9387_v61 = vld [vmem:[%s12551_s13 + $0x1b0] ss:$8 sps:$4 sm:$0xff]  }
0x1082   :  { %v4946_v2 = vadd.f32 %v4944_v3, %v4941_v29  ;;  %v9324_v3 = vld [vmem:[%s12551_s13 + $0x50] ss:$8 sps:$4 sm:$0xff]   ;;  %v9329_v29 = vld [vmem:[%s12551_s13 + $0x154] ss:$8 sps:$4 sm:$0xff]  }
0x1083   :  { %5390 = vmatpush1.bf16.msra.mxu0 %v9324_v3  ;;  %5655 = vmatprep.subr.bf16.mxu1 %v9329_v29  ;;  %v9386_v3 = vld [vmem:[%s12551_s13 + $0xb4] ss:$8 sps:$4 sm:$0xff]   ;;  %v9390_v29 = vld [vmem:[%s12551_s13 + $0xa0] ss:$8 sps:$4 sm:$0xff]  }
0x1084   :  { %v4950_v60 = vadd.f32 %v4948_v1, %v4946_v2  ;;  %5656 = vmatpush1.bf16.msra.mxu1 %v9327_v62  ;;  %v9330_v2 = vld [vmem:[%s12551_s13 + $0x40] ss:$8 sps:$4 sm:$0xff]   ;;  %v9389_v62 = vld [vmem:[%s12551_s13 + $0x1b4] ss:$8 sps:$4 sm:$0xff]  }
0x1085   :  { %v4960_v28 = vpop.permute.xlu1 %4959  ;;  %v4956_v27 = vpop.permute.xlu0 %4955 }
0x1086   :  { %v4954_v7 = vadd.f32 %v4952_v63, %v4950_v60  ;;  %v9332_v60 = vld [vmem:[%s12551_s13 + $0x44] ss:$8 sps:$4 sm:$0xff]  }
0x1087   :  { %5391 = vmatprep.subr.bf16.mxu0 %v9332_v60  ;;  %v9395_v60 = vld [vmem:[%s12551_s13 + $0x1a4] ss:$8 sps:$4 sm:$0xff]  }
0x1088   :  { %v4958_v52 = vadd.f32 %v4956_v27, %v4954_v7  ;;  %v9335_v27 = vld [vmem:[%s12551_s13 + $0x144] ss:$8 sps:$4 sm:$0xff]   ;;  %5392 = vmatpush1.bf16.msra.mxu0 %v9330_v2  ;;  %v9336_v7 = vld [vmem:[%s12551_s13 + $0x30] ss:$8 sps:$4 sm:$0xff]   ;;  %v9393_v2 = vld [vmem:[%s12551_s13 + $0x1a0] ss:$8 sps:$4 sm:$0xff]  }
0x1089   :  { %v4968_v53 = vpop.permute.xlu1 %4967  ;;  %v4964_v23 = vpop.permute.xlu0 %4963  ;;  %5657 = vmatprep.subr.bf16.mxu1 %v9335_v27  ;;  %v9396_v27 = vld [vmem:[%s12551_s13 + $0x90] ss:$8 sps:$4 sm:$0xff]  }
0x108a   :  { %v4962_v14 = vadd.f32 %v4960_v28, %v4958_v52  ;;  %v9333_v28 = vld [vmem:[%s12551_s13 + $0x140] ss:$8 sps:$4 sm:$0xff]   ;;  %v9338_v52 = vld [vmem:[%s12551_s13 + $0x34] ss:$8 sps:$4 sm:$0xff]  }
0x108b   :  { %5658 = vmatpush1.bf16.msra.mxu1 %v9333_v28  ;;  %5393 = vmatprep.subr.bf16.mxu0 %v9338_v52  ;;  %v9398_v28 = vld [vmem:[%s12551_s13 + $0x94] ss:$8 sps:$4 sm:$0xff]  }
0x108c   :  { %v4966_v21 = vadd.f32 %v4964_v23, %v4962_v14  ;;  %v9341_v23 = vld [vmem:[%s12551_s13 + $0x134] ss:$8 sps:$4 sm:$0xff]   ;;  %5394 = vmatpush1.bf16.msra.mxu0 %v9336_v7  ;;  %v9342_v14 = vld [vmem:[%s12551_s13 + $0x20] ss:$8 sps:$4 sm:$0xff]   ;;  %v9399_v7 = vld [vmem:[%s12551_s13 + $0x190] ss:$8 sps:$4 sm:$0xff]  }
0x108d   :  { %v4976_v4 = vpop.permute.xlu1 %4975  ;;  %v4972_v35 = vpop.permute.xlu0 %4971  ;;  %5659 = vmatprep.subr.bf16.mxu1 %v9341_v23  ;;  %v9401_v52 = vld [vmem:[%s12551_s13 + $0x194] ss:$8 sps:$4 sm:$0xff]   ;;  %v9402_v23 = vld [vmem:[%s12551_s13 + $0x80] ss:$8 sps:$4 sm:$0xff]  }
0x108e   :  { %v4970_v40 = vadd.f32 %v4968_v53, %v4966_v21  ;;  %v9339_v53 = vld [vmem:[%s12551_s13 + $0x130] ss:$8 sps:$4 sm:$0xff]   ;;  %v9344_v21 = vld [vmem:[%s12551_s13 + $0x24] ss:$8 sps:$4 sm:$0xff]  }
0x108f   :  { %5660 = vmatpush1.bf16.msra.mxu1 %v9339_v53  ;;  %5395 = vmatprep.subr.bf16.mxu0 %v9344_v21  ;;  %v9404_v53 = vld [vmem:[%s12551_s13 + $0x84] ss:$8 sps:$4 sm:$0xff]   ;;  %v9405_v21 = vld [vmem:[%s12551_s13 + $0x180] ss:$8 sps:$4 sm:$0xff]  }
0x1090   :  { %v4974_v41 = vadd.f32 %v4972_v35, %v4970_v40  ;;  %v9347_v35 = vld [vmem:[%s12551_s13 + $0x124] ss:$8 sps:$4 sm:$0xff]   ;;  %5396 = vmatpush1.bf16.msra.mxu0 %v9342_v14  ;;  %v9348_v40 = vld [vmem:[%s12551_s13 + $0x10] ss:$8 sps:$4 sm:$0xff]  }
0x1091   :  { %v4984_v5 = vpop.permute.xlu1 %4983  ;;  %v4980_v42 = vpop.permute.xlu0 %4979  ;;  %5661 = vmatprep.subr.bf16.mxu1 %v9347_v35  ;;  %v9407_v14 = vld [vmem:[%s12551_s13 + $0x184] ss:$8 sps:$4 sm:$0xff]  }
0x1092   :  { %v4978_v45 = vadd.f32 %v4976_v4, %v4974_v41  ;;  %v9345_v4 = vld [vmem:[%s12551_s13 + $0x120] ss:$8 sps:$4 sm:$0xff]   ;;  %v9350_v41 = vld [vmem:[%s12551_s13 + $0x14] ss:$8 sps:$4 sm:$0xff]  }
0x1093   :  { %5662 = vmatpush1.bf16.msra.mxu1 %v9345_v4  ;;  %5397 = vmatprep.subr.bf16.mxu0 %v9350_v41  ;;  %v9410_v4 = vld [vmem:[%s12551_s13 + $0x274] ss:$8 sps:$4 sm:$0xff]  }
0x1094   :  { %v4982_v10 = vadd.f32 %v4980_v42, %v4978_v45  ;;  %v9353_v42 = vld [vmem:[%s12551_s13 + $0x114] ss:$8 sps:$4 sm:$0xff]   ;;  %5398 = vmatpush1.bf16.msra.mxu0 %v9348_v40  ;;  %v9354_v45 = vld [vmem:[%s12551_s13] ss:$8 sps:$4 sm:$0xff]  }
0x1095   :  { %v4988_v24 = vpop.permute.xlu0 %4987  ;;  %v4992_v43 = vpop.permute.xlu1 %4991  ;;  %5663 = vmatprep.subr.bf16.mxu1 %v9353_v42 }
0x1096   :  { %v4986_v13 = vadd.f32 %v4984_v5, %v4982_v10  ;;  %v9351_v5 = vld [vmem:[%s12551_s13 + $0x110] ss:$8 sps:$4 sm:$0xff]   ;;  %v9356_v10 = vld [vmem:[%s12551_s13 + $0x4] ss:$8 sps:$4 sm:$0xff]  }
0x1097   :  { %5664 = vmatpush1.bf16.msra.mxu1 %v9351_v5  ;;  %5399 = vmatprep.subr.bf16.mxu0 %v9356_v10 }
0x1098   :  { %v4990_v30 = vadd.f32 %v4988_v24, %v4986_v13  ;;  %v9357_v24 = vld [vmem:[%s12551_s13 + $0x100] ss:$8 sps:$4 sm:$0xff]   ;;  %v9359_v13 = vld [vmem:[%s12551_s13 + $0x104] ss:$8 sps:$4 sm:$0xff]   ;;  %5400 = vmatpush1.bf16.msra.mxu0 %v9354_v45 }
0x1099   :  { %v4996_v46 = vpop.permute.xlu0 %4995  ;;  %v5000_v48 = vpop.permute.xlu1 %4999  ;;  %5665 = vmatprep.subr.bf16.mxu1 %v9359_v13 }
0x109a   :  { %v4994_v22 = vadd.f32 %v4992_v43, %v4990_v30  ;;  %v9360_v43 = vld [vmem:[%s12551_s13 + $0xf0] ss:$8 sps:$4 sm:$0xff]   ;;  %v9362_v30 = vld [vmem:[%s12551_s13 + $0xf4] ss:$8 sps:$4 sm:$0xff]  }
0x109b   :  { %5666 = vmatpush1.bf16.msra.mxu1 %v9357_v24  ;;  %5401 = vmatprep.subr.bf16.mxu0 %v9362_v30 }
0x109c   :  { %v4998_v32 = vadd.f32 %v4996_v46, %v4994_v22  ;;  %v9363_v22 = vld [vmem:[%s12551_s13 + $0x1f0] ss:$8 sps:$4 sm:$0xff]   ;;  %v9365_v46 = vld [vmem:[%s12551_s13 + $0x1f4] ss:$8 sps:$4 sm:$0xff]   ;;  %5402 = vmatpush2.bf16.msra.mxu0 %v9360_v43 }
0x109d   :  { %5667 = vmatprep.subr.bf16.mxu1 %v9365_v46  ;;  %v5090_v35 = vpop.permute.xlu1 %5089 }
0x109e   :  { %v5002_v37 = vadd.f32 %v5000_v48, %v4998_v32  ;;  %v9366_v32 = vld [vmem:[%s12551_s13 + $0xe0] ss:$8 sps:$4 sm:$0xff]   ;;  %v9368_v48 = vld [vmem:[%s12551_s13 + $0xe4] ss:$8 sps:$4 sm:$0xff]  }
0x109f   :  { %5668 = vmatpush2.bf16.msra.mxu1 %v9363_v22  ;;  %5403 = vmatprep.subr.bf16.mxu0 %v9368_v48 }
0x10a0   :  { %v5003_v18 = vmul.f32 0.00048828125, %v5002_v37  ;;  %v9369_v37 = vld [vmem:[%s12551_s13 + $0x1e0] ss:$8 sps:$4 sm:$0xff]   ;;  %5404 = vmatpush2.bf16.msra.mxu0 %v9366_v32  ;;  %v5134_v32 = vsel %vm4795_vm12, %v11337_v12, %v5090_v35 }
0x10a1   :  { %5405 = vmatprep.subr.bf16.mxu0 %v9374_v31  ;;  %v5093_v40 = vpop.permute.xlu1 %5092 }
0x10a2   :  { %v5004_v33 = vadd.f32 1e-05, %v5003_v18  ;;  %v9371_v18 = vld [vmem:[%s12551_s13 + $0x1e4] ss:$8 sps:$4 sm:$0xff]  }
0x10a3   :  { %5669 = vmatprep.subr.bf16.mxu1 %v9371_v18  ;;  %v5135_v18 = vsel %vm216_vm0, %v5134_v32, %v5093_v40 }
0x10a4   :  { %9504 = vrsqrt.f32 %v5004_v33  ;;  %5670 = vmatpush2.bf16.msra.mxu1 %v9369_v37  ;;  %v9372_v33 = vld [vmem:[%s12551_s13 + $0xd0] ss:$8 sps:$4 sm:$0xff]  }
0x10a5   :  { %5406 = vmatpush2.bf16.msra.mxu0 %v9372_v33  ;;  %5671 = vmatprep.subr.bf16.mxu1 %v9377_v55  ;;  %v5096_v41 = vpop.permute.xlu1 %5095 }
0x10a6   :  { %5407 = vmatprep.subr.bf16.mxu0 %v9380_v26  ;;  %v5136_v31 = vsel %vm4798_vm13, %v5135_v18, %v5096_v41 }
0x10a8   :  { %5672 = vmatpush2.bf16.msra.mxu1 %v9375_v54 }
0x10a9   :  { %5408 = vmatpush2.bf16.msra.mxu0 %v9378_v57  ;;  %5673 = vmatprep.subr.bf16.mxu1 %v9383_v47  ;;  %v5099_v5 = vpop.permute.xlu1 %5098 }
0x10aa   :  { %5409 = vmatprep.subr.bf16.mxu0 %v9386_v3  ;;  %v5137_v57 = vsel %vm1898_vm7, %v5136_v31, %v5099_v5 }
0x10ac   :  { %5674 = vmatpush2.bf16.msra.mxu1 %v9381_v58 }
0x10ad   :  { %5410 = vmatpush2.bf16.msra.mxu0 %v9384_v49  ;;  %5675 = vmatprep.subr.bf16.mxu1 %v9389_v62  ;;  %v5102_v42 = vpop.permute.xlu1 %5101 }
0x10ae   :  { %v5138_v26 = vsel %vm4801_vm14, %v5137_v57, %v5102_v42 }
0x10b0   :  { %5676 = vmatpush2.bf16.msra.mxu1 %v9387_v61 }
0x10b1   :  { %v9505_v63 = vpop.eup %9504  ;;  %5677 = vmatprep.subr.bf16.mxu1 %v9395_v60  ;;  %v5105_v10 = vpop.permute.xlu1 %5104 }
0x10b2   :  { %v11396_v1 = vmul.f32 %v9505_v63, %v11337_v12  ;;  %v9392_v63 = vld [vmem:[%s12551_s13 + $0xa4] ss:$8 sps:$4 sm:$0xff]   ;;  %v5139_v49 = vsel %vm3217_vm9, %v5138_v26, %v5105_v10 }
0x10b3   :  { %5411 = vmatprep.subr.bf16.mxu0 %v9392_v63 }
0x10b4   :  { %5011 = vrot.lane.b32.xlu1 %v11396_v1, %s9775_s8  ;;  %5008 = vrot.lane.b32.xlu0 %v11396_v1, %s9759_s20 }
0x10b5   :  { %5412 = vmatpush2.bf16.msra.mxu0 %v9390_v29  ;;  %5678 = vmatpush2.bf16.msra.mxu1 %v9393_v2  ;;  %v5108_v43 = vpop.permute.xlu1 %5107 }
0x10b6   :  { %5413 = vmatprep.subr.bf16.mxu0 %v9398_v28  ;;  %5679 = vmatprep.subr.bf16.mxu1 %v9401_v52  ;;  %v5140_v61 = vsel %vm4804_vm15, %v5139_v49, %v5108_v43 }
0x10b8   :  { %5014 = vrot.lane.b32.xlu0 %v11396_v1, %s9782_s5  ;;  %5119 = vrot.lane.b32.xlu1 %v11337_v12, %s9778_s28 }
0x10b9   :  { %5414 = vmatpush2.bf16.msra.mxu0 %v9396_v27  ;;  %5680 = vmatpush2.bf16.msra.mxu1 %v9399_v7  ;;  %v5111_v22 = vpop.permute.xlu1 %5110 }
0x10ba   :  { %5415 = vmatprep.subr.bf16.mxu0 %v9404_v53  ;;  %5681 = vmatprep.subr.bf16.mxu1 %v9407_v14  ;;  %v5141_v2 = vsel %vm668_vm6, %v5140_v61, %v5111_v22 }
0x10bc   :  { %5017 = vrot.lane.b32.xlu0 %v11396_v1, %s9771_s27  ;;  %5122 = vrot.lane.b32.xlu1 %v11337_v12, %s9770_s4 }
0x10bd   :  { %5416 = vmatpush2.bf16.msra.mxu0 %v9402_v23  ;;  %5682 = vmatpush2.bf16.msra.mxu1 %v9405_v21  ;;  %v5114_v37 = vpop.permute.xlu1 %5113 }
0x10be   :  { %5917 = vmatprep.subr.bf16.mxu0 %v9410_v4  ;;  %v5142_v7 = vsel %vm4807_vm1, %v5141_v2, %v5114_v37 }
0x10c0   :  { %5020 = vrot.lane.b32.xlu0 %v11396_v1, %s9781_s1  ;;  %5125 = vrot.lane.b32.xlu1 %v11337_v12, %s9777_s10 }
0x10c1   :  { %v5117_v54 = vpop.permute.xlu1 %5116 }
0x10c2   :  { %v5143_v21 = vsel %vm3220_vm10, %v5142_v7, %v5117_v54 }
0x10c4   :  { %5023 = vrot.lane.b32.xlu0 %v11396_v1, %s9774_s3  ;;  %5131 = vrot.lane.b32.xlu1 %v11337_v12, %s9776_s26 }
0x10c8   :  { %5026 = vrot.lane.b32.xlu0 %v11396_v1, %s9780_s0 }
0x10cc   :  { %5029 = vrot.lane.b32.xlu0 %v11396_v1, %s9769_s24 }
0x10d0   :  { %5032 = vrot.lane.b32.xlu0 %v11396_v1, %s9779_s29 }
0x10d4   :  { %5035 = vrot.lane.b32.xlu0 %v11396_v1, %s9773_s25 }
0x10d8   :  { %5038 = vrot.lane.b32.xlu0 %v11396_v1, %s9778_s28 }
0x10dc   :  { %5041 = vrot.lane.b32.xlu0 %v11396_v1, %s9770_s4 }
0x10e0   :  { %5044 = vrot.lane.b32.xlu0 %v11396_v1, %s9777_s10 }
0x10e4   :  { %5047 = vrot.lane.b32.xlu0 %v11396_v1, %s9772_s7 }
0x10e8   :  { %5050 = vrot.lane.b32.xlu0 %v11396_v1, %s9776_s26 }
0x10ec   :  { %5128 = vrot.lane.b32.xlu0 %v11337_v12, %s9772_s7 }
0x1126   :  { %v5009_v45 = vpop.permute.xlu0 %5008  ;;  %v5012_v47 = vpop.permute.xlu1 %5011 }
0x1127   :  { %v5053_v12 = vsel %vm4795_vm12, %v11396_v1, %v5009_v45 }
0x1128   :  { %v5054_v29 = vsel %vm216_vm0, %v5053_v12, %v5012_v47 }
0x112a   :  { %v5015_v24 = vpop.permute.xlu0 %5014  ;;  %v5120_v62 = vpop.permute.xlu1 %5119 }
0x112b   :  { %v5055_v60 = vsel %vm4798_vm13, %v5054_v29, %v5015_v24  ;;  %v5144_v5 = vsel %vm4810_vm2, %v5143_v21, %v5120_v62 }
0x112e   :  { %v5018_v13 = vpop.permute.xlu0 %5017  ;;  %v5123_v1 = vpop.permute.xlu1 %5122 }
0x112f   :  { %v5056_v28 = vsel %vm1898_vm7, %v5055_v60, %v5018_v13  ;;  %v5145_v43 = vsel %vm1901_vm8, %v5144_v5, %v5123_v1  ;;  %v9408_v60 = vld [vmem:[%s12551_s13 + $0x270] ss:$8 sps:$4 sm:$0xff]  }
0x1130   :  { %v9414_v5 = vld [vmem:[%s12551_s13 + $0x250] ss:$8 sps:$4 sm:$0xff]  }
0x1132   :  { %v5021_v30 = vpop.permute.xlu0 %5020  ;;  %v5126_v45 = vpop.permute.xlu1 %5125 }
0x1133   :  { %v5057_v27 = vsel %vm4801_vm14, %v5056_v28, %v5021_v30  ;;  %v5146_v32 = vsel %vm4813_vm3, %v5145_v43, %v5126_v45 }
0x1136   :  { %v5024_v46 = vpop.permute.xlu0 %5023 }
0x1137   :  { %v5058_v52 = vsel %vm3217_vm9, %v5057_v27, %v5024_v46  ;;  %v5132_v46 = vpop.permute.xlu1 %5131 }
0x113a   :  { %v5027_v48 = vpop.permute.xlu0 %5026 }
0x113b   :  { %v5059_v23 = vsel %vm4804_vm15, %v5058_v52, %v5027_v48 }
0x113e   :  { %v5030_v33 = vpop.permute.xlu0 %5029 }
0x113f   :  { %v5060_v14 = vsel %vm668_vm6, %v5059_v23, %v5030_v33  ;;  %v9416_v23 = vld [vmem:[%s12551_s13 + $0x254] ss:$8 sps:$4 sm:$0xff]  }
0x1142   :  { %v5033_v55 = vpop.permute.xlu0 %5032 }
0x1143   :  { %v5061_v4 = vsel %vm4807_vm1, %v5060_v14, %v5033_v55 }
0x1146   :  { %v5036_v58 = vpop.permute.xlu0 %5035 }
0x1147   :  { %v5062_v35 = vsel %vm3220_vm10, %v5061_v4, %v5036_v58 }
0x114a   :  { %v5039_v3 = vpop.permute.xlu0 %5038 }
0x114b   :  { %v5063_v41 = vsel %vm4810_vm2, %v5062_v35, %v5039_v3 }
0x114e   :  { %v5042_v63 = vpop.permute.xlu0 %5041 }
0x114f   :  { %v5064_v42 = vsel %vm1901_vm8, %v5063_v41, %v5042_v63 }
0x1152   :  { %v5045_v53 = vpop.permute.xlu0 %5044 }
0x1153   :  { %v5065_v10 = vsel %vm4813_vm3, %v5064_v42, %v5045_v53 }
0x1156   :  { %v5048_v40 = vpop.permute.xlu0 %5047 }
0x1157   :  { %v5066_v24 = vsel %vm3223_vm11, %v5065_v10, %v5048_v40 }
0x115a   :  { %v5051_v13 = vpop.permute.xlu0 %5050 }
0x115b   :  { %v5067_v30 = vsel %vm4816_vm5, %v5066_v24, %v5051_v13 }
0x115c   :  { %v11627_v22 = vrot.slane %v5067_v30, %v9985_v19  ;;  %v9422_v30 = vld [vmem:[%s12551_s13 + $0x234] ss:$8 sps:$4 sm:$0xff]  }
0x115e   :  { %v5129_v48 = vpop.permute.xlu0 %5128  ;;  %v5073_v33 = vmul.f32 %v11627_v22, %v11231_v9  ;;  %v5075_v54 = vmul.f32 %v11627_v22, %v11234_v17  ;;  %v5072_v55 = vmul.f32 %v11627_v22, %v11225_v15  ;;  %v5074_v57 = vmul.f32 %v11627_v22, %v11228_v16 }
0x115f   :  { %v5147_v37 = vsel %vm3223_vm11, %v5146_v32, %v5129_v48  ;;  %v5077_v26 = vmul.f32 %v11627_v22, %v11256_v8  ;;  %v5079_v58 = vmul.f32 %v11627_v22, %v11269_v50  ;;  %v5076_v50 = vmul.f32 %v11627_v22, %v11237_v20  ;;  %v9413_v20 = vld [vmem:[%s12551_s13 + $0x264] ss:$8 sps:$4 sm:$0xff]  }
0x1160   :  { %v5148_v18 = vsel %vm4816_vm5, %v5147_v37, %v5132_v46  ;;  %v5078_v63 = vmul.f32 %v11627_v22, %v11244_v34  ;;  %v5081_v27 = vmul.f32 %v11627_v22, %v11281_v38  ;;  %v5083_v7 = vmul.f32 %v11627_v22, %v11288_v56  ;;  %v9411_v56 = vld [vmem:[%s12551_s13 + $0x260] ss:$8 sps:$4 sm:$0xff]  }
0x1161   :  { %v11635_v31 = vrot.slane %v5148_v18, %v10212_v59  ;;  %v5080_v40 = vmul.f32 %v11627_v22, %v11247_v36  ;;  %v5082_v41 = vmul.f32 %v11627_v22, %v11259_v6  ;;  %v5085_v42 = vmul.f32 %v11627_v22, %v11293_v44  ;;  %v9419_v36 = vld [vmem:[%s12551_s13 + $0x244] ss:$8 sps:$4 sm:$0xff]  }
0x1162   :  { %v5087_v45 = vmul.f32 %v11627_v22, %v11298_v51  ;;  %v9417_v51 = vld [vmem:[%s12551_s13 + $0x240] ss:$8 sps:$4 sm:$0xff]   ;;  %v5084_v18 = vmul.f32 %v11627_v22, %v11264_v39 }
0x1163   :  { %v5154_v9 = vadd.f32 %v11635_v31, %v5073_v33  ;;  %v5156_v47 = vadd.f32 %v11635_v31, %v5075_v54  ;;  %v5153_v49 = vadd.f32 %v11635_v31, %v5072_v55  ;;  %v5155_v17 = vadd.f32 %v11635_v31, %v5074_v57  ;;  %v9420_v54 = vld [vmem:[%s12551_s13 + $0x230] ss:$8 sps:$4 sm:$0xff]   ;;  %v9425_v57 = vld [vmem:[%s12551_s13 + $0x224] ss:$8 sps:$4 sm:$0xff]  }
0x1164   :  { %v5158_v3 = vadd.f32 %v11635_v31, %v5077_v26  ;;  %v5160_v15 = vadd.f32 %v11635_v31, %v5079_v58  ;;  %v5157_v34 = vadd.f32 %v11635_v31, %v5076_v50  ;;  %v5159_v52 = vadd.f32 %v11635_v31, %v5078_v63  ;;  %v9441_v50 = vld [vmem:[%s12551_s13 + $0x2c0] ss:$8 sps:$4 sm:$0xff]   ;;  %v9446_v63 = vld [vmem:[%s12551_s13 + $0x2b4] ss:$8 sps:$4 sm:$0xff]  }
0x1165   :  { %v5170_v12 = vmax.f32 %v5154_v9, 0.0  ;;  %v5172_v16 = vmax.f32 %v5156_v47, 0.0  ;;  %v5169_v61 = vmax.f32 %v5153_v49, 0.0  ;;  %v5171_v62 = vmax.f32 %v5155_v17, 0.0  ;;  %v9431_v17 = vld [vmem:[%s12551_s13 + $0x204] ss:$8 sps:$4 sm:$0xff]  }
0x1166   :  { %v5174_v8 = vmax.f32 %v5158_v3, 0.0  ;;  %v5176_v29 = vmax.f32 %v5160_v15, 0.0  ;;  %v5162_v1 = vadd.f32 %v11635_v31, %v5081_v27  ;;  %v5164_v38 = vadd.f32 %v11635_v31, %v5083_v7  ;;  %v9429_v3 = vld [vmem:[%s12551_s13 + $0x200] ss:$8 sps:$4 sm:$0xff]   ;;  %v9434_v15 = vld [vmem:[%s12551_s13 + $0x2f4] ss:$8 sps:$4 sm:$0xff]  }
0x1167   :  { %v11657_v2 = vpack.c.bf16 %v5172_v16, %v5170_v12  ;;  %v11662_v28 = vpack.c.bf16 %v5171_v62, %v5169_v61  ;;  %v5173_v14 = vmax.f32 %v5157_v34, 0.0  ;;  %v5175_v21 = vmax.f32 %v5159_v52, 0.0  ;;  %v9432_v12 = vld [vmem:[%s12551_s13 + $0x2f0] ss:$8 sps:$4 sm:$0xff]   ;;  %v9437_v16 = vld [vmem:[%s12551_s13 + $0x2e4] ss:$8 sps:$4 sm:$0xff]  }
0x1168   :  { %v11675_v53 = vpack.c.bf16 %v5176_v29, %v5174_v8  ;;  %v5178_v4 = vmax.f32 %v5162_v1, 0.0  ;;  %v5180_v35 = vmax.f32 %v5164_v38, 0.0  ;;  %v5161_v6 = vadd.f32 %v11635_v31, %v5080_v40  ;;  %v9435_v61 = vld [vmem:[%s12551_s13 + $0x2e0] ss:$8 sps:$4 sm:$0xff]   ;;  %v9440_v62 = vld [vmem:[%s12551_s13 + $0x2d4] ss:$8 sps:$4 sm:$0xff]  }
0x1169   :  { %5417 = vmatprep.mubr.bf16.mxu0 %v11657_v2  ;;  %5683 = vmatprep.mubr.bf16.mxu1 %v11657_v2  ;;  %v11700_v10 = vpack.c.bf16 %v5175_v21, %v5173_v14  ;;  %v5163_v24 = vadd.f32 %v11635_v31, %v5082_v41  ;;  %v5166_v43 = vadd.f32 %v11635_v31, %v5085_v42  ;;  %v9438_v8 = vld [vmem:[%s12551_s13 + $0x2d0] ss:$8 sps:$4 sm:$0xff]   ;;  %v9443_v29 = vld [vmem:[%s12551_s13 + $0x2c4] ss:$8 sps:$4 sm:$0xff]   ;;  %v9447_v27 = vld [vmem:[%s12551_s13 + $0x2a0] ss:$8 sps:$4 sm:$0xff]  }
0x116a   :  { %5418 = vmatmul.mubr.bf16.vlgmr.msra.gmra.mxu0 %v11662_v28  ;;  %5684 = vmatmul.mubr.bf16.vlgmr.msra.gmra.mxu1 %v11662_v28  ;;  %v11707_v13 = vpack.c.bf16 %v5180_v35, %v5178_v4  ;;  %v5168_v44 = vadd.f32 %v11635_v31, %v5087_v45  ;;  %v5177_v46 = vmax.f32 %v5161_v6, 0.0  ;;  %v5086_v33 = vmul.f32 %v11627_v22, %v11272_v25  ;;  %v9423_v25 = vld [vmem:[%s12551_s13 + $0x220] ss:$8 sps:$4 sm:$0xff]   ;;  %v9428_v22 = vld [vmem:[%s12551_s13 + $0x214] ss:$8 sps:$4 sm:$0xff]  }
0x116b   :  { %5918 = vmatpush1.bf16.msra.mxu0 %v9408_v60  ;;  %5427 = vmatprep.mubr.bf16.mxu0 %v11675_v53  ;;  %v5179_v32 = vmax.f32 %v5163_v24, 0.0  ;;  %v5182_v48 = vmax.f32 %v5166_v43, 0.0  ;;  %v5165_v26 = vadd.f32 %v11635_v31, %v5084_v18  ;;  %v9449_v60 = vld [vmem:[%s12551_s13 + $0x2a4] ss:$8 sps:$4 sm:$0xff]   ;;  %v9452_v7 = vld [vmem:[%s12551_s13 + $0x294] ss:$8 sps:$4 sm:$0xff]  }
0x116c   :  { %5693 = vmatprep.mubr.bf16.mxu1 %v11675_v53  ;;  %5919 = vmatprep.subr.bf16.mxu0 %v9413_v20  ;;  %v5184_v37 = vmax.f32 %v5168_v44, 0.0  ;;  %v5167_v58 = vadd.f32 %v11635_v31, %v5086_v33  ;;  %v9426_v31 = vld [vmem:[%s12551_s13 + $0x210] ss:$8 sps:$4 sm:$0xff]   ;;  %v9455_v34 = vld [vmem:[%s12551_s13 + $0x284] ss:$8 sps:$4 sm:$0xff]  }
0x116d   :  { %v11728_v55 = vpack.c.bf16 %v5179_v32, %v5177_v46  ;;  %v5181_v9 = vmax.f32 %v5165_v26, 0.0  ;;  %v9450_v20 = vld [vmem:[%s12551_s13 + $0x290] ss:$8 sps:$4 sm:$0xff]   ;;  %v9453_v52 = vld [vmem:[%s12551_s13 + $0x280] ss:$8 sps:$4 sm:$0xff]  }
0x116e   :  { %v5192_v39 = vpack.c.bf16 %v5184_v37, %v5182_v48  ;;  %v5183_v47 = vmax.f32 %v5167_v58, 0.0 }
0x116f   :  { %5920 = vmatpush1.bf16.msra.mxu0 %v9411_v56 }
0x1170   :  { %5921 = vmatprep.subr.bf16.mxu0 %v9416_v23  ;;  %v5191_v49 = vpack.c.bf16 %v5183_v47, %v5181_v9 }
0x1172   :  { %5428 = vmatmul.mubr.bf16.gmra.mxu0 %v11700_v10  ;;  %5694 = vmatmul.mubr.bf16.gmra.mxu1 %v11700_v10 }
0x1173   :  { %5922 = vmatpush1.bf16.msra.mxu0 %v9414_v5  ;;  %5437 = vmatprep.mubr.bf16.mxu0 %v11707_v13 }
0x1174   :  { %5703 = vmatprep.mubr.bf16.mxu1 %v11707_v13  ;;  %5923 = vmatprep.subr.bf16.mxu0 %v9419_v36 }
0x1177   :  { %5924 = vmatpush1.bf16.msra.mxu0 %v9417_v51 }
0x1178   :  { %5925 = vmatprep.subr.bf16.mxu0 %v9422_v30 }
0x117a   :  { %5438 = vmatmul.mubr.bf16.gmra.mxu0 %v11728_v55  ;;  %5704 = vmatmul.mubr.bf16.gmra.mxu1 %v11728_v55 }
0x117b   :  { %5926 = vmatpush1.bf16.msra.mxu0 %v9420_v54  ;;  %5447 = vmatprep.mubr.bf16.mxu0 %v5192_v39 }
0x117c   :  { %5713 = vmatprep.mubr.bf16.mxu1 %v5192_v39  ;;  %5927 = vmatprep.subr.bf16.mxu0 %v9425_v57 }
0x117f   :  { %5928 = vmatpush1.bf16.msra.mxu0 %v9423_v25 }
0x1180   :  { %5929 = vmatprep.subr.bf16.mxu0 %v9428_v22 }
0x1182   :  { %5448 = vmatmul.mubr.bf16.gmra.mxu0 %v5191_v49  ;;  %5714 = vmatmul.mubr.bf16.gmra.mxu1 %v5191_v49 }
0x1183   :  { %5930 = vmatpush1.bf16.msra.mxu0 %v9426_v31  ;;  %5949 = vmatprep.mubr.bf16.mxu0 %v11657_v2  ;;  %v9444_v2 = vld [vmem:[%s12551_s13 + $0x2b0] ss:$8 sps:$4 sm:$0xff]  }
0x1184   :  { %5931 = vmatprep.subr.bf16.mxu0 %v9431_v17  ;;  %6070 = vmatprep.mubr.f32.mxu1 %v9768_v11 }
0x1187   :  { %5932 = vmatpush1.bf16.msra.mxu0 %v9429_v3 }
0x1188   :  { %5933 = vmatprep.subr.bf16.mxu0 %v9434_v15  ;;  %v5990_v15 = vld [vmem:[#allocation16] sm:$0xff] }
0x118b   :  { %5934 = vmatpush2.bf16.msra.mxu0 %v9432_v12 }
0x118c   :  { %5935 = vmatprep.subr.bf16.mxu0 %v9437_v16 }
0x118f   :  { %5936 = vmatpush2.bf16.msra.mxu0 %v9435_v61  ;;  %v5991_v61 = vld [vmem:[#allocation16 + $0x8] sm:$0xff] }
0x1190   :  { %5937 = vmatprep.subr.bf16.mxu0 %v9440_v62 }
0x1193   :  { %5938 = vmatpush2.bf16.msra.mxu0 %v9438_v8  ;;  %v5992_v8 = vld [vmem:[#allocation16 + $0x10] sm:$0xff] }
0x1194   :  { %5939 = vmatprep.subr.bf16.mxu0 %v9443_v29 }
0x1197   :  { %5940 = vmatpush2.bf16.msra.mxu0 %v9441_v50  ;;  %v5993_v50 = vld [vmem:[#allocation16 + $0x18] sm:$0xf] }
0x1198   :  { %5941 = vmatprep.subr.bf16.mxu0 %v9446_v63 }
0x119b   :  { %5942 = vmatpush2.bf16.msra.mxu0 %v9444_v2 }
0x119c   :  { %5943 = vmatprep.subr.bf16.mxu0 %v9449_v60 }
0x119f   :  { %5944 = vmatpush2.bf16.msra.mxu0 %v9447_v27 }
0x11a0   :  { %5945 = vmatprep.subr.bf16.mxu0 %v9452_v7 }
0x11a3   :  { %5946 = vmatpush2.bf16.msra.mxu0 %v9450_v20 }
0x11a4   :  { %5947 = vmatprep.subr.bf16.mxu0 %v9455_v34 }
0x11a7   :  { %5948 = vmatpush2.bf16.msra.mxu0 %v9453_v52 }
0x11a8   :  { %7085 = vmatprep.subr.bf16.mxu0 %v9767_v0 }
0x11aa   :  { %5950 = vmatmul.mubr.bf16.vlgmr.msra.gmra.mxu0 %v11662_v28 }
0x11ab   :  { %5959 = vmatprep.mubr.bf16.mxu0 %v11675_v53 }
0x11b2   :  { %5960 = vmatmul.mubr.bf16.gmra.mxu0 %v11700_v10 }
0x11b3   :  { %5969 = vmatprep.mubr.bf16.mxu0 %v11707_v13 }
0x11ba   :  { %5970 = vmatmul.mubr.bf16.gmra.mxu0 %v11728_v55 }
0x11bb   :  { %5979 = vmatprep.mubr.bf16.mxu0 %v5192_v39 }
0x11c2   :  { %5980 = vmatmul.mubr.bf16.gmra.mxu0 %v5191_v49 }
0x122a   :  { %v11808_v1 = vpop.f32.mrf.mxu0  ;;  %v5685_v5 = vpop.f32.mrf.mxu1 }
0x122c   :  { %v11810_v38 = vpop.f32.mrf.mxu0  ;;  %v5687_v45 = vpop.f32.mrf.mxu1 }
0x122e   :  { %v5423_v56 = vpop.f32.mrf.mxu0  ;;  %v5689_v36 = vpop.f32.mrf.mxu1 }
0x1230   :  { %v5425_v23 = vpop.f32.mrf.mxu0  ;;  %v5691_v24 = vpop.f32.mrf.mxu1 }
0x1232   :  { %v5429_v14 = vpop.f32.mrf.mxu0  ;;  %v5695_v44 = vpop.f32.mrf.mxu1 }
0x1234   :  { %v5431_v21 = vpop.f32.mrf.mxu0  ;;  %v5697_v46 = vpop.f32.mrf.mxu1 }
0x1236   :  { %v5433_v4 = vpop.f32.mrf.mxu0  ;;  %v5699_v37 = vpop.f32.mrf.mxu1 }
0x1238   :  { %v5435_v28 = vpop.f32.mrf.mxu0  ;;  %v5701_v54 = vpop.f32.mrf.mxu1 }
0x123a   :  { %v11812_v35 = vpop.f32.mrf.mxu0  ;;  %v5705_v26 = vpop.f32.mrf.mxu1 }
0x123c   :  { %v11814_v53 = vpop.f32.mrf.mxu0  ;;  %v5707_v25 = vpop.f32.mrf.mxu1 }
0x123e   :  { %v11816_v40 = vpop.f32.mrf.mxu0  ;;  %v5709_v9 = vpop.f32.mrf.mxu1 }
0x1240   :  { %v11818_v41 = vpop.f32.mrf.mxu0  ;;  %v5711_v31 = vpop.f32.mrf.mxu1 }
0x1242   :  { %v11820_v42 = vpop.f32.mrf.mxu0  ;;  %v5715_v17 = vpop.f32.mrf.mxu1 }
0x1244   :  { %v11822_v10 = vpop.f32.mrf.mxu0  ;;  %v5717_v12 = vpop.f32.mrf.mxu1 }
0x1246   :  { %v11824_v6 = vpop.f32.mrf.mxu0  ;;  %v5719_v62 = vpop.f32.mrf.mxu1 }
0x1248   :  { %v11826_v13 = vpop.f32.mrf.mxu0  ;;  %v5721_v29 = vpop.f32.mrf.mxu1 }
0x126a   :  { %v5951_v43 = vpop.f32.mrf.mxu0 }
0x126c   :  { %v5953_v51 = vpop.f32.mrf.mxu0 }
0x126e   :  { %v5955_v30 = vpop.f32.mrf.mxu0 }
0x1270   :  { %v5957_v32 = vpop.f32.mrf.mxu0 }
0x1272   :  { %v5961_v48 = vpop.f32.mrf.mxu0 }
0x1274   :  { %v5963_v18 = vpop.f32.mrf.mxu0 }
0x1276   :  { %v5965_v33 = vpop.f32.mrf.mxu0 }
0x1278   :  { %v5967_v55 = vpop.f32.mrf.mxu0 }
0x1279   :  { %6014 = vmatprep.subr.mxu1 %v5967_v55 }
0x127a   :  { %v5971_v57 = vpop.f32.mrf.mxu0  ;;  %6015 = vmatpush1.msra.mxu1 %v5965_v33 }
0x127b   :  { %6016 = vmatprep.subr.mxu1 %v5963_v18 }
0x127c   :  { %v5973_v58 = vpop.f32.mrf.mxu0  ;;  %6017 = vmatpush1.msra.mxu1 %v5961_v48 }
0x127d   :  { %6018 = vmatprep.subr.mxu1 %v5957_v32 }
0x127e   :  { %v5975_v39 = vpop.f32.mrf.mxu0  ;;  %6019 = vmatpush1.msra.mxu1 %v5955_v30 }
0x127f   :  { %6020 = vmatprep.subr.mxu1 %v5953_v51 }
0x1280   :  { %v5977_v22 = vpop.f32.mrf.mxu0  ;;  %6021 = vmatpush1.msra.mxu1 %v5951_v43 }
0x1281   :  { %6022 = vmatprep.subr.mxu1 %v5701_v54 }
0x1282   :  { %6023 = vmatpush1.msra.mxu1 %v5699_v37  ;;  %v5981_v47 = vpop.f32.mrf.mxu0 }
0x1283   :  { %6024 = vmatprep.subr.mxu1 %v5697_v46 }
0x1284   :  { %6025 = vmatpush1.msra.mxu1 %v5695_v44  ;;  %v5983_v49 = vpop.f32.mrf.mxu0 }
0x1285   :  { %6026 = vmatprep.subr.mxu1 %v5691_v24 }
0x1286   :  { %6027 = vmatpush1.msra.mxu1 %v5689_v36  ;;  %v5985_v3 = vpop.f32.mrf.mxu0 }
0x1287   :  { %6028 = vmatprep.subr.mxu1 %v5687_v45 }
0x1288   :  { %6029 = vmatpush1.msra.mxu1 %v5685_v5  ;;  %v5987_v16 = vpop.f32.mrf.mxu0 }
0x1289   :  { %6030 = vmatprep.subr.mxu1 %v5435_v28 }
0x128a   :  { %6031 = vmatpush1.msra.mxu1 %v5433_v4 }
0x128b   :  { %6032 = vmatprep.subr.mxu1 %v5431_v21 }
0x128c   :  { %6033 = vmatpush1.msra.mxu1 %v5429_v14 }
0x128d   :  { %6034 = vmatprep.subr.mxu1 %v5425_v23 }
0x128e   :  { %6035 = vmatpush1.msra.mxu1 %v5423_v56 }
0x128f   :  { %6036 = vmatprep.subr.mxu1 %v11810_v38 }
0x1290   :  { %6037 = vmatpush1.msra.mxu1 %v11808_v1 }
0x1291   :  { %8467 = vmatmul.mubr.msk.f32.vlgmr.msra.gmra.mxu1 %vm1901_vm8, %v5990_v15  ;;  %6103 = vmatprep.subr.mxu1 %v5987_v16 }
0x1292   :  { %6104 = vmatpush1.msra.mxu1 %v5985_v3  ;;  %6076 = vmatprep.mubr.f32.mxu1 %v9768_v11 }
0x1293   :  { %6105 = vmatprep.subr.mxu1 %v5983_v49 }
0x1294   :  { %6106 = vmatpush1.msra.mxu1 %v5981_v47 }
0x1295   :  { %8468 = vmatmul.mubr.msk.f32.gmra.mxu1 %vm1901_vm8, %v5991_v61  ;;  %6107 = vmatprep.subr.mxu1 %v5977_v22 }
0x1296   :  { %6108 = vmatpush1.msra.mxu1 %v5975_v39  ;;  %6082 = vmatprep.mubr.f32.mxu1 %v9768_v11 }
0x1297   :  { %6109 = vmatprep.subr.mxu1 %v5973_v58 }
0x1298   :  { %6110 = vmatpush1.msra.mxu1 %v5971_v57 }
0x1299   :  { %8469 = vmatmul.mubr.msk.f32.gmra.mxu1 %vm1901_vm8, %v5992_v8  ;;  %6111 = vmatprep.subr.mxu1 %v5721_v29 }
0x129a   :  { %6112 = vmatpush1.msra.mxu1 %v5719_v62  ;;  %6088 = vmatprep.mubr.f32.mxu1 %v9768_v11 }
0x129b   :  { %6113 = vmatprep.subr.mxu1 %v5717_v12 }
0x129c   :  { %6114 = vmatpush1.msra.mxu1 %v5715_v17 }
0x129d   :  { %6115 = vmatprep.subr.mxu1 %v5711_v31  ;;  %8470 = vmatmul.mubr.msk.f32.gmra.mxu1 %vm1901_vm8, %v5993_v50 }
0x129e   :  { %6116 = vmatpush1.msra.mxu1 %v5709_v9  ;;  %6159 = vmatprep.mubr.f32.mxu1 %v9768_v11 }
0x129f   :  { %6117 = vmatprep.subr.mxu1 %v5707_v25 }
0x12a0   :  { %6118 = vmatpush1.msra.mxu1 %v5705_v26 }
0x12a1   :  { %6119 = vmatprep.subr.mxu1 %v11826_v13 }
0x12a2   :  { %6120 = vmatpush1.msra.mxu1 %v11824_v6 }
0x12a3   :  { %6121 = vmatprep.subr.mxu1 %v11822_v10 }
0x12a4   :  { %6122 = vmatpush1.msra.mxu1 %v11820_v42 }
0x12a5   :  { %6123 = vmatprep.subr.mxu1 %v11818_v41 }
0x12a6   :  { %6124 = vmatpush1.msra.mxu1 %v11816_v40 }
0x12a7   :  { %6125 = vmatprep.subr.mxu1 %v11814_v53 }
0x12a8   :  { %6126 = vmatpush1.msra.mxu1 %v11812_v35 }
0x12a9   :  { %8471 = vmatmul.mubr.msk.f32.vlgmr.msra.gmra.mxu1 %vm1901_vm8, %v5990_v15  ;;  %6908 = vmatprep.subr.bf16.mxu1 %v9767_v0 }
0x12aa   :  { %6165 = vmatprep.mubr.f32.mxu1 %v9768_v11 }
0x12ad   :  { %8472 = vmatmul.mubr.msk.f32.gmra.mxu1 %vm1901_vm8, %v5991_v61 }
0x12ae   :  { %6171 = vmatprep.mubr.f32.mxu1 %v9768_v11 }
0x12b1   :  { %8473 = vmatmul.mubr.msk.f32.gmra.mxu1 %vm1901_vm8, %v5992_v8 }
0x12b2   :  { %6177 = vmatprep.mubr.f32.mxu1 %v9768_v11 }
0x12b5   :  { %8474 = vmatmul.mubr.msk.f32.gmra.mxu1 %vm1901_vm8, %v5993_v50 }
0x1351   :  { %v11854_v63 = vpop.f32.mrf.mxu1 }
0x1353   :  { %v11856_v2 = vpop.f32.mrf.mxu1 }
0x1354   :  { %v6229_v18 = vsel %vm1901_vm8, %v11856_v2, 0.0 }
0x1355   :  { %v11858_v60 = vpop.f32.mrf.mxu1 }
0x1356   :  { %v6217_v14 = vadd.f32 %v11858_v60, %v11854_v63 }
0x1357   :  { %v11860_v27 = vpop.f32.mrf.mxu1 }
0x1358   :  { %v6230_v30 = vsel %vm1901_vm8, %v11860_v27, 0.0 }
0x1359   :  { %v11862_v7 = vpop.f32.mrf.mxu1  ;;  %v6231_v54 = vadd.f32 %v6230_v30, %v6229_v18 }
0x135a   :  { %v6218_v28 = vadd.f32 %v6217_v14, %v11862_v7 }
0x135b   :  { %v11864_v20 = vpop.f32.mrf.mxu1 }
0x135c   :  { %v6232_v33 = vsel %vm1901_vm8, %v11864_v20, 0.0 }
0x135d   :  { %v6090_v34 = vpop.f32.mrf.mxu1  ;;  %v6233_v39 = vadd.f32 %v6232_v33, %v6231_v54 }
0x135f   :  { %v6092_v52 = vpop.f32.mrf.mxu1 }
0x1369   :  { %v6161_v1 = vpop.f32.mrf.mxu1 }
0x136a   :  { %v6192_v56 = vrot.slane %v6161_v1, 4 }
0x136b   :  { %v6163_v38 = vpop.f32.mrf.mxu1 }
0x136c   :  { %v11869_v4 = vsel %vm455_vm4, %v6090_v34, %v6192_v56  ;;  %v6193_v13 = vrot.slane %v6163_v38, 4 }
0x136d   :  { %v6167_v11 = vpop.f32.mrf.mxu1  ;;  %v6219_v41 = vadd.f32 %v6218_v28, %v11869_v4 }
0x136e   :  { %v6194_v23 = vrot.slane %v6167_v11, 4  ;;  %v11888_v32 = vsel %vm455_vm4, %v6092_v52, %v6193_v13 }
0x136f   :  { %v6169_v21 = vpop.f32.mrf.mxu1  ;;  %v6234_v58 = vsel %vm1901_vm8, %v11888_v32, 0.0 }
0x1370   :  { %v11873_v53 = vsel %vm455_vm4, %v6192_v56, %v6194_v23  ;;  %v6196_v44 = vrot.slane %v6169_v21, 4  ;;  %v6235_v47 = vadd.f32 %v6234_v58, %v6233_v39 }
0x1371   :  { %v6173_v35 = vpop.f32.mrf.mxu1  ;;  %v6220_v45 = vadd.f32 %v6219_v41, %v11873_v53 }
0x1372   :  { %v6198_v40 = vrot.slane %v6173_v35, 4  ;;  %v11895_v55 = vsel %vm455_vm4, %v6193_v13, %v6196_v44 }
0x1373   :  { %v6175_v5 = vpop.f32.mrf.mxu1  ;;  %v6236_v9 = vsel %vm1901_vm8, %v11895_v55, 0.0 }
0x1374   :  { %v11877_v42 = vsel %vm455_vm4, %v6194_v23, %v6198_v40  ;;  %v6200_v48 = vrot.slane %v6175_v5, 4  ;;  %v6237_v3 = vadd.f32 %v6236_v9, %v6235_v47 }
0x1375   :  { %v6179_v10 = vpop.f32.mrf.mxu1  ;;  %v6221_v6 = vadd.f32 %v6220_v45, %v11877_v42 }
0x1376   :  { %v6202_v36 = vrot.slane %v6179_v10, 4  ;;  %v11900_v25 = vsel %vm455_vm4, %v6196_v44, %v6200_v48 }
0x1377   :  { %v6181_v46 = vpop.f32.mrf.mxu1  ;;  %v6238_v17 = vsel %vm1901_vm8, %v11900_v25, 0.0 }
0x1378   :  { %v11882_v24 = vsel %vm455_vm4, %v6198_v40, %v6202_v36  ;;  %v6204_v26 = vrot.slane %v6181_v46, 4  ;;  %v6239_v16 = vadd.f32 %v6238_v17, %v6237_v3 }
0x1379   :  { %v6222_v43 = vadd.f32 %v6221_v6, %v11882_v24 }
0x137a   :  { %v11905_v49 = vsel %vm455_vm4, %v6200_v48, %v6204_v26 }
0x137b   :  { %v6223_v51 = vrot.slane %v6222_v43, 4  ;;  %v6240_v12 = vsel %vm1901_vm8, %v11905_v49, 0.0 }
0x137c   :  { %v6241_v61 = vadd.f32 %v6240_v12, %v6239_v16 }
0x137d   :  { %v6224_v37 = vadd.f32 %v6223_v51, %v6222_v43 }
0x137e   :  { %v6242_v62 = vrot.slane %v6241_v61, 4 }
0x137f   :  { %v6225_v57 = vrot.slane %v6224_v37, 2 }
0x1380   :  { %v6243_v8 = vadd.f32 %v6242_v62, %v6241_v61 }
0x1381   :  { %v6226_v22 = vadd.f32 %v6225_v57, %v6224_v37 }
0x1382   :  { %v6244_v29 = vrot.slane %v6243_v8, 2 }
0x1383   :  { %v6227_v31 = vrot.slane %v6226_v22, 1 }
0x1384   :  { %v6245_v50 = vadd.f32 %v6244_v29, %v6243_v8 }
0x1385   :  { %v6228_v15 = vadd.f32 %v6227_v31, %v6226_v22 }
0x1386   :  { %v6246_v34 = vrot.slane %v6245_v50, 1 }
0x1387   :  { %6253 = vrot.lane.b32.xlu1 %v6228_v15, %s9772_s7  ;;  %6249 = vrot.lane.b32.xlu0 %v6228_v15, %s9776_s26 }
0x1388   :  { %v6247_v52 = vadd.f32 %v6246_v34, %v6245_v50 }
0x138b   :  { %6261 = vrot.lane.b32.xlu1 %v6228_v15, %s9770_s4  ;;  %6257 = vrot.lane.b32.xlu0 %v6228_v15, %s9777_s10 }
0x138f   :  { %6269 = vrot.lane.b32.xlu1 %v6228_v15, %s9773_s25  ;;  %6265 = vrot.lane.b32.xlu0 %v6228_v15, %s9778_s28 }
0x1393   :  { %6277 = vrot.lane.b32.xlu1 %v6228_v15, %s9769_s24  ;;  %6273 = vrot.lane.b32.xlu0 %v6228_v15, %s9779_s29 }
0x1397   :  { %6285 = vrot.lane.b32.xlu1 %v6228_v15, %s9774_s3  ;;  %6281 = vrot.lane.b32.xlu0 %v6228_v15, %s9780_s0 }
0x139b   :  { %6293 = vrot.lane.b32.xlu1 %v6228_v15, %s9771_s27  ;;  %6289 = vrot.lane.b32.xlu0 %v6228_v15, %s9781_s1 }
0x139f   :  { %6301 = vrot.lane.b32.xlu1 %v6228_v15, %s9775_s8  ;;  %6297 = vrot.lane.b32.xlu0 %v6228_v15, %s9782_s5 }
0x13a3   :  { %6305 = vrot.lane.b32.xlu0 %v6228_v15, %s9759_s20  ;;  %6311 = vrot.lane.b32.xlu1 %v6247_v52, %s9776_s26 }
0x13a7   :  { %6315 = vrot.lane.b32.xlu0 %v6247_v52, %s9772_s7  ;;  %6319 = vrot.lane.b32.xlu1 %v6247_v52, %s9777_s10 }
0x13ab   :  { %6323 = vrot.lane.b32.xlu0 %v6247_v52, %s9770_s4  ;;  %6327 = vrot.lane.b32.xlu1 %v6247_v52, %s9778_s28 }
0x13af   :  { %6331 = vrot.lane.b32.xlu0 %v6247_v52, %s9773_s25  ;;  %6335 = vrot.lane.b32.xlu1 %v6247_v52, %s9779_s29 }
0x13b3   :  { %6339 = vrot.lane.b32.xlu0 %v6247_v52, %s9769_s24  ;;  %6343 = vrot.lane.b32.xlu1 %v6247_v52, %s9780_s0 }
0x13b7   :  { %6347 = vrot.lane.b32.xlu0 %v6247_v52, %s9774_s3  ;;  %6351 = vrot.lane.b32.xlu1 %v6247_v52, %s9781_s1 }
0x13f9   :  { %v6254_v1 = vpop.permute.xlu1 %6253  ;;  %v6250_v38 = vpop.permute.xlu0 %6249 }
0x13fa   :  { %v6252_v56 = vadd.f32 %v6250_v38, %v6228_v15 }
0x13fc   :  { %v6256_v11 = vadd.f32 %v6254_v1, %v6252_v56 }
0x13fd   :  { %v6262_v23 = vpop.permute.xlu1 %6261  ;;  %v6258_v14 = vpop.permute.xlu0 %6257 }
0x13fe   :  { %v6260_v21 = vadd.f32 %v6258_v14, %v6256_v11 }
0x1400   :  { %v6264_v28 = vadd.f32 %v6262_v23, %v6260_v21 }
0x1401   :  { %v6270_v35 = vpop.permute.xlu1 %6269  ;;  %v6266_v40 = vpop.permute.xlu0 %6265 }
0x1402   :  { %v6268_v41 = vadd.f32 %v6266_v40, %v6264_v28 }
0x1404   :  { %v6272_v5 = vadd.f32 %v6270_v35, %v6268_v41 }
0x1405   :  { %v6278_v45 = vpop.permute.xlu1 %6277  ;;  %v6274_v10 = vpop.permute.xlu0 %6273 }
0x1406   :  { %v6276_v36 = vadd.f32 %v6274_v10, %v6272_v5 }
0x1408   :  { %v6280_v6 = vadd.f32 %v6278_v45, %v6276_v36 }
0x1409   :  { %v6286_v13 = vpop.permute.xlu1 %6285  ;;  %v6282_v43 = vpop.permute.xlu0 %6281 }
0x140a   :  { %v6284_v44 = vadd.f32 %v6282_v43, %v6280_v6 }
0x140c   :  { %v6288_v51 = vadd.f32 %v6286_v13, %v6284_v44 }
0x140d   :  { %v6294_v30 = vpop.permute.xlu1 %6293  ;;  %v6290_v46 = vpop.permute.xlu0 %6289 }
0x140e   :  { %v6292_v48 = vadd.f32 %v6290_v46, %v6288_v51 }
0x1410   :  { %v6296_v37 = vadd.f32 %v6294_v30, %v6292_v48 }
0x1411   :  { %v6302_v18 = vpop.permute.xlu1 %6301  ;;  %v6298_v33 = vpop.permute.xlu0 %6297 }
0x1412   :  { %v6300_v54 = vadd.f32 %v6298_v33, %v6296_v37 }
0x1414   :  { %v6304_v57 = vadd.f32 %v6302_v18, %v6300_v54 }
0x1415   :  { %v6306_v26 = vpop.permute.xlu0 %6305  ;;  %v6312_v58 = vpop.permute.xlu1 %6311 }
0x1416   :  { %v6308_v39 = vadd.f32 %v6306_v26, %v6304_v57 }
0x1418   :  { %v6309_v22 = vadd.f32 %v6308_v39, %v6247_v52 }
0x1419   :  { %v6316_v9 = vpop.permute.xlu0 %6315  ;;  %v6320_v47 = vpop.permute.xlu1 %6319 }
0x141a   :  { %v6314_v31 = vadd.f32 %v6312_v58, %v6309_v22 }
0x141c   :  { %v6318_v17 = vadd.f32 %v6316_v9, %v6314_v31 }
0x141d   :  { %v6324_v3 = vpop.permute.xlu0 %6323  ;;  %v6328_v15 = vpop.permute.xlu1 %6327 }
0x141e   :  { %v6322_v12 = vadd.f32 %v6320_v47, %v6318_v17 }
0x1420   :  { %v6326_v16 = vadd.f32 %v6324_v3, %v6322_v12 }
0x1421   :  { %v6332_v61 = vpop.permute.xlu0 %6331  ;;  %v6336_v62 = vpop.permute.xlu1 %6335 }
0x1422   :  { %v6330_v8 = vadd.f32 %v6328_v15, %v6326_v16 }
0x1424   :  { %v6334_v29 = vadd.f32 %v6332_v61, %v6330_v8 }
0x1425   :  { %v6340_v50 = vpop.permute.xlu0 %6339  ;;  %v6344_v1 = vpop.permute.xlu1 %6343 }
0x1426   :  { %v6338_v34 = vadd.f32 %v6336_v62, %v6334_v29 }
0x1428   :  { %v6342_v38 = vadd.f32 %v6340_v50, %v6338_v34 }
0x1429   :  { %v6348_v11 = vpop.permute.xlu0 %6347  ;;  %v6352_v52 = vpop.permute.xlu1 %6351 }
0x142a   :  { %v6346_v56 = vadd.f32 %v6344_v1, %v6342_v38 }
0x142c   :  { %v6350_v23 = vadd.f32 %v6348_v11, %v6346_v56 }
0x142e   :  { %v6354_v14 = vadd.f32 %v6352_v52, %v6350_v23 }
0x1430   :  { %v6356_v21 = vmul.f32 0.0006377551, %v6354_v14 }
0x1432   :  { %6361 = vrot.lane.b32.xlu1 %v6356_v21, %s9775_s8  ;;  %6358 = vrot.lane.b32.xlu0 %v6356_v21, %s9759_s20 }
0x1436   :  { %6367 = vrot.lane.b32.xlu1 %v6356_v21, %s9771_s27  ;;  %6364 = vrot.lane.b32.xlu0 %v6356_v21, %s9782_s5 }
0x143a   :  { %6373 = vrot.lane.b32.xlu1 %v6356_v21, %s9774_s3  ;;  %6370 = vrot.lane.b32.xlu0 %v6356_v21, %s9781_s1 }
0x143e   :  { %6379 = vrot.lane.b32.xlu1 %v6356_v21, %s9769_s24  ;;  %6376 = vrot.lane.b32.xlu0 %v6356_v21, %s9780_s0 }
0x1442   :  { %6385 = vrot.lane.b32.xlu1 %v6356_v21, %s9773_s25  ;;  %6382 = vrot.lane.b32.xlu0 %v6356_v21, %s9779_s29 }
0x1446   :  { %6391 = vrot.lane.b32.xlu1 %v6356_v21, %s9770_s4  ;;  %6388 = vrot.lane.b32.xlu0 %v6356_v21, %s9778_s28 }
0x144a   :  { %6397 = vrot.lane.b32.xlu1 %v6356_v21, %s9772_s7  ;;  %6394 = vrot.lane.b32.xlu0 %v6356_v21, %s9777_s10 }
0x144e   :  { %6400 = vrot.lane.b32.xlu0 %v6356_v21, %s9776_s26 }
0x14a4   :  { %v6362_v28 = vpop.permute.xlu1 %6361  ;;  %v6359_v35 = vpop.permute.xlu0 %6358 }
0x14a5   :  { %v6403_v40 = vsel %vm4795_vm12, %v6356_v21, %v6359_v35 }
0x14a6   :  { %v6404_v45 = vsel %vm216_vm0, %v6403_v40, %v6362_v28 }
0x14a8   :  { %v6368_v41 = vpop.permute.xlu1 %6367  ;;  %v6365_v5 = vpop.permute.xlu0 %6364 }
0x14a9   :  { %v6405_v10 = vsel %vm4798_vm13, %v6404_v45, %v6365_v5 }
0x14aa   :  { %v6406_v13 = vsel %vm1898_vm7, %v6405_v10, %v6368_v41 }
0x14ac   :  { %v6374_v36 = vpop.permute.xlu1 %6373  ;;  %v6371_v6 = vpop.permute.xlu0 %6370 }
0x14ad   :  { %v6407_v43 = vsel %vm4801_vm14, %v6406_v13, %v6371_v6 }
0x14ae   :  { %v6408_v30 = vsel %vm3217_vm9, %v6407_v43, %v6374_v36 }
0x14b0   :  { %v6380_v44 = vpop.permute.xlu1 %6379  ;;  %v6377_v51 = vpop.permute.xlu0 %6376 }
0x14b1   :  { %v6409_v46 = vsel %vm4804_vm15, %v6408_v30, %v6377_v51 }
0x14b2   :  { %v6410_v18 = vsel %vm668_vm6, %v6409_v46, %v6380_v44 }
0x14b4   :  { %v6386_v48 = vpop.permute.xlu1 %6385  ;;  %v6383_v37 = vpop.permute.xlu0 %6382 }
0x14b5   :  { %v6411_v33 = vsel %vm4807_vm1, %v6410_v18, %v6383_v37 }
0x14b6   :  { %v6412_v26 = vsel %vm3220_vm10, %v6411_v33, %v6386_v48 }
0x14b8   :  { %v6392_v54 = vpop.permute.xlu1 %6391  ;;  %v6389_v57 = vpop.permute.xlu0 %6388 }
0x14b9   :  { %v6413_v58 = vsel %vm4810_vm2, %v6412_v26, %v6389_v57 }
0x14ba   :  { %v6414_v22 = vsel %vm1901_vm8, %v6413_v58, %v6392_v54  ;;  %v6425_v31 = vrot.slane %v6413_v58, %v9985_v19 }
0x14bc   :  { %v6395_v39 = vpop.permute.xlu0 %6394  ;;  %v6398_v9 = vpop.permute.xlu1 %6397  ;;  %v11970_v16 = vsub.f32 %v11856_v2, %v6425_v31  ;;  %v11973_v61 = vsub.f32 %v11860_v27, %v6425_v31  ;;  %v12001_v1 = vsub.f32 %v11864_v20, %v6425_v31  ;;  %v12016_v20 = vsub.f32 %v11888_v32, %v6425_v31 }
0x14bd   :  { %v6415_v47 = vsel %vm4813_vm3, %v6414_v22, %v6395_v39  ;;  %v12025_v5 = vsub.f32 %v11895_v55, %v6425_v31  ;;  %v12031_v13 = vsub.f32 %v11900_v25, %v6425_v31  ;;  %v12037_v46 = vsub.f32 %v11905_v49, %v6425_v31 }
0x14be   :  { %v6416_v3 = vsel %vm3223_vm11, %v6415_v47, %v6398_v9  ;;  %v6441_v27 = vmul.f32 %v11970_v16, %v11970_v16  ;;  %v6447_v45 = vmul.f32 %v12016_v20, %v12016_v20 }
0x14bf   :  { %v6449_v43 = vmul.f32 %v12025_v5, %v12025_v5  ;;  %v6451_v48 = vmul.f32 %v12031_v13, %v12031_v13  ;;  %v6453_v54 = vmul.f32 %v12037_v46, %v12037_v46 }
0x14c0   :  { %v6401_v17 = vpop.permute.xlu0 %6400  ;;  %v6466_v23 = vsel %vm1901_vm8, %v6441_v27, 0.0  ;;  %v6471_v44 = vsel %vm1901_vm8, %v6447_v45, 0.0 }
0x14c1   :  { %v6417_v15 = vsel %vm4816_vm5, %v6416_v3, %v6401_v17  ;;  %v6473_v37 = vsel %vm1901_vm8, %v6449_v43, 0.0  ;;  %v6475_v57 = vsel %vm1901_vm8, %v6451_v48, 0.0  ;;  %v6477_v49 = vsel %vm1901_vm8, %v6453_v54, 0.0 }
0x14c2   :  { %v6421_v12 = vrot.slane %v6417_v15, %v9985_v19  ;;  %v12075_v15 = vld [vmem:[%s12553_s15] sm:$0x3]  ;;  %s9784_s15 = smov 6  }
0x14c4   :  { %v11976_v62 = vsub.f32 %v11854_v63, %v6421_v12  ;;  %v11979_v8 = vsub.f32 %v11858_v60, %v6421_v12  ;;  %v11982_v29 = vsub.f32 %v11862_v7, %v6421_v12  ;;  %v11985_v50 = vsub.f32 %v11869_v4, %v6421_v12 }
0x14c5   :  { %v6443_v63 = vmul.f32 %v11973_v61, %v11973_v61  ;;  %v11996_v60 = vsub.f32 %v11873_v53, %v6421_v12  ;;  %v12004_v38 = vsub.f32 %v11877_v42, %v6421_v12  ;;  %v12011_v53 = vsub.f32 %v11882_v24, %v6421_v12 }
0x14c6   :  { %v6440_v34 = vmul.f32 %v11976_v62, %v11976_v62  ;;  %v6442_v2 = vmul.f32 %v11979_v8, %v11979_v8  ;;  %v6444_v7 = vmul.f32 %v11982_v29, %v11982_v29  ;;  %v6446_v56 = vmul.f32 %v11985_v50, %v11985_v50 }
0x14c7   :  { %v6467_v52 = vsel %vm1901_vm8, %v6443_v63, 0.0  ;;  %v6448_v14 = vmul.f32 %v11996_v60, %v11996_v60  ;;  %v6445_v42 = vmul.f32 %v12001_v1, %v12001_v1  ;;  %v6450_v35 = vmul.f32 %v12004_v38, %v12004_v38 }
0x14c8   :  { %v6454_v4 = vadd.f32 %v6442_v2, %v6440_v34  ;;  %v6468_v28 = vadd.f32 %v6467_v52, %v6466_v23  ;;  %v6452_v41 = vmul.f32 %v12011_v53, %v12011_v53 }
0x14c9   :  { %v6469_v32 = vsel %vm1901_vm8, %v6445_v42, 0.0 }
0x14ca   :  { %v6455_v11 = vadd.f32 %v6454_v4, %v6444_v7  ;;  %v6470_v10 = vadd.f32 %v6469_v32, %v6468_v28 }
0x14cc   :  { %v6456_v21 = vadd.f32 %v6455_v11, %v6446_v56  ;;  %v6472_v51 = vadd.f32 %v6471_v44, %v6470_v10 }
0x14ce   :  { %v6457_v40 = vadd.f32 %v6456_v21, %v6448_v14  ;;  %v6474_v18 = vadd.f32 %v6473_v37, %v6472_v51 }
0x14d0   :  { %v6458_v24 = vadd.f32 %v6457_v40, %v6450_v35  ;;  %v6476_v26 = vadd.f32 %v6475_v57, %v6474_v18 }
0x14d2   :  { %v6459_v36 = vadd.f32 %v6458_v24, %v6452_v41  ;;  %v6478_v39 = vadd.f32 %v6477_v49, %v6476_v26 }
0x14d4   :  { %v6460_v6 = vrot.slane %v6459_v36, 4  ;;  %v6479_v22 = vrot.slane %v6478_v39, 4 }
0x14d6   :  { %v6461_v30 = vadd.f32 %v6460_v6, %v6459_v36  ;;  %v6480_v9 = vadd.f32 %v6479_v22, %v6478_v39 }
0x14d8   :  { %v6462_v55 = vrot.slane %v6461_v30, 2  ;;  %v6481_v47 = vrot.slane %v6480_v9, 2 }
0x14da   :  { %v6463_v33 = vadd.f32 %v6462_v55, %v6461_v30  ;;  %v6482_v31 = vadd.f32 %v6481_v47, %v6480_v9 }
0x14dc   :  { %v6464_v25 = vrot.slane %v6463_v33, 1  ;;  %v6483_v17 = vrot.slane %v6482_v31, 1 }
0x14de   :  { %v6465_v58 = vadd.f32 %v6464_v25, %v6463_v33  ;;  %v6484_v3 = vadd.f32 %v6483_v17, %v6482_v31 }
0x14e0   :  { %6490 = vrot.lane.b32.xlu0 %v6465_v58, %s9772_s7  ;;  %6486 = vrot.lane.b32.xlu1 %v6465_v58, %s9776_s26 }
0x14e4   :  { %6498 = vrot.lane.b32.xlu0 %v6465_v58, %s9770_s4  ;;  %6494 = vrot.lane.b32.xlu1 %v6465_v58, %s9777_s10 }
0x14e8   :  { %6506 = vrot.lane.b32.xlu0 %v6465_v58, %s9773_s25  ;;  %6502 = vrot.lane.b32.xlu1 %v6465_v58, %s9778_s28 }
0x14ec   :  { %6514 = vrot.lane.b32.xlu0 %v6465_v58, %s9769_s24  ;;  %6510 = vrot.lane.b32.xlu1 %v6465_v58, %s9779_s29 }
0x14f0   :  { %6522 = vrot.lane.b32.xlu0 %v6465_v58, %s9774_s3  ;;  %6518 = vrot.lane.b32.xlu1 %v6465_v58, %s9780_s0 }
0x14f4   :  { %6530 = vrot.lane.b32.xlu0 %v6465_v58, %s9771_s27  ;;  %6526 = vrot.lane.b32.xlu1 %v6465_v58, %s9781_s1 }
0x14f8   :  { %6538 = vrot.lane.b32.xlu0 %v6465_v58, %s9775_s8  ;;  %6534 = vrot.lane.b32.xlu1 %v6465_v58, %s9782_s5 }
0x14fc   :  { %6548 = vrot.lane.b32.xlu0 %v6484_v3, %s9776_s26  ;;  %6542 = vrot.lane.b32.xlu1 %v6465_v58, %s9759_s20 }
0x1500   :  { %6556 = vrot.lane.b32.xlu0 %v6484_v3, %s9777_s10  ;;  %6552 = vrot.lane.b32.xlu1 %v6484_v3, %s9772_s7 }
0x1504   :  { %6564 = vrot.lane.b32.xlu0 %v6484_v3, %s9778_s28  ;;  %6560 = vrot.lane.b32.xlu1 %v6484_v3, %s9770_s4 }
0x1508   :  { %6572 = vrot.lane.b32.xlu0 %v6484_v3, %s9779_s29  ;;  %6568 = vrot.lane.b32.xlu1 %v6484_v3, %s9773_s25 }
0x150c   :  { %6580 = vrot.lane.b32.xlu0 %v6484_v3, %s9780_s0  ;;  %6576 = vrot.lane.b32.xlu1 %v6484_v3, %s9769_s24 }
0x1510   :  { %6588 = vrot.lane.b32.xlu0 %v6484_v3, %s9781_s1  ;;  %6584 = vrot.lane.b32.xlu1 %v6484_v3, %s9774_s3 }
0x1514   :  { %6680 = vrot.lane.b32.xlu0 %v12075_v15, %s9759_s20 }
0x1518   :  { %6683 = vrot.lane.b32.xlu0 %v12075_v15, %s9775_s8 }
0x151c   :  { %6686 = vrot.lane.b32.xlu0 %v12075_v15, %s9782_s5 }
0x1520   :  { %6689 = vrot.lane.b32.xlu0 %v12075_v15, %s9771_s27 }
0x1524   :  { %6692 = vrot.lane.b32.xlu0 %v12075_v15, %s9781_s1 }
0x1528   :  { %6695 = vrot.lane.b32.xlu0 %v12075_v15, %s9774_s3 }
0x152c   :  { %6698 = vrot.lane.b32.xlu0 %v12075_v15, %s9780_s0 }
0x1530   :  { %6701 = vrot.lane.b32.xlu0 %v12075_v15, %s9769_s24 }
0x1534   :  { %6704 = vrot.lane.b32.xlu0 %v12075_v15, %s9779_s29 }
0x1538   :  { %6707 = vrot.lane.b32.xlu0 %v12075_v15, %s9773_s25 }
0x1552   :  { %v6491_v12 = vpop.permute.xlu0 %6490  ;;  %v6487_v34 = vpop.permute.xlu1 %6486 }
0x1553   :  { %v6489_v2 = vadd.f32 %v6487_v34, %v6465_v58 }
0x1555   :  { %v6493_v27 = vadd.f32 %v6491_v12, %v6489_v2 }
0x1556   :  { %v6499_v63 = vpop.permute.xlu0 %6498  ;;  %v6495_v7 = vpop.permute.xlu1 %6494 }
0x1557   :  { %v6497_v4 = vadd.f32 %v6495_v7, %v6493_v27 }
0x1559   :  { %v6501_v56 = vadd.f32 %v6499_v63, %v6497_v4 }
0x155a   :  { %v6507_v11 = vpop.permute.xlu0 %6506  ;;  %v6503_v23 = vpop.permute.xlu1 %6502 }
0x155b   :  { %v6505_v52 = vadd.f32 %v6503_v23, %v6501_v56  ;;  %v9456_v23 = vld [vmem:[%s12554_s16 + $0x38] sm:$0xff]  }
0x155c   :  { %6909 = vmatpush1.bf16.msra.mxu1 %v9456_v23 }
0x155d   :  { %v6509_v14 = vadd.f32 %v6507_v11, %v6505_v52  ;;  %v9457_v52 = vld [vmem:[%s12554_s16 + $0xa8] sm:$0xff]   ;;  %6910 = vmatprep.subr.bf16.mxu1 %v9767_v0 }
0x155e   :  { %v6515_v21 = vpop.permute.xlu0 %6514  ;;  %v6511_v42 = vpop.permute.xlu1 %6510  ;;  %7086 = vmatpush1.bf16.msra.mxu0 %v9457_v52 }
0x155f   :  { %v6513_v28 = vadd.f32 %v6511_v42, %v6509_v14  ;;  %7087 = vmatprep.subr.bf16.mxu0 %v9767_v0  ;;  %v9458_v42 = vld [vmem:[%s12554_s16 + $0x30] sm:$0xff]  }
0x1560   :  { %6911 = vmatpush1.bf16.msra.mxu1 %v9458_v42 }
0x1561   :  { %v6517_v35 = vadd.f32 %v6515_v21, %v6513_v28  ;;  %v9459_v28 = vld [vmem:[%s12554_s16 + $0xa0] sm:$0xff]   ;;  %6912 = vmatprep.subr.bf16.mxu1 %v9767_v0 }
0x1562   :  { %v6523_v40 = vpop.permute.xlu0 %6522  ;;  %v6519_v41 = vpop.permute.xlu1 %6518  ;;  %7088 = vmatpush1.bf16.msra.mxu0 %v9459_v28  ;;  %v12260_v28 = vld [vmem:[%s12556_s18] sm:$0x1]  ;;  %s9785_s18 = smov 9  }
0x1563   :  { %v6521_v24 = vadd.f32 %v6519_v41, %v6517_v35  ;;  %7089 = vmatprep.subr.bf16.mxu0 %v9767_v0  ;;  %v9460_v35 = vld [vmem:[%s12554_s16 + $0x28] sm:$0xff]   ;;  %v9462_v41 = vld [vmem:[%s12554_s16 + $0x20] sm:$0xff]  }
0x1564   :  { %6913 = vmatpush1.bf16.msra.mxu1 %v9460_v35  ;;  %v12264_v35 = vrot.slane %v12260_v28, %v9985_v19 }
0x1565   :  { %v6525_v45 = vadd.f32 %v6523_v40, %v6521_v24  ;;  %v9461_v40 = vld [vmem:[%s12554_s16 + $0x98] sm:$0xff]   ;;  %6914 = vmatprep.subr.bf16.mxu1 %v9767_v0  ;;  %v9463_v24 = vld [vmem:[%s12554_s16 + $0x90] sm:$0xff]  }
0x1566   :  { %v6531_v32 = vpop.permute.xlu0 %6530  ;;  %v6527_v10 = vpop.permute.xlu1 %6526  ;;  %7090 = vmatpush1.bf16.msra.mxu0 %v9461_v40 }
0x1567   :  { %v6529_v36 = vadd.f32 %v6527_v10, %v6525_v45  ;;  %7091 = vmatprep.subr.bf16.mxu0 %v9767_v0  ;;  %v9464_v45 = vld [vmem:[%s12554_s16 + $0x18] sm:$0xff]   ;;  %v9466_v10 = vld [vmem:[%s12554_s16 + $0x10] sm:$0xff]  }
0x1568   :  { %6915 = vmatpush1.bf16.msra.mxu1 %v9462_v41 }
0x1569   :  { %v6533_v6 = vadd.f32 %v6531_v32, %v6529_v36  ;;  %6916 = vmatprep.subr.bf16.mxu1 %v9767_v0  ;;  %v9465_v32 = vld [vmem:[%s12554_s16 + $0x88] sm:$0xff]   ;;  %v9467_v36 = vld [vmem:[%s12554_s16 + $0x80] sm:$0xff]  }
0x156a   :  { %v6539_v43 = vpop.permute.xlu0 %6538  ;;  %v6535_v44 = vpop.permute.xlu1 %6534  ;;  %7092 = vmatpush1.bf16.msra.mxu0 %v9463_v24 }
0x156b   :  { %v6537_v51 = vadd.f32 %v6535_v44, %v6533_v6  ;;  %7093 = vmatprep.subr.bf16.mxu0 %v9767_v0  ;;  %v9468_v6 = vld [vmem:[%s12554_s16 + $0x8] sm:$0xff]   ;;  %v9470_v44 = vld [vmem:[%s12554_s16] sm:$0xff]  }
0x156c   :  { %6917 = vmatpush1.bf16.msra.mxu1 %v9464_v45 }
0x156d   :  { %v6541_v30 = vadd.f32 %v6539_v43, %v6537_v51  ;;  %6918 = vmatprep.subr.bf16.mxu1 %v9767_v0  ;;  %v9469_v43 = vld [vmem:[%s12554_s16 + $0x78] sm:$0xff]   ;;  %v9471_v51 = vld [vmem:[%s12554_s16 + $0x70] sm:$0xff]  }
0x156e   :  { %v6549_v55 = vpop.permute.xlu0 %6548  ;;  %v6543_v48 = vpop.permute.xlu1 %6542  ;;  %7094 = vmatpush1.bf16.msra.mxu0 %v9465_v32 }
0x156f   :  { %v6545_v37 = vadd.f32 %v6543_v48, %v6541_v30  ;;  %7095 = vmatprep.subr.bf16.mxu0 %v9767_v0  ;;  %v9472_v30 = vld [vmem:[%s12554_s16 + $0x68] sm:$0xff]   ;;  %v9474_v48 = vld [vmem:[%s12554_s16 + $0x60] sm:$0xff]  }
0x1570   :  { %6919 = vmatpush1.bf16.msra.mxu1 %v9466_v10 }
0x1571   :  { %v6546_v18 = vadd.f32 %v6545_v37, %v6484_v3  ;;  %6920 = vmatprep.subr.bf16.mxu1 %v9767_v0  ;;  %v9475_v37 = vld [vmem:[%s12554_s16 + $0xd0] sm:$0xff]  }
0x1572   :  { %v6557_v33 = vpop.permute.xlu0 %6556  ;;  %v6553_v25 = vpop.permute.xlu1 %6552  ;;  %7096 = vmatpush1.bf16.msra.mxu0 %v9467_v36 }
0x1573   :  { %v6551_v54 = vadd.f32 %v6549_v55, %v6546_v18  ;;  %7097 = vmatprep.subr.bf16.mxu0 %v9767_v0  ;;  %v9473_v55 = vld [vmem:[%s12554_s16 + $0xd8] sm:$0xff]  }
0x1574   :  { %6921 = vmatpush1.bf16.msra.mxu1 %v9468_v6  ;;  %v9476_v18 = vld [vmem:[%s12554_s16 + $0x58] sm:$0xff]  }
0x1575   :  { %v6555_v57 = vadd.f32 %v6553_v25, %v6551_v54  ;;  %6922 = vmatprep.subr.bf16.mxu1 %v9767_v0  ;;  %v9478_v25 = vld [vmem:[%s12554_s16 + $0x50] sm:$0xff]   ;;  %v9479_v54 = vld [vmem:[%s12554_s16 + $0xc0] sm:$0xff]  }
0x1576   :  { %v6565_v26 = vpop.permute.xlu0 %6564  ;;  %v6561_v58 = vpop.permute.xlu1 %6560  ;;  %7098 = vmatpush1.bf16.msra.mxu0 %v9469_v43 }
0x1577   :  { %v6559_v49 = vadd.f32 %v6557_v33, %v6555_v57  ;;  %7099 = vmatprep.subr.bf16.mxu0 %v9767_v0  ;;  %v9477_v33 = vld [vmem:[%s12554_s16 + $0xc8] sm:$0xff]  }
0x1578   :  { %6923 = vmatpush1.bf16.msra.mxu1 %v9470_v44  ;;  %v9480_v57 = vld [vmem:[%s12554_s16 + $0x48] sm:$0xff]  }
0x1579   :  { %v6563_v39 = vadd.f32 %v6561_v58, %v6559_v49  ;;  %6928 = vmatprep.subr.bf16.mxu1 %v9767_v0  ;;  %v9482_v58 = vld [vmem:[%s12554_s16 + $0x40] sm:$0xff]   ;;  %v9483_v49 = vld [vmem:[%s12554_s16 + $0xb0] sm:$0xff]  }
0x157a   :  { %v6573_v22 = vpop.permute.xlu0 %6572  ;;  %v6569_v9 = vpop.permute.xlu1 %6568  ;;  %7100 = vmatpush1.bf16.msra.mxu0 %v9471_v51 }
0x157b   :  { %v6567_v47 = vadd.f32 %v6565_v26, %v6563_v39  ;;  %7105 = vmatprep.subr.bf16.mxu0 %v9767_v0  ;;  %v9481_v26 = vld [vmem:[%s12554_s16 + $0xb8] sm:$0xff]  }
0x157c   :  { %6929 = vmatpush2.bf16.msra.mxu1 %v9472_v30 }
0x157d   :  { %v6571_v31 = vadd.f32 %v6569_v9, %v6567_v47  ;;  %6930 = vmatprep.subr.bf16.mxu1 %v9767_v0 }
0x157e   :  { %v6577_v17 = vpop.permute.xlu1 %6576  ;;  %v6581_v34 = vpop.permute.xlu0 %6580  ;;  %7106 = vmatpush2.bf16.msra.mxu0 %v9473_v55 }
0x157f   :  { %v6575_v12 = vadd.f32 %v6573_v22, %v6571_v31  ;;  %7107 = vmatprep.subr.bf16.mxu0 %v9767_v0 }
0x1580   :  { %6931 = vmatpush2.bf16.msra.mxu1 %v9474_v48 }
0x1581   :  { %v6579_v2 = vadd.f32 %v6577_v17, %v6575_v12  ;;  %6932 = vmatprep.subr.bf16.mxu1 %v9767_v0 }
0x1582   :  { %v6585_v63 = vpop.permute.xlu1 %6584  ;;  %v6589_v3 = vpop.permute.xlu0 %6588  ;;  %7108 = vmatpush2.bf16.msra.mxu0 %v9475_v37 }
0x1583   :  { %v6583_v27 = vadd.f32 %v6581_v34, %v6579_v2  ;;  %7109 = vmatprep.subr.bf16.mxu0 %v9767_v0 }
0x1584   :  { %6933 = vmatpush2.bf16.msra.mxu1 %v9476_v18 }
0x1585   :  { %v6587_v7 = vadd.f32 %v6585_v63, %v6583_v27  ;;  %6934 = vmatprep.subr.bf16.mxu1 %v9767_v0 }
0x1586   :  { %7110 = vmatpush2.bf16.msra.mxu0 %v9477_v33  ;;  %v6681_v39 = vpop.permute.xlu0 %6680 }
0x1587   :  { %v6591_v4 = vadd.f32 %v6589_v3, %v6587_v7  ;;  %7111 = vmatprep.subr.bf16.mxu0 %v9767_v0  ;;  %v6725_v27 = vsel %vm4795_vm12, %v12075_v15, %v6681_v39 }
0x1588   :  { %6935 = vmatpush2.bf16.msra.mxu1 %v9478_v25 }
0x1589   :  { %v6592_v56 = vmul.f32 0.0006377551, %v6591_v4  ;;  %6936 = vmatprep.subr.bf16.mxu1 %v9767_v0 }
0x158a   :  { %7112 = vmatpush2.bf16.msra.mxu0 %v9479_v54  ;;  %v6684_v22 = vpop.permute.xlu0 %6683 }
0x158b   :  { %v6593_v11 = vadd.f32 1e-05, %v6592_v56  ;;  %7113 = vmatprep.subr.bf16.mxu0 %v9767_v0  ;;  %v6726_v3 = vsel %vm216_vm0, %v6725_v27, %v6684_v22 }
0x158c   :  { %6937 = vmatpush2.bf16.msra.mxu1 %v9480_v57 }
0x158d   :  { %9506 = vrsqrt.f32 %v6593_v11  ;;  %6938 = vmatprep.subr.bf16.mxu1 %v9767_v0 }
0x158e   :  { %7114 = vmatpush2.bf16.msra.mxu0 %v9481_v26  ;;  %v6687_v9 = vpop.permute.xlu0 %6686 }
0x158f   :  { %7115 = vmatprep.subr.bf16.mxu0 %v9767_v0  ;;  %v6727_v56 = vsel %vm4798_vm13, %v6726_v3, %v6687_v9 }
0x1590   :  { %6939 = vmatpush2.bf16.msra.mxu1 %v9482_v58 }
0x1591   :  { %7262 = vmatprep.subr.bf16.mxu1 %v9767_v0 }
0x1592   :  { %7116 = vmatpush2.bf16.msra.mxu0 %v9483_v49  ;;  %v6690_v47 = vpop.permute.xlu0 %6689 }
0x1593   :  { %v6728_v23 = vsel %vm1898_vm7, %v6727_v56, %v6690_v47 }
0x1596   :  { %v6693_v31 = vpop.permute.xlu0 %6692 }
0x159a   :  { %v9507_v14 = vpop.eup %9506  ;;  %v6696_v17 = vpop.permute.xlu0 %6695 }
0x159b   :  { %v12104_v21 = vmul.f32 %v9507_v14, %v12075_v15  ;;  %v6729_v14 = vsel %vm4801_vm14, %v6728_v23, %v6693_v31 }
0x159c   :  { %v6730_v40 = vsel %vm3217_vm9, %v6729_v14, %v6696_v17 }
0x159d   :  { %6600 = vrot.lane.b32.xlu0 %v12104_v21, %s9775_s8  ;;  %6597 = vrot.lane.b32.xlu1 %v12104_v21, %s9759_s20 }
0x159e   :  { %v6699_v34 = vpop.permute.xlu0 %6698 }
0x159f   :  { %v6731_v24 = vsel %vm4804_vm15, %v6730_v40, %v6699_v34 }
0x15a1   :  { %6603 = vrot.lane.b32.xlu1 %v12104_v21, %s9782_s5  ;;  %6710 = vrot.lane.b32.xlu0 %v12075_v15, %s9778_s28 }
0x15a2   :  { %v6702_v63 = vpop.permute.xlu0 %6701 }
0x15a3   :  { %v6732_v10 = vsel %vm668_vm6, %v6731_v24, %v6702_v63 }
0x15a5   :  { %6606 = vrot.lane.b32.xlu1 %v12104_v21, %s9771_s27  ;;  %6713 = vrot.lane.b32.xlu0 %v12075_v15, %s9770_s4  ;;  %s9791_s27 = smov 30  }
0x15a6   :  { %v6705_v11 = vpop.permute.xlu0 %6704 }
0x15a9   :  { %6609 = vrot.lane.b32.xlu1 %v12104_v21, %s9781_s1  ;;  %6716 = vrot.lane.b32.xlu0 %v12075_v15, %s9777_s10 }
0x15aa   :  { %v6708_v42 = vpop.permute.xlu0 %6707 }
0x15ad   :  { %6612 = vrot.lane.b32.xlu1 %v12104_v21, %s9774_s3  ;;  %6722 = vrot.lane.b32.xlu0 %v12075_v15, %s9776_s26 }
0x15b1   :  { %6615 = vrot.lane.b32.xlu1 %v12104_v21, %s9780_s0  ;;  %s9783_s0 = smov 3   ;;  %7588 = vrot.lane.b32.xlu0 %v12264_v35, %s9784_s15 }
0x15b5   :  { %6618 = vrot.lane.b32.xlu1 %v12104_v21, %s9769_s24  ;;  %7594 = vrot.lane.b32.xlu0 %v12264_v35, %s9786_s11  ;;  %s9787_s24 = smov 15  }
0x15b9   :  { %6621 = vrot.lane.b32.xlu1 %v12104_v21, %s9779_s29  ;;  %7600 = vrot.lane.b32.xlu0 %v12264_v35, %s9788_s17  ;;  %s9794_s29 = smov 39  }
0x15bd   :  { %6624 = vrot.lane.b32.xlu1 %v12104_v21, %s9773_s25  ;;  %7606 = vrot.lane.b32.xlu0 %v12264_v35, %s9782_s5  ;;  %s9792_s5 = smov 33  }
0x15c1   :  { %6627 = vrot.lane.b32.xlu1 %v12104_v21, %s9778_s28  ;;  %7612 = vrot.lane.b32.xlu0 %v12264_v35, %s9791_s27 }
0x15c5   :  { %6630 = vrot.lane.b32.xlu1 %v12104_v21, %s9770_s4 }
0x15c9   :  { %6633 = vrot.lane.b32.xlu1 %v12104_v21, %s9777_s10 }
0x15cd   :  { %6636 = vrot.lane.b32.xlu1 %v12104_v21, %s9772_s7 }
0x15d1   :  { %6639 = vrot.lane.b32.xlu1 %v12104_v21, %s9776_s26 }
0x15d5   :  { %6719 = vrot.lane.b32.xlu1 %v12075_v15, %s9772_s7 }
0x15d9   :  { %7585 = vrot.lane.b32.xlu1 %v12264_v35, %s9783_s0 }
0x15dd   :  { %7591 = vrot.lane.b32.xlu1 %v12264_v35, %s9785_s18 }
0x15e1   :  { %7597 = vrot.lane.b32.xlu1 %v12264_v35, %s9787_s24 }
0x15e5   :  { %7603 = vrot.lane.b32.xlu1 %v12264_v35, %s9789_s30 }
0x15e9   :  { %7609 = vrot.lane.b32.xlu1 %v12264_v35, %s9790_s6 }
0x15ed   :  { %7615 = vrot.lane.b32.xlu1 %v12264_v35, %s9792_s5 }
0x15f1   :  { %7621 = vrot.lane.b32.xlu1 %v12264_v35, %s9794_s29 }
0x15f5   :  { %7627 = vrot.lane.b32.xlu1 %v12264_v35, %s9796_s12 }
0x160f   :  { %v6598_v12 = vpop.permute.xlu1 %6597  ;;  %v6601_v45 = vpop.permute.xlu0 %6600 }
0x1610   :  { %v6642_v32 = vsel %vm4795_vm12, %v12104_v21, %v6598_v12  ;;  %v6733_v21 = vsel %vm4807_vm1, %v6732_v10, %v6705_v11  ;;  %vm7642_vm12 = vcmask 171008  }
0x1611   :  { %v6643_v36 = vsel %vm216_vm0, %v6642_v32, %v6601_v45  ;;  %v6734_v37 = vsel %vm3220_vm10, %v6733_v21, %v6708_v42  ;;  %vm7630_vm0 = vcmask 23552  }
0x1613   :  { %v6604_v2 = vpop.permute.xlu1 %6603  ;;  %v6711_v25 = vpop.permute.xlu0 %6710 }
0x1614   :  { %v6644_v43 = vsel %vm4798_vm13, %v6643_v36, %v6604_v2  ;;  %v6735_v26 = vsel %vm4810_vm2, %v6734_v37, %v6711_v25 }
0x1615   :  { %v12299_v39 = vrot.slane %v6735_v26, %v10212_v59 }
0x1617   :  { %v6607_v7 = vpop.permute.xlu1 %6606  ;;  %v6714_v27 = vpop.permute.xlu0 %6713 }
0x1618   :  { %v6645_v44 = vsel %vm1898_vm7, %v6644_v43, %v6607_v7  ;;  %v6736_v11 = vsel %vm1901_vm8, %v6735_v26, %v6714_v27  ;;  %vm7634_vm7 = vcmask 72704  }
0x161b   :  { %v6610_v4 = vpop.permute.xlu1 %6609  ;;  %v6717_v7 = vpop.permute.xlu0 %6716 }
0x161c   :  { %v6646_v51 = vsel %vm4801_vm14, %v6645_v44, %v6610_v4  ;;  %v6737_v40 = vsel %vm4813_vm3, %v6736_v11, %v6717_v7  ;;  %v9491_v11 = vld [vmem:[%s12554_s16 + $0xe0] sm:$0xff]   ;;  %vm7645_vm14 = vcmask 220160  }
0x161f   :  { %v6613_v52 = vpop.permute.xlu1 %6612 }
0x1620   :  { %v6647_v30 = vsel %vm3217_vm9, %v6646_v51, %v6613_v52 }
0x1623   :  { %v6616_v15 = vpop.permute.xlu1 %6615 }
0x1624   :  { %v6648_v48 = vsel %vm4804_vm15, %v6647_v30, %v6616_v15  ;;  %v6723_v15 = vpop.permute.xlu0 %6722  ;;  %vm7647_vm15 = vcmask 244736  }
0x1627   :  { %v6619_v41 = vpop.permute.xlu1 %6618 }
0x1628   :  { %v6649_v18 = vsel %vm668_vm6, %v6648_v48, %v6619_v41  ;;  %vm7632_vm6 = vcmask 48128  }
0x162b   :  { %v6622_v6 = vpop.permute.xlu1 %6621 }
0x162c   :  { %v6650_v33 = vsel %vm4807_vm1, %v6649_v18, %v6622_v6  ;;  %vm7649_vm1 = vcmask 269312  }
0x162f   :  { %v6625_v55 = vpop.permute.xlu1 %6624 }
0x1630   :  { %v6651_v54 = vsel %vm3220_vm10, %v6650_v33, %v6625_v55  ;;  %vm7636_vm10 = vcmask 97280  }
0x1633   :  { %v6628_v57 = vpop.permute.xlu1 %6627 }
0x1634   :  { %v6652_v58 = vsel %vm4810_vm2, %v6651_v54, %v6628_v57  ;;  %vm7651_vm2 = vcmask 293888  }
0x1635   :  { %v12294_v49 = vrot.slane %v6652_v58, %v9985_v19 }
0x1637   :  { %v6631_v22 = vpop.permute.xlu1 %6630  ;;  %v6666_v9 = vmul.f32 %v12294_v49, %v11970_v16  ;;  %v6668_v47 = vmul.f32 %v12294_v49, %v11973_v61  ;;  %v6670_v52 = vmul.f32 %v12294_v49, %v12001_v1  ;;  %v6672_v14 = vmul.f32 %v12294_v49, %v12016_v20 }
0x1638   :  { %v6653_v61 = vsel %vm1901_vm8, %v6652_v58, %v6631_v22  ;;  %v6674_v51 = vmul.f32 %v12294_v49, %v12025_v5  ;;  %v6676_v30 = vmul.f32 %v12294_v49, %v12031_v13  ;;  %v6678_v58 = vmul.f32 %v12294_v49, %v12037_v46 }
0x1639   :  { %v6749_v31 = vadd.f32 %v12299_v39, %v6666_v9  ;;  %v6751_v17 = vadd.f32 %v12299_v39, %v6668_v47  ;;  %v6753_v32 = vadd.f32 %v12299_v39, %v6670_v52  ;;  %v6755_v10 = vadd.f32 %v12299_v39, %v6672_v14  ;;  %v9486_v47 = vld [vmem:[%s12554_s16 + $0x108] sm:$0xff]   ;;  %v9493_v52 = vld [vmem:[%s12554_s16 + $0x140] sm:$0xff]   ;;  %v9495_v14 = vld [vmem:[%s12554_s16 + $0x130] sm:$0xff]  }
0x163a   :  { %v6757_v5 = vadd.f32 %v12299_v39, %v6674_v51  ;;  %v6759_v13 = vadd.f32 %v12299_v39, %v6676_v30 }
0x163b   :  { %v6634_v12 = vpop.permute.xlu1 %6633  ;;  %v6763_v34 = vmax.f32 %v6749_v31, 0.0  ;;  %v6765_v2 = vmax.f32 %v6751_v17, 0.0  ;;  %v6767_v44 = vmax.f32 %v6753_v32, 0.0  ;;  %v6769_v21 = vmax.f32 %v6755_v10, 0.0 }
0x163c   :  { %v6654_v3 = vsel %vm4813_vm3, %v6653_v61, %v6634_v12  ;;  %v6771_v57 = vmax.f32 %v6757_v5, 0.0  ;;  %v6773_v26 = vmax.f32 %v6759_v13, 0.0  ;;  %vm7653_vm3 = vcmask 318464  }
0x163d   :  { %v12308_v63 = vpack.c.bf16 %v6765_v2, %v6763_v34  ;;  %v12343_v25 = vpack.c.bf16 %v6769_v21, %v6767_v44  ;;  %v6761_v2 = vadd.f32 %v12299_v39, %v6678_v58  ;;  %v9488_v39 = vld [vmem:[%s12554_s16 + $0xf8] sm:$0xff]  }
0x163e   :  { %v6781_v34 = vpack.c.bf16 %v6773_v26, %v6771_v57 }
0x163f   :  { %8489 = vmatprep.mubr.msk.bf16.mxu1 %vm1901_vm8, %v12308_v63  ;;  %8535 = vmatprep.mubr.msk.bf16.mxu0 %vm1901_vm8, %v12308_v63  ;;  %v6637_v16 = vpop.permute.xlu1 %6636  ;;  %v6775_v49 = vmax.f32 %v6761_v2, 0.0 }
0x1640   :  { %v6655_v4 = vsel %vm3223_vm11, %v6654_v3, %v6637_v16  ;;  %v9489_v3 = vld [vmem:[%s12554_s16 + $0xf0] sm:$0xff]  }
0x1641   :  { %v6783_v7 = vpack.c.bf16 %v6775_v49, %v6775_v49 }
0x1643   :  { %v6640_v56 = vpop.permute.xlu1 %6639 }
0x1644   :  { %v6656_v23 = vsel %vm4816_vm5, %v6655_v4, %v6640_v56  ;;  %v9490_v4 = vld [vmem:[%s12554_s16 + $0xe8] sm:$0xff]  }
0x1645   :  { %v6660_v42 = vrot.slane %v6656_v23, %v9985_v19  ;;  %v9492_v23 = vld [vmem:[%s12554_s16 + $0x148] sm:$0xff]  }
0x1647   :  { %v6720_v41 = vpop.permute.xlu1 %6719  ;;  %v6665_v1 = vmul.f32 %v6660_v42, %v11976_v62  ;;  %v6667_v20 = vmul.f32 %v6660_v42, %v11979_v8  ;;  %v6669_v37 = vmul.f32 %v6660_v42, %v11982_v29  ;;  %v9484_v62 = vld [vmem:[%s12554_s16 + $0x118] sm:$0xff]   ;;  %v9485_v29 = vld [vmem:[%s12554_s16 + $0x110] sm:$0xff]   ;;  %v6673_v22 = vmul.f32 %v6660_v42, %v11996_v60  ;;  %v9487_v60 = vld [vmem:[%s12554_s16 + $0x100] sm:$0xff]  }
0x1648   :  { %v6738_v24 = vsel %vm3223_vm11, %v6737_v40, %v6720_v41  ;;  %v6675_v9 = vmul.f32 %v6660_v42, %v12004_v38  ;;  %v6677_v27 = vmul.f32 %v6660_v42, %v12011_v53  ;;  %v7589_v41 = vpop.permute.xlu0 %7588  ;;  %vm7638_vm11 = vcmask 121856  }
0x1649   :  { %v6739_v45 = vsel %vm4816_vm5, %v6738_v24, %v6723_v15  ;;  %v9497_v15 = vld [vmem:[%s12554_s16 + $0x120] sm:$0xff]   ;;  %vm7655_vm5 = vcmask 343040  }
0x164a   :  { %v6743_v36 = vrot.slane %v6739_v45, %v10212_v59  ;;  %v6671_v59 = vmul.f32 %v6660_v42, %v11985_v50  ;;  %v9496_v42 = vld [vmem:[%s12554_s16 + $0x128] sm:$0xff]  }
0x164b   :  { %v7586_v40 = vpop.permute.xlu1 %7585 }
0x164c   :  { %v6748_v6 = vadd.f32 %v6743_v36, %v6665_v1  ;;  %v6750_v43 = vadd.f32 %v6743_v36, %v6667_v20  ;;  %v6752_v18 = vadd.f32 %v6743_v36, %v6669_v37  ;;  %v6754_v33 = vadd.f32 %v6743_v36, %v6671_v59 }
0x164d   :  { %v6756_v17 = vadd.f32 %v6743_v36, %v6673_v22  ;;  %v6758_v12 = vadd.f32 %v6743_v36, %v6675_v9  ;;  %v6760_v61 = vadd.f32 %v6743_v36, %v6677_v27  ;;  %v7631_v45 = vsel %vm7630_vm0, %v12260_v28, %v7586_v40 }
0x164e   :  { %v6762_v55 = vmax.f32 %v6748_v6, 0.0  ;;  %v6764_v48 = vmax.f32 %v6750_v43, 0.0  ;;  %v6766_v50 = vmax.f32 %v6752_v18, 0.0  ;;  %v6768_v54 = vmax.f32 %v6754_v33, 0.0 }
0x164f   :  { %v6770_v38 = vmax.f32 %v6756_v17, 0.0  ;;  %v6772_v46 = vmax.f32 %v6758_v12, 0.0  ;;  %v6774_v53 = vmax.f32 %v6760_v61, 0.0  ;;  %v7592_v24 = vpop.permute.xlu1 %7591  ;;  %v7633_v10 = vsel %vm7632_vm6, %v7631_v45, %v7589_v41 }
0x1650   :  { %v12341_v8 = vpack.c.bf16 %v6764_v48, %v6762_v55  ;;  %v6778_v31 = vpack.c.bf16 %v6768_v54, %v6766_v50  ;;  %v7635_v1 = vsel %vm7634_vm7, %v7633_v10, %v7592_v24  ;;  %vm7657_vm0 = vcmask 367616  }
0x1651   :  { %v6780_v16 = vpack.c.bf16 %v6772_v46, %v6770_v38  ;;  %v6782_v56 = vpack.c.bf16 %v6774_v53, %v6774_v53 }
0x1652   :  { %6941 = vmatmul.mubr.bf16.vlgmr.msra.gmra.mxu1 %v12341_v8  ;;  %7118 = vmatmul.mubr.bf16.vlgmr.msra.gmra.mxu0 %v12341_v8 }
0x1653   :  { %7263 = vmatpush1.bf16.msra.mxu1 %v9484_v62  ;;  %8490 = vmatprep.mubr.msk.bf16.mxu1 %vm1901_vm8, %v12343_v25  ;;  %v7598_v32 = vpop.permute.xlu1 %7597 }
0x1654   :  { %8536 = vmatprep.mubr.msk.bf16.mxu0 %vm1901_vm8, %v12343_v25  ;;  %7264 = vmatprep.subr.bf16.mxu1 %v9767_v0 }
0x1657   :  { %7265 = vmatpush1.bf16.msra.mxu1 %v9485_v29  ;;  %v7604_v20 = vpop.permute.xlu1 %7603 }
0x1658   :  { %7266 = vmatprep.subr.bf16.mxu1 %v9767_v0 }
0x165a   :  { %6949 = vmatmul.mubr.bf16.gmra.mxu1 %v6778_v31  ;;  %7126 = vmatmul.mubr.bf16.gmra.mxu0 %v6778_v31 }
0x165b   :  { %7267 = vmatpush1.bf16.msra.mxu1 %v9486_v47  ;;  %8491 = vmatprep.mubr.msk.bf16.mxu1 %vm1901_vm8, %v6781_v34  ;;  %v7610_v28 = vpop.permute.xlu1 %7609 }
0x165c   :  { %8537 = vmatprep.mubr.msk.bf16.mxu0 %vm1901_vm8, %v6781_v34  ;;  %7268 = vmatprep.subr.bf16.mxu1 %v9767_v0 }
0x165f   :  { %7269 = vmatpush1.bf16.msra.mxu1 %v9487_v60  ;;  %v7616_v59 = vpop.permute.xlu1 %7615 }
0x1660   :  { %7270 = vmatprep.subr.bf16.mxu1 %v9767_v0 }
0x1662   :  { %6957 = vmatmul.mubr.bf16.gmra.mxu1 %v6780_v16  ;;  %7134 = vmatmul.mubr.bf16.gmra.mxu0 %v6780_v16 }
0x1663   :  { %7271 = vmatpush1.bf16.msra.mxu1 %v9488_v39  ;;  %8492 = vmatprep.mubr.msk.bf16.mxu1 %vm1901_vm8, %v6783_v7 }
0x1664   :  { %8538 = vmatprep.mubr.msk.bf16.mxu0 %vm1901_vm8, %v6783_v7  ;;  %7272 = vmatprep.subr.bf16.mxu1 %v9767_v0 }
0x1667   :  { %7273 = vmatpush1.bf16.msra.mxu1 %v9489_v3 }
0x1668   :  { %7274 = vmatprep.subr.bf16.mxu1 %v9767_v0 }
0x166a   :  { %6965 = vmatmul.mubr.bf16.gmra.mxu1 %v6782_v56  ;;  %7142 = vmatmul.mubr.bf16.gmra.mxu0 %v6782_v56 }
0x166b   :  { %7275 = vmatpush1.bf16.msra.mxu1 %v9490_v4  ;;  %8581 = vmatprep.mubr.msk.bf16.mxu1 %vm1901_vm8, %v12308_v63  ;;  %v9494_v63 = vld [vmem:[%s12554_s16 + $0x138] sm:$0xff]   ;;  %s9793_s16 = smov 36  }
0x166c   :  { %7276 = vmatprep.subr.bf16.mxu1 %v9767_v0  ;;  %7618 = vrot.lane.b32.xlu0 %v12264_v35, %s9793_s16 }
0x166f   :  { %7277 = vmatpush1.bf16.msra.mxu1 %v9491_v11 }
0x1670   :  { %7282 = vmatprep.subr.bf16.mxu1 %v9767_v0  ;;  %7624 = vrot.lane.b32.xlu0 %v12264_v35, %s9795_s21 }
0x1673   :  { %7283 = vmatpush2.bf16.msra.mxu1 %v9492_v23 }
0x1674   :  { %7284 = vmatprep.subr.bf16.mxu1 %v9767_v0 }
0x1677   :  { %7285 = vmatpush2.bf16.msra.mxu1 %v9493_v52 }
0x1678   :  { %7286 = vmatprep.subr.bf16.mxu1 %v9767_v0 }
0x167b   :  { %7287 = vmatpush2.bf16.msra.mxu1 %v9494_v63 }
0x167c   :  { %7288 = vmatprep.subr.bf16.mxu1 %v9767_v0 }
0x167f   :  { %7289 = vmatpush2.bf16.msra.mxu1 %v9495_v14 }
0x1680   :  { %7290 = vmatprep.subr.bf16.mxu1 %v9767_v0 }
0x1683   :  { %7291 = vmatpush2.bf16.msra.mxu1 %v9496_v42 }
0x1684   :  { %7292 = vmatprep.subr.bf16.mxu1 %v9767_v0  ;;  %v7595_v0 = vpop.permute.xlu0 %7594 }
0x1685   :  { %v7637_v6 = vsel %vm7636_vm10, %v7635_v1, %v7595_v0 }
0x1686   :  { %v7639_v43 = vsel %vm7638_vm11, %v7637_v6, %v7598_v32 }
0x1687   :  { %7293 = vmatpush2.bf16.msra.mxu1 %v9497_v15 }
0x1688   :  { %v7601_v36 = vpop.permute.xlu0 %7600 }
0x168a   :  { %7295 = vmatmul.mubr.bf16.vlgmr.msra.gmra.mxu1 %v12341_v8  ;;  %v12432_v8 = vld [vmem:[#allocation18] sm:$0xff] }
0x168b   :  { %8582 = vmatprep.mubr.msk.bf16.mxu1 %vm1901_vm8, %v12343_v25 }
0x168c   :  { %v7607_v44 = vpop.permute.xlu0 %7606 }
0x1690   :  { %v7613_v48 = vpop.permute.xlu0 %7612 }
0x1692   :  { %7303 = vmatmul.mubr.bf16.gmra.mxu1 %v6778_v31 }
0x1693   :  { %8583 = vmatprep.mubr.msk.bf16.mxu1 %vm1901_vm8, %v6781_v34 }
0x169a   :  { %7311 = vmatmul.mubr.bf16.gmra.mxu1 %v6780_v16 }
0x169b   :  { %8584 = vmatprep.mubr.msk.bf16.mxu1 %vm1901_vm8, %v6783_v7  ;;  %vm7640_vm8 = vcmask 146432  }
0x169c   :  { %v7641_v21 = vsel %vm7640_vm8, %v7639_v43, %v7601_v36 }
0x169d   :  { %v7643_v51 = vsel %vm7642_vm12, %v7641_v21, %v7604_v20 }
0x169e   :  { %v7644_v30 = vsel %vm4798_vm13, %v7643_v51, %v7607_v44  ;;  %vm7346_vm13 = vcmask 687104  }
0x169f   :  { %v7646_v55 = vsel %vm7645_vm14, %v7644_v30, %v7610_v28  ;;  %8647 = vmatprep.mubr.msk.f32.mxu0 %vm7346_vm13, %v12432_v8 }
0x16a0   :  { %v7648_v37 = vsel %vm7647_vm15, %v7646_v55, %v7613_v48 }
0x16a1   :  { %v12427_v62 = vsel %vm7649_vm1, %v7648_v37, %v7616_v59 }
0x16a2   :  { %7319 = vmatmul.mubr.bf16.gmra.mxu1 %v6782_v56  ;;  %7660 = vrot.lane.b32.xlu0 %v12427_v62, %s9774_s3 }
0x1712   :  { %v12436_v18 = vpop.f32.mrf.mxu1  ;;  %v7119_v33 = vpop.f32.mrf.mxu0 }
0x1713   :  { %v7334_v50 = vrot.slane %v7119_v33, 4 }
0x1714   :  { %v6944_v25 = vpop.f32.mrf.mxu1  ;;  %v7121_v5 = vpop.f32.mrf.mxu0 }
0x1716   :  { %v12438_v13 = vpop.f32.mrf.mxu1  ;;  %v7122_v29 = vpop.f32.mrf.mxu0 }
0x1717   :  { %v7335_v54 = vrot.slane %v7122_v29, 4 }
0x1718   :  { %v6947_v35 = vpop.f32.mrf.mxu1  ;;  %v7124_v57 = vpop.f32.mrf.mxu0 }
0x1719   :  { %v12441_v26 = vsel %vm455_vm4, %v7334_v50, %v7335_v54 }
0x171a   :  { %v12443_v58 = vpop.f32.mrf.mxu1  ;;  %v7127_v22 = vpop.f32.mrf.mxu0 }
0x171b   :  { %v7337_v9 = vrot.slane %v7127_v22, 4 }
0x171c   :  { %v6952_v47 = vpop.f32.mrf.mxu1  ;;  %v7129_v31 = vpop.f32.mrf.mxu0 }
0x171d   :  { %v7338_v17 = vsel %vm455_vm4, %v7335_v54, %v7337_v9  ;;  %v7328_v54 = vld [vmem:[#allocation18 + $0x10] sm:$0xff]  ;;  %v7622_v47 = vpop.permute.xlu1 %7621 }
0x171e   :  { %v6953_v12 = vpop.f32.mrf.mxu1  ;;  %v7130_v34 = vpop.f32.mrf.mxu0 }
0x171f   :  { %v7345_v2 = vsel %vm455_vm4, %v6953_v12, %v7334_v50  ;;  %v7451_v27 = vrot.slane %v6953_v12, 4  ;;  %v7339_v28 = vrot.slane %v7130_v34, 4  ;;  %v7327_v50 = vld [vmem:[#allocation18 + $0x8] sm:$0xff] }
0x1720   :  { %v6955_v60 = vpop.f32.mrf.mxu1  ;;  %v7132_v38 = vpop.f32.mrf.mxu0 }
0x1721   :  { %v7340_v48 = vsel %vm455_vm4, %v7337_v9, %v7339_v28 }
0x1722   :  { %v6958_v46 = vpop.f32.mrf.mxu1  ;;  %v12447_v49 = vpop.f32.mrf.mxu0 }
0x1723   :  { %v7452_v39 = vrot.slane %v6958_v46, 4 }
0x1724   :  { %v6960_v16 = vpop.f32.mrf.mxu1  ;;  %v7137_v61 = vpop.f32.mrf.mxu0 }
0x1725   :  { %v12450_v7 = vsel %vm455_vm4, %v7451_v27, %v7452_v39 }
0x1726   :  { %v6961_v3 = vpop.f32.mrf.mxu1  ;;  %v12452_v53 = vpop.f32.mrf.mxu0 }
0x1727   :  { %v7454_v4 = vrot.slane %v6961_v3, 4 }
0x1728   :  { %v6963_v56 = vpop.f32.mrf.mxu1  ;;  %v7140_v11 = vpop.f32.mrf.mxu0 }
0x1729   :  { %v12455_v23 = vsel %vm455_vm4, %v7452_v39, %v7454_v4 }
0x172a   :  { %v6966_v52 = vpop.f32.mrf.mxu1  ;;  %v12457_v63 = vpop.f32.mrf.mxu0 }
0x172b   :  { %v7456_v14 = vrot.slane %v6966_v52, 4 }
0x172c   :  { %v6968_v42 = vpop.f32.mrf.mxu1  ;;  %v7145_v15 = vpop.f32.mrf.mxu0 }
0x172d   :  { %v12460_v40 = vsel %vm455_vm4, %v7456_v14, %v7130_v34  ;;  %v12463_v41 = vsel %vm455_vm4, %v7454_v4, %v7456_v14  ;;  %v7628_v34 = vpop.permute.xlu1 %7627 }
0x172e   :  { %v6969_v24 = vpop.f32.mrf.mxu1  ;;  %v7146_v45 = vpop.f32.mrf.mxu0 }
0x1730   :  { %v6970_v0 = vpop.f32.mrf.mxu1  ;;  %v7147_v32 = vpop.f32.mrf.mxu0 }
0x174a   :  { %v7296_v10 = vpop.f32.mrf.mxu1 }
0x174c   :  { %v7298_v36 = vpop.f32.mrf.mxu1 }
0x174e   :  { %v7299_v1 = vpop.f32.mrf.mxu1 }
0x1750   :  { %v7301_v20 = vpop.f32.mrf.mxu1 }
0x1752   :  { %v7304_v6 = vpop.f32.mrf.mxu1 }
0x1754   :  { %v7306_v43 = vpop.f32.mrf.mxu1 }
0x1756   :  { %v7307_v44 = vpop.f32.mrf.mxu1 }
0x1757   :  { %8625 = vmatprep.subr.msk.mxu0 %vm455_vm4, %v7307_v44 }
0x1758   :  { %v7309_v21 = vpop.f32.mrf.mxu1  ;;  %8626 = vmatpush3.msk.msra.mxu0 %vm455_vm4, %v7307_v44 }
0x1759   :  { %8627 = vmatprep.subr.mxu0 %v7304_v6 }
0x175a   :  { %v7312_v51 = vpop.f32.mrf.mxu1  ;;  %8628 = vmatpush3.msra.mxu0 %v7304_v6 }
0x175b   :  { %8629 = vmatprep.subr.mxu0 %v7299_v1  ;;  %v7466_v57 = vrot.slane %v7312_v51, 4 }
0x175c   :  { %v7314_v30 = vpop.f32.mrf.mxu1  ;;  %8630 = vmatpush3.msra.mxu0 %v7299_v1 }
0x175d   :  { %8631 = vmatprep.subr.mxu0 %v7296_v10 }
0x175e   :  { %v7315_v55 = vpop.f32.mrf.mxu1  ;;  %8632 = vmatpush3.msra.mxu0 %v7296_v10 }
0x175f   :  { %8633 = vmatprep.subr.mxu0 %v7340_v48  ;;  %v7468_v35 = vrot.slane %v7315_v55, 4 }
0x1760   :  { %v7317_v37 = vpop.f32.mrf.mxu1  ;;  %8634 = vmatpush3.msra.mxu0 %v7340_v48 }
0x1761   :  { %8635 = vmatprep.subr.mxu0 %v7338_v17  ;;  %v7469_v22 = vsel %vm455_vm4, %v7466_v57, %v7468_v35 }
0x1762   :  { %v7320_v59 = vpop.f32.mrf.mxu1  ;;  %8636 = vmatpush3.msra.mxu0 %v7338_v17 }
0x1763   :  { %8637 = vmatprep.subr.mxu0 %v12441_v26  ;;  %v7470_v29 = vrot.slane %v7320_v59, 4 }
0x1764   :  { %v7322_v33 = vpop.f32.mrf.mxu1  ;;  %8638 = vmatpush3.msra.mxu0 %v12441_v26 }
0x1765   :  { %8639 = vmatprep.subr.mxu0 %v7345_v2  ;;  %v7471_v26 = vsel %vm455_vm4, %v7468_v35, %v7470_v29 }
0x1766   :  { %v7323_v25 = vpop.f32.mrf.mxu1  ;;  %8640 = vmatpush3.msra.mxu0 %v7345_v2 }
0x1767   :  { %8641 = vmatprep.subr.mxu0 %v12443_v58 }
0x1768   :  { %v7324_v5 = vpop.f32.mrf.mxu1  ;;  %8642 = vmatpush3.msra.mxu0 %v12443_v58  ;;  %v7329_v58 = vld [vmem:[#allocation18 + $0x18] sm:$0xf] }
0x1769   :  { %8643 = vmatprep.subr.mxu0 %v12438_v13 }
0x176a   :  { %8644 = vmatpush3.msra.mxu0 %v12438_v13  ;;  %v7465_v13 = vrot.slane %v7307_v44, 4 }
0x176b   :  { %8645 = vmatprep.subr.mxu0 %v12436_v18 }
0x176c   :  { %8646 = vmatpush3.msra.mxu0 %v12436_v18  ;;  %v7467_v18 = vsel %vm455_vm4, %v7465_v13, %v7466_v57 }
0x176d   :  { %8648 = vmatmul.mubr.msk.f32.vlgmr.msra.gmra.mxu0 %vm7346_vm13, %v7327_v50  ;;  %8653 = vmatprep.subr.msk.mxu0 %vm455_vm4, %v7470_v29 }
0x176e   :  { %8654 = vmatpush3.msk.msra.mxu0 %vm455_vm4, %v7470_v29  ;;  %8650 = vmatprep.mubr.msk.f32.mxu0 %vm7346_vm13, %v7328_v54 }
0x176f   :  { %8655 = vmatprep.subr.mxu0 %v7471_v26 }
0x1770   :  { %8656 = vmatpush3.msra.mxu0 %v7471_v26 }
0x1771   :  { %8651 = vmatmul.mubr.msk.f32.gmra.mxu0 %vm7346_vm13, %v7329_v58  ;;  %8657 = vmatprep.subr.mxu0 %v7469_v22 }
0x1772   :  { %8658 = vmatpush3.msra.mxu0 %v7469_v22  ;;  %8675 = vmatprep.mubr.msk.f32.mxu0 %vm7346_vm13, %v12432_v8  ;;  %v7619_v8 = vpop.permute.xlu0 %7618 }
0x1773   :  { %8659 = vmatprep.subr.mxu0 %v7467_v18  ;;  %v7652_v9 = vsel %vm7651_vm2, %v12427_v62, %v7619_v8 }
0x1774   :  { %8660 = vmatpush3.msra.mxu0 %v7467_v18  ;;  %v7654_v31 = vsel %vm7653_vm3, %v7652_v9, %v7622_v47 }
0x1775   :  { %8661 = vmatprep.subr.mxu0 %v12457_v63 }
0x1776   :  { %8662 = vmatpush3.msra.mxu0 %v12457_v63  ;;  %v7625_v17 = vpop.permute.xlu0 %7624 }
0x1777   :  { %8663 = vmatprep.subr.mxu0 %v12452_v53  ;;  %v7656_v12 = vsel %vm7655_vm5, %v7654_v31, %v7625_v17 }
0x1778   :  { %8664 = vmatpush3.msra.mxu0 %v12452_v53  ;;  %v7658_v2 = vsel %vm7657_vm0, %v7656_v12, %v7628_v34 }
0x1779   :  { %8665 = vmatprep.subr.mxu0 %v12447_v49 }
0x177a   :  { %8666 = vmatpush3.msra.mxu0 %v12447_v49  ;;  %v7661_v60 = vpop.permute.xlu0 %7660 }
0x177b   :  { %8667 = vmatprep.subr.mxu0 %v12460_v40  ;;  %v7663_v38 = vsel %vm3217_vm9, %v7658_v2, %v7661_v60 }
0x177c   :  { %8668 = vmatpush3.msra.mxu0 %v12460_v40  ;;  %v7667_v46 = vrot.slane %v7663_v38, %v9985_v19 }
0x177d   :  { %8669 = vmatprep.subr.mxu0 %v12463_v41 }
0x177e   :  { %8670 = vmatpush3.msra.mxu0 %v12463_v41 }
0x177f   :  { %8671 = vmatprep.subr.mxu0 %v12455_v23 }
0x1780   :  { %8672 = vmatpush3.msra.mxu0 %v12455_v23 }
0x1781   :  { %8673 = vmatprep.subr.mxu0 %v12450_v7 }
0x1782   :  { %8674 = vmatpush3.msra.mxu0 %v12450_v7 }
0x1783   :  { %8676 = vmatmul.mubr.msk.f32.vlgmr.msra.gmra.mxu0 %vm7346_vm13, %v7327_v50 }
0x1784   :  { %8678 = vmatprep.mubr.msk.f32.mxu0 %vm7346_vm13, %v7328_v54 }
0x1787   :  { %8679 = vmatmul.mubr.msk.f32.gmra.mxu0 %vm7346_vm13, %v7329_v58 }
0x182d   :  { %v8649_v49 = vpop.f32.mrf.mxu0 }
0x182e   :  { %v7669_v27 = vadd.f32 %v8649_v49, %v7667_v46 }
0x182f   :  { %v7428_v39 = vpop.f32.mrf.mxu0 }
0x1830   :  { %9508 = vtanh.f32 %v7669_v27  ;;  %v7668_v16 = vadd.f32 %v7667_v46, %v7428_v39 }
0x1831   :  { %v8652_v62 = vpop.f32.mrf.mxu0 }
0x1832   :  { %9510 = vtanh.f32 %v7668_v16 }
0x1833   :  { %v7438_v61 = vpop.f32.mrf.mxu0 }
0x1834   :  { %v7670_v7 = vadd.f32 %v7667_v46, %v7438_v61 }
0x1836   :  { %9512 = vtanh.f32 %v7670_v7 }
0x183d   :  { %v9509_v3 = vpop.eup %9508 }
0x183e   :  { %7683 = vst.msk [vmem:[%s12557_s19 + $0x8] sm:$0xff] %vm7346_vm13, %v9509_v3 }
0x183f   :  { %v9511_v53 = vpop.eup %9510 }
0x1840   :  { %7682 = vst.msk [vmem:[%s12557_s19] sm:$0xff] %vm7346_vm13, %v9511_v53 }
0x1843   :  { %v9513_v19 = vpop.eup %9512  ;;  %v8677_v4 = vpop.f32.mrf.mxu0 }
0x1844   :  { %7684 = vst.msk [vmem:[%s12557_s19 + $0x10] sm:$0xff] %vm7346_vm13, %v9513_v19  ;;  %v7568_v11 = vrot.slane %v8677_v4, 4 }
0x1845   :  { %v7544_v56 = vpop.f32.mrf.mxu0 }
0x1846   :  { %v7567_v23 = vrot.slane %v7544_v56, 4 }
0x1847   :  { %v8680_v52 = vpop.f32.mrf.mxu0 }
0x1848   :  { %v7569_v63 = vsel %vm455_vm4, %v7567_v23, %v7568_v11  ;;  %v7578_v14 = vsel %vm455_vm4, %v8652_v62, %v7567_v23  ;;  %v7572_v41 = vrot.slane %v8680_v52, 4 }
0x1849   :  { %v7671_v42 = vadd.f32 %v7667_v46, %v7578_v14  ;;  %v7672_v15 = vadd.f32 %v7667_v46, %v7569_v63  ;;  %v7554_v40 = vpop.f32.mrf.mxu0 }
0x184a   :  { %v7570_v24 = vrot.slane %v7554_v40, 4 }
0x184b   :  { %9514 = vtanh.f32 %v7671_v42 }
0x184c   :  { %9516 = vtanh.f32 %v7672_v15  ;;  %v7571_v45 = vsel %vm455_vm4, %v7568_v11, %v7570_v24  ;;  %v7573_v0 = vsel %vm455_vm4, %v7570_v24, %v7572_v41 }
0x184d   :  { %v7673_v32 = vadd.f32 %v7667_v46, %v7571_v45  ;;  %v7674_v10 = vadd.f32 %v7667_v46, %v7573_v0 }
0x184f   :  { %9518 = vtanh.f32 %v7673_v32 }
0x1850   :  { %9520 = vtanh.f32 %v7674_v10 }
0x1858   :  { %v9515_v36 = vpop.eup %9514 }
0x1859   :  { %v9517_v1 = vpop.eup %9516  ;;  %7685 = vst.msk [vmem:[%s12557_s19 + $0x18] sm:$0xff] %vm7346_vm13, %v9515_v36 }
0x185a   :  { %7686 = vst.msk [vmem:[%s12557_s19 + $0x20] sm:$0xff] %vm7346_vm13, %v9517_v1 }
0x185c   :  { %v9519_v20 = vpop.eup %9518 }
0x185d   :  { %v9521_v6 = vpop.eup %9520  ;;  %7687 = vst.msk [vmem:[%s12557_s19 + $0x28] sm:$0xff] %vm7346_vm13, %v9519_v20 }
0x185e   :  { %7688 = vst.msk [vmem:[%s12557_s19 + $0x30] sm:$0xff] %vm7346_vm13, %v9521_v6 }
0x185f   :  { %7693 = vsyncpa [#allocation3], 1 }
0x1860   :  { %7694 = vsyncpa [#allocation5], 1 }
0x1861   :  { %7695 = vsyncpa [#allocation8], 1 }
0x1862   :  { %7696 = vsyncpa [#allocation11], 1 }
0x1863   :  { %7697 = vsyncpa [#allocation14], 1 }
0x1864   :  { %7698 = vsyncpa [#allocation17], 1 }

</bundles_post_ra>
